<compile_context>
chip_gen: v6e
topology: v6e:2x2x1
jax: 0.10.0
libtpu: 0.0.40
codegen_flags: <defaults>
</compile_context>

<pallas_src>
import functools

import jax
import jax.numpy as jnp
from jax.experimental import pallas as pl
from jax.experimental.pallas import tpu as pltpu


def _round_up(x, m):
    return (x + m - 1) // m * m


# Sub-pixel taps for ConvTranspose2d(k=4, s=2, p=1): output phase -> ((input shift, kernel tap), ...)
_PHASE_TAPS = {0: ((0, 1), (-1, 3)), 1: ((1, 0), (0, 2))}

_PATCH_TILE_BYTES = 4 << 20    # bf16 patch tile budget per grid step
_OUT_TILE_BYTES = 2 << 20      # output tile budget per grid step
_EPS = 1e-5                    # nn.BatchNorm2d default


# ---------------------------------------------------------------------------
# Pallas kernels: (1, TM, K) @ (1, K, OCp) -> (1, TM, OCp), f32 accumulate,
# stored in the (bf16 for intermediates) output dtype.
# ---------------------------------------------------------------------------
def _gemm_kernel(p_ref, w_ref, b_ref, o_ref, *, out_act):
    acc = jnp.dot(p_ref[0], w_ref[0], preferred_element_type=jnp.float32)
    acc = acc + b_ref[...]
    if out_act == "tanh":                       # outermost upconv epilogue
        acc = jnp.tanh(acc)
    o_ref[0] = acc.astype(o_ref.dtype)


def _gemm_stats_kernel(p_ref, w_ref, o_ref, s_ref):
    # Conv immediately followed by BatchNorm: bias dropped (cancels in BN mean
    # subtraction).  Tiles always divide M exactly -> no row masking needed.
    acc = jnp.dot(p_ref[0], w_ref[0], preferred_element_type=jnp.float32)
    o_ref[0] = acc.astype(o_ref.dtype)
    s = jnp.sum(acc, axis=0, keepdims=True)           # (1, OCp) per-channel sum
    ss = jnp.sum(acc * acc, axis=0, keepdims=True)    # (1, OCp) per-channel sum sq
    s_ref[0, 0] = jnp.concatenate([s, ss], axis=0)


# ---------------------------------------------------------------------------
# GEMM wrapper (phase-batched)
# ---------------------------------------------------------------------------
def _pick_tile_m(m, k, ocp, out_bytes, phases):
    """Largest multiple-of-8 exact divisor of m within the VMEM row budget."""
    rows = max(8, _PATCH_TILE_BYTES // (2 * k))
    rows = min(rows, max(8, _OUT_TILE_BYTES // (ocp * out_bytes)))
    if phases == 1 and m >= 16:
        rows = min(rows, m // 2)    # >=2 grid points so both v7x TensorCores get work
    rows = min(rows, m)
    d = rows - rows % 8
    while d >= 8:
        if m % d == 0:
            return d
        d -= 8
    return m                        # tiny layers: single full tile


def _gemm_phased(patches, w, b, *, oc, out_act="none", want_stats=False,
                 out_dtype=jnp.bfloat16):
    """patches:(P,M,K) bf16, w:(P,K,OCp) bf16, b:(1,OCp) f32 -> (P,M,oc) out_dtype
    and, if requested, per-channel (sum, sum_sq) over all P*M rows, shape (2, oc)."""
    P, M, K = patches.shape
    OCp = w.shape[2]
    out_bytes = jnp.dtype(out_dtype).itemsize
    TM = _pick_tile_m(M, K, OCp, out_bytes, P)
    n_tiles = M // TM

    in_specs = [
        pl.BlockSpec((1, TM, K), lambda p, i: (p, i, 0)),    # M-tiled, double-buffered
        pl.BlockSpec((1, K, OCp), lambda p, i: (p, 0, 0)),   # resident across the M sweep
    ]
    operands = [patches, w]
    out_shape = [jax.ShapeDtypeStruct((P, M, OCp), out_dtype)]
    out_specs = [pl.BlockSpec((1, TM, OCp), lambda p, i: (p, i, 0))]
    if want_stats:
        kernel = _gemm_stats_kernel
        out_shape.append(jax.ShapeDtypeStruct((P, n_tiles, 2, OCp), jnp.float32))
        out_specs.append(pl.BlockSpec((1, 1, 2, OCp), lambda p, i: (p, i, 0, 0)))
    else:
        kernel = functools.partial(_gemm_kernel, out_act=out_act)
        in_specs.append(pl.BlockSpec((1, OCp), lambda p, i: (0, 0)))
        operands.append(b)

    # Explicit VMEM budget: double-buffered patch + out tiles, double-buffered
    # resident weight, stats/bias slivers, 2 MiB headroom.
    vmem_bytes = (2 * TM * K * 2 + 2 * K * OCp * 2 + 2 * TM * OCp * out_bytes
                  + 4 * 2 * OCp * 4 + 2 * OCp * 4 + (2 << 20))
    vmem_bytes = int(min(max(vmem_bytes, 16 << 20), 48 << 20))

    outs = pl.pallas_call(
        kernel,
        grid=(P, n_tiles),
        in_specs=in_specs,
        out_specs=out_specs,
        out_shape=out_shape,
        compiler_params=pltpu.CompilerParams(
            dimension_semantics=("parallel", "parallel"),
            vmem_limit_bytes=vmem_bytes),
    )(*operands)

    out = outs[0][:, :, :oc]
    if want_stats:
        return out, jnp.sum(outs[1], axis=(0, 1))[:, :oc]
    return out, None


# ---------------------------------------------------------------------------
# Prologue (lazy BatchNorm apply + input activation) and BN stats finalize
# ---------------------------------------------------------------------------
def _prologue(y, scale, shift, act):
    """Pending per-channel BN scale/shift + input activation, applied BEFORE im2col
    (16x cheaper than inside the patch matrix); fuses into the XLA patch gather."""
    if scale is not None:
        y = y * scale + shift
    if act == "leaky_relu":
        y = jnp.where(y >= 0.0, y, 0.2 * y)
    elif act == "relu":
        y = jnp.maximum(y, 0.0)
    return y.astype(jnp.bfloat16)               # bf16 feeds the MXU


def _bn_scale_shift(stats, count):
    """Training-mode BatchNorm2d (gamma=1, beta=0) from per-channel (sum, sum_sq)."""
    mean = stats[0] / count
    var = jnp.maximum(stats[1] / count - mean * mean, 0.0)
    scale = jax.lax.rsqrt(var + _EPS)
    return scale, -mean * scale


# ---------------------------------------------------------------------------
# Convolutions (NHWC)
# ---------------------------------------------------------------------------
def conv_down(y, scale, shift, act, wp, want_stats=False):
    """Conv2d(k=4, s=2, p=1) on NHWC y via one im2col GEMM."""
    N, H, W, IC = y.shape
    OH, OW = H // 2, W // 2
    y = _prologue(y, scale, shift, act)
    yp = jnp.pad(y, ((0, 0), (1, 1), (1, 1), (0, 0)))
    cols = [yp[:, kh:kh + 2 * OH:2, kw:kw + 2 * OW:2, :]
            for kh in range(4) for kw in range(4)]
    patches = jnp.stack(cols, axis=3).reshape(1, N * OH * OW, 16 * IC)
    out, stats = _gemm_phased(patches, wp["w"], wp["b"], oc=wp["oc"],
                              want_stats=want_stats)
    out = out[0].reshape(N, OH, OW, wp["oc"])
    if want_stats:
        return out, _bn_scale_shift(stats, count=float(N * OH * OW))
    return out, None


def conv_up(y, scale, shift, act, wp, out_act="none", want_stats=False,
            out_dtype=jnp.bfloat16):
    """ConvTranspose2d(k=4, s=2, p=1) on NHWC y: 4 sub-pixel phase GEMMs, K = 4*IC."""
    N, H, W, IC = y.shape
    OC = wp["oc"]
    y = _prologue(y, scale, shift, act)
    yp = jnp.pad(y, ((0, 0), (1, 1), (1, 1), (0, 0)))
    phase_patches = []
    for ph in (0, 1):
        for pw in (0, 1):
            taps = [yp[:, 1 + dh:1 + dh + H, 1 + dw:1 + dw + W, :]
                    for dh, _ in _PHASE_TAPS[ph] for dw, _ in _PHASE_TAPS[pw]]
            phase_patches.append(jnp.stack(taps, axis=3).reshape(N * H * W, 4 * IC))
    patches = jnp.stack(phase_patches, axis=0)               # (4, N*H*W, 4*IC)
    out, stats = _gemm_phased(patches, wp["w"], wp["b"], oc=OC, out_act=out_act,
                              want_stats=want_stats, out_dtype=out_dtype)
    out = (out.reshape(2, 2, N, H, W, OC)                    # (ph, pw, N, H, W, OC)
              .transpose(2, 3, 0, 4, 1, 5)
              .reshape(N, 2 * H, 2 * W, OC))
    if want_stats:
        return out, _bn_scale_shift(stats, count=float(N * 4 * H * W))
    return out, None


# ---------------------------------------------------------------------------
# Parameters (PyTorch layout) + one-time GEMM-ready preparation
# ---------------------------------------------------------------------------
def init_params(key, input_nc, output_nc, ngf, num_downs):
    assert input_nc == output_nc
    assert num_downs >= 5
    cfgs = [("outermost", output_nc, ngf),
            ("middle", ngf, ngf * 2),
            ("middle", ngf * 2, ngf * 4),
            ("middle", ngf * 4, ngf * 8)]
    cfgs += [("middle", ngf * 8, ngf * 8)] * (num_downs - 5)
    cfgs += [("innermost", ngf * 8, ngf * 8)]

    params = []
    for kind, outer, inner in cfgs:
        key, k1, k2, k3, k4 = jax.random.split(key, 5)
        up_in = inner if kind == "innermost" else inner * 2
        params.append(dict(
            kind=kind,
            dw=0.05 * jax.random.normal(k1, (inner, outer, 4, 4), jnp.float32),  # Conv2d (OC,IC,4,4)
            db=0.02 * jax.random.normal(k2, (inner,), jnp.float32),
            uw=0.05 * jax.random.normal(k3, (up_in, outer, 4, 4), jnp.float32),  # ConvT (IC,OC,4,4)
            ub=0.02 * jax.random.normal(k4, (outer,), jnp.float32),
        ))
    return params


def _oc_pad(oc):
    # 256-lane slabs for wide layers (fills the v6e/v7x MXU); 128 otherwise.
    return _round_up(oc, 256) if oc >= 256 else _round_up(oc, 128)


def prepare_params(params):
    """Convert once to GEMM-ready bf16 weight matrices with OC padded to a lane slab
    (unmasked output stores; no per-call padding copies of runtime tensors)."""
    prepped = []
    for p in params:
        w_d, b_d, w_u, b_u = p["dw"], p["db"], p["uw"], p["ub"]

        oc_d, ic_d = w_d.shape[0], w_d.shape[1]
        ocp_d = _oc_pad(oc_d)
        wd = w_d.transpose(2, 3, 1, 0).reshape(16 * ic_d, oc_d)   # K order (kh, kw, ic)
        wd_pad = jnp.zeros((1, 16 * ic_d, ocp_d), jnp.bfloat16)
        wd_pad = wd_pad.at[0, :, :oc_d].set(wd.astype(jnp.bfloat16))
        bd_pad = jnp.zeros((1, ocp_d), jnp.float32).at[0, :oc_d].set(b_d)

        ic_u, oc_u = w_u.shape[0], w_u.shape[1]
        ocp_u = _oc_pad(oc_u)
        mats = []
        for ph in (0, 1):
            for pw in (0, 1):
                taps = [w_u[:, :, kh, kw]
                        for _, kh in _PHASE_TAPS[ph] for _, kw in _PHASE_TAPS[pw]]
                mats.append(jnp.stack(taps, axis=0).reshape(4 * ic_u, oc_u))
        wu = jnp.stack(mats, axis=0)                              # (4, 4*IC, OC)
        wu_pad = jnp.zeros((4, 4 * ic_u, ocp_u), jnp.bfloat16)
        wu_pad = wu_pad.at[:, :, :oc_u].set(wu.astype(jnp.bfloat16))
        bu_pad = jnp.zeros((1, ocp_u), jnp.float32).at[0, :oc_u].set(b_u)

        prepped.append(dict(
            kind=p["kind"],
            down=dict(w=wd_pad, b=bd_pad, oc=oc_d),
            up=dict(w=wu_pad, b=bu_pad, oc=oc_u),
        ))
    return prepped


# ---------------------------------------------------------------------------
# Nested UnetSkipConnectionBlock forward (opt.use_norm=1, use_dropout=False)
# ---------------------------------------------------------------------------
def _identity_pending(c):
    return jnp.ones((c,), jnp.float32), jnp.zeros((c,), jnp.float32)


def unet_forward(params, x_nchw):
    """BatchNorm is carried as a lazy per-channel (scale, shift) that the next
    consumer's prologue applies before its own activation + im2col.  Skip concat
    is [model(x), x], exactly matching torch.cat([self.model(x), x], 1)."""
    x = jnp.transpose(x_nchw, (0, 2, 3, 1))          # NHWC internally

    def block(level, a, a_scale, a_shift):
        p = params[level]
        kind = p["kind"]
        if kind == "outermost":
            # model = [downconv, submodule, uprelu, upconv, tanh]
            d, _ = conv_down(a, None, None, "none", p["down"])
            s, s_scale, s_shift = block(level + 1, d, None, None)
            out, _ = conv_up(s, s_scale, s_shift, "relu", p["up"], out_act="tanh",
                             out_dtype=jnp.float32)
            return out, None, None
        if kind == "innermost":
            # model = [downrelu, downconv, uprelu, upconv, upnorm]; cat([model(x), x], C)
            d, _ = conv_down(a, a_scale, a_shift, "leaky_relu", p["down"])
            u, (u_sc, u_sh) = conv_up(d, None, None, "relu", p["up"], want_stats=True)
        else:
            # model = [downrelu, downconv, downnorm, submodule, uprelu, upconv, upnorm]
            d, (d_sc, d_sh) = conv_down(a, a_scale, a_shift, "leaky_relu",
                                        p["down"], want_stats=True)
            s, s_scale, s_shift = block(level + 1, d, d_sc, d_sh)
            u, (u_sc, u_sh) = conv_up(s, s_scale, s_shift, "relu", p["up"],
                                      want_stats=True)
        if a_scale is None:
            a_scale, a_shift = _identity_pending(a.shape[-1])
        cat = jnp.concatenate([u, a], axis=-1)       # [model(x), x]
        return (cat,
                jnp.concatenate([u_sc, a_scale]),
                jnp.concatenate([u_sh, a_shift]))

    out, _, _ = block(0, x, None, None)
    return jnp.transpose(out, (0, 3, 1, 2))          # back to NCHW


# ---------------------------------------------------------------------------
# Pure-JAX (lax.conv) reference with bit-matched bf16 rounding points
# ---------------------------------------------------------------------------
def _ref_prologue(y, scale, shift, act):
    y = y.astype(jnp.float32)
    if scale is not None:
        y = y * scale + shift
    if act == "leaky_relu":
        y = jnp.where(y >= 0.0, y, 0.2 * y)
    elif act == "relu":
        y = jnp.maximum(y, 0.0)
    return y.astype(jnp.bfloat16)


def _ref_conv_down(y, w, b, use_bias):
    wb = w.astype(jnp.bfloat16).astype(jnp.float32)          # same bf16 rounding
    out = jax.lax.conv_general_dilated(
        y.astype(jnp.float32), jnp.transpose(wb, (2, 3, 1, 0)),
        window_strides=(2, 2), padding=((1, 1), (1, 1)),
        dimension_numbers=("NHWC", "HWIO", "NHWC"))
    if use_bias:
        out = out + b
    return out


def _ref_conv_up(y, w, b, use_bias):
    wb = w.astype(jnp.bfloat16).astype(jnp.float32)
    out = jax.lax.conv_general_dilated(
        y.astype(jnp.float32),
        jnp.transpose(wb[:, :, ::-1, ::-1], (2, 3, 0, 1)),    # flip -> direct conv
        window_strides=(1, 1), padding=((2, 2), (2, 2)), lhs_dilation=(2, 2),
        dimension_numbers=("NHWC", "HWIO", "NHWC"))
    if use_bias:
        out = out + b
    return out


def _ref_bn(y):
    mean = jnp.mean(y, axis=(0, 1, 2))
    msq = jnp.mean(y * y, axis=(0, 1, 2))
    var = jnp.maximum(msq - mean * mean, 0.0)
    scale = jax.lax.rsqrt(var + _EPS)
    return scale, -mean * scale


def unet_reference(raw_params, x_nchw):
    x = jnp.transpose(x_nchw, (0, 2, 3, 1))

    def block(level, a, a_scale, a_shift):
        p = raw_params[level]
        kind = p["kind"]
        if kind == "outermost":
            d = _ref_conv_down(_ref_prologue(a, None, None, "none"),
                               p["dw"], p["db"], True).astype(jnp.bfloat16)
            s, s_sc, s_sh = block(level + 1, d, None, None)
            out = jnp.tanh(_ref_conv_up(_ref_prologue(s, s_sc, s_sh, "relu"),
                                        p["uw"], p["ub"], True))
            return out, None, None
        if kind == "innermost":
            d = _ref_conv_down(_ref_prologue(a, a_scale, a_shift, "leaky_relu"),
                               p["dw"], p["db"], True).astype(jnp.bfloat16)
            u_f = _ref_conv_up(_ref_prologue(d, None, None, "relu"),
                               p["uw"], p["ub"], False)
            u_sc, u_sh = _ref_bn(u_f)
            u = u_f.astype(jnp.bfloat16)
        else:
            d_f = _ref_conv_down(_ref_prologue(a, a_scale, a_shift, "leaky_relu"),
                                 p["dw"], p["db"], False)
            d_sc, d_sh = _ref_bn(d_f)
            d = d_f.astype(jnp.bfloat16)
            s, s_sc, s_sh = block(level + 1, d, d_sc, d_sh)
            u_f = _ref_conv_up(_ref_prologue(s, s_sc, s_sh, "relu"),
                               p["uw"], p["ub"], False)
            u_sc, u_sh = _ref_bn(u_f)
            u = u_f.astype(jnp.bfloat16)
        if a_scale is None:
            a_scale, a_shift = _identity_pending(a.shape[-1])
        cat = jnp.concatenate([u, a], axis=-1)
        return (cat,
                jnp.concatenate([u_sc, a_scale]),
                jnp.concatenate([u_sh, a_shift]))

    out, _, _ = block(0, x, None, None)
    return jnp.transpose(out, (0, 3, 1, 2))


if __name__ == "__main__":
    input_nc = output_nc = 4
    ngf = 8
    num_downs = 5                    # spatial must be divisible by 2**num_downs
    N, H, W = 2, 64, 64              # 64 so the M-tiled GEMM path is exercised

    key = jax.random.PRNGKey(0)
    kp, kx = jax.random.split(key)
    raw_params = init_params(kp, input_nc, output_nc, ngf, num_downs)
    params = prepare_params(raw_params)
    x = jax.random.normal(kx, (N, input_nc, H, W), jnp.float32)

    fwd = jax.jit(lambda inp: unet_forward(params, inp))
    out = fwd(x)
    jax.block_until_ready(out)

    assert out.shape == (N, output_nc, H, W), out.shape
    assert bool(jnp.all(jnp.isfinite(out)))

    # Numerical reference check (mixed bf16/f32 path is matched, so tolerance is loose
    # only to cover accumulation-order differences through the BN chain).
    ref = jax.jit(lambda inp: unet_reference(raw_params, inp))(x)
    jax.block_until_ready(ref)
    max_err = float(jnp.max(jnp.abs(out - ref)))
    assert max_err < 3e-2, f"mismatch vs lax reference: max |err| = {max_err}"

    print("KERNEL_OK")
</pallas_src>

<mosaic_0001>
module attributes {stable_mosaic.version = 11 : i64} {
  func.func @_gemm_kernel(%arg0: i32, %arg1: i32, %arg2: memref<1x1024x64xbf16, #tpu.memory_space<vmem>>, %arg3: memref<1x64x128xbf16, #tpu.memory_space<vmem>>, %arg4: memref<1x128xf32, #tpu.memory_space<vmem>>, %arg5: memref<1x1024x128xbf16, #tpu.memory_space<vmem>>) attributes {dimension_semantics = [#tpu.dimension_semantics<parallel>, #tpu.dimension_semantics<parallel>], iteration_bounds = array<i64: 1, 2>, scalar_prefetch = 0 : i64, scratch_operands = 0 : i64, tpu.core_type = #tpu.core_type<tc>, window_params = [{transform_indices = @transform_0, window_bounds = array<i64: 1, 1024, 64>}, {transform_indices = @transform_1, window_bounds = array<i64: 1, 64, 128>}, {pipeline_mode = #tpu.pipeline_mode<synchronous>, transform_indices = @transform_2, window_bounds = array<i64: 1, 128>}, {transform_indices = @transform_3, window_bounds = array<i64: 1, 1024, 128>}]} {
    %c0 = arith.constant 0 : index
    %c0_0 = arith.constant 0 : index
    %c0_1 = arith.constant 0 : index
    %0 = vector.load %arg2[%c0, %c0_0, %c0_1] : memref<1x1024x64xbf16, #tpu.memory_space<vmem>>, vector<1x1024x64xbf16>
    %1 = vector.shape_cast %0 : vector<1x1024x64xbf16> to vector<1024x64xbf16>
    %c0_2 = arith.constant 0 : index
    %c0_3 = arith.constant 0 : index
    %c0_4 = arith.constant 0 : index
    %2 = vector.load %arg3[%c0_2, %c0_3, %c0_4] : memref<1x64x128xbf16, #tpu.memory_space<vmem>>, vector<1x64x128xbf16>
    %3 = vector.shape_cast %2 : vector<1x64x128xbf16> to vector<64x128xbf16>
    %cst = arith.constant dense<0.000000e+00> : vector<1024x128xf32>
    %4 = tpu.matmul %1, %3, %cst {dimension_numbers = #tpu.dot_dimension_numbers<[1], [0], [0], [1], [0, 0, 1, 1], [], []>} : vector<1024x64xbf16>, vector<64x128xbf16>, vector<1024x128xf32> -> vector<1024x128xf32>
    %c0_5 = arith.constant 0 : index
    %c0_6 = arith.constant 0 : index
    %5 = vector.load %arg4[%c0_5, %c0_6] : memref<1x128xf32, #tpu.memory_space<vmem>>, vector<1x128xf32>
    %6 = vector.broadcast %5 : vector<1x128xf32> to vector<1024x128xf32>
    %7 = arith.addf %4, %6 : vector<1024x128xf32>
    %8 = arith.truncf %7 : vector<1024x128xf32> to vector<1024x128xbf16>
    %c0_7 = arith.constant 0 : index
    %c0_8 = arith.constant 0 : index
    %c0_9 = arith.constant 0 : index
    %9 = vector.load %arg5[%c0_7, %c0_8, %c0_9] : memref<1x1024x128xbf16, #tpu.memory_space<vmem>>, vector<1x1024x128xbf16>
    %10 = vector.shape_cast %9 : vector<1x1024x128xbf16> to vector<1024x128xbf16>
    %11 = vector.shape_cast %8 : vector<1024x128xbf16> to vector<1x1024x128xbf16>
    tpu.vector_store %arg5[%c0_7, %c0_8, %c0_9], %11 {strides = array<i32>} : memref<1x1024x128xbf16, #tpu.memory_space<vmem>>, vector<1x1024x128xbf16>,
    return
  }
  func.func @transform_0(%arg0: i32, %arg1: i32) -> (i32, i32, i32) {
    %c0_i32 = arith.constant 0 : i32
    %c0_i32_0 = arith.constant 0 : i32
    return %arg0, %arg1, %c0_i32 : i32, i32, i32
  }
  func.func @transform_1(%arg0: i32, %arg1: i32) -> (i32, i32, i32) {
    %c0_i32 = arith.constant 0 : i32
    %c0_i32_0 = arith.constant 0 : i32
    %c0_i32_1 = arith.constant 0 : i32
    return %arg0, %c0_i32, %c0_i32_0 : i32, i32, i32
  }
  func.func @transform_2(%arg0: i32, %arg1: i32) -> (i32, i32) {
    %c0_i32 = arith.constant 0 : i32
    %c0_i32_0 = arith.constant 0 : i32
    %c0_i32_1 = arith.constant 0 : i32
    return %c0_i32, %c0_i32_0 : i32, i32
  }
  func.func @transform_3(%arg0: i32, %arg1: i32) -> (i32, i32, i32) {
    %c0_i32 = arith.constant 0 : i32
    %c0_i32_0 = arith.constant 0 : i32
    return %arg0, %arg1, %c0_i32 : i32, i32, i32
  }
}

module attributes {stable_mosaic.version = 11 : i64} {
  func.func @_gemm_stats_kernel(%arg0: i32, %arg1: i32, %arg2: memref<1x256x128xbf16, #tpu.memory_space<vmem>>, %arg3: memref<1x128x128xbf16, #tpu.memory_space<vmem>>, %arg4: memref<1x256x128xbf16, #tpu.memory_space<vmem>>, %arg5: memref<1x1x2x128xf32, #tpu.memory_space<vmem>>) attributes {dimension_semantics = [#tpu.dimension_semantics<parallel>, #tpu.dimension_semantics<parallel>], iteration_bounds = array<i64: 1, 2>, scalar_prefetch = 0 : i64, scratch_operands = 0 : i64, tpu.core_type = #tpu.core_type<tc>, window_params = [{transform_indices = @transform_0, window_bounds = array<i64: 1, 256, 128>}, {transform_indices = @transform_1, window_bounds = array<i64: 1, 128, 128>}, {transform_indices = @transform_2, window_bounds = array<i64: 1, 256, 128>}, {transform_indices = @transform_3, window_bounds = array<i64: 1, 1, 2, 128>}]} {
    %c0 = arith.constant 0 : index
    %c0_0 = arith.constant 0 : index
    %c0_1 = arith.constant 0 : index
    %0 = vector.load %arg2[%c0, %c0_0, %c0_1] : memref<1x256x128xbf16, #tpu.memory_space<vmem>>, vector<1x256x128xbf16>
    %1 = vector.shape_cast %0 : vector<1x256x128xbf16> to vector<256x128xbf16>
    %c0_2 = arith.constant 0 : index
    %c0_3 = arith.constant 0 : index
    %c0_4 = arith.constant 0 : index
    %2 = vector.load %arg3[%c0_2, %c0_3, %c0_4] : memref<1x128x128xbf16, #tpu.memory_space<vmem>>, vector<1x128x128xbf16>
    %3 = vector.shape_cast %2 : vector<1x128x128xbf16> to vector<128x128xbf16>
    %cst = arith.constant dense<0.000000e+00> : vector<256x128xf32>
    %4 = tpu.matmul %1, %3, %cst {dimension_numbers = #tpu.dot_dimension_numbers<[1], [0], [0], [1], [0, 0, 1, 1], [], []>} : vector<256x128xbf16>, vector<128x128xbf16>, vector<256x128xf32> -> vector<256x128xf32>
    %5 = arith.truncf %4 : vector<256x128xf32> to vector<256x128xbf16>
    %c0_5 = arith.constant 0 : index
    %c0_6 = arith.constant 0 : index
    %c0_7 = arith.constant 0 : index
    %6 = vector.load %arg4[%c0_5, %c0_6, %c0_7] : memref<1x256x128xbf16, #tpu.memory_space<vmem>>, vector<1x256x128xbf16>
    %7 = vector.shape_cast %6 : vector<1x256x128xbf16> to vector<256x128xbf16>
    %8 = vector.shape_cast %5 : vector<256x128xbf16> to vector<1x256x128xbf16>
    tpu.vector_store %arg4[%c0_5, %c0_6, %c0_7], %8 {strides = array<i32>} : memref<1x256x128xbf16, #tpu.memory_space<vmem>>, vector<1x256x128xbf16>,
    %cst_8 = arith.constant dense<0.000000e+00> : vector<128xf32>
    %9 = vector.multi_reduction <add>, %4, %cst_8 [0] : vector<256x128xf32> to vector<128xf32>
    %10 = vector.shape_cast %9 : vector<128xf32> to vector<1x128xf32>
    %11 = arith.mulf %4, %4 : vector<256x128xf32>
    %cst_9 = arith.constant dense<0.000000e+00> : vector<128xf32>
    %12 = vector.multi_reduction <add>, %11, %cst_9 [0] : vector<256x128xf32> to vector<128xf32>
    %13 = vector.shape_cast %12 : vector<128xf32> to vector<1x128xf32>
    %14 = tpu.concatenate %10, %13 in 0 : vector<1x128xf32>, vector<1x128xf32> -> vector<2x128xf32>
    %c0_10 = arith.constant 0 : index
    %c0_11 = arith.constant 0 : index
    %c0_12 = arith.constant 0 : index
    %c0_13 = arith.constant 0 : index
    %15 = vector.load %arg5[%c0_10, %c0_11, %c0_12, %c0_13] : memref<1x1x2x128xf32, #tpu.memory_space<vmem>>, vector<1x1x2x128xf32>
    %16 = vector.shape_cast %15 : vector<1x1x2x128xf32> to vector<2x128xf32>
    %17 = vector.shape_cast %14 : vector<2x128xf32> to vector<1x1x2x128xf32>
    tpu.vector_store %arg5[%c0_10, %c0_11, %c0_12, %c0_13], %17 {strides = array<i32>} : memref<1x1x2x128xf32, #tpu.memory_space<vmem>>, vector<1x1x2x128xf32>,
    return
  }
  func.func @transform_0(%arg0: i32, %arg1: i32) -> (i32, i32, i32) {
    %c0_i32 = arith.constant 0 : i32
    %c0_i32_0 = arith.constant 0 : i32
    return %arg0, %arg1, %c0_i32 : i32, i32, i32
  }
  func.func @transform_1(%arg0: i32, %arg1: i32) -> (i32, i32, i32) {
    %c0_i32 = arith.constant 0 : i32
    %c0_i32_0 = arith.constant 0 : i32
    %c0_i32_1 = arith.constant 0 : i32
    return %arg0, %c0_i32, %c0_i32_0 : i32, i32, i32
  }
  func.func @transform_2(%arg0: i32, %arg1: i32) -> (i32, i32, i32) {
    %c0_i32 = arith.constant 0 : i32
    %c0_i32_0 = arith.constant 0 : i32
    return %arg0, %arg1, %c0_i32 : i32, i32, i32
  }
  func.func @transform_3(%arg0: i32, %arg1: i32) -> (i32, i32, i32, i32) {
    %c0_i32 = arith.constant 0 : i32
    %c0_i32_0 = arith.constant 0 : i32
    %c0_i32_1 = arith.constant 0 : i32
    return %arg0, %arg1, %c0_i32, %c0_i32_0 : i32, i32, i32, i32
  }
}

module attributes {stable_mosaic.version = 11 : i64} {
  func.func @_gemm_stats_kernel(%arg0: i32, %arg1: i32, %arg2: memref<1x64x256xbf16, #tpu.memory_space<vmem>>, %arg3: memref<1x256x128xbf16, #tpu.memory_space<vmem>>, %arg4: memref<1x64x128xbf16, #tpu.memory_space<vmem>>, %arg5: memref<1x1x2x128xf32, #tpu.memory_space<vmem>>) attributes {dimension_semantics = [#tpu.dimension_semantics<parallel>, #tpu.dimension_semantics<parallel>], iteration_bounds = array<i64: 1, 2>, scalar_prefetch = 0 : i64, scratch_operands = 0 : i64, tpu.core_type = #tpu.core_type<tc>, window_params = [{transform_indices = @transform_0, window_bounds = array<i64: 1, 64, 256>}, {transform_indices = @transform_1, window_bounds = array<i64: 1, 256, 128>}, {transform_indices = @transform_2, window_bounds = array<i64: 1, 64, 128>}, {transform_indices = @transform_3, window_bounds = array<i64: 1, 1, 2, 128>}]} {
    %c0 = arith.constant 0 : index
    %c0_0 = arith.constant 0 : index
    %c0_1 = arith.constant 0 : index
    %0 = vector.load %arg2[%c0, %c0_0, %c0_1] : memref<1x64x256xbf16, #tpu.memory_space<vmem>>, vector<1x64x256xbf16>
    %1 = vector.shape_cast %0 : vector<1x64x256xbf16> to vector<64x256xbf16>
    %c0_2 = arith.constant 0 : index
    %c0_3 = arith.constant 0 : index
    %c0_4 = arith.constant 0 : index
    %2 = vector.load %arg3[%c0_2, %c0_3, %c0_4] : memref<1x256x128xbf16, #tpu.memory_space<vmem>>, vector<1x256x128xbf16>
    %3 = vector.shape_cast %2 : vector<1x256x128xbf16> to vector<256x128xbf16>
    %cst = arith.constant dense<0.000000e+00> : vector<64x128xf32>
    %4 = tpu.matmul %1, %3, %cst {dimension_numbers = #tpu.dot_dimension_numbers<[1], [0], [0], [1], [0, 0, 1, 1], [], []>} : vector<64x256xbf16>, vector<256x128xbf16>, vector<64x128xf32> -> vector<64x128xf32>
    %5 = arith.truncf %4 : vector<64x128xf32> to vector<64x128xbf16>
    %c0_5 = arith.constant 0 : index
    %c0_6 = arith.constant 0 : index
    %c0_7 = arith.constant 0 : index
    %6 = vector.load %arg4[%c0_5, %c0_6, %c0_7] : memref<1x64x128xbf16, #tpu.memory_space<vmem>>, vector<1x64x128xbf16>
    %7 = vector.shape_cast %6 : vector<1x64x128xbf16> to vector<64x128xbf16>
    %8 = vector.shape_cast %5 : vector<64x128xbf16> to vector<1x64x128xbf16>
    tpu.vector_store %arg4[%c0_5, %c0_6, %c0_7], %8 {strides = array<i32>} : memref<1x64x128xbf16, #tpu.memory_space<vmem>>, vector<1x64x128xbf16>,
    %cst_8 = arith.constant dense<0.000000e+00> : vector<128xf32>
    %9 = vector.multi_reduction <add>, %4, %cst_8 [0] : vector<64x128xf32> to vector<128xf32>
    %10 = vector.shape_cast %9 : vector<128xf32> to vector<1x128xf32>
    %11 = arith.mulf %4, %4 : vector<64x128xf32>
    %cst_9 = arith.constant dense<0.000000e+00> : vector<128xf32>
    %12 = vector.multi_reduction <add>, %11, %cst_9 [0] : vector<64x128xf32> to vector<128xf32>
    %13 = vector.shape_cast %12 : vector<128xf32> to vector<1x128xf32>
    %14 = tpu.concatenate %10, %13 in 0 : vector<1x128xf32>, vector<1x128xf32> -> vector<2x128xf32>
    %c0_10 = arith.constant 0 : index
    %c0_11 = arith.constant 0 : index
    %c0_12 = arith.constant 0 : index
    %c0_13 = arith.constant 0 : index
    %15 = vector.load %arg5[%c0_10, %c0_11, %c0_12, %c0_13] : memref<1x1x2x128xf32, #tpu.memory_space<vmem>>, vector<1x1x2x128xf32>
    %16 = vector.shape_cast %15 : vector<1x1x2x128xf32> to vector<2x128xf32>
    %17 = vector.shape_cast %14 : vector<2x128xf32> to vector<1x1x2x128xf32>
    tpu.vector_store %arg5[%c0_10, %c0_11, %c0_12, %c0_13], %17 {strides = array<i32>} : memref<1x1x2x128xf32, #tpu.memory_space<vmem>>, vector<1x1x2x128xf32>,
    return
  }
  func.func @transform_0(%arg0: i32, %arg1: i32) -> (i32, i32, i32) {
    %c0_i32 = arith.constant 0 : i32
    %c0_i32_0 = arith.constant 0 : i32
    return %arg0, %arg1, %c0_i32 : i32, i32, i32
  }
  func.func @transform_1(%arg0: i32, %arg1: i32) -> (i32, i32, i32) {
    %c0_i32 = arith.constant 0 : i32
    %c0_i32_0 = arith.constant 0 : i32
    %c0_i32_1 = arith.constant 0 : i32
    return %arg0, %c0_i32, %c0_i32_0 : i32, i32, i32
  }
  func.func @transform_2(%arg0: i32, %arg1: i32) -> (i32, i32, i32) {
    %c0_i32 = arith.constant 0 : i32
    %c0_i32_0 = arith.constant 0 : i32
    return %arg0, %arg1, %c0_i32 : i32, i32, i32
  }
  func.func @transform_3(%arg0: i32, %arg1: i32) -> (i32, i32, i32, i32) {
    %c0_i32 = arith.constant 0 : i32
    %c0_i32_0 = arith.constant 0 : i32
    %c0_i32_1 = arith.constant 0 : i32
    return %arg0, %arg1, %c0_i32, %c0_i32_0 : i32, i32, i32, i32
  }
}

module attributes {stable_mosaic.version = 11 : i64} {
  func.func @_gemm_stats_kernel(%arg0: i32, %arg1: i32, %arg2: memref<1x16x512xbf16, #tpu.memory_space<vmem>>, %arg3: memref<1x512x128xbf16, #tpu.memory_space<vmem>>, %arg4: memref<1x16x128xbf16, #tpu.memory_space<vmem>>, %arg5: memref<1x1x2x128xf32, #tpu.memory_space<vmem>>) attributes {dimension_semantics = [#tpu.dimension_semantics<parallel>, #tpu.dimension_semantics<parallel>], iteration_bounds = array<i64: 1, 2>, scalar_prefetch = 0 : i64, scratch_operands = 0 : i64, tpu.core_type = #tpu.core_type<tc>, window_params = [{transform_indices = @transform_0, window_bounds = array<i64: 1, 16, 512>}, {transform_indices = @transform_1, window_bounds = array<i64: 1, 512, 128>}, {transform_indices = @transform_2, window_bounds = array<i64: 1, 16, 128>}, {transform_indices = @transform_3, window_bounds = array<i64: 1, 1, 2, 128>}]} {
    %c0 = arith.constant 0 : index
    %c0_0 = arith.constant 0 : index
    %c0_1 = arith.constant 0 : index
    %0 = vector.load %arg2[%c0, %c0_0, %c0_1] : memref<1x16x512xbf16, #tpu.memory_space<vmem>>, vector<1x16x512xbf16>
    %1 = vector.shape_cast %0 : vector<1x16x512xbf16> to vector<16x512xbf16>
    %c0_2 = arith.constant 0 : index
    %c0_3 = arith.constant 0 : index
    %c0_4 = arith.constant 0 : index
    %2 = vector.load %arg3[%c0_2, %c0_3, %c0_4] : memref<1x512x128xbf16, #tpu.memory_space<vmem>>, vector<1x512x128xbf16>
    %3 = vector.shape_cast %2 : vector<1x512x128xbf16> to vector<512x128xbf16>
    %cst = arith.constant dense<0.000000e+00> : vector<16x128xf32>
    %4 = tpu.matmul %1, %3, %cst {dimension_numbers = #tpu.dot_dimension_numbers<[1], [0], [0], [1], [0, 0, 1, 1], [], []>} : vector<16x512xbf16>, vector<512x128xbf16>, vector<16x128xf32> -> vector<16x128xf32>
    %5 = arith.truncf %4 : vector<16x128xf32> to vector<16x128xbf16>
    %c0_5 = arith.constant 0 : index
    %c0_6 = arith.constant 0 : index
    %c0_7 = arith.constant 0 : index
    %6 = vector.load %arg4[%c0_5, %c0_6, %c0_7] : memref<1x16x128xbf16, #tpu.memory_space<vmem>>, vector<1x16x128xbf16>
    %7 = vector.shape_cast %6 : vector<1x16x128xbf16> to vector<16x128xbf16>
    %8 = vector.shape_cast %5 : vector<16x128xbf16> to vector<1x16x128xbf16>
    tpu.vector_store %arg4[%c0_5, %c0_6, %c0_7], %8 {strides = array<i32>} : memref<1x16x128xbf16, #tpu.memory_space<vmem>>, vector<1x16x128xbf16>,
    %cst_8 = arith.constant dense<0.000000e+00> : vector<128xf32>
    %9 = vector.multi_reduction <add>, %4, %cst_8 [0] : vector<16x128xf32> to vector<128xf32>
    %10 = vector.shape_cast %9 : vector<128xf32> to vector<1x128xf32>
    %11 = arith.mulf %4, %4 : vector<16x128xf32>
    %cst_9 = arith.constant dense<0.000000e+00> : vector<128xf32>
    %12 = vector.multi_reduction <add>, %11, %cst_9 [0] : vector<16x128xf32> to vector<128xf32>
    %13 = vector.shape_cast %12 : vector<128xf32> to vector<1x128xf32>
    %14 = tpu.concatenate %10, %13 in 0 : vector<1x128xf32>, vector<1x128xf32> -> vector<2x128xf32>
    %c0_10 = arith.constant 0 : index
    %c0_11 = arith.constant 0 : index
    %c0_12 = arith.constant 0 : index
    %c0_13 = arith.constant 0 : index
    %15 = vector.load %arg5[%c0_10, %c0_11, %c0_12, %c0_13] : memref<1x1x2x128xf32, #tpu.memory_space<vmem>>, vector<1x1x2x128xf32>
    %16 = vector.shape_cast %15 : vector<1x1x2x128xf32> to vector<2x128xf32>
    %17 = vector.shape_cast %14 : vector<2x128xf32> to vector<1x1x2x128xf32>
    tpu.vector_store %arg5[%c0_10, %c0_11, %c0_12, %c0_13], %17 {strides = array<i32>} : memref<1x1x2x128xf32, #tpu.memory_space<vmem>>, vector<1x1x2x128xf32>,
    return
  }
  func.func @transform_0(%arg0: i32, %arg1: i32) -> (i32, i32, i32) {
    %c0_i32 = arith.constant 0 : i32
    %c0_i32_0 = arith.constant 0 : i32
    return %arg0, %arg1, %c0_i32 : i32, i32, i32
  }
  func.func @transform_1(%arg0: i32, %arg1: i32) -> (i32, i32, i32) {
    %c0_i32 = arith.constant 0 : i32
    %c0_i32_0 = arith.constant 0 : i32
    %c0_i32_1 = arith.constant 0 : i32
    return %arg0, %c0_i32, %c0_i32_0 : i32, i32, i32
  }
  func.func @transform_2(%arg0: i32, %arg1: i32) -> (i32, i32, i32) {
    %c0_i32 = arith.constant 0 : i32
    %c0_i32_0 = arith.constant 0 : i32
    return %arg0, %arg1, %c0_i32 : i32, i32, i32
  }
  func.func @transform_3(%arg0: i32, %arg1: i32) -> (i32, i32, i32, i32) {
    %c0_i32 = arith.constant 0 : i32
    %c0_i32_0 = arith.constant 0 : i32
    %c0_i32_1 = arith.constant 0 : i32
    return %arg0, %arg1, %c0_i32, %c0_i32_0 : i32, i32, i32, i32
  }
}

module attributes {stable_mosaic.version = 11 : i64} {
  func.func @_gemm_kernel(%arg0: i32, %arg1: i32, %arg2: memref<1x8x1024xbf16, #tpu.memory_space<vmem>>, %arg3: memref<1x1024x128xbf16, #tpu.memory_space<vmem>>, %arg4: memref<1x128xf32, #tpu.memory_space<vmem>>, %arg5: memref<1x8x128xbf16, #tpu.memory_space<vmem>>) attributes {dimension_semantics = [#tpu.dimension_semantics<parallel>, #tpu.dimension_semantics<parallel>], iteration_bounds = array<i64: 1, 1>, scalar_prefetch = 0 : i64, scratch_operands = 0 : i64, tpu.core_type = #tpu.core_type<tc>, window_params = [{transform_indices = @transform_0, window_bounds = array<i64: 1, 8, 1024>}, {transform_indices = @transform_1, window_bounds = array<i64: 1, 1024, 128>}, {pipeline_mode = #tpu.pipeline_mode<synchronous>, transform_indices = @transform_2, window_bounds = array<i64: 1, 128>}, {transform_indices = @transform_3, window_bounds = array<i64: 1, 8, 128>}]} {
    %c0 = arith.constant 0 : index
    %c0_0 = arith.constant 0 : index
    %c0_1 = arith.constant 0 : index
    %0 = vector.load %arg2[%c0, %c0_0, %c0_1] : memref<1x8x1024xbf16, #tpu.memory_space<vmem>>, vector<1x8x1024xbf16>
    %1 = vector.shape_cast %0 : vector<1x8x1024xbf16> to vector<8x1024xbf16>
    %c0_2 = arith.constant 0 : index
    %c0_3 = arith.constant 0 : index
    %c0_4 = arith.constant 0 : index
    %2 = vector.load %arg3[%c0_2, %c0_3, %c0_4] : memref<1x1024x128xbf16, #tpu.memory_space<vmem>>, vector<1x1024x128xbf16>
    %3 = vector.shape_cast %2 : vector<1x1024x128xbf16> to vector<1024x128xbf16>
    %cst = arith.constant dense<0.000000e+00> : vector<8x128xf32>
    %4 = tpu.matmul %1, %3, %cst {dimension_numbers = #tpu.dot_dimension_numbers<[1], [0], [0], [1], [0, 0, 1, 1], [], []>} : vector<8x1024xbf16>, vector<1024x128xbf16>, vector<8x128xf32> -> vector<8x128xf32>
    %c0_5 = arith.constant 0 : index
    %c0_6 = arith.constant 0 : index
    %5 = vector.load %arg4[%c0_5, %c0_6] : memref<1x128xf32, #tpu.memory_space<vmem>>, vector<1x128xf32>
    %6 = vector.broadcast %5 : vector<1x128xf32> to vector<8x128xf32>
    %7 = arith.addf %4, %6 : vector<8x128xf32>
    %8 = arith.truncf %7 : vector<8x128xf32> to vector<8x128xbf16>
    %c0_7 = arith.constant 0 : index
    %c0_8 = arith.constant 0 : index
    %c0_9 = arith.constant 0 : index
    %9 = vector.load %arg5[%c0_7, %c0_8, %c0_9] : memref<1x8x128xbf16, #tpu.memory_space<vmem>>, vector<1x8x128xbf16>
    %10 = vector.shape_cast %9 : vector<1x8x128xbf16> to vector<8x128xbf16>
    %11 = vector.shape_cast %8 : vector<8x128xbf16> to vector<1x8x128xbf16>
    tpu.vector_store %arg5[%c0_7, %c0_8, %c0_9], %11 {strides = array<i32>} : memref<1x8x128xbf16, #tpu.memory_space<vmem>>, vector<1x8x128xbf16>,
    return
  }
  func.func @transform_0(%arg0: i32, %arg1: i32) -> (i32, i32, i32) {
    %c0_i32 = arith.constant 0 : i32
    %c0_i32_0 = arith.constant 0 : i32
    return %arg0, %arg1, %c0_i32 : i32, i32, i32
  }
  func.func @transform_1(%arg0: i32, %arg1: i32) -> (i32, i32, i32) {
    %c0_i32 = arith.constant 0 : i32
    %c0_i32_0 = arith.constant 0 : i32
    %c0_i32_1 = arith.constant 0 : i32
    return %arg0, %c0_i32, %c0_i32_0 : i32, i32, i32
  }
  func.func @transform_2(%arg0: i32, %arg1: i32) -> (i32, i32) {
    %c0_i32 = arith.constant 0 : i32
    %c0_i32_0 = arith.constant 0 : i32
    %c0_i32_1 = arith.constant 0 : i32
    return %c0_i32, %c0_i32_0 : i32, i32
  }
  func.func @transform_3(%arg0: i32, %arg1: i32) -> (i32, i32, i32) {
    %c0_i32 = arith.constant 0 : i32
    %c0_i32_0 = arith.constant 0 : i32
    return %arg0, %arg1, %c0_i32 : i32, i32, i32
  }
}

module attributes {stable_mosaic.version = 11 : i64} {
  func.func @_gemm_stats_kernel(%arg0: i32, %arg1: i32, %arg2: memref<1x8x256xbf16, #tpu.memory_space<vmem>>, %arg3: memref<1x256x128xbf16, #tpu.memory_space<vmem>>, %arg4: memref<1x8x128xbf16, #tpu.memory_space<vmem>>, %arg5: memref<1x1x2x128xf32, #tpu.memory_space<vmem>>) attributes {dimension_semantics = [#tpu.dimension_semantics<parallel>, #tpu.dimension_semantics<parallel>], iteration_bounds = array<i64: 4, 1>, scalar_prefetch = 0 : i64, scratch_operands = 0 : i64, tpu.core_type = #tpu.core_type<tc>, window_params = [{transform_indices = @transform_0, window_bounds = array<i64: 1, 8, 256>}, {transform_indices = @transform_1, window_bounds = array<i64: 1, 256, 128>}, {transform_indices = @transform_2, window_bounds = array<i64: 1, 8, 128>}, {transform_indices = @transform_3, window_bounds = array<i64: 1, 1, 2, 128>}]} {
    %c0 = arith.constant 0 : index
    %c0_0 = arith.constant 0 : index
    %c0_1 = arith.constant 0 : index
    %0 = vector.load %arg2[%c0, %c0_0, %c0_1] : memref<1x8x256xbf16, #tpu.memory_space<vmem>>, vector<1x8x256xbf16>
    %1 = vector.shape_cast %0 : vector<1x8x256xbf16> to vector<8x256xbf16>
    %c0_2 = arith.constant 0 : index
    %c0_3 = arith.constant 0 : index
    %c0_4 = arith.constant 0 : index
    %2 = vector.load %arg3[%c0_2, %c0_3, %c0_4] : memref<1x256x128xbf16, #tpu.memory_space<vmem>>, vector<1x256x128xbf16>
    %3 = vector.shape_cast %2 : vector<1x256x128xbf16> to vector<256x128xbf16>
    %cst = arith.constant dense<0.000000e+00> : vector<8x128xf32>
    %4 = tpu.matmul %1, %3, %cst {dimension_numbers = #tpu.dot_dimension_numbers<[1], [0], [0], [1], [0, 0, 1, 1], [], []>} : vector<8x256xbf16>, vector<256x128xbf16>, vector<8x128xf32> -> vector<8x128xf32>
    %5 = arith.truncf %4 : vector<8x128xf32> to vector<8x128xbf16>
    %c0_5 = arith.constant 0 : index
    %c0_6 = arith.constant 0 : index
    %c0_7 = arith.constant 0 : index
    %6 = vector.load %arg4[%c0_5, %c0_6, %c0_7] : memref<1x8x128xbf16, #tpu.memory_space<vmem>>, vector<1x8x128xbf16>
    %7 = vector.shape_cast %6 : vector<1x8x128xbf16> to vector<8x128xbf16>
    %8 = vector.shape_cast %5 : vector<8x128xbf16> to vector<1x8x128xbf16>
    tpu.vector_store %arg4[%c0_5, %c0_6, %c0_7], %8 {strides = array<i32>} : memref<1x8x128xbf16, #tpu.memory_space<vmem>>, vector<1x8x128xbf16>,
    %cst_8 = arith.constant dense<0.000000e+00> : vector<128xf32>
    %9 = vector.multi_reduction <add>, %4, %cst_8 [0] : vector<8x128xf32> to vector<128xf32>
    %10 = vector.shape_cast %9 : vector<128xf32> to vector<1x128xf32>
    %11 = arith.mulf %4, %4 : vector<8x128xf32>
    %cst_9 = arith.constant dense<0.000000e+00> : vector<128xf32>
    %12 = vector.multi_reduction <add>, %11, %cst_9 [0] : vector<8x128xf32> to vector<128xf32>
    %13 = vector.shape_cast %12 : vector<128xf32> to vector<1x128xf32>
    %14 = tpu.concatenate %10, %13 in 0 : vector<1x128xf32>, vector<1x128xf32> -> vector<2x128xf32>
    %c0_10 = arith.constant 0 : index
    %c0_11 = arith.constant 0 : index
    %c0_12 = arith.constant 0 : index
    %c0_13 = arith.constant 0 : index
    %15 = vector.load %arg5[%c0_10, %c0_11, %c0_12, %c0_13] : memref<1x1x2x128xf32, #tpu.memory_space<vmem>>, vector<1x1x2x128xf32>
    %16 = vector.shape_cast %15 : vector<1x1x2x128xf32> to vector<2x128xf32>
    %17 = vector.shape_cast %14 : vector<2x128xf32> to vector<1x1x2x128xf32>
    tpu.vector_store %arg5[%c0_10, %c0_11, %c0_12, %c0_13], %17 {strides = array<i32>} : memref<1x1x2x128xf32, #tpu.memory_space<vmem>>, vector<1x1x2x128xf32>,
    return
  }
  func.func @transform_0(%arg0: i32, %arg1: i32) -> (i32, i32, i32) {
    %c0_i32 = arith.constant 0 : i32
    %c0_i32_0 = arith.constant 0 : i32
    return %arg0, %arg1, %c0_i32 : i32, i32, i32
  }
  func.func @transform_1(%arg0: i32, %arg1: i32) -> (i32, i32, i32) {
    %c0_i32 = arith.constant 0 : i32
    %c0_i32_0 = arith.constant 0 : i32
    %c0_i32_1 = arith.constant 0 : i32
    return %arg0, %c0_i32, %c0_i32_0 : i32, i32, i32
  }
  func.func @transform_2(%arg0: i32, %arg1: i32) -> (i32, i32, i32) {
    %c0_i32 = arith.constant 0 : i32
    %c0_i32_0 = arith.constant 0 : i32
    return %arg0, %arg1, %c0_i32 : i32, i32, i32
  }
  func.func @transform_3(%arg0: i32, %arg1: i32) -> (i32, i32, i32, i32) {
    %c0_i32 = arith.constant 0 : i32
    %c0_i32_0 = arith.constant 0 : i32
    %c0_i32_1 = arith.constant 0 : i32
    return %arg0, %arg1, %c0_i32, %c0_i32_0 : i32, i32, i32, i32
  }
}

module attributes {stable_mosaic.version = 11 : i64} {
  func.func @_gemm_stats_kernel(%arg0: i32, %arg1: i32, %arg2: memref<1x32x512xbf16, #tpu.memory_space<vmem>>, %arg3: memref<1x512x128xbf16, #tpu.memory_space<vmem>>, %arg4: memref<1x32x128xbf16, #tpu.memory_space<vmem>>, %arg5: memref<1x1x2x128xf32, #tpu.memory_space<vmem>>) attributes {dimension_semantics = [#tpu.dimension_semantics<parallel>, #tpu.dimension_semantics<parallel>], iteration_bounds = array<i64: 4, 1>, scalar_prefetch = 0 : i64, scratch_operands = 0 : i64, tpu.core_type = #tpu.core_type<tc>, window_params = [{transform_indices = @transform_0, window_bounds = array<i64: 1, 32, 512>}, {transform_indices = @transform_1, window_bounds = array<i64: 1, 512, 128>}, {transform_indices = @transform_2, window_bounds = array<i64: 1, 32, 128>}, {transform_indices = @transform_3, window_bounds = array<i64: 1, 1, 2, 128>}]} {
    %c0 = arith.constant 0 : index
    %c0_0 = arith.constant 0 : index
    %c0_1 = arith.constant 0 : index
    %0 = vector.load %arg2[%c0, %c0_0, %c0_1] : memref<1x32x512xbf16, #tpu.memory_space<vmem>>, vector<1x32x512xbf16>
    %1 = vector.shape_cast %0 : vector<1x32x512xbf16> to vector<32x512xbf16>
    %c0_2 = arith.constant 0 : index
    %c0_3 = arith.constant 0 : index
    %c0_4 = arith.constant 0 : index
    %2 = vector.load %arg3[%c0_2, %c0_3, %c0_4] : memref<1x512x128xbf16, #tpu.memory_space<vmem>>, vector<1x512x128xbf16>
    %3 = vector.shape_cast %2 : vector<1x512x128xbf16> to vector<512x128xbf16>
    %cst = arith.constant dense<0.000000e+00> : vector<32x128xf32>
    %4 = tpu.matmul %1, %3, %cst {dimension_numbers = #tpu.dot_dimension_numbers<[1], [0], [0], [1], [0, 0, 1, 1], [], []>} : vector<32x512xbf16>, vector<512x128xbf16>, vector<32x128xf32> -> vector<32x128xf32>
    %5 = arith.truncf %4 : vector<32x128xf32> to vector<32x128xbf16>
    %c0_5 = arith.constant 0 : index
    %c0_6 = arith.constant 0 : index
    %c0_7 = arith.constant 0 : index
    %6 = vector.load %arg4[%c0_5, %c0_6, %c0_7] : memref<1x32x128xbf16, #tpu.memory_space<vmem>>, vector<1x32x128xbf16>
    %7 = vector.shape_cast %6 : vector<1x32x128xbf16> to vector<32x128xbf16>
    %8 = vector.shape_cast %5 : vector<32x128xbf16> to vector<1x32x128xbf16>
    tpu.vector_store %arg4[%c0_5, %c0_6, %c0_7], %8 {strides = array<i32>} : memref<1x32x128xbf16, #tpu.memory_space<vmem>>, vector<1x32x128xbf16>,
    %cst_8 = arith.constant dense<0.000000e+00> : vector<128xf32>
    %9 = vector.multi_reduction <add>, %4, %cst_8 [0] : vector<32x128xf32> to vector<128xf32>
    %10 = vector.shape_cast %9 : vector<128xf32> to vector<1x128xf32>
    %11 = arith.mulf %4, %4 : vector<32x128xf32>
    %cst_9 = arith.constant dense<0.000000e+00> : vector<128xf32>
    %12 = vector.multi_reduction <add>, %11, %cst_9 [0] : vector<32x128xf32> to vector<128xf32>
    %13 = vector.shape_cast %12 : vector<128xf32> to vector<1x128xf32>
    %14 = tpu.concatenate %10, %13 in 0 : vector<1x128xf32>, vector<1x128xf32> -> vector<2x128xf32>
    %c0_10 = arith.constant 0 : index
    %c0_11 = arith.constant 0 : index
    %c0_12 = arith.constant 0 : index
    %c0_13 = arith.constant 0 : index
    %15 = vector.load %arg5[%c0_10, %c0_11, %c0_12, %c0_13] : memref<1x1x2x128xf32, #tpu.memory_space<vmem>>, vector<1x1x2x128xf32>
    %16 = vector.shape_cast %15 : vector<1x1x2x128xf32> to vector<2x128xf32>
    %17 = vector.shape_cast %14 : vector<2x128xf32> to vector<1x1x2x128xf32>
    tpu.vector_store %arg5[%c0_10, %c0_11, %c0_12, %c0_13], %17 {strides = array<i32>} : memref<1x1x2x128xf32, #tpu.memory_space<vmem>>, vector<1x1x2x128xf32>,
    return
  }
  func.func @transform_0(%arg0: i32, %arg1: i32) -> (i32, i32, i32) {
    %c0_i32 = arith.constant 0 : i32
    %c0_i32_0 = arith.constant 0 : i32
    return %arg0, %arg1, %c0_i32 : i32, i32, i32
  }
  func.func @transform_1(%arg0: i32, %arg1: i32) -> (i32, i32, i32) {
    %c0_i32 = arith.constant 0 : i32
    %c0_i32_0 = arith.constant 0 : i32
    %c0_i32_1 = arith.constant 0 : i32
    return %arg0, %c0_i32, %c0_i32_0 : i32, i32, i32
  }
  func.func @transform_2(%arg0: i32, %arg1: i32) -> (i32, i32, i32) {
    %c0_i32 = arith.constant 0 : i32
    %c0_i32_0 = arith.constant 0 : i32
    return %arg0, %arg1, %c0_i32 : i32, i32, i32
  }
  func.func @transform_3(%arg0: i32, %arg1: i32) -> (i32, i32, i32, i32) {
    %c0_i32 = arith.constant 0 : i32
    %c0_i32_0 = arith.constant 0 : i32
    %c0_i32_1 = arith.constant 0 : i32
    return %arg0, %arg1, %c0_i32, %c0_i32_0 : i32, i32, i32, i32
  }
}

module attributes {stable_mosaic.version = 11 : i64} {
  func.func @_gemm_stats_kernel(%arg0: i32, %arg1: i32, %arg2: memref<1x128x256xbf16, #tpu.memory_space<vmem>>, %arg3: memref<1x256x128xbf16, #tpu.memory_space<vmem>>, %arg4: memref<1x128x128xbf16, #tpu.memory_space<vmem>>, %arg5: memref<1x1x2x128xf32, #tpu.memory_space<vmem>>) attributes {dimension_semantics = [#tpu.dimension_semantics<parallel>, #tpu.dimension_semantics<parallel>], iteration_bounds = array<i64: 4, 1>, scalar_prefetch = 0 : i64, scratch_operands = 0 : i64, tpu.core_type = #tpu.core_type<tc>, window_params = [{transform_indices = @transform_0, window_bounds = array<i64: 1, 128, 256>}, {transform_indices = @transform_1, window_bounds = array<i64: 1, 256, 128>}, {transform_indices = @transform_2, window_bounds = array<i64: 1, 128, 128>}, {transform_indices = @transform_3, window_bounds = array<i64: 1, 1, 2, 128>}]} {
    %c0 = arith.constant 0 : index
    %c0_0 = arith.constant 0 : index
    %c0_1 = arith.constant 0 : index
    %0 = vector.load %arg2[%c0, %c0_0, %c0_1] : memref<1x128x256xbf16, #tpu.memory_space<vmem>>, vector<1x128x256xbf16>
    %1 = vector.shape_cast %0 : vector<1x128x256xbf16> to vector<128x256xbf16>
    %c0_2 = arith.constant 0 : index
    %c0_3 = arith.constant 0 : index
    %c0_4 = arith.constant 0 : index
    %2 = vector.load %arg3[%c0_2, %c0_3, %c0_4] : memref<1x256x128xbf16, #tpu.memory_space<vmem>>, vector<1x256x128xbf16>
    %3 = vector.shape_cast %2 : vector<1x256x128xbf16> to vector<256x128xbf16>
    %cst = arith.constant dense<0.000000e+00> : vector<128x128xf32>
    %4 = tpu.matmul %1, %3, %cst {dimension_numbers = #tpu.dot_dimension_numbers<[1], [0], [0], [1], [0, 0, 1, 1], [], []>} : vector<128x256xbf16>, vector<256x128xbf16>, vector<128x128xf32> -> vector<128x128xf32>
    %5 = arith.truncf %4 : vector<128x128xf32> to vector<128x128xbf16>
    %c0_5 = arith.constant 0 : index
    %c0_6 = arith.constant 0 : index
    %c0_7 = arith.constant 0 : index
    %6 = vector.load %arg4[%c0_5, %c0_6, %c0_7] : memref<1x128x128xbf16, #tpu.memory_space<vmem>>, vector<1x128x128xbf16>
    %7 = vector.shape_cast %6 : vector<1x128x128xbf16> to vector<128x128xbf16>
    %8 = vector.shape_cast %5 : vector<128x128xbf16> to vector<1x128x128xbf16>
    tpu.vector_store %arg4[%c0_5, %c0_6, %c0_7], %8 {strides = array<i32>} : memref<1x128x128xbf16, #tpu.memory_space<vmem>>, vector<1x128x128xbf16>,
    %cst_8 = arith.constant dense<0.000000e+00> : vector<128xf32>
    %9 = vector.multi_reduction <add>, %4, %cst_8 [0] : vector<128x128xf32> to vector<128xf32>
    %10 = vector.shape_cast %9 : vector<128xf32> to vector<1x128xf32>
    %11 = arith.mulf %4, %4 : vector<128x128xf32>
    %cst_9 = arith.constant dense<0.000000e+00> : vector<128xf32>
    %12 = vector.multi_reduction <add>, %11, %cst_9 [0] : vector<128x128xf32> to vector<128xf32>
    %13 = vector.shape_cast %12 : vector<128xf32> to vector<1x128xf32>
    %14 = tpu.concatenate %10, %13 in 0 : vector<1x128xf32>, vector<1x128xf32> -> vector<2x128xf32>
    %c0_10 = arith.constant 0 : index
    %c0_11 = arith.constant 0 : index
    %c0_12 = arith.constant 0 : index
    %c0_13 = arith.constant 0 : index
    %15 = vector.load %arg5[%c0_10, %c0_11, %c0_12, %c0_13] : memref<1x1x2x128xf32, #tpu.memory_space<vmem>>, vector<1x1x2x128xf32>
    %16 = vector.shape_cast %15 : vector<1x1x2x128xf32> to vector<2x128xf32>
    %17 = vector.shape_cast %14 : vector<2x128xf32> to vector<1x1x2x128xf32>
    tpu.vector_store %arg5[%c0_10, %c0_11, %c0_12, %c0_13], %17 {strides = array<i32>} : memref<1x1x2x128xf32, #tpu.memory_space<vmem>>, vector<1x1x2x128xf32>,
    return
  }
  func.func @transform_0(%arg0: i32, %arg1: i32) -> (i32, i32, i32) {
    %c0_i32 = arith.constant 0 : i32
    %c0_i32_0 = arith.constant 0 : i32
    return %arg0, %arg1, %c0_i32 : i32, i32, i32
  }
  func.func @transform_1(%arg0: i32, %arg1: i32) -> (i32, i32, i32) {
    %c0_i32 = arith.constant 0 : i32
    %c0_i32_0 = arith.constant 0 : i32
    %c0_i32_1 = arith.constant 0 : i32
    return %arg0, %c0_i32, %c0_i32_0 : i32, i32, i32
  }
  func.func @transform_2(%arg0: i32, %arg1: i32) -> (i32, i32, i32) {
    %c0_i32 = arith.constant 0 : i32
    %c0_i32_0 = arith.constant 0 : i32
    return %arg0, %arg1, %c0_i32 : i32, i32, i32
  }
  func.func @transform_3(%arg0: i32, %arg1: i32) -> (i32, i32, i32, i32) {
    %c0_i32 = arith.constant 0 : i32
    %c0_i32_0 = arith.constant 0 : i32
    %c0_i32_1 = arith.constant 0 : i32
    return %arg0, %arg1, %c0_i32, %c0_i32_0 : i32, i32, i32, i32
  }
}

module attributes {stable_mosaic.version = 11 : i64} {
  func.func @_gemm_stats_kernel(%arg0: i32, %arg1: i32, %arg2: memref<1x512x128xbf16, #tpu.memory_space<vmem>>, %arg3: memref<1x128x128xbf16, #tpu.memory_space<vmem>>, %arg4: memref<1x512x128xbf16, #tpu.memory_space<vmem>>, %arg5: memref<1x1x2x128xf32, #tpu.memory_space<vmem>>) attributes {dimension_semantics = [#tpu.dimension_semantics<parallel>, #tpu.dimension_semantics<parallel>], iteration_bounds = array<i64: 4, 1>, scalar_prefetch = 0 : i64, scratch_operands = 0 : i64, tpu.core_type = #tpu.core_type<tc>, window_params = [{transform_indices = @transform_0, window_bounds = array<i64: 1, 512, 128>}, {transform_indices = @transform_1, window_bounds = array<i64: 1, 128, 128>}, {transform_indices = @transform_2, window_bounds = array<i64: 1, 512, 128>}, {transform_indices = @transform_3, window_bounds = array<i64: 1, 1, 2, 128>}]} {
    %c0 = arith.constant 0 : index
    %c0_0 = arith.constant 0 : index
    %c0_1 = arith.constant 0 : index
    %0 = vector.load %arg2[%c0, %c0_0, %c0_1] : memref<1x512x128xbf16, #tpu.memory_space<vmem>>, vector<1x512x128xbf16>
    %1 = vector.shape_cast %0 : vector<1x512x128xbf16> to vector<512x128xbf16>
    %c0_2 = arith.constant 0 : index
    %c0_3 = arith.constant 0 : index
    %c0_4 = arith.constant 0 : index
    %2 = vector.load %arg3[%c0_2, %c0_3, %c0_4] : memref<1x128x128xbf16, #tpu.memory_space<vmem>>, vector<1x128x128xbf16>
    %3 = vector.shape_cast %2 : vector<1x128x128xbf16> to vector<128x128xbf16>
    %cst = arith.constant dense<0.000000e+00> : vector<512x128xf32>
    %4 = tpu.matmul %1, %3, %cst {dimension_numbers = #tpu.dot_dimension_numbers<[1], [0], [0], [1], [0, 0, 1, 1], [], []>} : vector<512x128xbf16>, vector<128x128xbf16>, vector<512x128xf32> -> vector<512x128xf32>
    %5 = arith.truncf %4 : vector<512x128xf32> to vector<512x128xbf16>
    %c0_5 = arith.constant 0 : index
    %c0_6 = arith.constant 0 : index
    %c0_7 = arith.constant 0 : index
    %6 = vector.load %arg4[%c0_5, %c0_6, %c0_7] : memref<1x512x128xbf16, #tpu.memory_space<vmem>>, vector<1x512x128xbf16>
    %7 = vector.shape_cast %6 : vector<1x512x128xbf16> to vector<512x128xbf16>
    %8 = vector.shape_cast %5 : vector<512x128xbf16> to vector<1x512x128xbf16>
    tpu.vector_store %arg4[%c0_5, %c0_6, %c0_7], %8 {strides = array<i32>} : memref<1x512x128xbf16, #tpu.memory_space<vmem>>, vector<1x512x128xbf16>,
    %cst_8 = arith.constant dense<0.000000e+00> : vector<128xf32>
    %9 = vector.multi_reduction <add>, %4, %cst_8 [0] : vector<512x128xf32> to vector<128xf32>
    %10 = vector.shape_cast %9 : vector<128xf32> to vector<1x128xf32>
    %11 = arith.mulf %4, %4 : vector<512x128xf32>
    %cst_9 = arith.constant dense<0.000000e+00> : vector<128xf32>
    %12 = vector.multi_reduction <add>, %11, %cst_9 [0] : vector<512x128xf32> to vector<128xf32>
    %13 = vector.shape_cast %12 : vector<128xf32> to vector<1x128xf32>
    %14 = tpu.concatenate %10, %13 in 0 : vector<1x128xf32>, vector<1x128xf32> -> vector<2x128xf32>
    %c0_10 = arith.constant 0 : index
    %c0_11 = arith.constant 0 : index
    %c0_12 = arith.constant 0 : index
    %c0_13 = arith.constant 0 : index
    %15 = vector.load %arg5[%c0_10, %c0_11, %c0_12, %c0_13] : memref<1x1x2x128xf32, #tpu.memory_space<vmem>>, vector<1x1x2x128xf32>
    %16 = vector.shape_cast %15 : vector<1x1x2x128xf32> to vector<2x128xf32>
    %17 = vector.shape_cast %14 : vector<2x128xf32> to vector<1x1x2x128xf32>
    tpu.vector_store %arg5[%c0_10, %c0_11, %c0_12, %c0_13], %17 {strides = array<i32>} : memref<1x1x2x128xf32, #tpu.memory_space<vmem>>, vector<1x1x2x128xf32>,
    return
  }
  func.func @transform_0(%arg0: i32, %arg1: i32) -> (i32, i32, i32) {
    %c0_i32 = arith.constant 0 : i32
    %c0_i32_0 = arith.constant 0 : i32
    return %arg0, %arg1, %c0_i32 : i32, i32, i32
  }
  func.func @transform_1(%arg0: i32, %arg1: i32) -> (i32, i32, i32) {
    %c0_i32 = arith.constant 0 : i32
    %c0_i32_0 = arith.constant 0 : i32
    %c0_i32_1 = arith.constant 0 : i32
    return %arg0, %c0_i32, %c0_i32_0 : i32, i32, i32
  }
  func.func @transform_2(%arg0: i32, %arg1: i32) -> (i32, i32, i32) {
    %c0_i32 = arith.constant 0 : i32
    %c0_i32_0 = arith.constant 0 : i32
    return %arg0, %arg1, %c0_i32 : i32, i32, i32
  }
  func.func @transform_3(%arg0: i32, %arg1: i32) -> (i32, i32, i32, i32) {
    %c0_i32 = arith.constant 0 : i32
    %c0_i32_0 = arith.constant 0 : i32
    %c0_i32_1 = arith.constant 0 : i32
    return %arg0, %arg1, %c0_i32, %c0_i32_0 : i32, i32, i32, i32
  }
}

module attributes {stable_mosaic.version = 11 : i64} {
  func.func @_gemm_kernel(%arg0: i32, %arg1: i32, %arg2: memref<1x2048x64xbf16, #tpu.memory_space<vmem>>, %arg3: memref<1x64x128xbf16, #tpu.memory_space<vmem>>, %arg4: memref<1x128xf32, #tpu.memory_space<vmem>>, %arg5: memref<1x2048x128xf32, #tpu.memory_space<vmem>>) attributes {dimension_semantics = [#tpu.dimension_semantics<parallel>, #tpu.dimension_semantics<parallel>], iteration_bounds = array<i64: 4, 1>, scalar_prefetch = 0 : i64, scratch_operands = 0 : i64, tpu.core_type = #tpu.core_type<tc>, window_params = [{transform_indices = @transform_0, window_bounds = array<i64: 1, 2048, 64>}, {transform_indices = @transform_1, window_bounds = array<i64: 1, 64, 128>}, {pipeline_mode = #tpu.pipeline_mode<synchronous>, transform_indices = @transform_2, window_bounds = array<i64: 1, 128>}, {transform_indices = @transform_3, window_bounds = array<i64: 1, 2048, 128>}]} {
    %c0 = arith.constant 0 : index
    %c0_0 = arith.constant 0 : index
    %c0_1 = arith.constant 0 : index
    %0 = vector.load %arg2[%c0, %c0_0, %c0_1] : memref<1x2048x64xbf16, #tpu.memory_space<vmem>>, vector<1x2048x64xbf16>
    %1 = vector.shape_cast %0 : vector<1x2048x64xbf16> to vector<2048x64xbf16>
    %c0_2 = arith.constant 0 : index
    %c0_3 = arith.constant 0 : index
    %c0_4 = arith.constant 0 : index
    %2 = vector.load %arg3[%c0_2, %c0_3, %c0_4] : memref<1x64x128xbf16, #tpu.memory_space<vmem>>, vector<1x64x128xbf16>
    %3 = vector.shape_cast %2 : vector<1x64x128xbf16> to vector<64x128xbf16>
    %cst = arith.constant dense<0.000000e+00> : vector<2048x128xf32>
    %4 = tpu.matmul %1, %3, %cst {dimension_numbers = #tpu.dot_dimension_numbers<[1], [0], [0], [1], [0, 0, 1, 1], [], []>} : vector<2048x64xbf16>, vector<64x128xbf16>, vector<2048x128xf32> -> vector<2048x128xf32>
    %c0_5 = arith.constant 0 : index
    %c0_6 = arith.constant 0 : index
    %5 = vector.load %arg4[%c0_5, %c0_6] : memref<1x128xf32, #tpu.memory_space<vmem>>, vector<1x128xf32>
    %6 = vector.broadcast %5 : vector<1x128xf32> to vector<2048x128xf32>
    %7 = arith.addf %4, %6 : vector<2048x128xf32>
    %8 = math.tanh %7 : vector<2048x128xf32>
    %c0_7 = arith.constant 0 : index
    %c0_8 = arith.constant 0 : index
    %c0_9 = arith.constant 0 : index
    %9 = vector.load %arg5[%c0_7, %c0_8, %c0_9] : memref<1x2048x128xf32, #tpu.memory_space<vmem>>, vector<1x2048x128xf32>
    %10 = vector.shape_cast %9 : vector<1x2048x128xf32> to vector<2048x128xf32>
    %11 = vector.shape_cast %8 : vector<2048x128xf32> to vector<1x2048x128xf32>
    tpu.vector_store %arg5[%c0_7, %c0_8, %c0_9], %11 {strides = array<i32>} : memref<1x2048x128xf32, #tpu.memory_space<vmem>>, vector<1x2048x128xf32>,
    return
  }
  func.func @transform_0(%arg0: i32, %arg1: i32) -> (i32, i32, i32) {
    %c0_i32 = arith.constant 0 : i32
    %c0_i32_0 = arith.constant 0 : i32
    return %arg0, %arg1, %c0_i32 : i32, i32, i32
  }
  func.func @transform_1(%arg0: i32, %arg1: i32) -> (i32, i32, i32) {
    %c0_i32 = arith.constant 0 : i32
    %c0_i32_0 = arith.constant 0 : i32
    %c0_i32_1 = arith.constant 0 : i32
    return %arg0, %c0_i32, %c0_i32_0 : i32, i32, i32
  }
  func.func @transform_2(%arg0: i32, %arg1: i32) -> (i32, i32) {
    %c0_i32 = arith.constant 0 : i32
    %c0_i32_0 = arith.constant 0 : i32
    %c0_i32_1 = arith.constant 0 : i32
    return %c0_i32, %c0_i32_0 : i32, i32
  }
  func.func @transform_3(%arg0: i32, %arg1: i32) -> (i32, i32, i32) {
    %c0_i32 = arith.constant 0 : i32
    %c0_i32_0 = arith.constant 0 : i32
    return %arg0, %arg1, %c0_i32 : i32, i32, i32
  }
}

</mosaic_0001>

<bundles_post_ra>
// kernel: _lambda_.10
= control target key start
LH: loop header
LB: loop body
LE: loop exit
PB: predicated region body
PF: predicated region fallthrough
CT: control target
= control target key end

     0   :  { %s3330_s12 = smov 0   ;;  %s3332_s13 = smov 0   ;;  %s3711_s0 = inlined_call_operand.vmem [shape: bf16[1,2048,64], index: 0, kind: input, shape index: {}]   ;;  %s3712_s1 = inlined_call_operand.vmem [shape: bf16[1,64,128], index: 1, kind: input, shape index: {}]   ;;  %s3713_s2 = inlined_call_operand.vmem [shape: f32[1,128], index: 2, kind: input, shape index: {}]   ;;  %s3714_s3 = inlined_call_operand.vmem [shape: bf16[1,2048,128], index: 3, kind: output, shape index: {}]  }
   0x1   :  { %s3334_s14 = smov 0  }
   0x2 LB: > { %s22_s15 = sadd.s32 1, %s3304_s13  ;;  %p2203_p0 = scmp.ge.s32.totalorder %s3308_s14, 1  ;;  %s3308_s14 = sphi %s3334_s14, %s13_s14   ;;  %s3304_s13 = sphi %s3332_s13, %s3716_s13   ;;  %s3300_s12 = sphi %s3330_s12, %s3715_s12  }
   0x3   : > { %p23_p1 = scmp.ge.s32.totalorder %s22_s15, 2  ;;  %p168_p2 = scmp.lt.s32.totalorder %s3308_s14, 3 }
   0x5   : > { %s3718_s15 = smov (%p23_p1, %s22_s15), 0  ;;  %p169_p3 = pnand %p2203_p0, %p168_p2 }
   0x6   : > { %s2204_s18 = sshll.u32 (!%p169_p3), %s3300_s12, 7 }
   0x7   : > { %172 = sbr.rel (%p169_p3) target bundleno = 353 (0x161), region = 32  ;;  %p208_p4 = scmp.lt.s32.totalorder (!%p169_p3), %s2204_s18, 255 }
   0xc   : > { %v3218_v0 = vld [vmem:[%s3712_s1 + $0x18] sm:$0xff]   ;;  %v3219_v1 = vld [vmem:[%s3712_s1 + $0x10] sm:$0xff]   ;;  %s3720_s18 = smov (!%p208_p4, %s2204_s18), 255  ;;  %v3220_v2 = vld [vmem:[%s3712_s1 + $0x8] sm:$0xff]   ;;  %vm718_vm0 = vcmask 523264  }
   0xd   : > { %3050 = vmatprep.subr.bf16.mxu0 %v3218_v0  ;;  %3186 = vmatprep.subr.bf16.mxu1 %v3218_v0  ;;  %s2205_s23 = sshll.u32 %s3720_s18, 2  ;;  %v3221_v3 = vld [vmem:[%s3712_s1] sm:$0xff]  }
   0xe   : > { %3051 = vmatpush3.bf16.msra.mxu0 %v3218_v0  ;;  %3190 = vmatpush3.bf16.msra.mxu1 %v3218_v0  ;;  %s3368_s28 = scalar_lea.vmem %s3711_s0, %s2205_s23  ;;  %s3514_s6 = scalar_lea.vmem %s3714_s3, %s2205_s23 }
   0xf   : > { %3052 = vmatprep.subr.bf16.mxu0 %v3219_v1  ;;  %3187 = vmatprep.subr.bf16.mxu1 %v3219_v1  ;;  %v3222_v4 = vld [vmem:[%s3368_s28] sm:$0xff]   ;;  %v3224_v6 = vld [vmem:[%s3368_s28 + $0x8] sm:$0xff]   ;;  %v3226_v8 = vld [vmem:[%s3368_s28 + $0x10] sm:$0xff]  }
  0x10   : > { %v3223_v5 = vld [vmem:[%s3368_s28 + $0x100] sm:$0xff]   ;;  %3058 = vmatprep.mubr.msk.bf16.mxu0 %vm718_vm0, %v3222_v4  ;;  %v3225_v7 = vld [vmem:[%s3368_s28 + $0x108] sm:$0xff]   ;;  %v3227_v9 = vld [vmem:[%s3368_s28 + $0x110] sm:$0xff]  }
  0x11   : > { %3122 = vmatprep.mubr.msk.bf16.mxu1 %vm718_vm0, %v3223_v5  ;;  %v3228_v10 = vld [vmem:[%s3368_s28 + $0x18] sm:$0xff]   ;;  %v3230_v12 = vld [vmem:[%s3368_s28 + $0x20] sm:$0xff]   ;;  %v3232_v14 = vld [vmem:[%s3368_s28 + $0x28] sm:$0xff]  }
  0x12   : > { %3053 = vmatpush3.bf16.msra.mxu0 %v3219_v1  ;;  %3191 = vmatpush3.bf16.msra.mxu1 %v3219_v1  ;;  %v3229_v11 = vld [vmem:[%s3368_s28 + $0x118] sm:$0xff]   ;;  %v3231_v13 = vld [vmem:[%s3368_s28 + $0x120] sm:$0xff]   ;;  %v3233_v15 = vld [vmem:[%s3368_s28 + $0x128] sm:$0xff]  }
  0x13   : > { %3054 = vmatprep.subr.bf16.mxu0 %v3220_v2  ;;  %3188 = vmatprep.subr.bf16.mxu1 %v3220_v2  ;;  %v3234_v16 = vld [vmem:[%s3368_s28 + $0x30] sm:$0xff]   ;;  %v3236_v18 = vld [vmem:[%s3368_s28 + $0x38] sm:$0xff]   ;;  %v3238_v20 = vld [vmem:[%s3368_s28 + $0x40] sm:$0xff]  }
  0x14   : > { %v3235_v17 = vld [vmem:[%s3368_s28 + $0x130] sm:$0xff]   ;;  %v3237_v19 = vld [vmem:[%s3368_s28 + $0x138] sm:$0xff]   ;;  %v3239_v21 = vld [vmem:[%s3368_s28 + $0x140] sm:$0xff]  }
  0x15   : > { %v3240_v22 = vld [vmem:[%s3368_s28 + $0x48] sm:$0xff]   ;;  %v3242_v24 = vld [vmem:[%s3368_s28 + $0x50] sm:$0xff]   ;;  %v3244_v26 = vld [vmem:[%s3368_s28 + $0x58] sm:$0xff]  }
  0x16   : > { %3055 = vmatpush3.bf16.msra.mxu0 %v3220_v2  ;;  %3192 = vmatpush3.bf16.msra.mxu1 %v3220_v2  ;;  %v3241_v23 = vld [vmem:[%s3368_s28 + $0x148] sm:$0xff]   ;;  %v3243_v25 = vld [vmem:[%s3368_s28 + $0x150] sm:$0xff]   ;;  %v3245_v27 = vld [vmem:[%s3368_s28 + $0x158] sm:$0xff]  }
  0x17   : > { %3056 = vmatprep.subr.bf16.mxu0 %v3221_v3  ;;  %3189 = vmatprep.subr.bf16.mxu1 %v3221_v3  ;;  %v3246_v28 = vld [vmem:[%s3368_s28 + $0x60] sm:$0xff]   ;;  %v3248_v30 = vld [vmem:[%s3368_s28 + $0x68] sm:$0xff]   ;;  %v3250_v32 = vld [vmem:[%s3368_s28 + $0x70] sm:$0xff]  }
  0x18   : > { %v3247_v29 = vld [vmem:[%s3368_s28 + $0x160] sm:$0xff]   ;;  %v3249_v31 = vld [vmem:[%s3368_s28 + $0x168] sm:$0xff]   ;;  %v3251_v33 = vld [vmem:[%s3368_s28 + $0x170] sm:$0xff]  }
  0x19   : > { %v3252_v34 = vld [vmem:[%s3368_s28 + $0x78] sm:$0xff]   ;;  %v3254_v36 = vld [vmem:[%s3368_s28 + $0x80] sm:$0xff]   ;;  %v3256_v38 = vld [vmem:[%s3368_s28 + $0x88] sm:$0xff]  }
  0x1a   : > { %3057 = vmatpush3.bf16.msra.mxu0 %v3221_v3  ;;  %3193 = vmatpush3.bf16.msra.mxu1 %v3221_v3  ;;  %v3253_v35 = vld [vmem:[%s3368_s28 + $0x178] sm:$0xff]   ;;  %v3255_v37 = vld [vmem:[%s3368_s28 + $0x180] sm:$0xff]   ;;  %v3257_v39 = vld [vmem:[%s3368_s28 + $0x188] sm:$0xff]  }
  0x1b   : > { %v3258_v40 = vld [vmem:[%s3368_s28 + $0x90] sm:$0xff]   ;;  %v3260_v42 = vld [vmem:[%s3368_s28 + $0x98] sm:$0xff]   ;;  %v3262_v44 = vld [vmem:[%s3368_s28 + $0xa0] sm:$0xff]  }
  0x1c   : > { %v3259_v41 = vld [vmem:[%s3368_s28 + $0x190] sm:$0xff]   ;;  %v3261_v43 = vld [vmem:[%s3368_s28 + $0x198] sm:$0xff]   ;;  %v3263_v45 = vld [vmem:[%s3368_s28 + $0x1a0] sm:$0xff]  }
  0x1d   : > { %3059 = vmatmul.mubr.msk.bf16.vlgmr.msra.gmra.mxu0 %vm718_vm0, %v3224_v6  ;;  %3123 = vmatmul.mubr.msk.bf16.vlgmr.msra.gmra.mxu1 %vm718_vm0, %v3225_v7  ;;  %v3264_v46 = vld [vmem:[%s3368_s28 + $0xa8] sm:$0xff]   ;;  %v3266_v48 = vld [vmem:[%s3368_s28 + $0xb0] sm:$0xff]   ;;  %v3268_v50 = vld [vmem:[%s3368_s28 + $0xb8] sm:$0xff]  }
  0x1e   : > { %3062 = vmatprep.mubr.msk.bf16.mxu0 %vm718_vm0, %v3226_v8  ;;  %3126 = vmatprep.mubr.msk.bf16.mxu1 %vm718_vm0, %v3227_v9  ;;  %v3265_v47 = vld [vmem:[%s3368_s28 + $0x1a8] sm:$0xff]   ;;  %v3267_v49 = vld [vmem:[%s3368_s28 + $0x1b0] sm:$0xff]   ;;  %v3269_v51 = vld [vmem:[%s3368_s28 + $0x1b8] sm:$0xff]  }
  0x1f   : > { %v3270_v52 = vld [vmem:[%s3368_s28 + $0xc0] sm:$0xff]   ;;  %v3272_v54 = vld [vmem:[%s3368_s28 + $0xc8] sm:$0xff]   ;;  %v3274_v56 = vld [vmem:[%s3368_s28 + $0xd0] sm:$0xff]  }
  0x20   : > { %v3271_v53 = vld [vmem:[%s3368_s28 + $0x1c0] sm:$0xff]   ;;  %v3273_v55 = vld [vmem:[%s3368_s28 + $0x1c8] sm:$0xff]   ;;  %v3275_v57 = vld [vmem:[%s3368_s28 + $0x1d0] sm:$0xff]  }
  0x21   : > { %v3276_v58 = vld [vmem:[%s3368_s28 + $0xd8] sm:$0xff]   ;;  %v3278_v60 = vld [vmem:[%s3368_s28 + $0xe0] sm:$0xff]   ;;  %v3280_v62 = vld [vmem:[%s3368_s28 + $0xe8] sm:$0xff]  }
  0x22   : > { %v3277_v59 = vld [vmem:[%s3368_s28 + $0x1d8] sm:$0xff]   ;;  %v3279_v61 = vld [vmem:[%s3368_s28 + $0x1e0] sm:$0xff]   ;;  %v3281_v63 = vld [vmem:[%s3368_s28 + $0x1e8] sm:$0xff]  }
  0x23   : > { %v3282_v0 = vld [vmem:[%s3368_s28 + $0xf0] sm:$0xff]   ;;  %v3284_v2 = vld [vmem:[%s3368_s28 + $0xf8] sm:$0xff]   ;;  %v3501_v6 = vld [vmem:[%s3713_s2] ss:$0 sm:$0xff] }
  0x24   : > { %v3283_v1 = vld [vmem:[%s3368_s28 + $0x1f0] sm:$0xff]   ;;  %v3285_v3 = vld [vmem:[%s3368_s28 + $0x1f8] sm:$0xff]  }
  0x25   : > { %3063 = vmatmul.mubr.msk.bf16.gmra.mxu0 %vm718_vm0, %v3228_v10  ;;  %3127 = vmatmul.mubr.msk.bf16.gmra.mxu1 %vm718_vm0, %v3229_v11 }
  0x26   : > { %3066 = vmatprep.mubr.msk.bf16.mxu0 %vm718_vm0, %v3230_v12  ;;  %3130 = vmatprep.mubr.msk.bf16.mxu1 %vm718_vm0, %v3231_v13 }
  0x2d   : > { %3067 = vmatmul.mubr.msk.bf16.gmra.mxu0 %vm718_vm0, %v3232_v14  ;;  %3131 = vmatmul.mubr.msk.bf16.gmra.mxu1 %vm718_vm0, %v3233_v15 }
  0x2e   : > { %3070 = vmatprep.mubr.msk.bf16.mxu0 %vm718_vm0, %v3234_v16  ;;  %3134 = vmatprep.mubr.msk.bf16.mxu1 %vm718_vm0, %v3235_v17 }
  0x35   : > { %3071 = vmatmul.mubr.msk.bf16.gmra.mxu0 %vm718_vm0, %v3236_v18  ;;  %3135 = vmatmul.mubr.msk.bf16.gmra.mxu1 %vm718_vm0, %v3237_v19 }
  0x36   : > { %3074 = vmatprep.mubr.msk.bf16.mxu0 %vm718_vm0, %v3238_v20  ;;  %3138 = vmatprep.mubr.msk.bf16.mxu1 %vm718_vm0, %v3239_v21 }
  0x3d   : > { %3075 = vmatmul.mubr.msk.bf16.gmra.mxu0 %vm718_vm0, %v3240_v22  ;;  %3139 = vmatmul.mubr.msk.bf16.gmra.mxu1 %vm718_vm0, %v3241_v23 }
  0x3e   : > { %3078 = vmatprep.mubr.msk.bf16.mxu0 %vm718_vm0, %v3242_v24  ;;  %3142 = vmatprep.mubr.msk.bf16.mxu1 %vm718_vm0, %v3243_v25 }
  0x45   : > { %3079 = vmatmul.mubr.msk.bf16.gmra.mxu0 %vm718_vm0, %v3244_v26  ;;  %3143 = vmatmul.mubr.msk.bf16.gmra.mxu1 %vm718_vm0, %v3245_v27 }
  0x46   : > { %3082 = vmatprep.mubr.msk.bf16.mxu0 %vm718_vm0, %v3246_v28  ;;  %3146 = vmatprep.mubr.msk.bf16.mxu1 %vm718_vm0, %v3247_v29 }
  0x4d   : > { %3083 = vmatmul.mubr.msk.bf16.gmra.mxu0 %vm718_vm0, %v3248_v30  ;;  %3147 = vmatmul.mubr.msk.bf16.gmra.mxu1 %vm718_vm0, %v3249_v31 }
  0x4e   : > { %3086 = vmatprep.mubr.msk.bf16.mxu0 %vm718_vm0, %v3250_v32  ;;  %3150 = vmatprep.mubr.msk.bf16.mxu1 %vm718_vm0, %v3251_v33 }
  0x55   : > { %3087 = vmatmul.mubr.msk.bf16.gmra.mxu0 %vm718_vm0, %v3252_v34  ;;  %3151 = vmatmul.mubr.msk.bf16.gmra.mxu1 %vm718_vm0, %v3253_v35 }
  0x56   : > { %3090 = vmatprep.mubr.msk.bf16.mxu0 %vm718_vm0, %v3254_v36  ;;  %3154 = vmatprep.mubr.msk.bf16.mxu1 %vm718_vm0, %v3255_v37 }
  0x5d   : > { %3091 = vmatmul.mubr.msk.bf16.gmra.mxu0 %vm718_vm0, %v3256_v38  ;;  %3155 = vmatmul.mubr.msk.bf16.gmra.mxu1 %vm718_vm0, %v3257_v39 }
  0x5e   : > { %3094 = vmatprep.mubr.msk.bf16.mxu0 %vm718_vm0, %v3258_v40  ;;  %3158 = vmatprep.mubr.msk.bf16.mxu1 %vm718_vm0, %v3259_v41 }
  0x65   : > { %3095 = vmatmul.mubr.msk.bf16.gmra.mxu0 %vm718_vm0, %v3260_v42  ;;  %3159 = vmatmul.mubr.msk.bf16.gmra.mxu1 %vm718_vm0, %v3261_v43 }
  0x66   : > { %3098 = vmatprep.mubr.msk.bf16.mxu0 %vm718_vm0, %v3262_v44  ;;  %3162 = vmatprep.mubr.msk.bf16.mxu1 %vm718_vm0, %v3263_v45 }
  0x6d   : > { %3099 = vmatmul.mubr.msk.bf16.gmra.mxu0 %vm718_vm0, %v3264_v46  ;;  %3163 = vmatmul.mubr.msk.bf16.gmra.mxu1 %vm718_vm0, %v3265_v47 }
  0x6e   : > { %3102 = vmatprep.mubr.msk.bf16.mxu0 %vm718_vm0, %v3266_v48  ;;  %3166 = vmatprep.mubr.msk.bf16.mxu1 %vm718_vm0, %v3267_v49 }
  0x75   : > { %3103 = vmatmul.mubr.msk.bf16.gmra.mxu0 %vm718_vm0, %v3268_v50  ;;  %3167 = vmatmul.mubr.msk.bf16.gmra.mxu1 %vm718_vm0, %v3269_v51 }
  0x76   : > { %3106 = vmatprep.mubr.msk.bf16.mxu0 %vm718_vm0, %v3270_v52  ;;  %3170 = vmatprep.mubr.msk.bf16.mxu1 %vm718_vm0, %v3271_v53 }
  0x7d   : > { %3107 = vmatmul.mubr.msk.bf16.gmra.mxu0 %vm718_vm0, %v3272_v54  ;;  %3171 = vmatmul.mubr.msk.bf16.gmra.mxu1 %vm718_vm0, %v3273_v55 }
  0x7e   : > { %3110 = vmatprep.mubr.msk.bf16.mxu0 %vm718_vm0, %v3274_v56  ;;  %3174 = vmatprep.mubr.msk.bf16.mxu1 %vm718_vm0, %v3275_v57 }
  0x85   : > { %3111 = vmatmul.mubr.msk.bf16.gmra.mxu0 %vm718_vm0, %v3276_v58  ;;  %3175 = vmatmul.mubr.msk.bf16.gmra.mxu1 %vm718_vm0, %v3277_v59 }
  0x86   : > { %3114 = vmatprep.mubr.msk.bf16.mxu0 %vm718_vm0, %v3278_v60  ;;  %3178 = vmatprep.mubr.msk.bf16.mxu1 %vm718_vm0, %v3279_v61 }
  0x8d   : > { %3115 = vmatmul.mubr.msk.bf16.gmra.mxu0 %vm718_vm0, %v3280_v62  ;;  %3179 = vmatmul.mubr.msk.bf16.gmra.mxu1 %vm718_vm0, %v3281_v63 }
  0x8e   : > { %3118 = vmatprep.mubr.msk.bf16.mxu0 %vm718_vm0, %v3282_v0  ;;  %3182 = vmatprep.mubr.msk.bf16.mxu1 %vm718_vm0, %v3283_v1 }
  0x95   : > { %3119 = vmatmul.mubr.msk.bf16.gmra.mxu0 %vm718_vm0, %v3284_v2  ;;  %3183 = vmatmul.mubr.msk.bf16.gmra.mxu1 %vm718_vm0, %v3285_v3 }
  0xdd   : > { %v3060_v4 = vpop.f32.mrf.mxu0  ;;  %v3124_v5 = vpop.f32.mrf.mxu1 }
  0xde   : > { %v954_v11 = vadd.f32 %v3060_v4, %v3501_v6  ;;  %v1210_v12 = vadd.f32 %v3124_v5, %v3501_v6 }
  0xdf   : > { %v945_v7 = vpop.f32.mrf.mxu0  ;;  %v1201_v8 = vpop.f32.mrf.mxu1 }
  0xe0   : > { %v946_v15 = vadd.f32 %v3501_v6, %v945_v7  ;;  %v1202_v16 = vadd.f32 %v3501_v6, %v1201_v8 }
  0xe1   : > { %v3061_v9 = vpop.f32.mrf.mxu0  ;;  %v3125_v10 = vpop.f32.mrf.mxu1 }
  0xe2   : > { %v957_v13 = vadd.f32 %v3061_v9, %v3501_v6  ;;  %v1213_v14 = vadd.f32 %v3125_v10, %v3501_v6 }
  0xe3   : > { %v948_v17 = vpop.f32.mrf.mxu0  ;;  %v1204_v18 = vpop.f32.mrf.mxu1 }
  0xe4   : > { %v2607_v19 = vpack.c.bf16 %v957_v13, %v954_v11  ;;  %v2767_v20 = vpack.c.bf16 %v1213_v14, %v1210_v12  ;;  %v949_v21 = vadd.f32 %v3501_v6, %v948_v17  ;;  %v1205_v22 = vadd.f32 %v3501_v6, %v1204_v18 }
  0xe5   : > { %v3064_v23 = vpop.f32.mrf.mxu0  ;;  %v3128_v24 = vpop.f32.mrf.mxu1 }
  0xe6   : > { %2919 = vst [vmem:[%s3514_s6 + $0x8] sm:$0xff] %v2607_v19   ;;  %2951 = vst [vmem:[%s3514_s6 + $0x108] sm:$0xff] %v2767_v20   ;;  %v2602_v25 = vpack.c.bf16 %v949_v21, %v946_v15  ;;  %v2762_v26 = vpack.c.bf16 %v1205_v22, %v1202_v16  ;;  %v970_v31 = vadd.f32 %v3064_v23, %v3501_v6 }
  0xe7   : > { %v961_v27 = vpop.f32.mrf.mxu0  ;;  %v1217_v28 = vpop.f32.mrf.mxu1  ;;  %v1226_v32 = vadd.f32 %v3128_v24, %v3501_v6 }
  0xe8   : > { %2603 = vst [vmem:[%s3514_s6] sm:$0xff] %v2602_v25   ;;  %2950 = vst [vmem:[%s3514_s6 + $0x100] sm:$0xff] %v2762_v26   ;;  %v962_v35 = vadd.f32 %v3501_v6, %v961_v27  ;;  %v1218_v36 = vadd.f32 %v3501_v6, %v1217_v28 }
  0xe9   : > { %v3065_v29 = vpop.f32.mrf.mxu0  ;;  %v3129_v30 = vpop.f32.mrf.mxu1 }
  0xea   : > { %v973_v33 = vadd.f32 %v3065_v29, %v3501_v6  ;;  %v1229_v34 = vadd.f32 %v3129_v30, %v3501_v6 }
  0xeb   : > { %v964_v37 = vpop.f32.mrf.mxu0  ;;  %v1220_v38 = vpop.f32.mrf.mxu1 }
  0xec   : > { %v2617_v39 = vpack.c.bf16 %v973_v33, %v970_v31  ;;  %v2777_v40 = vpack.c.bf16 %v1229_v34, %v1226_v32  ;;  %v965_v41 = vadd.f32 %v3501_v6, %v964_v37  ;;  %v1221_v42 = vadd.f32 %v3501_v6, %v1220_v38 }
  0xed   : > { %v3068_v43 = vpop.f32.mrf.mxu0  ;;  %v3132_v44 = vpop.f32.mrf.mxu1 }
  0xee   : > { %2921 = vst [vmem:[%s3514_s6 + $0x18] sm:$0xff] %v2617_v39   ;;  %2953 = vst [vmem:[%s3514_s6 + $0x118] sm:$0xff] %v2777_v40   ;;  %v2612_v45 = vpack.c.bf16 %v965_v41, %v962_v35  ;;  %v2772_v46 = vpack.c.bf16 %v1221_v42, %v1218_v36  ;;  %v986_v51 = vadd.f32 %v3068_v43, %v3501_v6 }
  0xef   : > { %v977_v47 = vpop.f32.mrf.mxu0  ;;  %v1233_v48 = vpop.f32.mrf.mxu1  ;;  %v1242_v52 = vadd.f32 %v3132_v44, %v3501_v6 }
  0xf0   : > { %2920 = vst [vmem:[%s3514_s6 + $0x10] sm:$0xff] %v2612_v45   ;;  %2952 = vst [vmem:[%s3514_s6 + $0x110] sm:$0xff] %v2772_v46   ;;  %v978_v55 = vadd.f32 %v3501_v6, %v977_v47  ;;  %v1234_v56 = vadd.f32 %v3501_v6, %v1233_v48 }
  0xf1   : > { %v3069_v49 = vpop.f32.mrf.mxu0  ;;  %v3133_v50 = vpop.f32.mrf.mxu1 }
  0xf2   : > { %v989_v53 = vadd.f32 %v3069_v49, %v3501_v6  ;;  %v1245_v54 = vadd.f32 %v3133_v50, %v3501_v6 }
  0xf3   : > { %v980_v57 = vpop.f32.mrf.mxu0  ;;  %v1236_v58 = vpop.f32.mrf.mxu1 }
  0xf4   : > { %v2627_v59 = vpack.c.bf16 %v989_v53, %v986_v51  ;;  %v2787_v60 = vpack.c.bf16 %v1245_v54, %v1242_v52  ;;  %v981_v61 = vadd.f32 %v3501_v6, %v980_v57  ;;  %v1237_v62 = vadd.f32 %v3501_v6, %v1236_v58 }
  0xf5   : > { %v3072_v63 = vpop.f32.mrf.mxu0  ;;  %v3136_v0 = vpop.f32.mrf.mxu1 }
  0xf6   : > { %2923 = vst [vmem:[%s3514_s6 + $0x28] sm:$0xff] %v2627_v59   ;;  %2955 = vst [vmem:[%s3514_s6 + $0x128] sm:$0xff] %v2787_v60   ;;  %v2622_v1 = vpack.c.bf16 %v981_v61, %v978_v55  ;;  %v2782_v2 = vpack.c.bf16 %v1237_v62, %v1234_v56  ;;  %v1002_v8 = vadd.f32 %v3072_v63, %v3501_v6 }
  0xf7   : > { %v993_v3 = vpop.f32.mrf.mxu0  ;;  %v1249_v4 = vpop.f32.mrf.mxu1  ;;  %v1258_v9 = vadd.f32 %v3136_v0, %v3501_v6 }
  0xf8   : > { %2922 = vst [vmem:[%s3514_s6 + $0x20] sm:$0xff] %v2622_v1   ;;  %2954 = vst [vmem:[%s3514_s6 + $0x120] sm:$0xff] %v2782_v2   ;;  %v994_v12 = vadd.f32 %v3501_v6, %v993_v3  ;;  %v1250_v13 = vadd.f32 %v3501_v6, %v1249_v4 }
  0xf9   : > { %v3073_v5 = vpop.f32.mrf.mxu0  ;;  %v3137_v7 = vpop.f32.mrf.mxu1 }
  0xfa   : > { %v1005_v10 = vadd.f32 %v3073_v5, %v3501_v6  ;;  %v1261_v11 = vadd.f32 %v3137_v7, %v3501_v6 }
  0xfb   : > { %v996_v14 = vpop.f32.mrf.mxu0  ;;  %v1252_v15 = vpop.f32.mrf.mxu1 }
  0xfc   : > { %v2637_v16 = vpack.c.bf16 %v1005_v10, %v1002_v8  ;;  %v2797_v17 = vpack.c.bf16 %v1261_v11, %v1258_v9  ;;  %v997_v18 = vadd.f32 %v3501_v6, %v996_v14  ;;  %v1253_v19 = vadd.f32 %v3501_v6, %v1252_v15 }
  0xfd   : > { %v3076_v20 = vpop.f32.mrf.mxu0  ;;  %v3140_v21 = vpop.f32.mrf.mxu1 }
  0xfe   : > { %2925 = vst [vmem:[%s3514_s6 + $0x38] sm:$0xff] %v2637_v16   ;;  %2957 = vst [vmem:[%s3514_s6 + $0x138] sm:$0xff] %v2797_v17   ;;  %v2632_v22 = vpack.c.bf16 %v997_v18, %v994_v12  ;;  %v2792_v23 = vpack.c.bf16 %v1253_v19, %v1250_v13  ;;  %v1018_v28 = vadd.f32 %v3076_v20, %v3501_v6 }
  0xff   : > { %v1009_v24 = vpop.f32.mrf.mxu0  ;;  %v1265_v25 = vpop.f32.mrf.mxu1  ;;  %v1274_v29 = vadd.f32 %v3140_v21, %v3501_v6 }
 0x100   : > { %2924 = vst [vmem:[%s3514_s6 + $0x30] sm:$0xff] %v2632_v22   ;;  %2956 = vst [vmem:[%s3514_s6 + $0x130] sm:$0xff] %v2792_v23   ;;  %v1010_v32 = vadd.f32 %v3501_v6, %v1009_v24  ;;  %v1266_v33 = vadd.f32 %v3501_v6, %v1265_v25 }
 0x101   : > { %v3077_v26 = vpop.f32.mrf.mxu0  ;;  %v3141_v27 = vpop.f32.mrf.mxu1 }
 0x102   : > { %v1021_v30 = vadd.f32 %v3077_v26, %v3501_v6  ;;  %v1277_v31 = vadd.f32 %v3141_v27, %v3501_v6 }
 0x103   : > { %v1012_v34 = vpop.f32.mrf.mxu0  ;;  %v1268_v35 = vpop.f32.mrf.mxu1 }
 0x104   : > { %v2647_v36 = vpack.c.bf16 %v1021_v30, %v1018_v28  ;;  %v2807_v37 = vpack.c.bf16 %v1277_v31, %v1274_v29  ;;  %v1013_v38 = vadd.f32 %v3501_v6, %v1012_v34  ;;  %v1269_v39 = vadd.f32 %v3501_v6, %v1268_v35 }
 0x105   : > { %v3080_v40 = vpop.f32.mrf.mxu0  ;;  %v3144_v41 = vpop.f32.mrf.mxu1 }
 0x106   : > { %2927 = vst [vmem:[%s3514_s6 + $0x48] sm:$0xff] %v2647_v36   ;;  %2959 = vst [vmem:[%s3514_s6 + $0x148] sm:$0xff] %v2807_v37   ;;  %v2642_v42 = vpack.c.bf16 %v1013_v38, %v1010_v32  ;;  %v2802_v43 = vpack.c.bf16 %v1269_v39, %v1266_v33  ;;  %v1034_v48 = vadd.f32 %v3080_v40, %v3501_v6 }
 0x107   : > { %v1025_v44 = vpop.f32.mrf.mxu0  ;;  %v1281_v45 = vpop.f32.mrf.mxu1  ;;  %v1290_v49 = vadd.f32 %v3144_v41, %v3501_v6 }
 0x108   : > { %2926 = vst [vmem:[%s3514_s6 + $0x40] sm:$0xff] %v2642_v42   ;;  %2958 = vst [vmem:[%s3514_s6 + $0x140] sm:$0xff] %v2802_v43   ;;  %v1026_v52 = vadd.f32 %v3501_v6, %v1025_v44  ;;  %v1282_v53 = vadd.f32 %v3501_v6, %v1281_v45 }
 0x109   : > { %v3081_v46 = vpop.f32.mrf.mxu0  ;;  %v3145_v47 = vpop.f32.mrf.mxu1 }
 0x10a   : > { %v1037_v50 = vadd.f32 %v3081_v46, %v3501_v6  ;;  %v1293_v51 = vadd.f32 %v3145_v47, %v3501_v6 }
 0x10b   : > { %v1028_v54 = vpop.f32.mrf.mxu0  ;;  %v1284_v55 = vpop.f32.mrf.mxu1 }
 0x10c   : > { %v2657_v56 = vpack.c.bf16 %v1037_v50, %v1034_v48  ;;  %v2817_v57 = vpack.c.bf16 %v1293_v51, %v1290_v49  ;;  %v1029_v58 = vadd.f32 %v3501_v6, %v1028_v54  ;;  %v1285_v59 = vadd.f32 %v3501_v6, %v1284_v55 }
 0x10d   : > { %v3084_v60 = vpop.f32.mrf.mxu0  ;;  %v3148_v61 = vpop.f32.mrf.mxu1 }
 0x10e   : > { %2929 = vst [vmem:[%s3514_s6 + $0x58] sm:$0xff] %v2657_v56   ;;  %2961 = vst [vmem:[%s3514_s6 + $0x158] sm:$0xff] %v2817_v57   ;;  %v2652_v62 = vpack.c.bf16 %v1029_v58, %v1026_v52  ;;  %v2812_v63 = vpack.c.bf16 %v1285_v59, %v1282_v53  ;;  %v1050_v4 = vadd.f32 %v3084_v60, %v3501_v6 }
 0x10f   : > { %v1041_v0 = vpop.f32.mrf.mxu0  ;;  %v1297_v1 = vpop.f32.mrf.mxu1  ;;  %v1306_v5 = vadd.f32 %v3148_v61, %v3501_v6 }
 0x110   : > { %2928 = vst [vmem:[%s3514_s6 + $0x50] sm:$0xff] %v2652_v62   ;;  %2960 = vst [vmem:[%s3514_s6 + $0x150] sm:$0xff] %v2812_v63   ;;  %v1042_v9 = vadd.f32 %v3501_v6, %v1041_v0  ;;  %v1298_v10 = vadd.f32 %v3501_v6, %v1297_v1 }
 0x111   : > { %v3085_v2 = vpop.f32.mrf.mxu0  ;;  %v3149_v3 = vpop.f32.mrf.mxu1 }
 0x112   : > { %v1053_v7 = vadd.f32 %v3085_v2, %v3501_v6  ;;  %v1309_v8 = vadd.f32 %v3149_v3, %v3501_v6 }
 0x113   : > { %v1044_v11 = vpop.f32.mrf.mxu0  ;;  %v1300_v12 = vpop.f32.mrf.mxu1 }
 0x114   : > { %v2667_v13 = vpack.c.bf16 %v1053_v7, %v1050_v4  ;;  %v2827_v14 = vpack.c.bf16 %v1309_v8, %v1306_v5  ;;  %v1045_v15 = vadd.f32 %v3501_v6, %v1044_v11  ;;  %v1301_v16 = vadd.f32 %v3501_v6, %v1300_v12 }
 0x115   : > { %v3088_v17 = vpop.f32.mrf.mxu0  ;;  %v3152_v18 = vpop.f32.mrf.mxu1 }
 0x116   : > { %2931 = vst [vmem:[%s3514_s6 + $0x68] sm:$0xff] %v2667_v13   ;;  %2963 = vst [vmem:[%s3514_s6 + $0x168] sm:$0xff] %v2827_v14   ;;  %v2662_v19 = vpack.c.bf16 %v1045_v15, %v1042_v9  ;;  %v2822_v20 = vpack.c.bf16 %v1301_v16, %v1298_v10  ;;  %v1066_v25 = vadd.f32 %v3088_v17, %v3501_v6 }
 0x117   : > { %v1057_v21 = vpop.f32.mrf.mxu0  ;;  %v1313_v22 = vpop.f32.mrf.mxu1  ;;  %v1322_v26 = vadd.f32 %v3152_v18, %v3501_v6 }
 0x118   : > { %2930 = vst [vmem:[%s3514_s6 + $0x60] sm:$0xff] %v2662_v19   ;;  %2962 = vst [vmem:[%s3514_s6 + $0x160] sm:$0xff] %v2822_v20   ;;  %v1058_v29 = vadd.f32 %v3501_v6, %v1057_v21  ;;  %v1314_v30 = vadd.f32 %v3501_v6, %v1313_v22 }
 0x119   : > { %v3089_v23 = vpop.f32.mrf.mxu0  ;;  %v3153_v24 = vpop.f32.mrf.mxu1 }
 0x11a   : > { %v1069_v27 = vadd.f32 %v3089_v23, %v3501_v6  ;;  %v1325_v28 = vadd.f32 %v3153_v24, %v3501_v6 }
 0x11b   : > { %v1060_v31 = vpop.f32.mrf.mxu0  ;;  %v1316_v32 = vpop.f32.mrf.mxu1 }
 0x11c   : > { %v2677_v33 = vpack.c.bf16 %v1069_v27, %v1066_v25  ;;  %v2837_v34 = vpack.c.bf16 %v1325_v28, %v1322_v26  ;;  %v1061_v35 = vadd.f32 %v3501_v6, %v1060_v31  ;;  %v1317_v36 = vadd.f32 %v3501_v6, %v1316_v32 }
 0x11d   : > { %v3092_v37 = vpop.f32.mrf.mxu0  ;;  %v3156_v38 = vpop.f32.mrf.mxu1 }
 0x11e   : > { %2933 = vst [vmem:[%s3514_s6 + $0x78] sm:$0xff] %v2677_v33   ;;  %2965 = vst [vmem:[%s3514_s6 + $0x178] sm:$0xff] %v2837_v34   ;;  %v2672_v39 = vpack.c.bf16 %v1061_v35, %v1058_v29  ;;  %v2832_v40 = vpack.c.bf16 %v1317_v36, %v1314_v30  ;;  %v1082_v45 = vadd.f32 %v3092_v37, %v3501_v6 }
 0x11f   : > { %v1073_v41 = vpop.f32.mrf.mxu0  ;;  %v1329_v42 = vpop.f32.mrf.mxu1  ;;  %v1338_v46 = vadd.f32 %v3156_v38, %v3501_v6 }
 0x120   : > { %2932 = vst [vmem:[%s3514_s6 + $0x70] sm:$0xff] %v2672_v39   ;;  %2964 = vst [vmem:[%s3514_s6 + $0x170] sm:$0xff] %v2832_v40   ;;  %v1074_v49 = vadd.f32 %v3501_v6, %v1073_v41  ;;  %v1330_v50 = vadd.f32 %v3501_v6, %v1329_v42 }
 0x121   : > { %v3093_v43 = vpop.f32.mrf.mxu0  ;;  %v3157_v44 = vpop.f32.mrf.mxu1 }
 0x122   : > { %v1085_v47 = vadd.f32 %v3093_v43, %v3501_v6  ;;  %v1341_v48 = vadd.f32 %v3157_v44, %v3501_v6 }
 0x123   : > { %v1076_v51 = vpop.f32.mrf.mxu0  ;;  %v1332_v52 = vpop.f32.mrf.mxu1 }
 0x124   : > { %v2687_v53 = vpack.c.bf16 %v1085_v47, %v1082_v45  ;;  %v2847_v54 = vpack.c.bf16 %v1341_v48, %v1338_v46  ;;  %v1077_v55 = vadd.f32 %v3501_v6, %v1076_v51  ;;  %v1333_v56 = vadd.f32 %v3501_v6, %v1332_v52 }
 0x125   : > { %v3096_v57 = vpop.f32.mrf.mxu0  ;;  %v3160_v58 = vpop.f32.mrf.mxu1 }
 0x126   : > { %2935 = vst [vmem:[%s3514_s6 + $0x88] sm:$0xff] %v2687_v53   ;;  %2967 = vst [vmem:[%s3514_s6 + $0x188] sm:$0xff] %v2847_v54   ;;  %v2682_v59 = vpack.c.bf16 %v1077_v55, %v1074_v49  ;;  %v2842_v60 = vpack.c.bf16 %v1333_v56, %v1330_v50  ;;  %v1098_v1 = vadd.f32 %v3096_v57, %v3501_v6 }
 0x127   : > { %v1089_v61 = vpop.f32.mrf.mxu0  ;;  %v1345_v62 = vpop.f32.mrf.mxu1  ;;  %v1354_v2 = vadd.f32 %v3160_v58, %v3501_v6 }
 0x128   : > { %2934 = vst [vmem:[%s3514_s6 + $0x80] sm:$0xff] %v2682_v59   ;;  %2966 = vst [vmem:[%s3514_s6 + $0x180] sm:$0xff] %v2842_v60   ;;  %v1090_v5 = vadd.f32 %v3501_v6, %v1089_v61  ;;  %v1346_v7 = vadd.f32 %v3501_v6, %v1345_v62 }
 0x129   : > { %v3097_v63 = vpop.f32.mrf.mxu0  ;;  %v3161_v0 = vpop.f32.mrf.mxu1 }
 0x12a   : > { %v1101_v3 = vadd.f32 %v3097_v63, %v3501_v6  ;;  %v1357_v4 = vadd.f32 %v3161_v0, %v3501_v6 }
 0x12b   : > { %v1092_v8 = vpop.f32.mrf.mxu0  ;;  %v1348_v9 = vpop.f32.mrf.mxu1 }
 0x12c   : > { %v2697_v10 = vpack.c.bf16 %v1101_v3, %v1098_v1  ;;  %v2857_v11 = vpack.c.bf16 %v1357_v4, %v1354_v2  ;;  %v1093_v12 = vadd.f32 %v3501_v6, %v1092_v8  ;;  %v1349_v13 = vadd.f32 %v3501_v6, %v1348_v9 }
 0x12d   : > { %v3100_v14 = vpop.f32.mrf.mxu0  ;;  %v3164_v15 = vpop.f32.mrf.mxu1 }
 0x12e   : > { %2937 = vst [vmem:[%s3514_s6 + $0x98] sm:$0xff] %v2697_v10   ;;  %2969 = vst [vmem:[%s3514_s6 + $0x198] sm:$0xff] %v2857_v11   ;;  %v2692_v16 = vpack.c.bf16 %v1093_v12, %v1090_v5  ;;  %v2852_v17 = vpack.c.bf16 %v1349_v13, %v1346_v7  ;;  %v1114_v22 = vadd.f32 %v3100_v14, %v3501_v6 }
 0x12f   : > { %v1105_v18 = vpop.f32.mrf.mxu0  ;;  %v1361_v19 = vpop.f32.mrf.mxu1  ;;  %v1370_v23 = vadd.f32 %v3164_v15, %v3501_v6 }
 0x130   : > { %2936 = vst [vmem:[%s3514_s6 + $0x90] sm:$0xff] %v2692_v16   ;;  %2968 = vst [vmem:[%s3514_s6 + $0x190] sm:$0xff] %v2852_v17   ;;  %v1106_v26 = vadd.f32 %v3501_v6, %v1105_v18  ;;  %v1362_v27 = vadd.f32 %v3501_v6, %v1361_v19 }
 0x131   : > { %v3101_v20 = vpop.f32.mrf.mxu0  ;;  %v3165_v21 = vpop.f32.mrf.mxu1 }
 0x132   : > { %v1117_v24 = vadd.f32 %v3101_v20, %v3501_v6  ;;  %v1373_v25 = vadd.f32 %v3165_v21, %v3501_v6 }
 0x133   : > { %v1108_v28 = vpop.f32.mrf.mxu0  ;;  %v1364_v29 = vpop.f32.mrf.mxu1 }
 0x134   : > { %v2707_v30 = vpack.c.bf16 %v1117_v24, %v1114_v22  ;;  %v2867_v31 = vpack.c.bf16 %v1373_v25, %v1370_v23  ;;  %v1109_v32 = vadd.f32 %v3501_v6, %v1108_v28  ;;  %v1365_v33 = vadd.f32 %v3501_v6, %v1364_v29 }
 0x135   : > { %v3104_v34 = vpop.f32.mrf.mxu0  ;;  %v3168_v35 = vpop.f32.mrf.mxu1 }
 0x136   : > { %2939 = vst [vmem:[%s3514_s6 + $0xa8] sm:$0xff] %v2707_v30   ;;  %2971 = vst [vmem:[%s3514_s6 + $0x1a8] sm:$0xff] %v2867_v31   ;;  %v2702_v36 = vpack.c.bf16 %v1109_v32, %v1106_v26  ;;  %v2862_v37 = vpack.c.bf16 %v1365_v33, %v1362_v27  ;;  %v1130_v42 = vadd.f32 %v3104_v34, %v3501_v6 }
 0x137   : > { %v1121_v38 = vpop.f32.mrf.mxu0  ;;  %v1377_v39 = vpop.f32.mrf.mxu1  ;;  %v1386_v43 = vadd.f32 %v3168_v35, %v3501_v6 }
 0x138   : > { %2938 = vst [vmem:[%s3514_s6 + $0xa0] sm:$0xff] %v2702_v36   ;;  %2970 = vst [vmem:[%s3514_s6 + $0x1a0] sm:$0xff] %v2862_v37   ;;  %v1122_v46 = vadd.f32 %v3501_v6, %v1121_v38  ;;  %v1378_v47 = vadd.f32 %v3501_v6, %v1377_v39 }
 0x139   : > { %v3105_v40 = vpop.f32.mrf.mxu0  ;;  %v3169_v41 = vpop.f32.mrf.mxu1 }
 0x13a   : > { %v1133_v44 = vadd.f32 %v3105_v40, %v3501_v6  ;;  %v1389_v45 = vadd.f32 %v3169_v41, %v3501_v6 }
 0x13b   : > { %v1124_v48 = vpop.f32.mrf.mxu0  ;;  %v1380_v49 = vpop.f32.mrf.mxu1 }
 0x13c   : > { %v2717_v50 = vpack.c.bf16 %v1133_v44, %v1130_v42  ;;  %v2877_v51 = vpack.c.bf16 %v1389_v45, %v1386_v43  ;;  %v1125_v52 = vadd.f32 %v3501_v6, %v1124_v48  ;;  %v1381_v53 = vadd.f32 %v3501_v6, %v1380_v49 }
 0x13d   : > { %v3108_v54 = vpop.f32.mrf.mxu0  ;;  %v3172_v55 = vpop.f32.mrf.mxu1 }
 0x13e   : > { %2941 = vst [vmem:[%s3514_s6 + $0xb8] sm:$0xff] %v2717_v50   ;;  %2973 = vst [vmem:[%s3514_s6 + $0x1b8] sm:$0xff] %v2877_v51   ;;  %v2712_v56 = vpack.c.bf16 %v1125_v52, %v1122_v46  ;;  %v2872_v57 = vpack.c.bf16 %v1381_v53, %v1378_v47  ;;  %v1146_v62 = vadd.f32 %v3108_v54, %v3501_v6 }
 0x13f   : > { %v1137_v58 = vpop.f32.mrf.mxu0  ;;  %v1393_v59 = vpop.f32.mrf.mxu1  ;;  %v1402_v63 = vadd.f32 %v3172_v55, %v3501_v6 }
 0x140   : > { %2940 = vst [vmem:[%s3514_s6 + $0xb0] sm:$0xff] %v2712_v56   ;;  %2972 = vst [vmem:[%s3514_s6 + $0x1b0] sm:$0xff] %v2872_v57   ;;  %v1138_v2 = vadd.f32 %v3501_v6, %v1137_v58  ;;  %v1394_v3 = vadd.f32 %v3501_v6, %v1393_v59 }
 0x141   : > { %v3109_v60 = vpop.f32.mrf.mxu0  ;;  %v3173_v61 = vpop.f32.mrf.mxu1 }
 0x142   : > { %v1149_v0 = vadd.f32 %v3109_v60, %v3501_v6  ;;  %v1405_v1 = vadd.f32 %v3173_v61, %v3501_v6 }
 0x143   : > { %v1140_v4 = vpop.f32.mrf.mxu0  ;;  %v1396_v5 = vpop.f32.mrf.mxu1 }
 0x144   : > { %v2727_v7 = vpack.c.bf16 %v1149_v0, %v1146_v62  ;;  %v2887_v8 = vpack.c.bf16 %v1405_v1, %v1402_v63  ;;  %v1141_v9 = vadd.f32 %v3501_v6, %v1140_v4  ;;  %v1397_v10 = vadd.f32 %v3501_v6, %v1396_v5 }
 0x145   : > { %v3112_v11 = vpop.f32.mrf.mxu0  ;;  %v3176_v12 = vpop.f32.mrf.mxu1 }
 0x146   : > { %2943 = vst [vmem:[%s3514_s6 + $0xc8] sm:$0xff] %v2727_v7   ;;  %2975 = vst [vmem:[%s3514_s6 + $0x1c8] sm:$0xff] %v2887_v8   ;;  %v2722_v13 = vpack.c.bf16 %v1141_v9, %v1138_v2  ;;  %v2882_v14 = vpack.c.bf16 %v1397_v10, %v1394_v3  ;;  %v1162_v19 = vadd.f32 %v3112_v11, %v3501_v6 }
 0x147   : > { %v1153_v15 = vpop.f32.mrf.mxu0  ;;  %v1409_v16 = vpop.f32.mrf.mxu1  ;;  %v1418_v20 = vadd.f32 %v3176_v12, %v3501_v6 }
 0x148   : > { %2942 = vst [vmem:[%s3514_s6 + $0xc0] sm:$0xff] %v2722_v13   ;;  %2974 = vst [vmem:[%s3514_s6 + $0x1c0] sm:$0xff] %v2882_v14   ;;  %v1154_v23 = vadd.f32 %v3501_v6, %v1153_v15  ;;  %v1410_v24 = vadd.f32 %v3501_v6, %v1409_v16 }
 0x149   : > { %v3113_v17 = vpop.f32.mrf.mxu0  ;;  %v3177_v18 = vpop.f32.mrf.mxu1 }
 0x14a   : > { %v1165_v21 = vadd.f32 %v3113_v17, %v3501_v6  ;;  %v1421_v22 = vadd.f32 %v3177_v18, %v3501_v6 }
 0x14b   : > { %v1156_v25 = vpop.f32.mrf.mxu0  ;;  %v1412_v26 = vpop.f32.mrf.mxu1 }
 0x14c   : > { %v2737_v27 = vpack.c.bf16 %v1165_v21, %v1162_v19  ;;  %v2897_v28 = vpack.c.bf16 %v1421_v22, %v1418_v20  ;;  %v1157_v29 = vadd.f32 %v3501_v6, %v1156_v25  ;;  %v1413_v30 = vadd.f32 %v3501_v6, %v1412_v26 }
 0x14d   : > { %v3116_v31 = vpop.f32.mrf.mxu0  ;;  %v3180_v32 = vpop.f32.mrf.mxu1 }
 0x14e   : > { %2945 = vst [vmem:[%s3514_s6 + $0xd8] sm:$0xff] %v2737_v27   ;;  %2977 = vst [vmem:[%s3514_s6 + $0x1d8] sm:$0xff] %v2897_v28   ;;  %v2732_v33 = vpack.c.bf16 %v1157_v29, %v1154_v23  ;;  %v2892_v34 = vpack.c.bf16 %v1413_v30, %v1410_v24  ;;  %v1178_v39 = vadd.f32 %v3116_v31, %v3501_v6 }
 0x14f   : > { %v1169_v35 = vpop.f32.mrf.mxu0  ;;  %v1425_v36 = vpop.f32.mrf.mxu1  ;;  %v1434_v40 = vadd.f32 %v3180_v32, %v3501_v6 }
 0x150   : > { %2944 = vst [vmem:[%s3514_s6 + $0xd0] sm:$0xff] %v2732_v33   ;;  %2976 = vst [vmem:[%s3514_s6 + $0x1d0] sm:$0xff] %v2892_v34   ;;  %v1170_v43 = vadd.f32 %v3501_v6, %v1169_v35  ;;  %v1426_v44 = vadd.f32 %v3501_v6, %v1425_v36 }
 0x151   : > { %v3117_v37 = vpop.f32.mrf.mxu0  ;;  %v3181_v38 = vpop.f32.mrf.mxu1 }
 0x152   : > { %v1181_v41 = vadd.f32 %v3117_v37, %v3501_v6  ;;  %v1437_v42 = vadd.f32 %v3181_v38, %v3501_v6 }
 0x153   : > { %v1172_v45 = vpop.f32.mrf.mxu0  ;;  %v1428_v46 = vpop.f32.mrf.mxu1 }
 0x154   : > { %v2747_v47 = vpack.c.bf16 %v1181_v41, %v1178_v39  ;;  %v2907_v48 = vpack.c.bf16 %v1437_v42, %v1434_v40  ;;  %v1173_v49 = vadd.f32 %v3501_v6, %v1172_v45  ;;  %v1429_v50 = vadd.f32 %v3501_v6, %v1428_v46 }
 0x155   : > { %v3120_v51 = vpop.f32.mrf.mxu0  ;;  %v3184_v52 = vpop.f32.mrf.mxu1 }
 0x156   : > { %2947 = vst [vmem:[%s3514_s6 + $0xe8] sm:$0xff] %v2747_v47   ;;  %2979 = vst [vmem:[%s3514_s6 + $0x1e8] sm:$0xff] %v2907_v48   ;;  %v2742_v53 = vpack.c.bf16 %v1173_v49, %v1170_v43  ;;  %v2902_v54 = vpack.c.bf16 %v1429_v50, %v1426_v44  ;;  %v1194_v59 = vadd.f32 %v3120_v51, %v3501_v6 }
 0x157   : > { %v1185_v55 = vpop.f32.mrf.mxu0  ;;  %v1441_v56 = vpop.f32.mrf.mxu1  ;;  %v1450_v60 = vadd.f32 %v3184_v52, %v3501_v6 }
 0x158   : > { %2946 = vst [vmem:[%s3514_s6 + $0xe0] sm:$0xff] %v2742_v53   ;;  %2978 = vst [vmem:[%s3514_s6 + $0x1e0] sm:$0xff] %v2902_v54   ;;  %v1186_v63 = vadd.f32 %v3501_v6, %v1185_v55  ;;  %v1442_v0 = vadd.f32 %v3501_v6, %v1441_v56 }
 0x159   : > { %v3121_v57 = vpop.f32.mrf.mxu0  ;;  %v3185_v58 = vpop.f32.mrf.mxu1 }
 0x15a   : > { %v1197_v61 = vadd.f32 %v3121_v57, %v3501_v6  ;;  %v1453_v62 = vadd.f32 %v3185_v58, %v3501_v6 }
 0x15b   : > { %v1188_v1 = vpop.f32.mrf.mxu0  ;;  %v1444_v2 = vpop.f32.mrf.mxu1 }
 0x15c   : > { %v2757_v3 = vpack.c.bf16 %v1197_v61, %v1194_v59  ;;  %v2917_v4 = vpack.c.bf16 %v1453_v62, %v1450_v60  ;;  %v1189_v5 = vadd.f32 %v3501_v6, %v1188_v1  ;;  %v1445_v7 = vadd.f32 %v3501_v6, %v1444_v2 }
 0x15e   : > { %2949 = vst [vmem:[%s3514_s6 + $0xf8] sm:$0xff] %v2757_v3   ;;  %2981 = vst [vmem:[%s3514_s6 + $0x1f8] sm:$0xff] %v2917_v4   ;;  %v2752_v8 = vpack.c.bf16 %v1189_v5, %v1186_v63  ;;  %v2912_v9 = vpack.c.bf16 %v1445_v7, %v1442_v0 }
 0x160   : > { %2948 = vst [vmem:[%s3514_s6 + $0xf0] sm:$0xff] %v2752_v8   ;;  %2980 = vst [vmem:[%s3514_s6 + $0x1f0] sm:$0xff] %v2912_v9  }
 0x161 PF: > { %s13_s14 = sadd.s32 1, %s3308_s14   ;;  %s3715_s12 = smov %s3304_s13 }
 0x162   : > { %p10_p5 = scmp.ge.s32.totalorder %s13_s14, 4   ;;  %s3716_s13 = smov %s3718_s15 }
 0x164   :  { %12 = sbr.rel (!%p10_p5) target bundleno = 2 (0x2), region = 65 }

// kernel: _lambda_.11
= control target key start
LH: loop header
LB: loop body
LE: loop exit
PB: predicated region body
PF: predicated region fallthrough
CT: control target
= control target key end

     0   :  { %s1399_s12 = smov 0   ;;  %s1401_s13 = smov 0   ;;  %s1597_s0 = inlined_call_operand.vmem [shape: bf16[1,512,128], index: 0, kind: input, shape index: {}]   ;;  %s1598_s1 = inlined_call_operand.vmem [shape: bf16[1,128,128], index: 1, kind: input, shape index: {}]   ;;  %s1599_s2 = inlined_call_operand.vmem [shape: bf16[1,512,128], index: 2, kind: output, shape index: {0}]   ;;  %s1600_s3 = inlined_call_operand.vmem [shape: f32[1,2,2,128], index: 3, kind: output, shape index: {1}]  }
   0x1   :  { %s1403_s14 = smov 0  }
   0x2 LB: > { %s23_s15 = sadd.s32 1, %s1373_s13  ;;  %p1028_p0 = scmp.ge.s32.totalorder %s1377_s14, 1  ;;  %s1377_s14 = sphi %s1403_s14, %s14_s14   ;;  %s1373_s13 = sphi %s1401_s13, %s1602_s13   ;;  %s1369_s12 = sphi %s1399_s12, %s1601_s12  }
   0x3   : > { %p24_p1 = scmp.ge.s32.totalorder %s23_s15, 2  ;;  %p173_p2 = scmp.lt.s32.totalorder %s1377_s14, 3 }
   0x5   : > { %s1604_s15 = smov (%p24_p1, %s23_s15), 0  ;;  %p174_p3 = pnand %p1028_p0, %p173_p2 }
   0x6   : > { %s1029_s18 = sshll.u32 (!%p174_p3), %s1369_s12, 5  ;;  %p245_p5 = scmp.lt.s32.totalorder (!%p174_p3), %s1369_s12, 1 }
   0x7   : > { %177 = sbr.rel (%p174_p3) target bundleno = 322 (0x142), region = 28  ;;  %p221_p4 = scmp.lt.s32.totalorder (!%p174_p3), %s1029_s18, 63 }
   0xc   : > { %v1331_v0 = vld [vmem:[%s1598_s1 + $0x38] sm:$0xff]   ;;  %v1332_v1 = vld [vmem:[%s1598_s1 + $0x30] sm:$0xff]   ;;  %s1606_s18 = smov (!%p221_p4, %s1029_s18), 63  ;;  %v1333_v2 = vld [vmem:[%s1598_s1 + $0x28] sm:$0xff]   ;;  %s1608_s12 = smov (!%p245_p5, %s1369_s12), 1  ;;  %vm871_vm0 = vcmask 1040384  }
   0xd   : > { %1243 = vmatprep.subr.bf16.mxu0 %v1331_v0  ;;  %1291 = vmatprep.subr.bf16.mxu1 %v1331_v0  ;;  %s1030_s23 = sshll.u32 %s1606_s18, 2  ;;  %v1334_v3 = vld [vmem:[%s1598_s1 + $0x20] sm:$0xff]   ;;  %v1335_v5 = vld [vmem:[%s1598_s1 + $0x18] sm:$0xff]   ;;  %v1336_v6 = vld [vmem:[%s1598_s1 + $0x10] sm:$0xff]   ;;  %s1033_s17 = sshll.u32 %s1608_s12, 1 }
   0xe   : > { %1244 = vmatpush3.bf16.msra.mxu0 %v1331_v0  ;;  %1299 = vmatpush3.bf16.msra.mxu1 %v1331_v0  ;;  %s1437_s26 = scalar_lea.vmem %s1597_s0, %s1030_s23  ;;  %v1337_v8 = vld [vmem:[%s1598_s1 + $0x8] sm:$0xff]   ;;  %v1338_v9 = vld [vmem:[%s1598_s1] sm:$0xff]   ;;  %s1479_s16 = scalar_lea.vmem %s1599_s2, %s1030_s23 }
   0xf   : > { %1245 = vmatprep.subr.bf16.mxu0 %v1332_v1  ;;  %1292 = vmatprep.subr.bf16.mxu1 %v1332_v1  ;;  %v1339_v4 = vld [vmem:[%s1437_s26] sm:$0xff]   ;;  %v1340_v10 = vld [vmem:[%s1437_s26 + $0x8] sm:$0xff]   ;;  %v1341_v12 = vld [vmem:[%s1437_s26 + $0x10] sm:$0xff]   ;;  %s250_s20 = scalar_lea.vmem %s1600_s3, %s1033_s17 }
  0x10   : > { %1259 = vmatprep.mubr.bf16.mxu0 %v1339_v4  ;;  %v1347_v7 = vld [vmem:[%s1437_s26 + $0x40] sm:$0xff]   ;;  %v1348_v11 = vld [vmem:[%s1437_s26 + $0x48] sm:$0xff]   ;;  %v1349_v13 = vld [vmem:[%s1437_s26 + $0x50] sm:$0xff]  }
  0x11   : > { %1275 = vmatprep.mubr.bf16.mxu1 %v1347_v7  ;;  %v1342_v14 = vld [vmem:[%s1437_s26 + $0x18] sm:$0xff]   ;;  %v1343_v16 = vld [vmem:[%s1437_s26 + $0x20] sm:$0xff]   ;;  %v1344_v18 = vld [vmem:[%s1437_s26 + $0x28] sm:$0xff]  }
  0x12   : > { %1246 = vmatpush3.bf16.msra.mxu0 %v1332_v1  ;;  %1300 = vmatpush3.bf16.msra.mxu1 %v1332_v1  ;;  %v1350_v15 = vld [vmem:[%s1437_s26 + $0x58] sm:$0xff]   ;;  %v1351_v17 = vld [vmem:[%s1437_s26 + $0x60] sm:$0xff]   ;;  %v1352_v19 = vld [vmem:[%s1437_s26 + $0x68] sm:$0xff]  }
  0x13   : > { %1247 = vmatprep.subr.bf16.mxu0 %v1333_v2  ;;  %1293 = vmatprep.subr.bf16.mxu1 %v1333_v2  ;;  %v1345_v20 = vld [vmem:[%s1437_s26 + $0x30] sm:$0xff]   ;;  %v1346_v22 = vld [vmem:[%s1437_s26 + $0x38] sm:$0xff]  }
  0x14   : > { %v1353_v21 = vld [vmem:[%s1437_s26 + $0x70] sm:$0xff]   ;;  %v1354_v23 = vld [vmem:[%s1437_s26 + $0x78] sm:$0xff]  }
  0x16   : > { %1248 = vmatpush3.bf16.msra.mxu0 %v1333_v2  ;;  %1301 = vmatpush3.bf16.msra.mxu1 %v1333_v2 }
  0x17   : > { %1249 = vmatprep.subr.bf16.mxu0 %v1334_v3  ;;  %1294 = vmatprep.subr.bf16.mxu1 %v1334_v3 }
  0x1a   : > { %1250 = vmatpush3.bf16.msra.mxu0 %v1334_v3  ;;  %1302 = vmatpush3.bf16.msra.mxu1 %v1334_v3 }
  0x1b   : > { %1251 = vmatprep.subr.bf16.mxu0 %v1335_v5  ;;  %1295 = vmatprep.subr.bf16.mxu1 %v1335_v5 }
  0x1e   : > { %1252 = vmatpush3.bf16.msra.mxu0 %v1335_v5  ;;  %1303 = vmatpush3.bf16.msra.mxu1 %v1335_v5 }
  0x1f   : > { %1253 = vmatprep.subr.bf16.mxu0 %v1336_v6  ;;  %1296 = vmatprep.subr.bf16.mxu1 %v1336_v6 }
  0x22   : > { %1254 = vmatpush3.bf16.msra.mxu0 %v1336_v6  ;;  %1304 = vmatpush3.bf16.msra.mxu1 %v1336_v6 }
  0x23   : > { %1255 = vmatprep.subr.bf16.mxu0 %v1337_v8  ;;  %1297 = vmatprep.subr.bf16.mxu1 %v1337_v8 }
  0x26   : > { %1256 = vmatpush3.bf16.msra.mxu0 %v1337_v8  ;;  %1305 = vmatpush3.bf16.msra.mxu1 %v1337_v8 }
  0x27   : > { %1257 = vmatprep.subr.bf16.mxu0 %v1338_v9  ;;  %1298 = vmatprep.subr.bf16.mxu1 %v1338_v9 }
  0x2a   : > { %1258 = vmatpush3.bf16.msra.mxu0 %v1338_v9  ;;  %1306 = vmatpush3.bf16.msra.mxu1 %v1338_v9 }
  0x2d   : > { %1260 = vmatmul.mubr.bf16.vlgmr.msra.gmra.mxu0 %v1340_v10  ;;  %1276 = vmatmul.mubr.bf16.vlgmr.msra.gmra.mxu1 %v1348_v11 }
  0x2e   : > { %1263 = vmatprep.mubr.bf16.mxu0 %v1341_v12  ;;  %1279 = vmatprep.mubr.bf16.mxu1 %v1349_v13 }
  0x35   : > { %1264 = vmatmul.mubr.bf16.gmra.mxu0 %v1342_v14  ;;  %1280 = vmatmul.mubr.bf16.gmra.mxu1 %v1350_v15 }
  0x36   : > { %1267 = vmatprep.mubr.bf16.mxu0 %v1343_v16  ;;  %1283 = vmatprep.mubr.bf16.mxu1 %v1351_v17 }
  0x3d   : > { %1268 = vmatmul.mubr.bf16.gmra.mxu0 %v1344_v18  ;;  %1284 = vmatmul.mubr.bf16.gmra.mxu1 %v1352_v19 }
  0x3e   : > { %1271 = vmatprep.mubr.bf16.mxu0 %v1345_v20  ;;  %1287 = vmatprep.mubr.bf16.mxu1 %v1353_v21 }
  0x45   : > { %1272 = vmatmul.mubr.bf16.gmra.mxu0 %v1346_v22  ;;  %1288 = vmatmul.mubr.bf16.gmra.mxu1 %v1354_v23 }
  0xed   : > { %v1261_v24 = vpop.f32.mrf.mxu0  ;;  %v1470_v25 = vpop.f32.mrf.mxu1 }
  0xee   : > { %v804_v41 = vmul.f32 %v1261_v24, %v1261_v24 }
  0xef   : > { %v478_v26 = vpop.f32.mrf.mxu0  ;;  %v1472_v27 = vpop.f32.mrf.mxu1 }
  0xf0   : > { %v802_v32 = vmul.f32 %v478_v26, %v478_v26 }
  0xf1   : > { %v1262_v28 = vpop.f32.mrf.mxu0  ;;  %v1481_v29 = vpop.f32.mrf.mxu1 }
  0xf2   : > { %v1132_v30 = vpack.c.bf16 %v1262_v28, %v1261_v24  ;;  %v1172_v31 = vpack.c.bf16 %v1481_v29, %v1470_v25  ;;  %v805_v46 = vmul.f32 %v1262_v28, %v1262_v28 }
  0xf3   : > { %v481_v33 = vpop.f32.mrf.mxu0  ;;  %v1485_v34 = vpop.f32.mrf.mxu1 }
  0xf4   : > { %1204 = vst [vmem:[%s1479_s16 + $0x8] sm:$0xff] %v1132_v30   ;;  %v1127_v35 = vpack.c.bf16 %v481_v33, %v478_v26  ;;  %v765_v36 = vadd.f32 %v481_v33, %v478_v26  ;;  %v803_v37 = vmul.f32 %v481_v33, %v481_v33  ;;  %1212 = vst [vmem:[%s1479_s16 + $0x48] sm:$0xff] %v1172_v31  }
  0xf5   : > { %v1167_v38 = vpack.c.bf16 %v1485_v34, %v1472_v27  ;;  %v1265_v39 = vpop.f32.mrf.mxu0  ;;  %v1491_v40 = vpop.f32.mrf.mxu1 }
  0xf6   : > { %1128 = vst [vmem:[%s1479_s16] sm:$0xff] %v1127_v35   ;;  %v766_v42 = vadd.f32 %v1261_v24, %v765_v36  ;;  %v834_v43 = vadd.f32 %v803_v37, %v802_v32  ;;  %v808_v1 = vmul.f32 %v1265_v39, %v1265_v39 }
  0xf7   : > { %1211 = vst [vmem:[%s1479_s16 + $0x40] sm:$0xff] %v1167_v38   ;;  %v494_v44 = vpop.f32.mrf.mxu0  ;;  %v1495_v45 = vpop.f32.mrf.mxu1 }
  0xf8   : > { %v835_v47 = vadd.f32 %v834_v43, %v804_v41  ;;  %v767_v48 = vadd.f32 %v1262_v28, %v766_v42  ;;  %v806_v52 = vmul.f32 %v494_v44, %v494_v44 }
  0xf9   : > { %v1266_v49 = vpop.f32.mrf.mxu0  ;;  %v1497_v50 = vpop.f32.mrf.mxu1 }
  0xfa   : > { %v768_v51 = vadd.f32 %v767_v48, %v494_v44  ;;  %v836_v53 = vadd.f32 %v835_v47, %v805_v46  ;;  %v1142_v54 = vpack.c.bf16 %v1266_v49, %v1265_v39  ;;  %v1182_v56 = vpack.c.bf16 %v1497_v50, %v1491_v40 }
  0xfb   : > { %v497_v55 = vpop.f32.mrf.mxu0  ;;  %v1501_v57 = vpop.f32.mrf.mxu1  ;;  %v809_v6 = vmul.f32 %v1266_v49, %v1266_v49 }
  0xfc   : > { %v837_v58 = vadd.f32 %v836_v53, %v806_v52  ;;  %1206 = vst [vmem:[%s1479_s16 + $0x18] sm:$0xff] %v1142_v54   ;;  %v1137_v59 = vpack.c.bf16 %v497_v55, %v494_v44  ;;  %v769_v60 = vadd.f32 %v768_v51, %v497_v55  ;;  %v807_v61 = vmul.f32 %v497_v55, %v497_v55 }
  0xfd   : > { %v1269_v62 = vpop.f32.mrf.mxu0  ;;  %1214 = vst [vmem:[%s1479_s16 + $0x58] sm:$0xff] %v1182_v56   ;;  %v1177_v63 = vpack.c.bf16 %v1501_v57, %v1495_v45  ;;  %v1507_v0 = vpop.f32.mrf.mxu1 }
  0xfe   : > { %1205 = vst [vmem:[%s1479_s16 + $0x10] sm:$0xff] %v1137_v59   ;;  %v770_v2 = vadd.f32 %v1265_v39, %v769_v60  ;;  %v838_v3 = vadd.f32 %v837_v58, %v807_v61  ;;  %v812_v26 = vmul.f32 %v1269_v62, %v1269_v62  ;;  %v818_v61 = vmul.f32 %v1472_v27, %v1472_v27 }
  0xff   : > { %v510_v4 = vpop.f32.mrf.mxu0  ;;  %1213 = vst [vmem:[%s1479_s16 + $0x50] sm:$0xff] %v1177_v63   ;;  %v1511_v5 = vpop.f32.mrf.mxu1 }
 0x100   : > { %v839_v7 = vadd.f32 %v838_v3, %v808_v1  ;;  %v771_v8 = vadd.f32 %v1266_v49, %v770_v2  ;;  %v810_v12 = vmul.f32 %v510_v4, %v510_v4  ;;  %v819_v2 = vmul.f32 %v1485_v34, %v1485_v34 }
 0x101   : > { %v1270_v9 = vpop.f32.mrf.mxu0  ;;  %v1513_v10 = vpop.f32.mrf.mxu1 }
 0x102   : > { %v772_v11 = vadd.f32 %v771_v8, %v510_v4  ;;  %v840_v13 = vadd.f32 %v839_v7, %v809_v6  ;;  %v1152_v14 = vpack.c.bf16 %v1270_v9, %v1269_v62  ;;  %v1192_v16 = vpack.c.bf16 %v1513_v10, %v1507_v0 }
 0x103   : > { %v513_v15 = vpop.f32.mrf.mxu0  ;;  %v1517_v17 = vpop.f32.mrf.mxu1  ;;  %v813_v33 = vmul.f32 %v1270_v9, %v1270_v9  ;;  %v821_v8 = vmul.f32 %v1481_v29, %v1481_v29 }
 0x104   : > { %v841_v18 = vadd.f32 %v840_v13, %v810_v12  ;;  %1208 = vst [vmem:[%s1479_s16 + $0x28] sm:$0xff] %v1152_v14   ;;  %v1147_v19 = vpack.c.bf16 %v513_v15, %v510_v4  ;;  %v773_v20 = vadd.f32 %v772_v11, %v513_v15  ;;  %v811_v21 = vmul.f32 %v513_v15, %v513_v15 }
 0x105   : > { %v1273_v22 = vpop.f32.mrf.mxu0  ;;  %1216 = vst [vmem:[%s1479_s16 + $0x68] sm:$0xff] %v1192_v16   ;;  %v1187_v23 = vpack.c.bf16 %v1517_v17, %v1511_v5  ;;  %v1523_v24 = vpop.f32.mrf.mxu1  ;;  %v820_v4 = vmul.f32 %v1470_v25, %v1470_v25  ;;  %v822_v12 = vmul.f32 %v1495_v45, %v1495_v45  ;;  %v823_v15 = vmul.f32 %v1501_v57, %v1501_v57 }
 0x106   : > { %1207 = vst [vmem:[%s1479_s16 + $0x20] sm:$0xff] %v1147_v19   ;;  %v774_v28 = vadd.f32 %v1269_v62, %v773_v20  ;;  %v842_v30 = vadd.f32 %v841_v18, %v811_v21  ;;  %v816_v54 = vmul.f32 %v1273_v22, %v1273_v22  ;;  %v826_v21 = vmul.f32 %v1511_v5, %v1511_v5 }
 0x107   : > { %v526_v31 = vpop.f32.mrf.mxu0  ;;  %1215 = vst [vmem:[%s1479_s16 + $0x60] sm:$0xff] %v1187_v23   ;;  %v1527_v32 = vpop.f32.mrf.mxu1 }
 0x108   : > { %v843_v35 = vadd.f32 %v842_v30, %v812_v26  ;;  %v775_v36 = vadd.f32 %v1270_v9, %v774_v28  ;;  %v814_v41 = vmul.f32 %v526_v31, %v526_v31  ;;  %v827_v26 = vmul.f32 %v1517_v17, %v1517_v17 }
 0x109   : > { %v1274_v37 = vpop.f32.mrf.mxu0  ;;  %v1529_v38 = vpop.f32.mrf.mxu1 }
 0x10a   : > { %v776_v39 = vadd.f32 %v775_v36, %v526_v31  ;;  %v844_v42 = vadd.f32 %v843_v35, %v813_v33  ;;  %v1162_v43 = vpack.c.bf16 %v1274_v37, %v1273_v22  ;;  %v1202_v46 = vpack.c.bf16 %v1529_v38, %v1523_v24 }
 0x10b   : > { %v529_v44 = vpop.f32.mrf.mxu0  ;;  %v593_v47 = vpop.f32.mrf.mxu1  ;;  %v817_v58 = vmul.f32 %v1274_v37, %v1274_v37  ;;  %v830_v35 = vmul.f32 %v1527_v32, %v1527_v32 }
 0x10c   : > { %v845_v48 = vadd.f32 %v844_v42, %v814_v41  ;;  %1210 = vst [vmem:[%s1479_s16 + $0x38] sm:$0xff] %v1162_v43   ;;  %v1157_v49 = vpack.c.bf16 %v529_v44, %v526_v31  ;;  %v777_v51 = vadd.f32 %v776_v39, %v529_v44  ;;  %v815_v52 = vmul.f32 %v529_v44, %v529_v44 }
 0x10d   : > { %1218 = vst [vmem:[%s1479_s16 + $0x78] sm:$0xff] %v1202_v46   ;;  %v1197_v53 = vpack.c.bf16 %v593_v47, %v1527_v32  ;;  %v831_v39 = vmul.f32 %v593_v47, %v593_v47  ;;  %v833_v43 = vmul.f32 %v1529_v38, %v1529_v38 }
 0x10e   : > { %1209 = vst [vmem:[%s1479_s16 + $0x30] sm:$0xff] %v1157_v49   ;;  %v778_v55 = vadd.f32 %v1273_v22, %v777_v51  ;;  %v846_v56 = vadd.f32 %v845_v48, %v815_v52 }
 0x10f   : > { %1217 = vst [vmem:[%s1479_s16 + $0x70] sm:$0xff] %v1197_v53  }
 0x110   : > { %v779_v59 = vadd.f32 %v1274_v37, %v778_v55  ;;  %v847_v60 = vadd.f32 %v846_v56, %v816_v54 }
 0x112   : > { %v848_v62 = vadd.f32 %v847_v60, %v817_v58  ;;  %v780_v63 = vadd.f32 %v779_v59, %v1472_v27 }
 0x114   : > { %v781_v1 = vadd.f32 %v780_v63, %v1485_v34  ;;  %v849_v3 = vadd.f32 %v848_v62, %v818_v61 }
 0x116   : > { %v782_v6 = vadd.f32 %v1470_v25, %v781_v1  ;;  %v850_v7 = vadd.f32 %v849_v3, %v819_v2  ;;  %v824_v25 = vmul.f32 %v1491_v40, %v1491_v40 }
 0x118   : > { %v851_v9 = vadd.f32 %v850_v7, %v820_v4  ;;  %v783_v11 = vadd.f32 %v1481_v29, %v782_v6  ;;  %v825_v29 = vmul.f32 %v1497_v50, %v1497_v50 }
 0x11a   : > { %v784_v27 = vadd.f32 %v783_v11, %v1495_v45  ;;  %v852_v13 = vadd.f32 %v851_v9, %v821_v8 }
 0x11c   : > { %v853_v34 = vadd.f32 %v852_v13, %v822_v12  ;;  %v785_v14 = vadd.f32 %v784_v27, %v1501_v57 }
 0x11e   : > { %v786_v16 = vadd.f32 %v1491_v40, %v785_v14  ;;  %v854_v18 = vadd.f32 %v853_v34, %v823_v15  ;;  %v828_v40 = vmul.f32 %v1507_v0, %v1507_v0 }
 0x120   : > { %v855_v19 = vadd.f32 %v854_v18, %v824_v25  ;;  %v787_v20 = vadd.f32 %v1497_v50, %v786_v16  ;;  %v829_v50 = vmul.f32 %v1513_v10, %v1513_v10 }
 0x122   : > { %v788_v45 = vadd.f32 %v787_v20, %v1511_v5  ;;  %v856_v22 = vadd.f32 %v855_v19, %v825_v29 }
 0x124   : > { %v857_v23 = vadd.f32 %v856_v22, %v826_v21  ;;  %v789_v57 = vadd.f32 %v788_v45, %v1517_v17 }
 0x126   : > { %v790_v28 = vadd.f32 %v1507_v0, %v789_v57  ;;  %v858_v30 = vadd.f32 %v857_v23, %v827_v26  ;;  %v832_v0 = vmul.f32 %v1523_v24, %v1523_v24 }
 0x128   : > { %v859_v31 = vadd.f32 %v858_v30, %v828_v40  ;;  %v791_v5 = vadd.f32 %v1513_v10, %v790_v28 }
 0x12a   : > { %v792_v33 = vadd.f32 %v791_v5, %v1527_v32  ;;  %v860_v36 = vadd.f32 %v859_v31, %v829_v50 }
 0x12c   : > { %v861_v17 = vadd.f32 %v860_v36, %v830_v35  ;;  %v793_v37 = vadd.f32 %v792_v33, %v593_v47 }
 0x12e   : > { %v794_v41 = vadd.f32 %v1523_v24, %v793_v37  ;;  %v862_v42 = vadd.f32 %v861_v17, %v831_v39 }
 0x130   : > { %v795_v10 = vadd.f32 %v1529_v38, %v794_v41  ;;  %v863_v44 = vadd.f32 %v862_v42, %v832_v0 }
 0x132   : > { %v796_v46 = vrot.slane %v795_v10, 4  ;;  %v864_v48 = vadd.f32 %v863_v44, %v833_v43 }
 0x134   : > { %v797_v32 = vadd.f32 %v796_v46, %v795_v10  ;;  %v865_v49 = vrot.slane %v864_v48, 4 }
 0x136   : > { %v798_v51 = vrot.slane %v797_v32, 2  ;;  %v866_v52 = vadd.f32 %v865_v49, %v864_v48 }
 0x138   : > { %v799_v47 = vadd.f32 %v798_v51, %v797_v32  ;;  %v867_v53 = vrot.slane %v866_v52, 2 }
 0x13a   : > { %v800_v54 = vrot.slane %v799_v47, 1  ;;  %v868_v55 = vadd.f32 %v867_v53, %v866_v52 }
 0x13c   : > { %v869_v24 = vrot.slane %v868_v55, 1  ;;  %v801_v38 = vadd.f32 %v800_v54, %v799_v47 }
 0x13e   : > { %v870_v56 = vadd.f32 %v869_v24, %v868_v55 }
 0x140   : > { %v872_v58 = vsel %vm871_vm0, %v801_v38, %v870_v56 }
 0x141   : > { %873 = vst [vmem:[%s250_s20] sm:$0x3] %v872_v58 }
 0x142 PF: > { %s14_s14 = sadd.s32 1, %s1377_s14   ;;  %s1601_s12 = smov %s1373_s13 }
 0x143   : > { %p11_p6 = scmp.ge.s32.totalorder %s14_s14, 4   ;;  %s1602_s13 = smov %s1604_s15 }
 0x145   :  { %13 = sbr.rel (!%p11_p6) target bundleno = 2 (0x2), region = 73 }

// kernel: _lambda_.12
= control target key start
LH: loop header
LB: loop body
LE: loop exit
PB: predicated region body
PF: predicated region fallthrough
CT: control target
= control target key end

     0   :  { %s955_s12 = smov 0   ;;  %s957_s13 = smov 0   ;;  %s1064_s0 = inlined_call_operand.vmem [shape: bf16[1,128,256], index: 0, kind: input, shape index: {}]   ;;  %s1065_s1 = inlined_call_operand.vmem [shape: bf16[1,256,128], index: 1, kind: input, shape index: {}]   ;;  %s1066_s2 = inlined_call_operand.vmem [shape: bf16[1,128,128], index: 2, kind: output, shape index: {0}]   ;;  %s1067_s3 = inlined_call_operand.vmem [shape: f32[1,2,2,128], index: 3, kind: output, shape index: {1}]  }
   0x1   :  { %s959_s14 = smov 0  }
   0x2 LB: > { %s23_s15 = sadd.s32 1, %s929_s13  ;;  %p730_p0 = scmp.ge.s32.totalorder %s933_s14, 1  ;;  %s933_s14 = sphi %s959_s14, %s14_s14   ;;  %s929_s13 = sphi %s957_s13, %s1069_s13   ;;  %s925_s12 = sphi %s955_s12, %s1068_s12  }
   0x3   : > { %p24_p1 = scmp.ge.s32.totalorder %s23_s15, 2  ;;  %p174_p2 = scmp.lt.s32.totalorder %s933_s14, 3 }
   0x5   : > { %s1071_s15 = smov (%p24_p1, %s23_s15), 0  ;;  %p175_p3 = pnand %p730_p0, %p174_p2 }
   0x6   : > { %s731_s18 = sshll.u32 (!%p175_p3), %s925_s12, 3  ;;  %p248_p5 = scmp.lt.s32.totalorder (!%p175_p3), %s925_s12, 1 }
   0x7   : > { %178 = sbr.rel (%p175_p3) target bundleno = 280 (0x118), region = 28  ;;  %p223_p4 = scmp.lt.s32.totalorder (!%p175_p3), %s731_s18, 15 }
   0xc   : > { %v883_v0 = vld [vmem:[%s1065_s1 + $0x78] sm:$0xff]   ;;  %v885_v2 = vld [vmem:[%s1065_s1 + $0x70] sm:$0xff]   ;;  %v887_v4 = vld [vmem:[%s1065_s1 + $0x68] sm:$0xff]   ;;  %s1073_s18 = smov (!%p223_p4, %s731_s18), 15  ;;  %s1075_s12 = smov (!%p248_p5, %s925_s12), 1  ;;  %vm570_vm0 = vcmask 1040384  }
   0xd   : > { %v884_v1 = vld [vmem:[%s1065_s1 + $0x38] sm:$0xff]   ;;  %803 = vmatprep.subr.bf16.mxu0 %v883_v0  ;;  %843 = vmatprep.subr.bf16.mxu1 %v883_v0  ;;  %v886_v3 = vld [vmem:[%s1065_s1 + $0x30] sm:$0xff]   ;;  %v888_v5 = vld [vmem:[%s1065_s1 + $0x28] sm:$0xff]   ;;  %s771_s6 = sshll.u32 %s1073_s18, 3  ;;  %s735_s4 = sshll.u32 %s1073_s18, 2 }
   0xe   : > { %804 = vmatpush3.bf16.msra.mxu0 %v884_v1  ;;  %851 = vmatpush3.bf16.msra.mxu1 %v884_v1  ;;  %v889_v6 = vld [vmem:[%s1065_s1 + $0x60] sm:$0xff]   ;;  %v891_v8 = vld [vmem:[%s1065_s1 + $0x58] sm:$0xff]   ;;  %s1009_s11 = scalar_lea.vmem %s1064_s0, %s771_s6  ;;  %v893_v10 = vld [vmem:[%s1065_s1 + $0x50] sm:$0xff]   ;;  %s1044_s7 = scalar_lea.vmem %s1066_s2, %s735_s4 }
   0xf   : > { %805 = vmatprep.subr.bf16.mxu0 %v885_v2  ;;  %844 = vmatprep.subr.bf16.mxu1 %v885_v2  ;;  %v890_v7 = vld [vmem:[%s1065_s1 + $0x20] sm:$0xff]   ;;  %v892_v9 = vld [vmem:[%s1065_s1 + $0x18] sm:$0xff]   ;;  %v894_v13 = vld [vmem:[%s1065_s1 + $0x10] sm:$0xff]   ;;  %s736_s18 = sshll.u32 %s1075_s12, 1 }
  0x10   : > { %v901_v11 = vld [vmem:[%s1009_s11 + $0x4] ss:$8 sps:$4 sm:$0xff]   ;;  %v899_v18 = vld [vmem:[%s1009_s11] ss:$8 sps:$4 sm:$0xff]   ;;  %v905_v20 = vld [vmem:[%s1009_s11 + $0x14] ss:$8 sps:$4 sm:$0xff]   ;;  %s253_s10 = scalar_lea.vmem %s1067_s3, %s736_s18 }
  0x11   : > { %v904_v12 = vld [vmem:[%s1009_s11 + $0x24] ss:$8 sps:$4 sm:$0xff]   ;;  %463 = vmatprep.mubr.bf16.mxu0 %v901_v11  ;;  %v902_v19 = vld [vmem:[%s1009_s11 + $0x20] ss:$8 sps:$4 sm:$0xff]   ;;  %v908_v21 = vld [vmem:[%s1009_s11 + $0x34] ss:$8 sps:$4 sm:$0xff]  }
  0x12   : > { %806 = vmatpush3.bf16.msra.mxu0 %v886_v3  ;;  %852 = vmatpush3.bf16.msra.mxu1 %v886_v3  ;;  %v895_v14 = vld [vmem:[%s1065_s1 + $0x48] sm:$0xff]   ;;  %v897_v16 = vld [vmem:[%s1065_s1 + $0x40] sm:$0xff]   ;;  %v907_v22 = vld [vmem:[%s1009_s11 + $0x10] ss:$8 sps:$4 sm:$0xff]  }
  0x13   : > { %807 = vmatprep.subr.bf16.mxu0 %v887_v4  ;;  %845 = vmatprep.subr.bf16.mxu1 %v887_v4  ;;  %v896_v15 = vld [vmem:[%s1065_s1 + $0x8] sm:$0xff]   ;;  %v898_v17 = vld [vmem:[%s1065_s1] sm:$0xff]   ;;  %v910_v23 = vld [vmem:[%s1009_s11 + $0x30] ss:$8 sps:$4 sm:$0xff]  }
  0x14   : > { %479 = vmatprep.mubr.bf16.mxu1 %v904_v12 }
  0x16   : > { %808 = vmatpush3.bf16.msra.mxu0 %v888_v5  ;;  %853 = vmatpush3.bf16.msra.mxu1 %v888_v5 }
  0x17   : > { %809 = vmatprep.subr.bf16.mxu0 %v889_v6  ;;  %846 = vmatprep.subr.bf16.mxu1 %v889_v6 }
  0x1a   : > { %810 = vmatpush3.bf16.msra.mxu0 %v890_v7  ;;  %854 = vmatpush3.bf16.msra.mxu1 %v890_v7 }
  0x1b   : > { %811 = vmatprep.subr.bf16.mxu0 %v891_v8  ;;  %847 = vmatprep.subr.bf16.mxu1 %v891_v8 }
  0x1e   : > { %812 = vmatpush3.bf16.msra.mxu0 %v892_v9  ;;  %855 = vmatpush3.bf16.msra.mxu1 %v892_v9 }
  0x1f   : > { %813 = vmatprep.subr.bf16.mxu0 %v893_v10  ;;  %848 = vmatprep.subr.bf16.mxu1 %v893_v10 }
  0x22   : > { %814 = vmatpush3.bf16.msra.mxu0 %v894_v13  ;;  %856 = vmatpush3.bf16.msra.mxu1 %v894_v13 }
  0x23   : > { %815 = vmatprep.subr.bf16.mxu0 %v895_v14  ;;  %849 = vmatprep.subr.bf16.mxu1 %v895_v14 }
  0x26   : > { %816 = vmatpush3.bf16.msra.mxu0 %v896_v15  ;;  %857 = vmatpush3.bf16.msra.mxu1 %v896_v15 }
  0x27   : > { %817 = vmatprep.subr.bf16.mxu0 %v897_v16  ;;  %850 = vmatprep.subr.bf16.mxu1 %v897_v16 }
  0x2a   : > { %818 = vmatpush3.bf16.msra.mxu0 %v898_v17  ;;  %858 = vmatpush3.bf16.msra.mxu1 %v898_v17 }
  0x2d   : > { %464 = vmatmul.mubr.bf16.vlgmr.msra.gmra.mxu0 %v899_v18  ;;  %480 = vmatmul.mubr.bf16.vlgmr.msra.gmra.mxu1 %v902_v19 }
  0x2e   : > { %471 = vmatprep.mubr.bf16.mxu0 %v905_v20  ;;  %487 = vmatprep.mubr.bf16.mxu1 %v908_v21 }
  0x35   : > { %472 = vmatmul.mubr.bf16.gmra.mxu0 %v907_v22  ;;  %488 = vmatmul.mubr.bf16.gmra.mxu1 %v910_v23 }
  0xed   : > { %v819_v24 = vpop.f32.mrf.mxu0  ;;  %v831_v25 = vpop.f32.mrf.mxu1 }
  0xef   : > { %v820_v26 = vpop.f32.mrf.mxu0  ;;  %v832_v27 = vpop.f32.mrf.mxu1 }
  0xf0   : > { %v833_v30 = vadd.f32 %v832_v27, %v831_v25  ;;  %v821_v33 = vadd.f32 %v820_v26, %v819_v24 }
  0xf1   : > { %v822_v28 = vpop.f32.mrf.mxu0  ;;  %v834_v29 = vpop.f32.mrf.mxu1 }
  0xf2   : > { %v549_v44 = vmul.f32 %v821_v33, %v821_v33  ;;  %v553_v61 = vmul.f32 %v833_v30, %v833_v30 }
  0xf3   : > { %v823_v31 = vpop.f32.mrf.mxu0  ;;  %v835_v32 = vpop.f32.mrf.mxu1 }
  0xf4   : > { %v824_v34 = vadd.f32 %v823_v31, %v822_v28  ;;  %v836_v35 = vadd.f32 %v835_v32, %v834_v29 }
  0xf5   : > { %v825_v36 = vpop.f32.mrf.mxu0  ;;  %v837_v37 = vpop.f32.mrf.mxu1 }
  0xf6   : > { %v783_v38 = vpack.c.bf16 %v824_v34, %v821_v33  ;;  %v793_v39 = vpack.c.bf16 %v836_v35, %v833_v30  ;;  %v550_v40 = vmul.f32 %v824_v34, %v824_v34  ;;  %v536_v47 = vadd.f32 %v824_v34, %v821_v33 }
  0xf7   : > { %v826_v41 = vpop.f32.mrf.mxu0  ;;  %v838_v42 = vpop.f32.mrf.mxu1  ;;  %v554_v0 = vmul.f32 %v836_v35, %v836_v35 }
  0xf8   : > { %784 = vst [vmem:[%s1044_s7] sm:$0xff] %v783_v38   ;;  %801 = vst [vmem:[%s1044_s7 + $0x10] sm:$0xff] %v793_v39   ;;  %v827_v43 = vadd.f32 %v826_v41, %v825_v36  ;;  %v839_v49 = vadd.f32 %v838_v42, %v837_v37  ;;  %v557_v50 = vadd.f32 %v550_v40, %v549_v44 }
  0xf9   : > { %v828_v45 = vpop.f32.mrf.mxu0  ;;  %v840_v46 = vpop.f32.mrf.mxu1 }
  0xfa   : > { %v551_v48 = vmul.f32 %v827_v43, %v827_v43  ;;  %v537_v53 = vadd.f32 %v827_v43, %v536_v47  ;;  %v555_v3 = vmul.f32 %v839_v49, %v839_v49 }
  0xfb   : > { %v829_v51 = vpop.f32.mrf.mxu0  ;;  %v841_v52 = vpop.f32.mrf.mxu1 }
  0xfc   : > { %v830_v54 = vadd.f32 %v829_v51, %v828_v45  ;;  %v842_v55 = vadd.f32 %v841_v52, %v840_v46  ;;  %v558_v56 = vadd.f32 %v557_v50, %v551_v48 }
  0xfe   : > { %v788_v57 = vpack.c.bf16 %v830_v54, %v827_v43  ;;  %v538_v58 = vadd.f32 %v830_v54, %v537_v53  ;;  %v552_v59 = vmul.f32 %v830_v54, %v830_v54  ;;  %v798_v60 = vpack.c.bf16 %v842_v55, %v839_v49 }
  0xff   : > { %v556_v7 = vmul.f32 %v842_v55, %v842_v55 }
 0x100   : > { %800 = vst [vmem:[%s1044_s7 + $0x8] sm:$0xff] %v788_v57   ;;  %v539_v62 = vadd.f32 %v833_v30, %v538_v58  ;;  %v559_v63 = vadd.f32 %v558_v56, %v552_v59  ;;  %802 = vst [vmem:[%s1044_s7 + $0x18] sm:$0xff] %v798_v60  }
 0x102   : > { %v560_v1 = vadd.f32 %v559_v63, %v553_v61  ;;  %v540_v2 = vadd.f32 %v836_v35, %v539_v62 }
 0x104   : > { %v541_v4 = vadd.f32 %v839_v49, %v540_v2  ;;  %v561_v5 = vadd.f32 %v560_v1, %v554_v0 }
 0x106   : > { %v542_v6 = vadd.f32 %v842_v55, %v541_v4  ;;  %v562_v8 = vadd.f32 %v561_v5, %v555_v3 }
 0x108   : > { %v543_v9 = vrot.slane %v542_v6, 4  ;;  %v563_v10 = vadd.f32 %v562_v8, %v556_v7 }
 0x10a   : > { %v544_v11 = vadd.f32 %v543_v9, %v542_v6  ;;  %v564_v12 = vrot.slane %v563_v10, 4 }
 0x10c   : > { %v545_v13 = vrot.slane %v544_v11, 2  ;;  %v565_v14 = vadd.f32 %v564_v12, %v563_v10 }
 0x10e   : > { %v546_v15 = vadd.f32 %v545_v13, %v544_v11  ;;  %v566_v16 = vrot.slane %v565_v14, 2 }
 0x110   : > { %v547_v17 = vrot.slane %v546_v15, 1  ;;  %v567_v18 = vadd.f32 %v566_v16, %v565_v14 }
 0x112   : > { %v568_v19 = vrot.slane %v567_v18, 1  ;;  %v548_v20 = vadd.f32 %v547_v17, %v546_v15 }
 0x114   : > { %v569_v21 = vadd.f32 %v568_v19, %v567_v18 }
 0x116   : > { %v571_v22 = vsel %vm570_vm0, %v548_v20, %v569_v21 }
 0x117   : > { %572 = vst [vmem:[%s253_s10] sm:$0x3] %v571_v22 }
 0x118 PF: > { %s14_s14 = sadd.s32 1, %s933_s14   ;;  %s1068_s12 = smov %s929_s13 }
 0x119   : > { %p11_p6 = scmp.ge.s32.totalorder %s14_s14, 4   ;;  %s1069_s13 = smov %s1071_s15 }
 0x11b   :  { %13 = sbr.rel (!%p11_p6) target bundleno = 2 (0x2), region = 73 }

// kernel: _lambda_.13
= control target key start
LH: loop header
LB: loop body
LE: loop exit
PB: predicated region body
PF: predicated region fallthrough
CT: control target
= control target key end

     0   :  { %s1008_s12 = smov 0   ;;  %s1010_s13 = smov 0   ;;  %s1149_s0 = inlined_call_operand.vmem [shape: bf16[1,32,512], index: 0, kind: input, shape index: {}]   ;;  %s1150_s1 = inlined_call_operand.vmem [shape: bf16[1,512,128], index: 1, kind: input, shape index: {}]   ;;  %s1151_s2 = inlined_call_operand.vmem [shape: bf16[1,32,128], index: 2, kind: output, shape index: {0}]   ;;  %s1152_s3 = inlined_call_operand.vmem [shape: f32[1,2,2,128], index: 3, kind: output, shape index: {1}]  }
   0x1   :  { %s1012_s14 = smov 0  }
   0x2 LB: > { %s23_s15 = sadd.s32 1, %s982_s13  ;;  %p803_p0 = scmp.ge.s32.totalorder %s986_s14, 1  ;;  %s986_s14 = sphi %s1012_s14, %s14_s14   ;;  %s982_s13 = sphi %s1010_s13, %s1154_s13   ;;  %s978_s12 = sphi %s1008_s12, %s1153_s12  }
   0x3   : > { %p24_p1 = scmp.ge.s32.totalorder %s23_s15, 2  ;;  %p174_p2 = scmp.lt.s32.totalorder %s986_s14, 3 }
   0x5   : > { %s1156_s15 = smov (%p24_p1, %s23_s15), 0  ;;  %p175_p3 = pnand %p803_p0, %p174_p2 }
   0x6   : > { %s804_s25 = sshll.u32 (!%p175_p3), %s978_s12, 1  ;;  %p248_p5 = scmp.lt.s32.totalorder (!%p175_p3), %s978_s12, 1 }
   0x7   : > { %178 = sbr.rel (%p175_p3) target bundleno = 268 (0x10c), region = 28  ;;  %p223_p4 = scmp.lt.s32.totalorder (!%p175_p3), %s804_s25, 3 }
   0xc   : > { %v926_v0 = vld [vmem:[%s1150_s1 + $0x78] sm:$0xff]   ;;  %v930_v4 = vld [vmem:[%s1150_s1 + $0x70] sm:$0xff]   ;;  %v934_v8 = vld [vmem:[%s1150_s1 + $0x68] sm:$0xff]   ;;  %s1158_s25 = smov (!%p223_p4, %s804_s25), 3  ;;  %s1160_s12 = smov (!%p248_p5, %s978_s12), 1  ;;  %vm643_vm0 = vcmask 1040384  }
   0xd   : > { %v927_v1 = vld [vmem:[%s1150_s1 + $0xf8] sm:$0xff]   ;;  %858 = vmatprep.subr.bf16.mxu0 %v926_v0  ;;  %v931_v5 = vld [vmem:[%s1150_s1 + $0xf0] sm:$0xff]   ;;  %v935_v9 = vld [vmem:[%s1150_s1 + $0xe8] sm:$0xff]   ;;  %s850_s26 = sshll.u32 %s1158_s25, 4  ;;  %s808_s17 = sshll.u32 %s1158_s25, 2 }
   0xe   : > { %v928_v2 = vld [vmem:[%s1150_s1 + $0x38] sm:$0xff]   ;;  %880 = vmatprep.subr.bf16.mxu1 %v927_v1  ;;  %v932_v6 = vld [vmem:[%s1150_s1 + $0x30] sm:$0xff]   ;;  %v936_v10 = vld [vmem:[%s1150_s1 + $0x28] sm:$0xff]   ;;  %s229_s8 = scalar_lea.vmem %s1149_s0, %s850_s26  ;;  %s244_s20 = scalar_lea.vmem %s1151_s2, %s808_s17 }
   0xf   : > { %v929_v3 = vld [vmem:[%s1150_s1 + $0xb8] sm:$0xff]   ;;  %859 = vmatpush3.bf16.msra.mxu0 %v928_v2  ;;  %v933_v7 = vld [vmem:[%s1150_s1 + $0xb0] sm:$0xff]   ;;  %v937_v11 = vld [vmem:[%s1150_s1 + $0xa8] sm:$0xff]   ;;  %s809_s25 = sshll.u32 %s1160_s12, 1 }
  0x10   : > { %881 = vmatpush3.bf16.msra.mxu1 %v929_v3  ;;  %860 = vmatprep.subr.bf16.mxu0 %v930_v4  ;;  %v938_v12 = vld [vmem:[%s1150_s1 + $0x60] sm:$0xff]   ;;  %v942_v16 = vld [vmem:[%s1150_s1 + $0x58] sm:$0xff]   ;;  %v946_v20 = vld [vmem:[%s1150_s1 + $0x50] sm:$0xff]   ;;  %s253_s23 = scalar_lea.vmem %s1152_s3, %s809_s25 }
  0x11   : > { %882 = vmatprep.subr.bf16.mxu1 %v931_v5  ;;  %v939_v13 = vld [vmem:[%s1150_s1 + $0xe0] sm:$0xff]   ;;  %v943_v17 = vld [vmem:[%s1150_s1 + $0xd8] sm:$0xff]   ;;  %v947_v21 = vld [vmem:[%s1150_s1 + $0xd0] sm:$0xff]  }
  0x12   : > { %v940_v14 = vld [vmem:[%s1150_s1 + $0x20] sm:$0xff]   ;;  %v944_v18 = vld [vmem:[%s1150_s1 + $0x18] sm:$0xff]   ;;  %v948_v22 = vld [vmem:[%s1150_s1 + $0x10] sm:$0xff]  }
  0x13   : > { %861 = vmatpush3.bf16.msra.mxu0 %v932_v6  ;;  %v941_v15 = vld [vmem:[%s1150_s1 + $0xa0] sm:$0xff]   ;;  %v945_v19 = vld [vmem:[%s1150_s1 + $0x98] sm:$0xff]   ;;  %v949_v23 = vld [vmem:[%s1150_s1 + $0x90] sm:$0xff]  }
  0x14   : > { %883 = vmatpush3.bf16.msra.mxu1 %v933_v7  ;;  %862 = vmatprep.subr.bf16.mxu0 %v934_v8  ;;  %v950_v24 = vld [vmem:[%s1150_s1 + $0x48] sm:$0xff]   ;;  %v954_v28 = vld [vmem:[%s1150_s1 + $0x40] sm:$0xff]  }
  0x15   : > { %884 = vmatprep.subr.bf16.mxu1 %v935_v9  ;;  %v951_v25 = vld [vmem:[%s1150_s1 + $0xc8] sm:$0xff]   ;;  %v955_v29 = vld [vmem:[%s1150_s1 + $0xc0] sm:$0xff]  }
  0x16   : > { %v952_v26 = vld [vmem:[%s1150_s1 + $0x8] sm:$0xff]   ;;  %v956_v30 = vld [vmem:[%s1150_s1] sm:$0xff]  }
  0x17   : > { %863 = vmatpush3.bf16.msra.mxu0 %v936_v10  ;;  %v953_v27 = vld [vmem:[%s1150_s1 + $0x88] sm:$0xff]   ;;  %v957_v31 = vld [vmem:[%s1150_s1 + $0x80] sm:$0xff]  }
  0x18   : > { %885 = vmatpush3.bf16.msra.mxu1 %v937_v11  ;;  %864 = vmatprep.subr.bf16.mxu0 %v938_v12  ;;  %v958_v32 = vld [vmem:[%s229_s8] ss:$16 sps:$4 sm:$0xff]   ;;  %v960_v33 = vld [vmem:[%s229_s8 + $0x4] ss:$16 sps:$4 sm:$0xff]   ;;  %v961_v34 = vld [vmem:[%s229_s8 + $0x8] ss:$16 sps:$4 sm:$0xff]  }
  0x19   : > { %886 = vmatprep.subr.bf16.mxu1 %v939_v13  ;;  %v963_v35 = vld [vmem:[%s229_s8 + $0xc] ss:$16 sps:$4 sm:$0xff]   ;;  %567 = vmatprep.mubr.bf16.mxu0 %v960_v33 }
  0x1a   : > { %608 = vmatprep.mubr.bf16.mxu1 %v963_v35 }
  0x1b   : > { %865 = vmatpush3.bf16.msra.mxu0 %v940_v14 }
  0x1c   : > { %887 = vmatpush3.bf16.msra.mxu1 %v941_v15  ;;  %866 = vmatprep.subr.bf16.mxu0 %v942_v16 }
  0x1d   : > { %888 = vmatprep.subr.bf16.mxu1 %v943_v17 }
  0x1f   : > { %867 = vmatpush3.bf16.msra.mxu0 %v944_v18 }
  0x20   : > { %889 = vmatpush3.bf16.msra.mxu1 %v945_v19  ;;  %868 = vmatprep.subr.bf16.mxu0 %v946_v20 }
  0x21   : > { %890 = vmatprep.subr.bf16.mxu1 %v947_v21 }
  0x23   : > { %869 = vmatpush3.bf16.msra.mxu0 %v948_v22 }
  0x24   : > { %891 = vmatpush3.bf16.msra.mxu1 %v949_v23  ;;  %870 = vmatprep.subr.bf16.mxu0 %v950_v24 }
  0x25   : > { %892 = vmatprep.subr.bf16.mxu1 %v951_v25 }
  0x27   : > { %871 = vmatpush3.bf16.msra.mxu0 %v952_v26 }
  0x28   : > { %893 = vmatpush3.bf16.msra.mxu1 %v953_v27  ;;  %872 = vmatprep.subr.bf16.mxu0 %v954_v28 }
  0x29   : > { %894 = vmatprep.subr.bf16.mxu1 %v955_v29 }
  0x2b   : > { %873 = vmatpush3.bf16.msra.mxu0 %v956_v30 }
  0x2c   : > { %895 = vmatpush3.bf16.msra.mxu1 %v957_v31 }
  0x2e   : > { %568 = vmatmul.mubr.bf16.vlgmr.msra.gmra.mxu0 %v958_v32 }
  0x2f   : > { %609 = vmatmul.mubr.bf16.vlgmr.msra.gmra.mxu1 %v961_v34 }
  0xee   : > { %v874_v36 = vpop.f32.mrf.mxu0 }
  0xef   : > { %v896_v37 = vpop.f32.mrf.mxu1 }
  0xf0   : > { %v875_v38 = vpop.f32.mrf.mxu0 }
  0xf1   : > { %v897_v39 = vpop.f32.mrf.mxu1  ;;  %v876_v40 = vadd.f32 %v875_v38, %v874_v36 }
  0xf2   : > { %v898_v41 = vadd.f32 %v897_v39, %v896_v37  ;;  %v877_v42 = vpop.f32.mrf.mxu0 }
  0xf3   : > { %v899_v43 = vpop.f32.mrf.mxu1 }
  0xf4   : > { %v878_v44 = vpop.f32.mrf.mxu0  ;;  %v611_v47 = vadd.f32 %v898_v41, %v876_v40 }
  0xf5   : > { %v879_v45 = vadd.f32 %v878_v44, %v877_v42  ;;  %v900_v46 = vpop.f32.mrf.mxu1 }
  0xf6   : > { %v901_v48 = vadd.f32 %v900_v46, %v899_v43  ;;  %v634_v50 = vmul.f32 %v611_v47, %v611_v47 }
  0xf8   : > { %v614_v49 = vadd.f32 %v901_v48, %v879_v45 }
  0xfa   : > { %v856_v51 = vpack.c.bf16 %v614_v49, %v611_v47  ;;  %v627_v52 = vadd.f32 %v614_v49, %v611_v47  ;;  %v635_v53 = vmul.f32 %v614_v49, %v614_v49 }
  0xfc   : > { %857 = vst [vmem:[%s244_s20] sm:$0xff] %v856_v51   ;;  %v628_v54 = vrot.slane %v627_v52, 4  ;;  %v636_v55 = vadd.f32 %v635_v53, %v634_v50 }
  0xfe   : > { %v629_v56 = vadd.f32 %v628_v54, %v627_v52  ;;  %v637_v57 = vrot.slane %v636_v55, 4 }
 0x100   : > { %v630_v58 = vrot.slane %v629_v56, 2  ;;  %v638_v59 = vadd.f32 %v637_v57, %v636_v55 }
 0x102   : > { %v631_v60 = vadd.f32 %v630_v58, %v629_v56  ;;  %v639_v61 = vrot.slane %v638_v59, 2 }
 0x104   : > { %v632_v62 = vrot.slane %v631_v60, 1  ;;  %v640_v63 = vadd.f32 %v639_v61, %v638_v59 }
 0x106   : > { %v641_v0 = vrot.slane %v640_v63, 1  ;;  %v633_v1 = vadd.f32 %v632_v62, %v631_v60 }
 0x108   : > { %v642_v2 = vadd.f32 %v641_v0, %v640_v63 }
 0x10a   : > { %v644_v3 = vsel %vm643_vm0, %v633_v1, %v642_v2 }
 0x10b   : > { %645 = vst [vmem:[%s253_s23] sm:$0x3] %v644_v3 }
 0x10c PF: > { %s14_s14 = sadd.s32 1, %s986_s14   ;;  %s1153_s12 = smov %s982_s13 }
 0x10d   : > { %p11_p6 = scmp.ge.s32.totalorder %s14_s14, 4   ;;  %s1154_s13 = smov %s1156_s15 }
 0x10f   :  { %13 = sbr.rel (!%p11_p6) target bundleno = 2 (0x2), region = 73 }

// kernel: _lambda_.14
= control target key start
LH: loop header
LB: loop body
LE: loop exit
PB: predicated region body
PF: predicated region fallthrough
CT: control target
= control target key end

     0   :  { %s1195_s1 = inlined_call_operand.vmem [shape: bf16[1,1024,128], index: 1, kind: input, shape index: {}]   ;;  %s1196_s0 = inlined_call_operand.vmem [shape: bf16[1,8,1024], index: 0, kind: input, shape index: {}]   ;;  %s1197_s2 = inlined_call_operand.vmem [shape: f32[1,128], index: 2, kind: input, shape index: {}]   ;;  %s1198_s3 = inlined_call_operand.vmem [shape: bf16[1,8,128], index: 3, kind: output, shape index: {}]  }
   0x1   :  { %v893_v0 = vld [vmem:[%s1195_s1 + $0x78] sm:$0xff]   ;;  %v897_v4 = vld [vmem:[%s1195_s1 + $0x70] sm:$0xff]   ;;  %v901_v8 = vld [vmem:[%s1195_s1 + $0x68] sm:$0xff]  }
   0x2   :  { %v894_v1 = vld [vmem:[%s1195_s1 + $0xf8] sm:$0xff]   ;;  %805 = vmatprep.subr.bf16.mxu0 %v893_v0  ;;  %v898_v5 = vld [vmem:[%s1195_s1 + $0xf0] sm:$0xff]   ;;  %v902_v9 = vld [vmem:[%s1195_s1 + $0xe8] sm:$0xff]  }
   0x3   :  { %v895_v2 = vld [vmem:[%s1195_s1 + $0x38] sm:$0xff]   ;;  %827 = vmatprep.subr.bf16.mxu1 %v894_v1  ;;  %v899_v6 = vld [vmem:[%s1195_s1 + $0x30] sm:$0xff]   ;;  %v903_v10 = vld [vmem:[%s1195_s1 + $0x28] sm:$0xff]  }
   0x4   :  { %v896_v3 = vld [vmem:[%s1195_s1 + $0xb8] sm:$0xff]   ;;  %806 = vmatpush3.bf16.msra.mxu0 %v895_v2  ;;  %v900_v7 = vld [vmem:[%s1195_s1 + $0xb0] sm:$0xff]   ;;  %v904_v11 = vld [vmem:[%s1195_s1 + $0xa8] sm:$0xff]  }
   0x5   :  { %828 = vmatpush3.bf16.msra.mxu1 %v896_v3  ;;  %807 = vmatprep.subr.bf16.mxu0 %v897_v4  ;;  %v905_v12 = vld [vmem:[%s1195_s1 + $0x60] sm:$0xff]   ;;  %v909_v16 = vld [vmem:[%s1195_s1 + $0x58] sm:$0xff]   ;;  %v913_v20 = vld [vmem:[%s1195_s1 + $0x50] sm:$0xff]  }
   0x6   :  { %829 = vmatprep.subr.bf16.mxu1 %v898_v5  ;;  %v906_v13 = vld [vmem:[%s1195_s1 + $0xe0] sm:$0xff]   ;;  %v910_v17 = vld [vmem:[%s1195_s1 + $0xd8] sm:$0xff]   ;;  %v914_v21 = vld [vmem:[%s1195_s1 + $0xd0] sm:$0xff]  }
   0x7   :  { %v907_v14 = vld [vmem:[%s1195_s1 + $0x20] sm:$0xff]   ;;  %v911_v18 = vld [vmem:[%s1195_s1 + $0x18] sm:$0xff]   ;;  %v915_v22 = vld [vmem:[%s1195_s1 + $0x10] sm:$0xff]  }
   0x8   :  { %808 = vmatpush3.bf16.msra.mxu0 %v899_v6  ;;  %v908_v15 = vld [vmem:[%s1195_s1 + $0xa0] sm:$0xff]   ;;  %v912_v19 = vld [vmem:[%s1195_s1 + $0x98] sm:$0xff]   ;;  %v916_v23 = vld [vmem:[%s1195_s1 + $0x90] sm:$0xff]  }
   0x9   :  { %830 = vmatpush3.bf16.msra.mxu1 %v900_v7  ;;  %809 = vmatprep.subr.bf16.mxu0 %v901_v8  ;;  %v917_v24 = vld [vmem:[%s1195_s1 + $0x48] sm:$0xff]   ;;  %v921_v28 = vld [vmem:[%s1195_s1 + $0x40] sm:$0xff]   ;;  %v929_v38 = vld [vmem:[%s1195_s1 + $0x178] sm:$0xff]  }
   0xa   :  { %831 = vmatprep.subr.bf16.mxu1 %v902_v9  ;;  %v918_v25 = vld [vmem:[%s1195_s1 + $0xc8] sm:$0xff]   ;;  %v922_v29 = vld [vmem:[%s1195_s1 + $0xc0] sm:$0xff]   ;;  %v930_v39 = vld [vmem:[%s1195_s1 + $0x1f8] sm:$0xff]  }
   0xb   :  { %v919_v26 = vld [vmem:[%s1195_s1 + $0x8] sm:$0xff]   ;;  %v923_v30 = vld [vmem:[%s1195_s1] sm:$0xff]   ;;  %v931_v40 = vld [vmem:[%s1195_s1 + $0x138] sm:$0xff]  }
   0xc   :  { %810 = vmatpush3.bf16.msra.mxu0 %v903_v10  ;;  %v920_v27 = vld [vmem:[%s1195_s1 + $0x88] sm:$0xff]   ;;  %v924_v31 = vld [vmem:[%s1195_s1 + $0x80] sm:$0xff]   ;;  %v932_v41 = vld [vmem:[%s1195_s1 + $0x1b8] sm:$0xff]  }
   0xd   :  { %832 = vmatpush3.bf16.msra.mxu1 %v904_v11  ;;  %811 = vmatprep.subr.bf16.mxu0 %v905_v12  ;;  %v15_v32 = vld [vmem:[%s1196_s0] sm:$0xff]  ;;  %v16_v33 = vld [vmem:[%s1196_s0 + $0x8] sm:$0xff]  ;;  %v933_v42 = vld [vmem:[%s1195_s1 + $0x170] sm:$0xff]  }
   0xe   :  { %833 = vmatprep.subr.bf16.mxu1 %v906_v13  ;;  %v733_v34 = vcombine.low %v15_v32, %v15_v32  ;;  %v734_v35 = vcombine.high %v15_v32, %v15_v32  ;;  %v735_v36 = vcombine.low %v16_v33, %v16_v33  ;;  %v736_v37 = vcombine.high %v16_v33, %v16_v33  ;;  %v934_v43 = vld [vmem:[%s1195_s1 + $0x1f0] sm:$0xff]   ;;  %v937_v46 = vld [vmem:[%s1195_s1 + $0x168] sm:$0xff]   ;;  %v941_v50 = vld [vmem:[%s1195_s1 + $0x160] sm:$0xff]  }
   0xf   :  { %v935_v44 = vld [vmem:[%s1195_s1 + $0x130] sm:$0xff]   ;;  %v938_v47 = vld [vmem:[%s1195_s1 + $0x1e8] sm:$0xff]   ;;  %v942_v51 = vld [vmem:[%s1195_s1 + $0x1e0] sm:$0xff]  }
  0x10   :  { %812 = vmatpush3.bf16.msra.mxu0 %v907_v14  ;;  %598 = vmatprep.mubr.bf16.mxu0 %v734_v35  ;;  %v936_v45 = vld [vmem:[%s1195_s1 + $0x1b0] sm:$0xff]   ;;  %v939_v48 = vld [vmem:[%s1195_s1 + $0x128] sm:$0xff]   ;;  %v943_v52 = vld [vmem:[%s1195_s1 + $0x120] sm:$0xff]  }
  0x11   :  { %834 = vmatpush3.bf16.msra.mxu1 %v908_v15  ;;  %813 = vmatprep.subr.bf16.mxu0 %v909_v16  ;;  %v940_v49 = vld [vmem:[%s1195_s1 + $0x1a8] sm:$0xff]   ;;  %v944_v53 = vld [vmem:[%s1195_s1 + $0x1a0] sm:$0xff]   ;;  %v945_v54 = vld [vmem:[%s1195_s1 + $0x158] sm:$0xff]  }
  0x12   :  { %835 = vmatprep.subr.bf16.mxu1 %v910_v17  ;;  %638 = vmatprep.mubr.bf16.mxu1 %v736_v37  ;;  %v946_v55 = vld [vmem:[%s1195_s1 + $0x1d8] sm:$0xff]   ;;  %v949_v58 = vld [vmem:[%s1195_s1 + $0x150] sm:$0xff]   ;;  %v953_v62 = vld [vmem:[%s1195_s1 + $0x148] sm:$0xff]  }
  0x13   :  { %v947_v56 = vld [vmem:[%s1195_s1 + $0x118] sm:$0xff]   ;;  %v950_v59 = vld [vmem:[%s1195_s1 + $0x1d0] sm:$0xff]   ;;  %v954_v63 = vld [vmem:[%s1195_s1 + $0x1c8] sm:$0xff]  }
  0x14   :  { %814 = vmatpush3.bf16.msra.mxu0 %v911_v18  ;;  %v948_v57 = vld [vmem:[%s1195_s1 + $0x198] sm:$0xff]   ;;  %v951_v60 = vld [vmem:[%s1195_s1 + $0x110] sm:$0xff]   ;;  %v955_v0 = vld [vmem:[%s1195_s1 + $0x108] sm:$0xff]  }
  0x15   :  { %836 = vmatpush3.bf16.msra.mxu1 %v912_v19  ;;  %815 = vmatprep.subr.bf16.mxu0 %v913_v20  ;;  %v952_v61 = vld [vmem:[%s1195_s1 + $0x190] sm:$0xff]   ;;  %v956_v1 = vld [vmem:[%s1195_s1 + $0x188] sm:$0xff]   ;;  %v957_v2 = vld [vmem:[%s1195_s1 + $0x140] sm:$0xff]  }
  0x16   :  { %837 = vmatprep.subr.bf16.mxu1 %v914_v21  ;;  %v958_v3 = vld [vmem:[%s1195_s1 + $0x1c0] sm:$0xff]   ;;  %v17_v6 = vld [vmem:[%s1196_s0 + $0x10] sm:$0xff]  ;;  %v18_v9 = vld [vmem:[%s1196_s0 + $0x18] sm:$0xff] }
  0x17   :  { %v959_v4 = vld [vmem:[%s1195_s1 + $0x100] sm:$0xff]   ;;  %v737_v7 = vcombine.low %v17_v6, %v17_v6  ;;  %v738_v8 = vcombine.high %v17_v6, %v17_v6  ;;  %v739_v10 = vcombine.low %v18_v9, %v18_v9  ;;  %v740_v11 = vcombine.high %v18_v9, %v18_v9 }
  0x18   :  { %816 = vmatpush3.bf16.msra.mxu0 %v915_v22  ;;  %v960_v5 = vld [vmem:[%s1195_s1 + $0x180] sm:$0xff]  }
  0x19   :  { %838 = vmatpush3.bf16.msra.mxu1 %v916_v23  ;;  %817 = vmatprep.subr.bf16.mxu0 %v917_v24  ;;  %v732_v21 = vld [vmem:[%s1197_s2] ss:$0 sm:$0xff] }
  0x1a   :  { %839 = vmatprep.subr.bf16.mxu1 %v918_v25 }
  0x1c   :  { %818 = vmatpush3.bf16.msra.mxu0 %v919_v26 }
  0x1d   :  { %840 = vmatpush3.bf16.msra.mxu1 %v920_v27  ;;  %819 = vmatprep.subr.bf16.mxu0 %v921_v28 }
  0x1e   :  { %841 = vmatprep.subr.bf16.mxu1 %v922_v29 }
  0x20   :  { %820 = vmatpush3.bf16.msra.mxu0 %v923_v30 }
  0x21   :  { %842 = vmatpush3.bf16.msra.mxu1 %v924_v31  ;;  %849 = vmatprep.subr.bf16.mxu0 %v929_v38 }
  0x22   :  { %871 = vmatprep.subr.bf16.mxu1 %v930_v39 }
  0x23   :  { %599 = vmatmul.mubr.bf16.vlgmr.msra.gmra.mxu0 %v733_v34 }
  0x24   :  { %639 = vmatmul.mubr.bf16.vlgmr.msra.gmra.mxu1 %v735_v36  ;;  %850 = vmatpush3.bf16.msra.mxu0 %v931_v40 }
  0x25   :  { %872 = vmatpush3.bf16.msra.mxu1 %v932_v41  ;;  %851 = vmatprep.subr.bf16.mxu0 %v933_v42 }
  0x26   :  { %873 = vmatprep.subr.bf16.mxu1 %v934_v43  ;;  %678 = vmatprep.mubr.bf16.mxu0 %v738_v8 }
  0x27   :  { %718 = vmatprep.mubr.bf16.mxu1 %v740_v11 }
  0x28   :  { %852 = vmatpush3.bf16.msra.mxu0 %v935_v44 }
  0x29   :  { %874 = vmatpush3.bf16.msra.mxu1 %v936_v45  ;;  %853 = vmatprep.subr.bf16.mxu0 %v937_v46 }
  0x2a   :  { %875 = vmatprep.subr.bf16.mxu1 %v938_v47 }
  0x2c   :  { %854 = vmatpush3.bf16.msra.mxu0 %v939_v48 }
  0x2d   :  { %876 = vmatpush3.bf16.msra.mxu1 %v940_v49  ;;  %855 = vmatprep.subr.bf16.mxu0 %v941_v50 }
  0x2e   :  { %877 = vmatprep.subr.bf16.mxu1 %v942_v51 }
  0x30   :  { %856 = vmatpush3.bf16.msra.mxu0 %v943_v52 }
  0x31   :  { %878 = vmatpush3.bf16.msra.mxu1 %v944_v53  ;;  %857 = vmatprep.subr.bf16.mxu0 %v945_v54 }
  0x32   :  { %879 = vmatprep.subr.bf16.mxu1 %v946_v55 }
  0x34   :  { %858 = vmatpush3.bf16.msra.mxu0 %v947_v56 }
  0x35   :  { %880 = vmatpush3.bf16.msra.mxu1 %v948_v57  ;;  %859 = vmatprep.subr.bf16.mxu0 %v949_v58 }
  0x36   :  { %881 = vmatprep.subr.bf16.mxu1 %v950_v59 }
  0x38   :  { %860 = vmatpush3.bf16.msra.mxu0 %v951_v60 }
  0x39   :  { %882 = vmatpush3.bf16.msra.mxu1 %v952_v61  ;;  %861 = vmatprep.subr.bf16.mxu0 %v953_v62 }
  0x3a   :  { %883 = vmatprep.subr.bf16.mxu1 %v954_v63 }
  0x3c   :  { %862 = vmatpush3.bf16.msra.mxu0 %v955_v0 }
  0x3d   :  { %884 = vmatpush3.bf16.msra.mxu1 %v956_v1  ;;  %863 = vmatprep.subr.bf16.mxu0 %v957_v2 }
  0x3e   :  { %885 = vmatprep.subr.bf16.mxu1 %v958_v3 }
  0x40   :  { %864 = vmatpush3.bf16.msra.mxu0 %v959_v4 }
  0x41   :  { %886 = vmatpush3.bf16.msra.mxu1 %v960_v5 }
  0x43   :  { %679 = vmatmul.mubr.bf16.vlgmr.msra.gmra.mxu0 %v737_v7 }
  0x44   :  { %719 = vmatmul.mubr.bf16.vlgmr.msra.gmra.mxu1 %v739_v10 }
  0xe3   :  { %v821_v12 = vpop.f32.mrf.mxu0 }
  0xe4   :  { %v843_v13 = vpop.f32.mrf.mxu1 }
  0xe5   :  { %v822_v14 = vpop.f32.mrf.mxu0 }
  0xe6   :  { %v844_v15 = vpop.f32.mrf.mxu1  ;;  %v823_v20 = vadd.f32 %v822_v14, %v821_v12 }
  0xe7   :  { %v824_v16 = vpop.f32.mrf.mxu0  ;;  %v845_v23 = vadd.f32 %v844_v15, %v843_v13 }
  0xe8   :  { %v846_v17 = vpop.f32.mrf.mxu1  ;;  %v601_v22 = vadd.f32 %v823_v20, %v732_v21 }
  0xe9   :  { %v825_v18 = vpop.f32.mrf.mxu0 }
  0xea   :  { %v847_v19 = vpop.f32.mrf.mxu1  ;;  %v641_v28 = vadd.f32 %v845_v23, %v601_v22 }
 0x103   :  { %v865_v24 = vpop.f32.mrf.mxu0 }
 0x104   :  { %v887_v25 = vpop.f32.mrf.mxu1 }
 0x105   :  { %v866_v26 = vpop.f32.mrf.mxu0 }
 0x106   :  { %v888_v27 = vpop.f32.mrf.mxu1  ;;  %v867_v29 = vadd.f32 %v866_v26, %v865_v24 }
 0x107   :  { %v868_v30 = vpop.f32.mrf.mxu0  ;;  %v889_v33 = vadd.f32 %v888_v27, %v887_v25 }
 0x108   :  { %v890_v31 = vpop.f32.mrf.mxu1  ;;  %v681_v32 = vadd.f32 %v867_v29, %v641_v28 }
 0x109   :  { %v869_v34 = vpop.f32.mrf.mxu0 }
 0x10a   :  { %v891_v35 = vpop.f32.mrf.mxu1  ;;  %v721_v36 = vadd.f32 %v889_v33, %v681_v32 }
 0x10c   :  { %v726_v37 = vpack.c.bf16 %v721_v36, %v721_v36 }
 0x10e   :  { %727 = vst [vmem:[%s1198_s3] sm:$0xf] %v726_v37 }

// kernel: _lambda_.15
= control target key start
LH: loop header
LB: loop body
LE: loop exit
PB: predicated region body
PF: predicated region fallthrough
CT: control target
= control target key end

     0   :  { %s711_s12 = smov 0   ;;  %s713_s13 = smov 0   ;;  %s774_s0 = inlined_call_operand.vmem [shape: bf16[4,8,256], index: 0, kind: input, shape index: {}]   ;;  %s775_s1 = inlined_call_operand.vmem [shape: bf16[4,256,128], index: 1, kind: input, shape index: {}]   ;;  %s776_s2 = inlined_call_operand.vmem [shape: bf16[4,8,128], index: 2, kind: output, shape index: {0}]   ;;  %s777_s3 = inlined_call_operand.vmem [shape: f32[4,1,2,128], index: 3, kind: output, shape index: {1}]  }
   0x1   :  { %s715_s14 = smov 0  }
   0x2 LB: > { %s26_s15 = sadd.s32 1, %s685_s13  ;;  %p574_p0 = scmp.ge.s32.totalorder %s689_s14, 1  ;;  %s689_s14 = sphi %s715_s14, %s14_s14   ;;  %s685_s13 = sphi %s713_s13, %s779_s13   ;;  %s681_s12 = sphi %s711_s12, %s778_s12  }
   0x3   : > { %p28_p1 = scmp.ge.s32.totalorder %s26_s15, 4  ;;  %p172_p2 = scmp.lt.s32.totalorder %s689_s14, 5 }
   0x5   : > { %s781_s15 = smov (%p28_p1, %s26_s15), 0  ;;  %p173_p3 = pnand %p574_p0, %p172_p2 }
   0x6   : > { %p214_p4 = scmp.lt.s32.totalorder (!%p173_p3), %s681_s12, 3 }
   0x7   : > { %176 = sbr.rel (%p173_p3) target bundleno = 261 (0x105), region = 28 }
   0xc   : > { %s783_s12 = smov (!%p214_p4, %s681_s12), 3  ;;  %vm434_vm0 = vcmask 1040384  }
   0xd   : > { %s602_s16 = sshll.u32 %s783_s12, 7  ;;  %s601_s20 = sshll.u32 %s783_s12, 3 }
   0xe   : > { %s735_s19 = scalar_lea.vmem %s775_s1, %s602_s16  ;;  %s222_s23 = scalar_lea.vmem %s774_s0, %s601_s20 }
   0xf   : > { %v649_v0 = vld [vmem:[%s735_s19 + $0x78] sm:$0xff]   ;;  %v651_v2 = vld [vmem:[%s735_s19 + $0x70] sm:$0xff]   ;;  %v653_v4 = vld [vmem:[%s735_s19 + $0x68] sm:$0xff]   ;;  %s579_s24 = sshll.u32 %s783_s12, 2  ;;  %s580_s28 = sshll.u32 %s783_s12, 1 }
  0x10   : > { %v650_v1 = vld [vmem:[%s735_s19 + $0x38] sm:$0xff]   ;;  %603 = vmatprep.subr.bf16.mxu0 %v649_v0  ;;  %v652_v3 = vld [vmem:[%s735_s19 + $0x30] sm:$0xff]   ;;  %v654_v5 = vld [vmem:[%s735_s19 + $0x28] sm:$0xff]   ;;  %s234_s27 = scalar_lea.vmem %s776_s2, %s579_s24  ;;  %s241_s4 = scalar_lea.vmem %s777_s3, %s580_s28 }
  0x11   : > { %604 = vmatpush3.bf16.msra.mxu0 %v650_v1  ;;  %v655_v6 = vld [vmem:[%s735_s19 + $0x60] sm:$0xff]   ;;  %v657_v8 = vld [vmem:[%s735_s19 + $0x58] sm:$0xff]   ;;  %v659_v10 = vld [vmem:[%s735_s19 + $0x50] sm:$0xff]  }
  0x12   : > { %605 = vmatprep.subr.bf16.mxu0 %v651_v2  ;;  %v656_v7 = vld [vmem:[%s735_s19 + $0x20] sm:$0xff]   ;;  %v658_v9 = vld [vmem:[%s735_s19 + $0x18] sm:$0xff]   ;;  %v660_v13 = vld [vmem:[%s735_s19 + $0x10] sm:$0xff]  }
  0x13   : > { %v243_v11 = vld [vmem:[%s222_s23] sm:$0xff]  ;;  %v661_v14 = vld [vmem:[%s735_s19 + $0x48] sm:$0xff]  }
  0x14   : > { %v582_v12 = vcombine.high %v243_v11, %v243_v11  ;;  %v662_v15 = vld [vmem:[%s735_s19 + $0x8] sm:$0xff]   ;;  %v663_v16 = vld [vmem:[%s735_s19 + $0x40] sm:$0xff]   ;;  %v581_v18 = vcombine.low %v243_v11, %v243_v11 }
  0x15   : > { %606 = vmatpush3.bf16.msra.mxu0 %v652_v3  ;;  %v664_v17 = vld [vmem:[%s735_s19] sm:$0xff]  }
  0x16   : > { %607 = vmatprep.subr.bf16.mxu0 %v653_v4  ;;  %411 = vmatprep.mubr.bf16.mxu0 %v582_v12 }
  0x19   : > { %608 = vmatpush3.bf16.msra.mxu0 %v654_v5 }
  0x1a   : > { %609 = vmatprep.subr.bf16.mxu0 %v655_v6 }
  0x1d   : > { %610 = vmatpush3.bf16.msra.mxu0 %v656_v7 }
  0x1e   : > { %611 = vmatprep.subr.bf16.mxu0 %v657_v8 }
  0x21   : > { %612 = vmatpush3.bf16.msra.mxu0 %v658_v9 }
  0x22   : > { %613 = vmatprep.subr.bf16.mxu0 %v659_v10 }
  0x25   : > { %614 = vmatpush3.bf16.msra.mxu0 %v660_v13 }
  0x26   : > { %615 = vmatprep.subr.bf16.mxu0 %v661_v14 }
  0x29   : > { %616 = vmatpush3.bf16.msra.mxu0 %v662_v15 }
  0x2a   : > { %617 = vmatprep.subr.bf16.mxu0 %v663_v16 }
  0x2d   : > { %618 = vmatpush3.bf16.msra.mxu0 %v664_v17 }
  0x30   : > { %412 = vmatmul.mubr.bf16.vlgmr.msra.gmra.mxu0 %v581_v18 }
  0xf0   : > { %v619_v19 = vpop.f32.mrf.mxu0 }
  0xf2   : > { %v620_v20 = vpop.f32.mrf.mxu0 }
  0xf3   : > { %v621_v21 = vadd.f32 %v620_v20, %v619_v19 }
  0xf4   : > { %v622_v22 = vpop.f32.mrf.mxu0 }
  0xf5   : > { %v419_v23 = vpack.c.bf16 %v621_v21, %v621_v21  ;;  %v421_v24 = vrot.slane %v621_v21, 4  ;;  %v427_v25 = vmul.f32 %v621_v21, %v621_v21 }
  0xf6   : > { %v623_v26 = vpop.f32.mrf.mxu0 }
  0xf7   : > { %420 = vst [vmem:[%s234_s27] sm:$0xf] %v419_v23  ;;  %v422_v27 = vadd.f32 %v621_v21, %v421_v24  ;;  %v428_v28 = vrot.slane %v427_v25, 4 }
  0xf9   : > { %v423_v29 = vrot.slane %v422_v27, 2  ;;  %v429_v30 = vadd.f32 %v428_v28, %v427_v25 }
  0xfb   : > { %v424_v31 = vadd.f32 %v423_v29, %v422_v27  ;;  %v430_v32 = vrot.slane %v429_v30, 2 }
  0xfd   : > { %v425_v33 = vrot.slane %v424_v31, 1  ;;  %v431_v34 = vadd.f32 %v430_v32, %v429_v30 }
  0xff   : > { %v432_v35 = vrot.slane %v431_v34, 1  ;;  %v426_v36 = vadd.f32 %v425_v33, %v424_v31 }
 0x101   : > { %v433_v37 = vadd.f32 %v432_v35, %v431_v34 }
 0x103   : > { %v435_v38 = vsel %vm434_vm0, %v426_v36, %v433_v37 }
 0x104   : > { %436 = vst [vmem:[%s241_s4] sm:$0x3] %v435_v38 }
 0x105 PF: > { %s14_s14 = sadd.s32 1, %s689_s14   ;;  %s778_s12 = smov %s685_s13 }
 0x106   : > { %p11_p5 = scmp.ge.s32.totalorder %s14_s14, 6   ;;  %s779_s13 = smov %s781_s15 }
 0x108   :  { %13 = sbr.rel (!%p11_p5) target bundleno = 2 (0x2), region = 73 }

// kernel: _lambda_.16
= control target key start
LH: loop header
LB: loop body
LE: loop exit
PB: predicated region body
PF: predicated region fallthrough
CT: control target
= control target key end

     0   :  { %s1087_s12 = smov 0   ;;  %s1089_s13 = smov 0   ;;  %s1166_s0 = inlined_call_operand.vmem [shape: bf16[4,32,512], index: 0, kind: input, shape index: {}]   ;;  %s1167_s1 = inlined_call_operand.vmem [shape: bf16[4,512,128], index: 1, kind: input, shape index: {}]   ;;  %s1168_s2 = inlined_call_operand.vmem [shape: bf16[4,32,128], index: 2, kind: output, shape index: {0}]   ;;  %s1169_s3 = inlined_call_operand.vmem [shape: f32[4,1,2,128], index: 3, kind: output, shape index: {1}]  }
   0x1   :  { %s1091_s14 = smov 0  }
   0x2 LB: > { %s26_s15 = sadd.s32 1, %s1061_s13  ;;  %p847_p0 = scmp.ge.s32.totalorder %s1065_s14, 1  ;;  %s1065_s14 = sphi %s1091_s14, %s14_s14   ;;  %s1061_s13 = sphi %s1089_s13, %s1171_s13   ;;  %s1057_s12 = sphi %s1087_s12, %s1170_s12  }
   0x3   : > { %p28_p1 = scmp.ge.s32.totalorder %s26_s15, 4  ;;  %p174_p2 = scmp.lt.s32.totalorder %s1065_s14, 5 }
   0x5   : > { %s1173_s15 = smov (%p28_p1, %s26_s15), 0  ;;  %p175_p3 = pnand %p847_p0, %p174_p2 }
   0x6   : > { %p220_p4 = scmp.lt.s32.totalorder (!%p175_p3), %s1057_s12, 3 }
   0x7   : > { %178 = sbr.rel (%p175_p3) target bundleno = 279 (0x117), region = 28 }
   0xc   : > { %s1175_s12 = smov (!%p220_p4, %s1057_s12), 3  ;;  %vm697_vm0 = vcmask 1040384  }
   0xd   : > { %s902_s16 = sshll.u32 %s1175_s12, 8  ;;  %s901_s20 = sshll.u32 %s1175_s12, 6 }
   0xe   : > { %s1111_s19 = scalar_lea.vmem %s1167_s1, %s902_s16  ;;  %s228_s23 = scalar_lea.vmem %s1166_s0, %s901_s20 }
   0xf   : > { %v999_v0 = vld [vmem:[%s1111_s19 + $0x78] sm:$0xff]   ;;  %v1003_v4 = vld [vmem:[%s1111_s19 + $0x70] sm:$0xff]   ;;  %v1007_v8 = vld [vmem:[%s1111_s19 + $0x68] sm:$0xff]   ;;  %s903_s24 = sshll.u32 %s1175_s12, 4  ;;  %s854_s28 = sshll.u32 %s1175_s12, 1 }
  0x10   : > { %v1000_v1 = vld [vmem:[%s1111_s19 + $0xf8] sm:$0xff]   ;;  %919 = vmatprep.subr.bf16.mxu0 %v999_v0  ;;  %v1004_v5 = vld [vmem:[%s1111_s19 + $0xf0] sm:$0xff]   ;;  %v1008_v9 = vld [vmem:[%s1111_s19 + $0xe8] sm:$0xff]   ;;  %s243_s27 = scalar_lea.vmem %s1168_s2, %s903_s24  ;;  %s251_s4 = scalar_lea.vmem %s1169_s3, %s854_s28 }
  0x11   : > { %v1001_v2 = vld [vmem:[%s1111_s19 + $0x38] sm:$0xff]   ;;  %947 = vmatprep.subr.bf16.mxu1 %v1000_v1  ;;  %v1005_v6 = vld [vmem:[%s1111_s19 + $0x30] sm:$0xff]   ;;  %v1009_v10 = vld [vmem:[%s1111_s19 + $0x28] sm:$0xff]  }
  0x12   : > { %v1002_v3 = vld [vmem:[%s1111_s19 + $0xb8] sm:$0xff]   ;;  %920 = vmatpush3.bf16.msra.mxu0 %v1001_v2  ;;  %v1006_v7 = vld [vmem:[%s1111_s19 + $0xb0] sm:$0xff]   ;;  %v1010_v11 = vld [vmem:[%s1111_s19 + $0xa8] sm:$0xff]  }
  0x13   : > { %948 = vmatpush3.bf16.msra.mxu1 %v1002_v3  ;;  %921 = vmatprep.subr.bf16.mxu0 %v1003_v4  ;;  %v1011_v12 = vld [vmem:[%s1111_s19 + $0x60] sm:$0xff]   ;;  %v1015_v16 = vld [vmem:[%s1111_s19 + $0x58] sm:$0xff]   ;;  %v1019_v20 = vld [vmem:[%s1111_s19 + $0x50] sm:$0xff]  }
  0x14   : > { %949 = vmatprep.subr.bf16.mxu1 %v1004_v5  ;;  %v1012_v13 = vld [vmem:[%s1111_s19 + $0xe0] sm:$0xff]   ;;  %v1016_v17 = vld [vmem:[%s1111_s19 + $0xd8] sm:$0xff]   ;;  %v1020_v21 = vld [vmem:[%s1111_s19 + $0xd0] sm:$0xff]  }
  0x15   : > { %v1013_v14 = vld [vmem:[%s1111_s19 + $0x20] sm:$0xff]   ;;  %v1017_v18 = vld [vmem:[%s1111_s19 + $0x18] sm:$0xff]   ;;  %v1021_v22 = vld [vmem:[%s1111_s19 + $0x10] sm:$0xff]  }
  0x16   : > { %922 = vmatpush3.bf16.msra.mxu0 %v1005_v6  ;;  %v1014_v15 = vld [vmem:[%s1111_s19 + $0xa0] sm:$0xff]   ;;  %v1018_v19 = vld [vmem:[%s1111_s19 + $0x98] sm:$0xff]   ;;  %v1022_v23 = vld [vmem:[%s1111_s19 + $0x90] sm:$0xff]  }
  0x17   : > { %950 = vmatpush3.bf16.msra.mxu1 %v1006_v7  ;;  %923 = vmatprep.subr.bf16.mxu0 %v1007_v8  ;;  %v1023_v24 = vld [vmem:[%s1111_s19 + $0x48] sm:$0xff]   ;;  %v1027_v28 = vld [vmem:[%s1111_s19 + $0x40] sm:$0xff]  }
  0x18   : > { %951 = vmatprep.subr.bf16.mxu1 %v1008_v9  ;;  %v1024_v25 = vld [vmem:[%s1111_s19 + $0xc8] sm:$0xff]   ;;  %v1028_v29 = vld [vmem:[%s1111_s19 + $0xc0] sm:$0xff]  }
  0x19   : > { %v1025_v26 = vld [vmem:[%s1111_s19 + $0x8] sm:$0xff]   ;;  %v1029_v30 = vld [vmem:[%s1111_s19] sm:$0xff]  }
  0x1a   : > { %924 = vmatpush3.bf16.msra.mxu0 %v1009_v10  ;;  %v1026_v27 = vld [vmem:[%s1111_s19 + $0x88] sm:$0xff]   ;;  %v1030_v31 = vld [vmem:[%s1111_s19 + $0x80] sm:$0xff]  }
  0x1b   : > { %952 = vmatpush3.bf16.msra.mxu1 %v1010_v11  ;;  %925 = vmatprep.subr.bf16.mxu0 %v1011_v12  ;;  %v1031_v32 = vld [vmem:[%s228_s23] ss:$16 sps:$4 sm:$0xff]   ;;  %v1033_v33 = vld [vmem:[%s228_s23 + $0x4] ss:$16 sps:$4 sm:$0xff]   ;;  %v1034_v34 = vld [vmem:[%s228_s23 + $0x8] ss:$16 sps:$4 sm:$0xff]  }
  0x1c   : > { %953 = vmatprep.subr.bf16.mxu1 %v1012_v13  ;;  %v1036_v35 = vld [vmem:[%s228_s23 + $0xc] ss:$16 sps:$4 sm:$0xff]   ;;  %589 = vmatprep.mubr.bf16.mxu0 %v1033_v33  ;;  %v1037_v36 = vld [vmem:[%s228_s23 + $0x24] ss:$16 sps:$4 sm:$0xff]   ;;  %v1041_v38 = vld [vmem:[%s228_s23 + $0x20] ss:$16 sps:$4 sm:$0xff]  }
  0x1d   : > { %638 = vmatprep.mubr.bf16.mxu1 %v1036_v35  ;;  %v1039_v37 = vld [vmem:[%s228_s23 + $0x2c] ss:$16 sps:$4 sm:$0xff]   ;;  %v1042_v39 = vld [vmem:[%s228_s23 + $0x28] ss:$16 sps:$4 sm:$0xff]  }
  0x1e   : > { %926 = vmatpush3.bf16.msra.mxu0 %v1013_v14 }
  0x1f   : > { %954 = vmatpush3.bf16.msra.mxu1 %v1014_v15  ;;  %927 = vmatprep.subr.bf16.mxu0 %v1015_v16 }
  0x20   : > { %955 = vmatprep.subr.bf16.mxu1 %v1016_v17 }
  0x22   : > { %928 = vmatpush3.bf16.msra.mxu0 %v1017_v18 }
  0x23   : > { %956 = vmatpush3.bf16.msra.mxu1 %v1018_v19  ;;  %929 = vmatprep.subr.bf16.mxu0 %v1019_v20 }
  0x24   : > { %957 = vmatprep.subr.bf16.mxu1 %v1020_v21 }
  0x26   : > { %930 = vmatpush3.bf16.msra.mxu0 %v1021_v22 }
  0x27   : > { %958 = vmatpush3.bf16.msra.mxu1 %v1022_v23  ;;  %931 = vmatprep.subr.bf16.mxu0 %v1023_v24 }
  0x28   : > { %959 = vmatprep.subr.bf16.mxu1 %v1024_v25 }
  0x2a   : > { %932 = vmatpush3.bf16.msra.mxu0 %v1025_v26 }
  0x2b   : > { %960 = vmatpush3.bf16.msra.mxu1 %v1026_v27  ;;  %933 = vmatprep.subr.bf16.mxu0 %v1027_v28 }
  0x2c   : > { %961 = vmatprep.subr.bf16.mxu1 %v1028_v29 }
  0x2e   : > { %934 = vmatpush3.bf16.msra.mxu0 %v1029_v30 }
  0x2f   : > { %962 = vmatpush3.bf16.msra.mxu1 %v1030_v31 }
  0x31   : > { %590 = vmatmul.mubr.bf16.vlgmr.msra.gmra.mxu0 %v1031_v32 }
  0x32   : > { %639 = vmatmul.mubr.bf16.vlgmr.msra.gmra.mxu1 %v1034_v34  ;;  %597 = vmatprep.mubr.bf16.mxu0 %v1037_v36 }
  0x33   : > { %646 = vmatprep.mubr.bf16.mxu1 %v1039_v37 }
  0x39   : > { %598 = vmatmul.mubr.bf16.gmra.mxu0 %v1041_v38 }
  0x3a   : > { %647 = vmatmul.mubr.bf16.gmra.mxu1 %v1042_v39 }
  0xf1   : > { %v935_v40 = vpop.f32.mrf.mxu0 }
  0xf2   : > { %v963_v41 = vpop.f32.mrf.mxu1 }
  0xf3   : > { %v936_v42 = vpop.f32.mrf.mxu0 }
  0xf4   : > { %v964_v43 = vpop.f32.mrf.mxu1  ;;  %v937_v46 = vadd.f32 %v936_v42, %v935_v40 }
  0xf5   : > { %v938_v44 = vpop.f32.mrf.mxu0  ;;  %v965_v47 = vadd.f32 %v964_v43, %v963_v41 }
  0xf6   : > { %v966_v45 = vpop.f32.mrf.mxu1 }
  0xf7   : > { %v939_v48 = vpop.f32.mrf.mxu0  ;;  %v641_v54 = vadd.f32 %v965_v47, %v937_v46 }
  0xf8   : > { %v940_v49 = vadd.f32 %v939_v48, %v938_v44  ;;  %v967_v50 = vpop.f32.mrf.mxu1 }
  0xf9   : > { %v968_v51 = vadd.f32 %v967_v50, %v966_v45  ;;  %v941_v52 = vpop.f32.mrf.mxu0  ;;  %v684_v4 = vmul.f32 %v641_v54, %v641_v54 }
  0xfa   : > { %v969_v53 = vpop.f32.mrf.mxu1 }
  0xfb   : > { %v644_v55 = vadd.f32 %v968_v51, %v940_v49  ;;  %v942_v56 = vpop.f32.mrf.mxu0 }
  0xfc   : > { %v943_v57 = vadd.f32 %v942_v56, %v941_v52  ;;  %v970_v58 = vpop.f32.mrf.mxu1 }
  0xfd   : > { %v911_v59 = vpack.c.bf16 %v644_v55, %v641_v54  ;;  %v971_v60 = vadd.f32 %v970_v58, %v969_v53  ;;  %v944_v61 = vpop.f32.mrf.mxu0  ;;  %v685_v63 = vmul.f32 %v644_v55, %v644_v55  ;;  %v675_v5 = vadd.f32 %v644_v55, %v641_v54 }
  0xfe   : > { %v972_v62 = vpop.f32.mrf.mxu1 }
  0xff   : > { %912 = vst [vmem:[%s243_s27] sm:$0xff] %v911_v59   ;;  %v649_v0 = vadd.f32 %v971_v60, %v943_v57  ;;  %v945_v1 = vpop.f32.mrf.mxu0  ;;  %v688_v8 = vadd.f32 %v685_v63, %v684_v4 }
 0x100   : > { %v946_v2 = vadd.f32 %v945_v1, %v944_v61  ;;  %v973_v3 = vpop.f32.mrf.mxu1 }
 0x101   : > { %v686_v6 = vmul.f32 %v649_v0, %v649_v0  ;;  %v974_v7 = vadd.f32 %v973_v3, %v972_v62  ;;  %v676_v9 = vadd.f32 %v675_v5, %v649_v0 }
 0x103   : > { %v652_v10 = vadd.f32 %v974_v7, %v946_v2  ;;  %v689_v11 = vadd.f32 %v688_v8, %v686_v6 }
 0x105   : > { %v916_v12 = vpack.c.bf16 %v652_v10, %v649_v0  ;;  %v677_v13 = vadd.f32 %v676_v9, %v652_v10  ;;  %v687_v14 = vmul.f32 %v652_v10, %v652_v10 }
 0x107   : > { %918 = vst [vmem:[%s243_s27 + $0x8] sm:$0xff] %v916_v12   ;;  %v678_v15 = vrot.slane %v677_v13, 4  ;;  %v690_v16 = vadd.f32 %v689_v11, %v687_v14 }
 0x109   : > { %v679_v17 = vadd.f32 %v678_v15, %v677_v13  ;;  %v691_v18 = vrot.slane %v690_v16, 4 }
 0x10b   : > { %v680_v19 = vrot.slane %v679_v17, 2  ;;  %v692_v20 = vadd.f32 %v691_v18, %v690_v16 }
 0x10d   : > { %v681_v21 = vadd.f32 %v680_v19, %v679_v17  ;;  %v693_v22 = vrot.slane %v692_v20, 2 }
 0x10f   : > { %v682_v23 = vrot.slane %v681_v21, 1  ;;  %v694_v24 = vadd.f32 %v693_v22, %v692_v20 }
 0x111   : > { %v695_v25 = vrot.slane %v694_v24, 1  ;;  %v683_v26 = vadd.f32 %v682_v23, %v681_v21 }
 0x113   : > { %v696_v27 = vadd.f32 %v695_v25, %v694_v24 }
 0x115   : > { %v698_v28 = vsel %vm697_vm0, %v683_v26, %v696_v27 }
 0x116   : > { %699 = vst [vmem:[%s251_s4] sm:$0x3] %v698_v28 }
 0x117 PF: > { %s14_s14 = sadd.s32 1, %s1065_s14   ;;  %s1170_s12 = smov %s1061_s13 }
 0x118   : > { %p11_p5 = scmp.ge.s32.totalorder %s14_s14, 6   ;;  %s1171_s13 = smov %s1173_s15 }
 0x11a   :  { %13 = sbr.rel (!%p11_p5) target bundleno = 2 (0x2), region = 73 }

// kernel: _lambda_.17
= control target key start
LH: loop header
LB: loop body
LE: loop exit
PB: predicated region body
PF: predicated region fallthrough
CT: control target
= control target key end

     0   :  { %s1174_s12 = smov 0   ;;  %s1176_s13 = smov 0   ;;  %s1288_s0 = inlined_call_operand.vmem [shape: bf16[4,128,256], index: 0, kind: input, shape index: {}]   ;;  %s1289_s1 = inlined_call_operand.vmem [shape: bf16[4,256,128], index: 1, kind: input, shape index: {}]   ;;  %s1290_s2 = inlined_call_operand.vmem [shape: bf16[4,128,128], index: 2, kind: output, shape index: {0}]   ;;  %s1291_s3 = inlined_call_operand.vmem [shape: f32[4,1,2,128], index: 3, kind: output, shape index: {1}]  }
   0x1   :  { %s1178_s14 = smov 0  }
   0x2 LB: > { %s26_s15 = sadd.s32 1, %s1148_s13  ;;  %p862_p0 = scmp.ge.s32.totalorder %s1152_s14, 1  ;;  %s1152_s14 = sphi %s1178_s14, %s14_s14   ;;  %s1148_s13 = sphi %s1176_s13, %s1293_s13   ;;  %s1144_s12 = sphi %s1174_s12, %s1292_s12  }
   0x3   : > { %p28_p1 = scmp.ge.s32.totalorder %s26_s15, 4  ;;  %p174_p2 = scmp.lt.s32.totalorder %s1152_s14, 5 }
   0x5   : > { %s1295_s15 = smov (%p28_p1, %s26_s15), 0  ;;  %p175_p3 = pnand %p862_p0, %p174_p2 }
   0x6   : > { %p220_p4 = scmp.lt.s32.totalorder (!%p175_p3), %s1144_s12, 3 }
   0x7   : > { %178 = sbr.rel (%p175_p3) target bundleno = 307 (0x133), region = 28 }
   0xc   : > { %s1297_s12 = smov (!%p220_p4, %s1144_s12), 3  ;;  %vm712_vm0 = vcmask 1040384  }
   0xd   : > { %s920_s16 = sshll.u32 %s1297_s12, 7  ;;  %s922_s23 = sshll.u32 %s1297_s12, 6 }
   0xe   : > { %s1198_s19 = scalar_lea.vmem %s1289_s1, %s920_s16  ;;  %s1212_s22 = scalar_lea.vmem %s1288_s0, %s920_s16 }
   0xf   : > { %v1090_v0 = vld [vmem:[%s1198_s19 + $0x78] sm:$0xff]   ;;  %v1092_v2 = vld [vmem:[%s1198_s19 + $0x70] sm:$0xff]   ;;  %v1094_v4 = vld [vmem:[%s1198_s19 + $0x68] sm:$0xff]   ;;  %s1245_s26 = scalar_lea.vmem %s1290_s2, %s922_s23  ;;  %s869_s27 = sshll.u32 %s1297_s12, 1 }
  0x10   : > { %v1091_v1 = vld [vmem:[%s1198_s19 + $0x38] sm:$0xff]   ;;  %986 = vmatprep.subr.bf16.mxu0 %v1090_v0  ;;  %1050 = vmatprep.subr.bf16.mxu1 %v1090_v0  ;;  %v1093_v3 = vld [vmem:[%s1198_s19 + $0x30] sm:$0xff]   ;;  %v1095_v5 = vld [vmem:[%s1198_s19 + $0x28] sm:$0xff]   ;;  %s251_s30 = scalar_lea.vmem %s1291_s3, %s869_s27 }
  0x11   : > { %987 = vmatpush3.bf16.msra.mxu0 %v1091_v1  ;;  %1058 = vmatpush3.bf16.msra.mxu1 %v1091_v1  ;;  %v1096_v6 = vld [vmem:[%s1198_s19 + $0x60] sm:$0xff]   ;;  %v1098_v8 = vld [vmem:[%s1198_s19 + $0x58] sm:$0xff]   ;;  %v1100_v10 = vld [vmem:[%s1198_s19 + $0x50] sm:$0xff]  }
  0x12   : > { %988 = vmatprep.subr.bf16.mxu0 %v1092_v2  ;;  %1051 = vmatprep.subr.bf16.mxu1 %v1092_v2  ;;  %v1097_v7 = vld [vmem:[%s1198_s19 + $0x20] sm:$0xff]   ;;  %v1099_v9 = vld [vmem:[%s1198_s19 + $0x18] sm:$0xff]   ;;  %v1101_v12 = vld [vmem:[%s1198_s19 + $0x10] sm:$0xff]  }
  0x13   : > { %v1108_v11 = vld [vmem:[%s1212_s22 + $0x4] ss:$8 sps:$4 sm:$0xff]   ;;  %v1106_v18 = vld [vmem:[%s1212_s22] ss:$8 sps:$4 sm:$0xff]   ;;  %v1109_v20 = vld [vmem:[%s1212_s22 + $0x14] ss:$8 sps:$4 sm:$0xff]  }
  0x14   : > { %v1114_v13 = vld [vmem:[%s1212_s22 + $0x44] ss:$8 sps:$4 sm:$0xff]   ;;  %509 = vmatprep.mubr.bf16.mxu0 %v1108_v11  ;;  %v1112_v19 = vld [vmem:[%s1212_s22 + $0x40] ss:$8 sps:$4 sm:$0xff]   ;;  %v1118_v21 = vld [vmem:[%s1212_s22 + $0x54] ss:$8 sps:$4 sm:$0xff]  }
  0x15   : > { %989 = vmatpush3.bf16.msra.mxu0 %v1093_v3  ;;  %1059 = vmatpush3.bf16.msra.mxu1 %v1093_v3  ;;  %v1102_v14 = vld [vmem:[%s1198_s19 + $0x48] sm:$0xff]   ;;  %v1104_v16 = vld [vmem:[%s1198_s19 + $0x40] sm:$0xff]   ;;  %v1111_v22 = vld [vmem:[%s1212_s22 + $0x10] ss:$8 sps:$4 sm:$0xff]  }
  0x16   : > { %990 = vmatprep.subr.bf16.mxu0 %v1094_v4  ;;  %1052 = vmatprep.subr.bf16.mxu1 %v1094_v4  ;;  %v1103_v15 = vld [vmem:[%s1198_s19 + $0x8] sm:$0xff]   ;;  %v1105_v17 = vld [vmem:[%s1198_s19] sm:$0xff]   ;;  %v1120_v23 = vld [vmem:[%s1212_s22 + $0x50] ss:$8 sps:$4 sm:$0xff]  }
  0x17   : > { %541 = vmatprep.mubr.bf16.mxu1 %v1114_v13  ;;  %v1115_v24 = vld [vmem:[%s1212_s22 + $0x24] ss:$8 sps:$4 sm:$0xff]   ;;  %v1117_v26 = vld [vmem:[%s1212_s22 + $0x20] ss:$8 sps:$4 sm:$0xff]   ;;  %v1121_v28 = vld [vmem:[%s1212_s22 + $0x34] ss:$8 sps:$4 sm:$0xff]  }
  0x18   : > { %v1124_v25 = vld [vmem:[%s1212_s22 + $0x64] ss:$8 sps:$4 sm:$0xff]   ;;  %v1126_v27 = vld [vmem:[%s1212_s22 + $0x60] ss:$8 sps:$4 sm:$0xff]   ;;  %v1127_v29 = vld [vmem:[%s1212_s22 + $0x74] ss:$8 sps:$4 sm:$0xff]  }
  0x19   : > { %991 = vmatpush3.bf16.msra.mxu0 %v1095_v5  ;;  %1060 = vmatpush3.bf16.msra.mxu1 %v1095_v5  ;;  %v1123_v30 = vld [vmem:[%s1212_s22 + $0x30] ss:$8 sps:$4 sm:$0xff]  }
  0x1a   : > { %992 = vmatprep.subr.bf16.mxu0 %v1096_v6  ;;  %1053 = vmatprep.subr.bf16.mxu1 %v1096_v6  ;;  %v1129_v31 = vld [vmem:[%s1212_s22 + $0x70] ss:$8 sps:$4 sm:$0xff]  }
  0x1d   : > { %993 = vmatpush3.bf16.msra.mxu0 %v1097_v7  ;;  %1061 = vmatpush3.bf16.msra.mxu1 %v1097_v7 }
  0x1e   : > { %994 = vmatprep.subr.bf16.mxu0 %v1098_v8  ;;  %1054 = vmatprep.subr.bf16.mxu1 %v1098_v8 }
  0x21   : > { %995 = vmatpush3.bf16.msra.mxu0 %v1099_v9  ;;  %1062 = vmatpush3.bf16.msra.mxu1 %v1099_v9 }
  0x22   : > { %996 = vmatprep.subr.bf16.mxu0 %v1100_v10  ;;  %1055 = vmatprep.subr.bf16.mxu1 %v1100_v10 }
  0x25   : > { %997 = vmatpush3.bf16.msra.mxu0 %v1101_v12  ;;  %1063 = vmatpush3.bf16.msra.mxu1 %v1101_v12 }
  0x26   : > { %998 = vmatprep.subr.bf16.mxu0 %v1102_v14  ;;  %1056 = vmatprep.subr.bf16.mxu1 %v1102_v14 }
  0x29   : > { %999 = vmatpush3.bf16.msra.mxu0 %v1103_v15  ;;  %1064 = vmatpush3.bf16.msra.mxu1 %v1103_v15 }
  0x2a   : > { %1000 = vmatprep.subr.bf16.mxu0 %v1104_v16  ;;  %1057 = vmatprep.subr.bf16.mxu1 %v1104_v16 }
  0x2d   : > { %1001 = vmatpush3.bf16.msra.mxu0 %v1105_v17  ;;  %1065 = vmatpush3.bf16.msra.mxu1 %v1105_v17 }
  0x30   : > { %510 = vmatmul.mubr.bf16.vlgmr.msra.gmra.mxu0 %v1106_v18  ;;  %542 = vmatmul.mubr.bf16.vlgmr.msra.gmra.mxu1 %v1112_v19 }
  0x31   : > { %517 = vmatprep.mubr.bf16.mxu0 %v1109_v20  ;;  %549 = vmatprep.mubr.bf16.mxu1 %v1118_v21 }
  0x38   : > { %518 = vmatmul.mubr.bf16.gmra.mxu0 %v1111_v22  ;;  %550 = vmatmul.mubr.bf16.gmra.mxu1 %v1120_v23 }
  0x39   : > { %525 = vmatprep.mubr.bf16.mxu0 %v1115_v24  ;;  %557 = vmatprep.mubr.bf16.mxu1 %v1124_v25 }
  0x40   : > { %526 = vmatmul.mubr.bf16.gmra.mxu0 %v1117_v26  ;;  %558 = vmatmul.mubr.bf16.gmra.mxu1 %v1126_v27 }
  0x41   : > { %533 = vmatprep.mubr.bf16.mxu0 %v1121_v28  ;;  %565 = vmatprep.mubr.bf16.mxu1 %v1127_v29 }
  0x48   : > { %534 = vmatmul.mubr.bf16.gmra.mxu0 %v1123_v30  ;;  %566 = vmatmul.mubr.bf16.gmra.mxu1 %v1129_v31 }
  0xf0   : > { %v1002_v32 = vpop.f32.mrf.mxu0  ;;  %v1026_v33 = vpop.f32.mrf.mxu1 }
  0xf2   : > { %v1003_v34 = vpop.f32.mrf.mxu0  ;;  %v1027_v35 = vpop.f32.mrf.mxu1 }
  0xf3   : > { %v1238_v38 = vadd.f32 %v1027_v35, %v1026_v33  ;;  %v1004_v41 = vadd.f32 %v1003_v34, %v1002_v32 }
  0xf4   : > { %v1005_v36 = vpop.f32.mrf.mxu0  ;;  %v1029_v37 = vpop.f32.mrf.mxu1 }
  0xf5   : > { %v675_v1 = vmul.f32 %v1004_v41, %v1004_v41 }
  0xf6   : > { %v1006_v39 = vpop.f32.mrf.mxu0  ;;  %v1030_v40 = vpop.f32.mrf.mxu1 }
  0xf7   : > { %v1007_v42 = vadd.f32 %v1006_v39, %v1005_v36  ;;  %v1240_v43 = vadd.f32 %v1030_v40, %v1029_v37 }
  0xf8   : > { %v1008_v44 = vpop.f32.mrf.mxu0  ;;  %v1032_v45 = vpop.f32.mrf.mxu1 }
  0xf9   : > { %v942_v46 = vpack.c.bf16 %v1007_v42, %v1004_v41  ;;  %v962_v47 = vpack.c.bf16 %v1240_v43, %v1238_v38  ;;  %v676_v62 = vmul.f32 %v1007_v42, %v1007_v42  ;;  %v654_v6 = vadd.f32 %v1007_v42, %v1004_v41 }
  0xfa   : > { %v1009_v48 = vpop.f32.mrf.mxu0  ;;  %v1033_v49 = vpop.f32.mrf.mxu1 }
  0xfb   : > { %943 = vst [vmem:[%s1245_s26] sm:$0xff] %v942_v46   ;;  %982 = vst [vmem:[%s1245_s26 + $0x20] sm:$0xff] %v962_v47   ;;  %v1251_v52 = vadd.f32 %v1033_v49, %v1032_v45  ;;  %v1010_v55 = vadd.f32 %v1009_v48, %v1008_v44  ;;  %v691_v8 = vadd.f32 %v676_v62, %v675_v1 }
  0xfc   : > { %v1011_v50 = vpop.f32.mrf.mxu0  ;;  %v1035_v51 = vpop.f32.mrf.mxu1  ;;  %v683_v47 = vmul.f32 %v1238_v38, %v1238_v38 }
  0xfd   : > { %v677_v2 = vmul.f32 %v1010_v55, %v1010_v55  ;;  %v655_v12 = vadd.f32 %v1010_v55, %v654_v6 }
  0xfe   : > { %v1012_v53 = vpop.f32.mrf.mxu0  ;;  %v1036_v54 = vpop.f32.mrf.mxu1 }
  0xff   : > { %v1013_v56 = vadd.f32 %v1012_v53, %v1011_v50  ;;  %v1253_v57 = vadd.f32 %v1036_v54, %v1035_v51  ;;  %v692_v15 = vadd.f32 %v691_v8, %v677_v2  ;;  %v684_v50 = vmul.f32 %v1240_v43, %v1240_v43 }
 0x100   : > { %v1014_v58 = vpop.f32.mrf.mxu0  ;;  %v1038_v59 = vpop.f32.mrf.mxu1  ;;  %v685_v54 = vmul.f32 %v1251_v52, %v1251_v52 }
 0x101   : > { %v947_v60 = vpack.c.bf16 %v1013_v56, %v1010_v55  ;;  %v967_v61 = vpack.c.bf16 %v1253_v57, %v1251_v52  ;;  %v678_v9 = vmul.f32 %v1013_v56, %v1013_v56  ;;  %v656_v19 = vadd.f32 %v1013_v56, %v655_v12 }
 0x102   : > { %v1015_v63 = vpop.f32.mrf.mxu0  ;;  %v1039_v0 = vpop.f32.mrf.mxu1 }
 0x103   : > { %979 = vst [vmem:[%s1245_s26 + $0x8] sm:$0xff] %v947_v60   ;;  %983 = vst [vmem:[%s1245_s26 + $0x28] sm:$0xff] %v967_v61   ;;  %v1016_v3 = vadd.f32 %v1015_v63, %v1014_v58  ;;  %v1040_v7 = vadd.f32 %v1039_v0, %v1038_v59  ;;  %v693_v22 = vadd.f32 %v692_v15, %v678_v9 }
 0x104   : > { %v1017_v4 = vpop.f32.mrf.mxu0  ;;  %v1041_v5 = vpop.f32.mrf.mxu1  ;;  %v686_v58 = vmul.f32 %v1253_v57, %v1253_v57 }
 0x105   : > { %v679_v16 = vmul.f32 %v1016_v3, %v1016_v3  ;;  %v657_v26 = vadd.f32 %v1016_v3, %v656_v19  ;;  %v687_v60 = vmul.f32 %v1040_v7, %v1040_v7 }
 0x106   : > { %v1018_v10 = vpop.f32.mrf.mxu0  ;;  %v1042_v11 = vpop.f32.mrf.mxu1 }
 0x107   : > { %v1019_v13 = vadd.f32 %v1018_v10, %v1017_v4  ;;  %v1043_v14 = vadd.f32 %v1042_v11, %v1041_v5  ;;  %v694_v28 = vadd.f32 %v693_v22, %v679_v16 }
 0x108   : > { %v1020_v17 = vpop.f32.mrf.mxu0  ;;  %v1044_v18 = vpop.f32.mrf.mxu1 }
 0x109   : > { %v952_v20 = vpack.c.bf16 %v1019_v13, %v1016_v3  ;;  %v972_v21 = vpack.c.bf16 %v1043_v14, %v1040_v7  ;;  %v680_v23 = vmul.f32 %v1019_v13, %v1019_v13  ;;  %v658_v31 = vadd.f32 %v1019_v13, %v657_v26 }
 0x10a   : > { %v1021_v24 = vpop.f32.mrf.mxu0  ;;  %v1045_v25 = vpop.f32.mrf.mxu1  ;;  %v688_v0 = vmul.f32 %v1043_v14, %v1043_v14 }
 0x10b   : > { %980 = vst [vmem:[%s1245_s26 + $0x10] sm:$0xff] %v952_v20   ;;  %v1022_v27 = vadd.f32 %v1021_v24, %v1020_v17  ;;  %984 = vst [vmem:[%s1245_s26 + $0x30] sm:$0xff] %v972_v21   ;;  %v1046_v33 = vadd.f32 %v1045_v25, %v1044_v18  ;;  %v695_v34 = vadd.f32 %v694_v28, %v680_v23 }
 0x10c   : > { %v1023_v29 = vpop.f32.mrf.mxu0  ;;  %v1047_v30 = vpop.f32.mrf.mxu1 }
 0x10d   : > { %v681_v32 = vmul.f32 %v1022_v27, %v1022_v27  ;;  %v659_v37 = vadd.f32 %v1022_v27, %v658_v31  ;;  %v689_v3 = vmul.f32 %v1046_v33, %v1046_v33 }
 0x10e   : > { %v1024_v35 = vpop.f32.mrf.mxu0  ;;  %v1048_v36 = vpop.f32.mrf.mxu1 }
 0x10f   : > { %v1025_v39 = vadd.f32 %v1024_v35, %v1023_v29  ;;  %v1049_v40 = vadd.f32 %v1048_v36, %v1047_v30  ;;  %v696_v41 = vadd.f32 %v695_v34, %v681_v32 }
 0x111   : > { %v957_v42 = vpack.c.bf16 %v1025_v39, %v1022_v27  ;;  %v660_v44 = vadd.f32 %v1025_v39, %v659_v37  ;;  %v682_v45 = vmul.f32 %v1025_v39, %v1025_v39  ;;  %v977_v46 = vpack.c.bf16 %v1049_v40, %v1046_v33 }
 0x112   : > { %v690_v6 = vmul.f32 %v1049_v40, %v1049_v40 }
 0x113   : > { %981 = vst [vmem:[%s1245_s26 + $0x18] sm:$0xff] %v957_v42   ;;  %v661_v48 = vadd.f32 %v1238_v38, %v660_v44  ;;  %v697_v49 = vadd.f32 %v696_v41, %v682_v45  ;;  %985 = vst [vmem:[%s1245_s26 + $0x38] sm:$0xff] %v977_v46  }
 0x115   : > { %v662_v51 = vadd.f32 %v1240_v43, %v661_v48  ;;  %v698_v53 = vadd.f32 %v697_v49, %v683_v47 }
 0x117   : > { %v699_v55 = vadd.f32 %v698_v53, %v684_v50  ;;  %v663_v56 = vadd.f32 %v1251_v52, %v662_v51 }
 0x119   : > { %v664_v59 = vadd.f32 %v1253_v57, %v663_v56  ;;  %v700_v38 = vadd.f32 %v699_v55, %v685_v54 }
 0x11b   : > { %v665_v61 = vadd.f32 %v1040_v7, %v664_v59  ;;  %v701_v62 = vadd.f32 %v700_v38, %v686_v58 }
 0x11d   : > { %v666_v63 = vadd.f32 %v1043_v14, %v665_v61  ;;  %v702_v1 = vadd.f32 %v701_v62, %v687_v60 }
 0x11f   : > { %v703_v43 = vadd.f32 %v702_v1, %v688_v0  ;;  %v667_v2 = vadd.f32 %v1046_v33, %v666_v63 }
 0x121   : > { %v704_v4 = vadd.f32 %v703_v43, %v689_v3  ;;  %v668_v5 = vadd.f32 %v1049_v40, %v667_v2 }
 0x123   : > { %v669_v52 = vrot.slane %v668_v5, 4  ;;  %v705_v8 = vadd.f32 %v704_v4, %v690_v6 }
 0x125   : > { %v670_v9 = vadd.f32 %v669_v52, %v668_v5  ;;  %v706_v10 = vrot.slane %v705_v8, 4 }
 0x127   : > { %v671_v11 = vrot.slane %v670_v9, 2  ;;  %v707_v57 = vadd.f32 %v706_v10, %v705_v8 }
 0x129   : > { %v672_v12 = vadd.f32 %v671_v11, %v670_v9  ;;  %v708_v13 = vrot.slane %v707_v57, 2 }
 0x12b   : > { %v673_v7 = vrot.slane %v672_v12, 1  ;;  %v709_v15 = vadd.f32 %v708_v13, %v707_v57 }
 0x12d   : > { %v710_v14 = vrot.slane %v709_v15, 1  ;;  %v674_v16 = vadd.f32 %v673_v7, %v672_v12 }
 0x12f   : > { %v711_v17 = vadd.f32 %v710_v14, %v709_v15 }
 0x131   : > { %v713_v18 = vsel %vm712_vm0, %v674_v16, %v711_v17 }
 0x132   : > { %714 = vst [vmem:[%s251_s30] sm:$0x3] %v713_v18 }
 0x133 PF: > { %s14_s14 = sadd.s32 1, %s1152_s14   ;;  %s1292_s12 = smov %s1148_s13 }
 0x134   : > { %p11_p5 = scmp.ge.s32.totalorder %s14_s14, 6   ;;  %s1293_s13 = smov %s1295_s15 }
 0x136   :  { %13 = sbr.rel (!%p11_p5) target bundleno = 2 (0x2), region = 73 }

// kernel: _lambda_.18
= control target key start
LH: loop header
LB: loop body
LE: loop exit
PB: predicated region body
PF: predicated region fallthrough
CT: control target
= control target key end

     0   :  { %s2144_s12 = smov 0   ;;  %s2146_s13 = smov 0   ;;  %s2462_s0 = inlined_call_operand.vmem [shape: bf16[4,512,128], index: 0, kind: input, shape index: {}]   ;;  %s2463_s1 = inlined_call_operand.vmem [shape: bf16[4,128,128], index: 1, kind: input, shape index: {}]   ;;  %s2464_s2 = inlined_call_operand.vmem [shape: bf16[4,512,128], index: 2, kind: output, shape index: {0}]   ;;  %s2465_s3 = inlined_call_operand.vmem [shape: f32[4,1,2,128], index: 3, kind: output, shape index: {1}]  }
   0x1   :  { %s2148_s14 = smov 0  }
   0x2 LB: > { %s26_s15 = sadd.s32 1, %s2118_s13  ;;  %p1528_p0 = scmp.ge.s32.totalorder %s2122_s14, 1  ;;  %s2122_s14 = sphi %s2148_s14, %s14_s14   ;;  %s2118_s13 = sphi %s2146_s13, %s2467_s13   ;;  %s2114_s12 = sphi %s2144_s12, %s2466_s12  }
   0x3   : > { %p28_p1 = scmp.ge.s32.totalorder %s26_s15, 4  ;;  %p173_p2 = scmp.lt.s32.totalorder %s2122_s14, 5 }
   0x5   : > { %s2469_s15 = smov (%p28_p1, %s26_s15), 0  ;;  %p174_p3 = pnand %p1528_p0, %p173_p2 }
   0x6   : > { %p218_p4 = scmp.lt.s32.totalorder (!%p174_p3), %s2114_s12, 3 }
   0x7   : > { %177 = sbr.rel (%p174_p3) target bundleno = 389 (0x185), region = 28 }
   0xc   : > { %s2471_s12 = smov (!%p218_p4, %s2114_s12), 3  ;;  %vm1381_vm0 = vcmask 1040384  }
   0xd   : > { %s1643_s16 = sshll.u32 %s2471_s12, 6  ;;  %s1642_s20 = sshll.u32 %s2471_s12, 8 }
   0xe   : > { %s2168_s19 = scalar_lea.vmem %s2463_s1, %s1643_s16  ;;  %s2179_s23 = scalar_lea.vmem %s2462_s0, %s1642_s20 }
   0xf   : > { %v2060_v0 = vld [vmem:[%s2168_s19 + $0x38] sm:$0xff]   ;;  %v2061_v1 = vld [vmem:[%s2168_s19 + $0x30] sm:$0xff]   ;;  %v2062_v2 = vld [vmem:[%s2168_s19 + $0x28] sm:$0xff]   ;;  %s2227_s26 = scalar_lea.vmem %s2464_s2, %s1642_s20  ;;  %s1535_s27 = sshll.u32 %s2471_s12, 1 }
  0x10   : > { %1940 = vmatprep.subr.bf16.mxu0 %v2060_v0  ;;  %2020 = vmatprep.subr.bf16.mxu1 %v2060_v0  ;;  %v2063_v3 = vld [vmem:[%s2168_s19 + $0x20] sm:$0xff]   ;;  %v2064_v5 = vld [vmem:[%s2168_s19 + $0x18] sm:$0xff]   ;;  %v2065_v6 = vld [vmem:[%s2168_s19 + $0x10] sm:$0xff]   ;;  %s248_s30 = scalar_lea.vmem %s2465_s3, %s1535_s27 }
  0x11   : > { %1941 = vmatpush3.bf16.msra.mxu0 %v2060_v0  ;;  %2028 = vmatpush3.bf16.msra.mxu1 %v2060_v0  ;;  %v2068_v4 = vld [vmem:[%s2179_s23] sm:$0xff]   ;;  %v2066_v7 = vld [vmem:[%s2168_s19 + $0x8] sm:$0xff]   ;;  %v2070_v11 = vld [vmem:[%s2179_s23 + $0x10] sm:$0xff]  }
  0x12   : > { %1942 = vmatprep.subr.bf16.mxu0 %v2061_v1  ;;  %2021 = vmatprep.subr.bf16.mxu1 %v2061_v1  ;;  %v2067_v8 = vld [vmem:[%s2168_s19] sm:$0xff]   ;;  %v2069_v10 = vld [vmem:[%s2179_s23 + $0x8] sm:$0xff]   ;;  %v2086_v13 = vld [vmem:[%s2179_s23 + $0x90] sm:$0xff]  }
  0x13   : > { %1956 = vmatprep.mubr.bf16.mxu0 %v2068_v4  ;;  %v2084_v9 = vld [vmem:[%s2179_s23 + $0x80] sm:$0xff]   ;;  %v2085_v12 = vld [vmem:[%s2179_s23 + $0x88] sm:$0xff]   ;;  %v2071_v14 = vld [vmem:[%s2179_s23 + $0x18] sm:$0xff]  }
  0x14   : > { %1988 = vmatprep.mubr.bf16.mxu1 %v2084_v9  ;;  %v2072_v15 = vld [vmem:[%s2179_s23 + $0x20] sm:$0xff]   ;;  %v2087_v16 = vld [vmem:[%s2179_s23 + $0x98] sm:$0xff]   ;;  %v2073_v18 = vld [vmem:[%s2179_s23 + $0x28] sm:$0xff]  }
  0x15   : > { %1943 = vmatpush3.bf16.msra.mxu0 %v2061_v1  ;;  %2029 = vmatpush3.bf16.msra.mxu1 %v2061_v1  ;;  %v2088_v17 = vld [vmem:[%s2179_s23 + $0xa0] sm:$0xff]   ;;  %v2089_v19 = vld [vmem:[%s2179_s23 + $0xa8] sm:$0xff]   ;;  %v2074_v20 = vld [vmem:[%s2179_s23 + $0x30] sm:$0xff]  }
  0x16   : > { %1944 = vmatprep.subr.bf16.mxu0 %v2062_v2  ;;  %2022 = vmatprep.subr.bf16.mxu1 %v2062_v2  ;;  %v2090_v21 = vld [vmem:[%s2179_s23 + $0xb0] sm:$0xff]   ;;  %v2075_v22 = vld [vmem:[%s2179_s23 + $0x38] sm:$0xff]   ;;  %v2076_v24 = vld [vmem:[%s2179_s23 + $0x40] sm:$0xff]  }
  0x17   : > { %v2091_v23 = vld [vmem:[%s2179_s23 + $0xb8] sm:$0xff]   ;;  %v2092_v25 = vld [vmem:[%s2179_s23 + $0xc0] sm:$0xff]   ;;  %v2077_v26 = vld [vmem:[%s2179_s23 + $0x48] sm:$0xff]  }
  0x18   : > { %v2093_v27 = vld [vmem:[%s2179_s23 + $0xc8] sm:$0xff]   ;;  %v2078_v28 = vld [vmem:[%s2179_s23 + $0x50] sm:$0xff]   ;;  %v2079_v30 = vld [vmem:[%s2179_s23 + $0x58] sm:$0xff]  }
  0x19   : > { %1945 = vmatpush3.bf16.msra.mxu0 %v2062_v2  ;;  %2030 = vmatpush3.bf16.msra.mxu1 %v2062_v2  ;;  %v2094_v29 = vld [vmem:[%s2179_s23 + $0xd0] sm:$0xff]   ;;  %v2095_v31 = vld [vmem:[%s2179_s23 + $0xd8] sm:$0xff]   ;;  %v2080_v32 = vld [vmem:[%s2179_s23 + $0x60] sm:$0xff]  }
  0x1a   : > { %1946 = vmatprep.subr.bf16.mxu0 %v2063_v3  ;;  %2023 = vmatprep.subr.bf16.mxu1 %v2063_v3  ;;  %v2096_v33 = vld [vmem:[%s2179_s23 + $0xe0] sm:$0xff]   ;;  %v2081_v34 = vld [vmem:[%s2179_s23 + $0x68] sm:$0xff]   ;;  %v2082_v36 = vld [vmem:[%s2179_s23 + $0x70] sm:$0xff]  }
  0x1b   : > { %v2097_v35 = vld [vmem:[%s2179_s23 + $0xe8] sm:$0xff]   ;;  %v2098_v37 = vld [vmem:[%s2179_s23 + $0xf0] sm:$0xff]   ;;  %v2083_v38 = vld [vmem:[%s2179_s23 + $0x78] sm:$0xff]  }
  0x1c   : > { %v2099_v39 = vld [vmem:[%s2179_s23 + $0xf8] sm:$0xff]  }
  0x1d   : > { %1947 = vmatpush3.bf16.msra.mxu0 %v2063_v3  ;;  %2031 = vmatpush3.bf16.msra.mxu1 %v2063_v3 }
  0x1e   : > { %1948 = vmatprep.subr.bf16.mxu0 %v2064_v5  ;;  %2024 = vmatprep.subr.bf16.mxu1 %v2064_v5 }
  0x21   : > { %1949 = vmatpush3.bf16.msra.mxu0 %v2064_v5  ;;  %2032 = vmatpush3.bf16.msra.mxu1 %v2064_v5 }
  0x22   : > { %1950 = vmatprep.subr.bf16.mxu0 %v2065_v6  ;;  %2025 = vmatprep.subr.bf16.mxu1 %v2065_v6 }
  0x25   : > { %1951 = vmatpush3.bf16.msra.mxu0 %v2065_v6  ;;  %2033 = vmatpush3.bf16.msra.mxu1 %v2065_v6 }
  0x26   : > { %1952 = vmatprep.subr.bf16.mxu0 %v2066_v7  ;;  %2026 = vmatprep.subr.bf16.mxu1 %v2066_v7 }
  0x29   : > { %1953 = vmatpush3.bf16.msra.mxu0 %v2066_v7  ;;  %2034 = vmatpush3.bf16.msra.mxu1 %v2066_v7 }
  0x2a   : > { %1954 = vmatprep.subr.bf16.mxu0 %v2067_v8  ;;  %2027 = vmatprep.subr.bf16.mxu1 %v2067_v8 }
  0x2d   : > { %1955 = vmatpush3.bf16.msra.mxu0 %v2067_v8  ;;  %2035 = vmatpush3.bf16.msra.mxu1 %v2067_v8 }
  0x30   : > { %1957 = vmatmul.mubr.bf16.vlgmr.msra.gmra.mxu0 %v2069_v10  ;;  %1989 = vmatmul.mubr.bf16.vlgmr.msra.gmra.mxu1 %v2085_v12 }
  0x31   : > { %1960 = vmatprep.mubr.bf16.mxu0 %v2070_v11  ;;  %1992 = vmatprep.mubr.bf16.mxu1 %v2086_v13 }
  0x38   : > { %1961 = vmatmul.mubr.bf16.gmra.mxu0 %v2071_v14  ;;  %1993 = vmatmul.mubr.bf16.gmra.mxu1 %v2087_v16 }
  0x39   : > { %1964 = vmatprep.mubr.bf16.mxu0 %v2072_v15  ;;  %1996 = vmatprep.mubr.bf16.mxu1 %v2088_v17 }
  0x40   : > { %1965 = vmatmul.mubr.bf16.gmra.mxu0 %v2073_v18  ;;  %1997 = vmatmul.mubr.bf16.gmra.mxu1 %v2089_v19 }
  0x41   : > { %1968 = vmatprep.mubr.bf16.mxu0 %v2074_v20  ;;  %2000 = vmatprep.mubr.bf16.mxu1 %v2090_v21 }
  0x48   : > { %1969 = vmatmul.mubr.bf16.gmra.mxu0 %v2075_v22  ;;  %2001 = vmatmul.mubr.bf16.gmra.mxu1 %v2091_v23 }
  0x49   : > { %1972 = vmatprep.mubr.bf16.mxu0 %v2076_v24  ;;  %2004 = vmatprep.mubr.bf16.mxu1 %v2092_v25 }
  0x50   : > { %1973 = vmatmul.mubr.bf16.gmra.mxu0 %v2077_v26  ;;  %2005 = vmatmul.mubr.bf16.gmra.mxu1 %v2093_v27 }
  0x51   : > { %1976 = vmatprep.mubr.bf16.mxu0 %v2078_v28  ;;  %2008 = vmatprep.mubr.bf16.mxu1 %v2094_v29 }
  0x58   : > { %1977 = vmatmul.mubr.bf16.gmra.mxu0 %v2079_v30  ;;  %2009 = vmatmul.mubr.bf16.gmra.mxu1 %v2095_v31 }
  0x59   : > { %1980 = vmatprep.mubr.bf16.mxu0 %v2080_v32  ;;  %2012 = vmatprep.mubr.bf16.mxu1 %v2096_v33 }
  0x60   : > { %1981 = vmatmul.mubr.bf16.gmra.mxu0 %v2081_v34  ;;  %2013 = vmatmul.mubr.bf16.gmra.mxu1 %v2097_v35 }
  0x61   : > { %1984 = vmatprep.mubr.bf16.mxu0 %v2082_v36  ;;  %2016 = vmatprep.mubr.bf16.mxu1 %v2098_v37 }
  0x68   : > { %1985 = vmatmul.mubr.bf16.gmra.mxu0 %v2083_v38  ;;  %2017 = vmatmul.mubr.bf16.gmra.mxu1 %v2099_v39 }
  0xf0   : > { %v1958_v40 = vpop.f32.mrf.mxu0  ;;  %v2218_v41 = vpop.f32.mrf.mxu1 }
  0xf1   : > { %v1250_v57 = vmul.f32 %v1958_v40, %v1958_v40 }
  0xf2   : > { %v604_v42 = vpop.f32.mrf.mxu0  ;;  %v2220_v43 = vpop.f32.mrf.mxu1 }
  0xf3   : > { %v1248_v48 = vmul.f32 %v604_v42, %v604_v42 }
  0xf4   : > { %v1959_v44 = vpop.f32.mrf.mxu0  ;;  %v2229_v45 = vpop.f32.mrf.mxu1 }
  0xf5   : > { %v1717_v46 = vpack.c.bf16 %v1959_v44, %v1958_v40  ;;  %v1797_v47 = vpack.c.bf16 %v2229_v45, %v2218_v41  ;;  %v1251_v62 = vmul.f32 %v1959_v44, %v1959_v44 }
  0xf6   : > { %v607_v49 = vpop.f32.mrf.mxu0  ;;  %v2233_v50 = vpop.f32.mrf.mxu1 }
  0xf7   : > { %1869 = vst [vmem:[%s2227_s26 + $0x8] sm:$0xff] %v1717_v46   ;;  %v1712_v51 = vpack.c.bf16 %v607_v49, %v604_v42  ;;  %v1179_v52 = vadd.f32 %v607_v49, %v604_v42  ;;  %v1249_v53 = vmul.f32 %v607_v49, %v607_v49  ;;  %1885 = vst [vmem:[%s2227_s26 + $0x88] sm:$0xff] %v1797_v47  }
  0xf8   : > { %v1792_v54 = vpack.c.bf16 %v2233_v50, %v2220_v43  ;;  %v1962_v55 = vpop.f32.mrf.mxu0  ;;  %v2239_v56 = vpop.f32.mrf.mxu1 }
  0xf9   : > { %1713 = vst [vmem:[%s2227_s26] sm:$0xff] %v1712_v51   ;;  %v1180_v58 = vadd.f32 %v1958_v40, %v1179_v52  ;;  %v1312_v59 = vadd.f32 %v1249_v53, %v1248_v48  ;;  %v1254_v17 = vmul.f32 %v1962_v55, %v1962_v55 }
  0xfa   : > { %1884 = vst [vmem:[%s2227_s26 + $0x80] sm:$0xff] %v1792_v54   ;;  %v620_v60 = vpop.f32.mrf.mxu0  ;;  %v2243_v61 = vpop.f32.mrf.mxu1 }
  0xfb   : > { %v1313_v63 = vadd.f32 %v1312_v59, %v1250_v57  ;;  %v1181_v0 = vadd.f32 %v1959_v44, %v1180_v58  ;;  %v1252_v4 = vmul.f32 %v620_v60, %v620_v60 }
  0xfc   : > { %v1963_v1 = vpop.f32.mrf.mxu0  ;;  %v2245_v2 = vpop.f32.mrf.mxu1 }
  0xfd   : > { %v1182_v3 = vadd.f32 %v1181_v0, %v620_v60  ;;  %v1314_v5 = vadd.f32 %v1313_v63, %v1251_v62  ;;  %v1727_v6 = vpack.c.bf16 %v1963_v1, %v1962_v55  ;;  %v1807_v8 = vpack.c.bf16 %v2245_v2, %v2239_v56 }
  0xfe   : > { %v623_v7 = vpop.f32.mrf.mxu0  ;;  %v2249_v9 = vpop.f32.mrf.mxu1  ;;  %v1255_v22 = vmul.f32 %v1963_v1, %v1963_v1 }
  0xff   : > { %v1315_v10 = vadd.f32 %v1314_v5, %v1252_v4  ;;  %1871 = vst [vmem:[%s2227_s26 + $0x18] sm:$0xff] %v1727_v6   ;;  %v1722_v11 = vpack.c.bf16 %v623_v7, %v620_v60  ;;  %v1183_v12 = vadd.f32 %v1182_v3, %v623_v7  ;;  %v1253_v13 = vmul.f32 %v623_v7, %v623_v7 }
 0x100   : > { %v1966_v14 = vpop.f32.mrf.mxu0  ;;  %1887 = vst [vmem:[%s2227_s26 + $0x98] sm:$0xff] %v1807_v8   ;;  %v1802_v15 = vpack.c.bf16 %v2249_v9, %v2243_v61  ;;  %v2255_v16 = vpop.f32.mrf.mxu1 }
 0x101   : > { %1870 = vst [vmem:[%s2227_s26 + $0x10] sm:$0xff] %v1722_v11   ;;  %v1184_v18 = vadd.f32 %v1962_v55, %v1183_v12  ;;  %v1316_v19 = vadd.f32 %v1315_v10, %v1253_v13  ;;  %v1258_v42 = vmul.f32 %v1966_v14, %v1966_v14 }
 0x102   : > { %v636_v20 = vpop.f32.mrf.mxu0  ;;  %1886 = vst [vmem:[%s2227_s26 + $0x90] sm:$0xff] %v1802_v15   ;;  %v2259_v21 = vpop.f32.mrf.mxu1 }
 0x103   : > { %v1317_v23 = vadd.f32 %v1316_v19, %v1254_v17  ;;  %v1185_v24 = vadd.f32 %v1963_v1, %v1184_v18  ;;  %v1256_v28 = vmul.f32 %v636_v20, %v636_v20 }
 0x104   : > { %v1967_v25 = vpop.f32.mrf.mxu0  ;;  %v2261_v26 = vpop.f32.mrf.mxu1 }
 0x105   : > { %v1186_v27 = vadd.f32 %v1185_v24, %v636_v20  ;;  %v1318_v29 = vadd.f32 %v1317_v23, %v1255_v22  ;;  %v1737_v30 = vpack.c.bf16 %v1967_v25, %v1966_v14  ;;  %v1817_v32 = vpack.c.bf16 %v2261_v26, %v2255_v16 }
 0x106   : > { %v639_v31 = vpop.f32.mrf.mxu0  ;;  %v2265_v33 = vpop.f32.mrf.mxu1  ;;  %v1259_v49 = vmul.f32 %v1967_v25, %v1967_v25 }
 0x107   : > { %v1319_v34 = vadd.f32 %v1318_v29, %v1256_v28  ;;  %1873 = vst [vmem:[%s2227_s26 + $0x28] sm:$0xff] %v1737_v30   ;;  %v1732_v35 = vpack.c.bf16 %v639_v31, %v636_v20  ;;  %v1187_v36 = vadd.f32 %v1186_v27, %v639_v31  ;;  %v1257_v37 = vmul.f32 %v639_v31, %v639_v31 }
 0x108   : > { %v1970_v38 = vpop.f32.mrf.mxu0  ;;  %1889 = vst [vmem:[%s2227_s26 + $0xa8] sm:$0xff] %v1817_v32   ;;  %v1812_v39 = vpack.c.bf16 %v2265_v33, %v2259_v21  ;;  %v2271_v40 = vpop.f32.mrf.mxu1 }
 0x109   : > { %1872 = vst [vmem:[%s2227_s26 + $0x20] sm:$0xff] %v1732_v35   ;;  %v1188_v44 = vadd.f32 %v1966_v14, %v1187_v36  ;;  %v1320_v46 = vadd.f32 %v1319_v34, %v1257_v37  ;;  %v1262_v8 = vmul.f32 %v1970_v38, %v1970_v38 }
 0x10a   : > { %v652_v47 = vpop.f32.mrf.mxu0  ;;  %1888 = vst [vmem:[%s2227_s26 + $0xa0] sm:$0xff] %v1812_v39   ;;  %v2275_v48 = vpop.f32.mrf.mxu1 }
 0x10b   : > { %v1321_v51 = vadd.f32 %v1320_v46, %v1258_v42  ;;  %v1189_v52 = vadd.f32 %v1967_v25, %v1188_v44  ;;  %v1260_v57 = vmul.f32 %v652_v47, %v652_v47 }
 0x10c   : > { %v1971_v53 = vpop.f32.mrf.mxu0  ;;  %v2277_v54 = vpop.f32.mrf.mxu1 }
 0x10d   : > { %v1190_v55 = vadd.f32 %v1189_v52, %v652_v47  ;;  %v1322_v58 = vadd.f32 %v1321_v51, %v1259_v49  ;;  %v1747_v59 = vpack.c.bf16 %v1971_v53, %v1970_v38  ;;  %v1827_v62 = vpack.c.bf16 %v2277_v54, %v2271_v40 }
 0x10e   : > { %v655_v60 = vpop.f32.mrf.mxu0  ;;  %v2281_v63 = vpop.f32.mrf.mxu1  ;;  %v1263_v14 = vmul.f32 %v1971_v53, %v1971_v53 }
 0x10f   : > { %v1323_v0 = vadd.f32 %v1322_v58, %v1260_v57  ;;  %1875 = vst [vmem:[%s2227_s26 + $0x38] sm:$0xff] %v1747_v59   ;;  %v1742_v1 = vpack.c.bf16 %v655_v60, %v652_v47  ;;  %v1191_v3 = vadd.f32 %v1190_v55, %v655_v60  ;;  %v1261_v4 = vmul.f32 %v655_v60, %v655_v60 }
 0x110   : > { %v1974_v5 = vpop.f32.mrf.mxu0  ;;  %1891 = vst [vmem:[%s2227_s26 + $0xb8] sm:$0xff] %v1827_v62   ;;  %v1822_v6 = vpack.c.bf16 %v2281_v63, %v2275_v48  ;;  %v2287_v7 = vpop.f32.mrf.mxu1 }
 0x111   : > { %1874 = vst [vmem:[%s2227_s26 + $0x30] sm:$0xff] %v1742_v1   ;;  %v1192_v10 = vadd.f32 %v1970_v38, %v1191_v3  ;;  %v1324_v11 = vadd.f32 %v1323_v0, %v1261_v4  ;;  %v1266_v37 = vmul.f32 %v1974_v5, %v1974_v5 }
 0x112   : > { %v668_v12 = vpop.f32.mrf.mxu0  ;;  %1890 = vst [vmem:[%s2227_s26 + $0xb0] sm:$0xff] %v1822_v6   ;;  %v2291_v13 = vpop.f32.mrf.mxu1 }
 0x113   : > { %v1325_v15 = vadd.f32 %v1324_v11, %v1262_v8  ;;  %v1193_v17 = vadd.f32 %v1971_v53, %v1192_v10  ;;  %v1264_v22 = vmul.f32 %v668_v12, %v668_v12 }
 0x114   : > { %v1975_v18 = vpop.f32.mrf.mxu0  ;;  %v2293_v19 = vpop.f32.mrf.mxu1 }
 0x115   : > { %v1194_v20 = vadd.f32 %v1193_v17, %v668_v12  ;;  %v1326_v23 = vadd.f32 %v1325_v15, %v1263_v14  ;;  %v1757_v24 = vpack.c.bf16 %v1975_v18, %v1974_v5  ;;  %v1837_v27 = vpack.c.bf16 %v2293_v19, %v2287_v7 }
 0x116   : > { %v671_v25 = vpop.f32.mrf.mxu0  ;;  %v2297_v28 = vpop.f32.mrf.mxu1  ;;  %v1267_v46 = vmul.f32 %v1975_v18, %v1975_v18 }
 0x117   : > { %v1327_v29 = vadd.f32 %v1326_v23, %v1264_v22  ;;  %1877 = vst [vmem:[%s2227_s26 + $0x48] sm:$0xff] %v1757_v24   ;;  %v1752_v30 = vpack.c.bf16 %v671_v25, %v668_v12  ;;  %v1195_v31 = vadd.f32 %v1194_v20, %v671_v25  ;;  %v1265_v32 = vmul.f32 %v671_v25, %v671_v25 }
 0x118   : > { %v1978_v34 = vpop.f32.mrf.mxu0  ;;  %1893 = vst [vmem:[%s2227_s26 + $0xc8] sm:$0xff] %v1837_v27   ;;  %v1832_v35 = vpack.c.bf16 %v2297_v28, %v2291_v13  ;;  %v2303_v36 = vpop.f32.mrf.mxu1 }
 0x119   : > { %1876 = vst [vmem:[%s2227_s26 + $0x40] sm:$0xff] %v1752_v30   ;;  %v1196_v38 = vadd.f32 %v1974_v5, %v1195_v31  ;;  %v1328_v39 = vadd.f32 %v1327_v29, %v1265_v32  ;;  %v1270_v10 = vmul.f32 %v1978_v34, %v1978_v34 }
 0x11a   : > { %v684_v42 = vpop.f32.mrf.mxu0  ;;  %1892 = vst [vmem:[%s2227_s26 + $0xc0] sm:$0xff] %v1832_v35   ;;  %v2307_v44 = vpop.f32.mrf.mxu1 }
 0x11b   : > { %v1329_v47 = vadd.f32 %v1328_v39, %v1266_v37  ;;  %v1197_v49 = vadd.f32 %v1975_v18, %v1196_v38  ;;  %v1268_v55 = vmul.f32 %v684_v42, %v684_v42 }
 0x11c   : > { %v1979_v51 = vpop.f32.mrf.mxu0  ;;  %v2309_v52 = vpop.f32.mrf.mxu1 }
 0x11d   : > { %v1198_v53 = vadd.f32 %v1197_v49, %v684_v42  ;;  %v1330_v57 = vadd.f32 %v1329_v47, %v1267_v46  ;;  %v1767_v58 = vpack.c.bf16 %v1979_v51, %v1978_v34  ;;  %v1847_v60 = vpack.c.bf16 %v2309_v52, %v2303_v36 }
 0x11e   : > { %v687_v59 = vpop.f32.mrf.mxu0  ;;  %v2313_v62 = vpop.f32.mrf.mxu1  ;;  %v1271_v17 = vmul.f32 %v1979_v51, %v1979_v51 }
 0x11f   : > { %v1331_v0 = vadd.f32 %v1330_v57, %v1268_v55  ;;  %1879 = vst [vmem:[%s2227_s26 + $0x58] sm:$0xff] %v1767_v58   ;;  %v1762_v1 = vpack.c.bf16 %v687_v59, %v684_v42  ;;  %v1199_v3 = vadd.f32 %v1198_v53, %v687_v59  ;;  %v1269_v4 = vmul.f32 %v687_v59, %v687_v59 }
 0x120   : > { %v1982_v5 = vpop.f32.mrf.mxu0  ;;  %1895 = vst [vmem:[%s2227_s26 + $0xd8] sm:$0xff] %v1847_v60   ;;  %v1842_v6 = vpack.c.bf16 %v2313_v62, %v2307_v44  ;;  %v2319_v8 = vpop.f32.mrf.mxu1 }
 0x121   : > { %1878 = vst [vmem:[%s2227_s26 + $0x50] sm:$0xff] %v1762_v1   ;;  %v1200_v11 = vadd.f32 %v1978_v34, %v1199_v3  ;;  %v1332_v12 = vadd.f32 %v1331_v0, %v1269_v4  ;;  %v1274_v47 = vmul.f32 %v1982_v5, %v1982_v5 }
 0x122   : > { %v700_v14 = vpop.f32.mrf.mxu0  ;;  %1894 = vst [vmem:[%s2227_s26 + $0xd0] sm:$0xff] %v1842_v6   ;;  %v2323_v15 = vpop.f32.mrf.mxu1 }
 0x123   : > { %v1333_v18 = vadd.f32 %v1332_v12, %v1270_v10  ;;  %v1201_v20 = vadd.f32 %v1979_v51, %v1200_v11  ;;  %v1272_v25 = vmul.f32 %v700_v14, %v700_v14 }
 0x124   : > { %v1983_v22 = vpop.f32.mrf.mxu0  ;;  %v2325_v23 = vpop.f32.mrf.mxu1 }
 0x125   : > { %v1202_v24 = vadd.f32 %v1201_v20, %v700_v14  ;;  %v1334_v27 = vadd.f32 %v1333_v18, %v1271_v17  ;;  %v1777_v29 = vpack.c.bf16 %v1983_v22, %v1982_v5  ;;  %v1857_v31 = vpack.c.bf16 %v2325_v23, %v2319_v8 }
 0x126   : > { %v703_v30 = vpop.f32.mrf.mxu0  ;;  %v2329_v32 = vpop.f32.mrf.mxu1  ;;  %v1275_v57 = vmul.f32 %v1983_v22, %v1983_v22 }
 0x127   : > { %v1335_v34 = vadd.f32 %v1334_v27, %v1272_v25  ;;  %1881 = vst [vmem:[%s2227_s26 + $0x68] sm:$0xff] %v1777_v29   ;;  %v1772_v35 = vpack.c.bf16 %v703_v30, %v700_v14  ;;  %v1203_v37 = vadd.f32 %v1202_v24, %v703_v30  ;;  %v1273_v38 = vmul.f32 %v703_v30, %v703_v30 }
 0x128   : > { %v1986_v39 = vpop.f32.mrf.mxu0  ;;  %1897 = vst [vmem:[%s2227_s26 + $0xe8] sm:$0xff] %v1857_v31   ;;  %v1852_v42 = vpack.c.bf16 %v2329_v32, %v2323_v15  ;;  %v2335_v46 = vpop.f32.mrf.mxu1  ;;  %v1280_v31 = vmul.f32 %v2220_v43, %v2220_v43 }
 0x129   : > { %1880 = vst [vmem:[%s2227_s26 + $0x60] sm:$0xff] %v1772_v35   ;;  %v1204_v49 = vadd.f32 %v1982_v5, %v1203_v37  ;;  %v1336_v51 = vadd.f32 %v1335_v34, %v1273_v38  ;;  %v1281_v38 = vmul.f32 %v2233_v50, %v2233_v50 }
 0x12a   : > { %v716_v53 = vpop.f32.mrf.mxu0  ;;  %1896 = vst [vmem:[%s2227_s26 + $0xe0] sm:$0xff] %v1852_v42   ;;  %v2339_v55 = vpop.f32.mrf.mxu1 }
 0x12b   : > { %v1337_v58 = vadd.f32 %v1336_v51, %v1274_v47  ;;  %v1205_v59 = vadd.f32 %v1983_v22, %v1204_v49  ;;  %v1276_v3 = vmul.f32 %v716_v53, %v716_v53  ;;  %v1278_v22 = vmul.f32 %v1986_v39, %v1986_v39 }
 0x12c   : > { %v1987_v60 = vpop.f32.mrf.mxu0  ;;  %v2341_v0 = vpop.f32.mrf.mxu1  ;;  %v1283_v51 = vmul.f32 %v2229_v45, %v2229_v45 }
 0x12d   : > { %v1206_v1 = vadd.f32 %v1205_v59, %v716_v53  ;;  %v1338_v4 = vadd.f32 %v1337_v58, %v1275_v57  ;;  %v1787_v6 = vpack.c.bf16 %v1987_v60, %v1986_v39  ;;  %v1867_v10 = vpack.c.bf16 %v2341_v0, %v2335_v46 }
 0x12e   : > { %v719_v5 = vpop.f32.mrf.mxu0  ;;  %v2345_v11 = vpop.f32.mrf.mxu1  ;;  %v1279_v27 = vmul.f32 %v1987_v60, %v1987_v60  ;;  %v1284_v58 = vmul.f32 %v2243_v61, %v2243_v61 }
 0x12f   : > { %v1339_v12 = vadd.f32 %v1338_v4, %v1276_v3  ;;  %1883 = vst [vmem:[%s2227_s26 + $0x78] sm:$0xff] %v1787_v6   ;;  %v1782_v14 = vpack.c.bf16 %v719_v5, %v716_v53  ;;  %v1207_v17 = vadd.f32 %v1206_v1, %v719_v5  ;;  %v1277_v18 = vmul.f32 %v719_v5, %v719_v5 }
 0x130   : > { %1899 = vst [vmem:[%s2227_s26 + $0xf8] sm:$0xff] %v1867_v10   ;;  %v1862_v20 = vpack.c.bf16 %v2345_v11, %v2339_v55  ;;  %v1285_v1 = vmul.f32 %v2249_v9, %v2249_v9  ;;  %v1288_v10 = vmul.f32 %v2259_v21, %v2259_v21 }
 0x131   : > { %1882 = vst [vmem:[%s2227_s26 + $0x70] sm:$0xff] %v1782_v14   ;;  %v1208_v24 = vadd.f32 %v1986_v39, %v1207_v17  ;;  %v1340_v25 = vadd.f32 %v1339_v12, %v1277_v18  ;;  %v1282_v39 = vmul.f32 %v2218_v41, %v2218_v41  ;;  %v1289_v17 = vmul.f32 %v2265_v33, %v2265_v33 }
 0x132   : > { %1898 = vst [vmem:[%s2227_s26 + $0xf0] sm:$0xff] %v1862_v20  }
 0x133   : > { %v1209_v29 = vadd.f32 %v1987_v60, %v1208_v24  ;;  %v1341_v30 = vadd.f32 %v1340_v25, %v1278_v22  ;;  %v1292_v25 = vmul.f32 %v2275_v48, %v2275_v48 }
 0x135   : > { %v1342_v34 = vadd.f32 %v1341_v30, %v1279_v27  ;;  %v1210_v35 = vadd.f32 %v1209_v29, %v2220_v43  ;;  %v1293_v30 = vmul.f32 %v2281_v63, %v2281_v63 }
 0x137   : > { %v1211_v37 = vadd.f32 %v1210_v35, %v2233_v50  ;;  %v1343_v42 = vadd.f32 %v1342_v34, %v1280_v31 }
 0x139   : > { %v1212_v47 = vadd.f32 %v2218_v41, %v1211_v37  ;;  %v1344_v49 = vadd.f32 %v1343_v42, %v1281_v38  ;;  %v1286_v41 = vmul.f32 %v2239_v56, %v2239_v56  ;;  %v1296_v38 = vmul.f32 %v2291_v13, %v2291_v13 }
 0x13b   : > { %v1345_v53 = vadd.f32 %v1344_v49, %v1282_v39  ;;  %v1213_v57 = vadd.f32 %v2229_v45, %v1212_v47  ;;  %v1287_v45 = vmul.f32 %v2245_v2, %v2245_v2  ;;  %v1297_v47 = vmul.f32 %v2297_v28, %v2297_v28 }
 0x13d   : > { %v1214_v43 = vadd.f32 %v1213_v57, %v2243_v61  ;;  %v1346_v59 = vadd.f32 %v1345_v53, %v1283_v51 }
 0x13f   : > { %v1347_v50 = vadd.f32 %v1346_v59, %v1284_v58  ;;  %v1215_v60 = vadd.f32 %v1214_v43, %v2249_v9  ;;  %v1300_v43 = vmul.f32 %v2307_v44, %v2307_v44 }
 0x141   : > { %v1216_v3 = vadd.f32 %v2239_v56, %v1215_v60  ;;  %v1348_v4 = vadd.f32 %v1347_v50, %v1285_v1  ;;  %v1290_v56 = vmul.f32 %v2255_v16, %v2255_v16  ;;  %v1301_v50 = vmul.f32 %v2313_v62, %v2313_v62 }
 0x143   : > { %v1349_v6 = vadd.f32 %v1348_v4, %v1286_v41  ;;  %v1217_v5 = vadd.f32 %v2245_v2, %v1216_v3  ;;  %v1291_v2 = vmul.f32 %v2261_v26, %v2261_v26  ;;  %v1304_v4 = vmul.f32 %v2323_v15, %v2323_v15 }
 0x145   : > { %v1218_v61 = vadd.f32 %v1217_v5, %v2259_v21  ;;  %v1350_v12 = vadd.f32 %v1349_v6, %v1287_v45  ;;  %v1305_v5 = vmul.f32 %v2329_v32, %v2329_v32 }
 0x147   : > { %v1351_v14 = vadd.f32 %v1350_v12, %v1288_v10  ;;  %v1219_v9 = vadd.f32 %v1218_v61, %v2265_v33 }
 0x149   : > { %v1220_v18 = vadd.f32 %v2255_v16, %v1219_v9  ;;  %v1352_v20 = vadd.f32 %v1351_v14, %v1289_v17  ;;  %v1294_v16 = vmul.f32 %v2271_v40, %v2271_v40  ;;  %v1308_v9 = vmul.f32 %v2339_v55, %v2339_v55 }
 0x14b   : > { %v1353_v22 = vadd.f32 %v1352_v20, %v1290_v56  ;;  %v1221_v24 = vadd.f32 %v2261_v26, %v1220_v18  ;;  %v1295_v26 = vmul.f32 %v2277_v54, %v2277_v54  ;;  %v1309_v18 = vmul.f32 %v2345_v11, %v2345_v11 }
 0x14d   : > { %v1222_v21 = vadd.f32 %v1221_v24, %v2275_v48  ;;  %v1354_v27 = vadd.f32 %v1353_v22, %v1291_v2 }
 0x14f   : > { %v1355_v29 = vadd.f32 %v1354_v27, %v1292_v25  ;;  %v1223_v33 = vadd.f32 %v1222_v21, %v2281_v63 }
 0x151   : > { %v1224_v31 = vadd.f32 %v2271_v40, %v1223_v33  ;;  %v1356_v34 = vadd.f32 %v1355_v29, %v1293_v30  ;;  %v1298_v40 = vmul.f32 %v2287_v7, %v2287_v7 }
 0x153   : > { %v1357_v35 = vadd.f32 %v1356_v34, %v1294_v16  ;;  %v1225_v37 = vadd.f32 %v2277_v54, %v1224_v31  ;;  %v1299_v54 = vmul.f32 %v2293_v19, %v2293_v19 }
 0x155   : > { %v1226_v48 = vadd.f32 %v1225_v37, %v2291_v13  ;;  %v1358_v42 = vadd.f32 %v1357_v35, %v1295_v26 }
 0x157   : > { %v1359_v39 = vadd.f32 %v1358_v42, %v1296_v38  ;;  %v1227_v63 = vadd.f32 %v1226_v48, %v2297_v28 }
 0x159   : > { %v1228_v49 = vadd.f32 %v2287_v7, %v1227_v63  ;;  %v1360_v51 = vadd.f32 %v1359_v39, %v1297_v47  ;;  %v1302_v7 = vmul.f32 %v2303_v36, %v2303_v36 }
 0x15b   : > { %v1361_v53 = vadd.f32 %v1360_v51, %v1298_v40  ;;  %v1229_v57 = vadd.f32 %v2293_v19, %v1228_v49  ;;  %v1303_v19 = vmul.f32 %v2309_v52, %v2309_v52 }
 0x15d   : > { %v1230_v13 = vadd.f32 %v1229_v57, %v2307_v44  ;;  %v1362_v58 = vadd.f32 %v1361_v53, %v1299_v54 }
 0x15f   : > { %v1363_v59 = vadd.f32 %v1362_v58, %v1300_v43  ;;  %v1231_v28 = vadd.f32 %v1230_v13, %v2313_v62 }
 0x161   : > { %v1232_v60 = vadd.f32 %v2303_v36, %v1231_v28  ;;  %v1364_v1 = vadd.f32 %v1363_v59, %v1301_v50  ;;  %v1306_v36 = vmul.f32 %v2319_v8, %v2319_v8 }
 0x163   : > { %v1365_v41 = vadd.f32 %v1364_v1, %v1302_v7  ;;  %v1233_v3 = vadd.f32 %v2309_v52, %v1232_v60  ;;  %v1307_v52 = vmul.f32 %v2325_v23, %v2325_v23 }
 0x165   : > { %v1234_v44 = vadd.f32 %v1233_v3, %v2323_v15  ;;  %v1366_v45 = vadd.f32 %v1365_v41, %v1303_v19 }
 0x167   : > { %v1367_v6 = vadd.f32 %v1366_v45, %v1304_v4  ;;  %v1235_v62 = vadd.f32 %v1234_v44, %v2329_v32 }
 0x169   : > { %v1236_v61 = vadd.f32 %v2319_v8, %v1235_v62  ;;  %v1368_v10 = vadd.f32 %v1367_v6, %v1305_v5  ;;  %v1310_v8 = vmul.f32 %v2335_v46, %v2335_v46 }
 0x16b   : > { %v1369_v12 = vadd.f32 %v1368_v10, %v1306_v36  ;;  %v1237_v14 = vadd.f32 %v2325_v23, %v1236_v61  ;;  %v1311_v23 = vmul.f32 %v2341_v0, %v2341_v0 }
 0x16d   : > { %v1238_v15 = vadd.f32 %v1237_v14, %v2339_v55  ;;  %v1370_v17 = vadd.f32 %v1369_v12, %v1307_v52 }
 0x16f   : > { %v1371_v56 = vadd.f32 %v1370_v17, %v1308_v9  ;;  %v1239_v32 = vadd.f32 %v1238_v15, %v2345_v11 }
 0x171   : > { %v1240_v20 = vadd.f32 %v2335_v46, %v1239_v32  ;;  %v1372_v2 = vadd.f32 %v1371_v56, %v1309_v18 }
 0x173   : > { %v1241_v22 = vadd.f32 %v2341_v0, %v1240_v20  ;;  %v1373_v55 = vadd.f32 %v1372_v2, %v1310_v8 }
 0x175   : > { %v1242_v24 = vrot.slane %v1241_v22, 4  ;;  %v1374_v21 = vadd.f32 %v1373_v55, %v1311_v23 }
 0x177   : > { %v1243_v25 = vadd.f32 %v1242_v24, %v1241_v22  ;;  %v1375_v27 = vrot.slane %v1374_v21, 4 }
 0x179   : > { %v1244_v29 = vrot.slane %v1243_v25, 2  ;;  %v1376_v33 = vadd.f32 %v1375_v27, %v1374_v21 }
 0x17b   : > { %v1245_v11 = vadd.f32 %v1244_v29, %v1243_v25  ;;  %v1377_v30 = vrot.slane %v1376_v33, 2 }
 0x17d   : > { %v1246_v16 = vrot.slane %v1245_v11, 1  ;;  %v1378_v31 = vadd.f32 %v1377_v30, %v1376_v33 }
 0x17f   : > { %v1379_v34 = vrot.slane %v1378_v31, 1  ;;  %v1247_v46 = vadd.f32 %v1246_v16, %v1245_v11 }
 0x181   : > { %v1380_v0 = vadd.f32 %v1379_v34, %v1378_v31 }
 0x183   : > { %v1382_v26 = vsel %vm1381_vm0, %v1247_v46, %v1380_v0 }
 0x184   : > { %1383 = vst [vmem:[%s248_s30] sm:$0x3] %v1382_v26 }
 0x185 PF: > { %s14_s14 = sadd.s32 1, %s2122_s14   ;;  %s2466_s12 = smov %s2118_s13 }
 0x186   : > { %p11_p5 = scmp.ge.s32.totalorder %s14_s14, 6   ;;  %s2467_s13 = smov %s2469_s15 }
 0x188   :  { %13 = sbr.rel (!%p11_p5) target bundleno = 2 (0x2), region = 73 }

// kernel: _lambda_.19
= control target key start
LH: loop header
LB: loop body
LE: loop exit
PB: predicated region body
PF: predicated region fallthrough
CT: control target
= control target key end

     0   :  { %s4614_s12 = smov 0   ;;  %s4616_s13 = smov 0   ;;  %s5442_s0 = inlined_call_operand.vmem [shape: bf16[4,2048,64], index: 0, kind: input, shape index: {}]   ;;  %s5443_s1 = inlined_call_operand.vmem [shape: bf16[4,64,128], index: 1, kind: input, shape index: {}]   ;;  %s5444_s2 = inlined_call_operand.vmem [shape: f32[1,128], index: 2, kind: input, shape index: {}]   ;;  %s5445_s3 = inlined_call_operand.vmem [shape: f32[4,2048,128], index: 3, kind: output, shape index: {}]  }
   0x1   :  { %s4618_s14 = smov 0  }
   0x2 LB: > { %s25_s15 = sadd.s32 1, %s4588_s13  ;;  %p3223_p0 = scmp.ge.s32.totalorder %s4592_s14, 1  ;;  %s4592_s14 = sphi %s4618_s14, %s13_s14   ;;  %s4588_s13 = sphi %s4616_s13, %s5447_s13   ;;  %s4584_s12 = sphi %s4614_s12, %s5446_s12  }
   0x3   : > { %p27_p1 = scmp.ge.s32.totalorder %s25_s15, 4  ;;  %p168_p2 = scmp.lt.s32.totalorder %s4592_s14, 5 }
   0x5   : > { %s5449_s15 = smov (%p27_p1, %s25_s15), 0  ;;  %p169_p3 = pnand %p3223_p0, %p168_p2 }
   0x6   : > { %p206_p4 = scmp.lt.s32.totalorder (!%p169_p3), %s4584_s12, 3 }
   0x7   : > { %172 = sbr.rel (%p169_p3) target bundleno = 497 (0x1f1), region = 32 }
   0xc   : > { %s5451_s12 = smov (!%p206_p4, %s4584_s12), 3  ;;  %vm1166_vm0 = vcmask 523264  }
   0xd   : > { %s3493_s16 = sshll.u32 %s5451_s12, 10  ;;  %s3494_s17 = sshll.u32 %s5451_s12, 5 }
   0xe   : > { %s219_s20 = scalar_lea.vmem %s5443_s1, %s3494_s17  ;;  %s4642_s23 = scalar_lea.vmem %s5442_s0, %s3493_s16 }
   0xf   : > { %v3924_v0 = vld [vmem:[%s219_s20 + $0x18] sm:$0xff]   ;;  %v3925_v1 = vld [vmem:[%s219_s20 + $0x10] sm:$0xff]   ;;  %v3926_v2 = vld [vmem:[%s219_s20 + $0x8] sm:$0xff]   ;;  %s3495_s26 = sshll.u32 %s5451_s12, 11 }
  0x10   : > { %3628 = vmatprep.subr.bf16.mxu0 %v3924_v0  ;;  %3892 = vmatprep.subr.bf16.mxu1 %v3924_v0  ;;  %v3928_v3 = vld [vmem:[%s4642_s23] sm:$0xff]   ;;  %v3930_v6 = vld [vmem:[%s4642_s23 + $0x8] sm:$0xff]   ;;  %v3932_v8 = vld [vmem:[%s4642_s23 + $0x10] sm:$0xff]   ;;  %s4883_s29 = scalar_lea.vmem %s5445_s3, %s3495_s26 }
  0x11   : > { %3629 = vmatpush3.bf16.msra.mxu0 %v3924_v0  ;;  %3896 = vmatpush3.bf16.msra.mxu1 %v3924_v0  ;;  %v3929_v4 = vld [vmem:[%s4642_s23 + $0x200] sm:$0xff]   ;;  %v3931_v7 = vld [vmem:[%s4642_s23 + $0x208] sm:$0xff]   ;;  %v3933_v9 = vld [vmem:[%s4642_s23 + $0x210] sm:$0xff]  }
  0x12   : > { %3630 = vmatprep.subr.bf16.mxu0 %v3925_v1  ;;  %3893 = vmatprep.subr.bf16.mxu1 %v3925_v1  ;;  %v3927_v5 = vld [vmem:[%s219_s20] sm:$0xff]   ;;  %v3934_v10 = vld [vmem:[%s4642_s23 + $0x18] sm:$0xff]   ;;  %v3938_v14 = vld [vmem:[%s4642_s23 + $0x28] sm:$0xff]  }
  0x13   : > { %3636 = vmatprep.mubr.msk.bf16.mxu0 %vm1166_vm0, %v3928_v3  ;;  %3764 = vmatprep.mubr.msk.bf16.mxu1 %vm1166_vm0, %v3929_v4  ;;  %v3935_v11 = vld [vmem:[%s4642_s23 + $0x218] sm:$0xff]   ;;  %v3936_v12 = vld [vmem:[%s4642_s23 + $0x20] sm:$0xff]   ;;  %v3939_v15 = vld [vmem:[%s4642_s23 + $0x228] sm:$0xff]  }
  0x14   : > { %v3937_v13 = vld [vmem:[%s4642_s23 + $0x220] sm:$0xff]   ;;  %v3940_v16 = vld [vmem:[%s4642_s23 + $0x30] sm:$0xff]   ;;  %v3942_v18 = vld [vmem:[%s4642_s23 + $0x38] sm:$0xff]  }
  0x15   : > { %3631 = vmatpush3.bf16.msra.mxu0 %v3925_v1  ;;  %3897 = vmatpush3.bf16.msra.mxu1 %v3925_v1  ;;  %v3941_v17 = vld [vmem:[%s4642_s23 + $0x230] sm:$0xff]   ;;  %v3943_v19 = vld [vmem:[%s4642_s23 + $0x238] sm:$0xff]   ;;  %v3944_v20 = vld [vmem:[%s4642_s23 + $0x40] sm:$0xff]  }
  0x16   : > { %3632 = vmatprep.subr.bf16.mxu0 %v3926_v2  ;;  %3894 = vmatprep.subr.bf16.mxu1 %v3926_v2  ;;  %v3945_v21 = vld [vmem:[%s4642_s23 + $0x240] sm:$0xff]   ;;  %v3946_v22 = vld [vmem:[%s4642_s23 + $0x48] sm:$0xff]   ;;  %v3948_v24 = vld [vmem:[%s4642_s23 + $0x50] sm:$0xff]  }
  0x17   : > { %v3947_v23 = vld [vmem:[%s4642_s23 + $0x248] sm:$0xff]   ;;  %v3949_v25 = vld [vmem:[%s4642_s23 + $0x250] sm:$0xff]   ;;  %v3950_v26 = vld [vmem:[%s4642_s23 + $0x58] sm:$0xff]  }
  0x18   : > { %v3951_v27 = vld [vmem:[%s4642_s23 + $0x258] sm:$0xff]   ;;  %v3952_v28 = vld [vmem:[%s4642_s23 + $0x60] sm:$0xff]   ;;  %v3954_v30 = vld [vmem:[%s4642_s23 + $0x68] sm:$0xff]  }
  0x19   : > { %3633 = vmatpush3.bf16.msra.mxu0 %v3926_v2  ;;  %3898 = vmatpush3.bf16.msra.mxu1 %v3926_v2  ;;  %v3953_v29 = vld [vmem:[%s4642_s23 + $0x260] sm:$0xff]   ;;  %v3955_v31 = vld [vmem:[%s4642_s23 + $0x268] sm:$0xff]   ;;  %v3956_v32 = vld [vmem:[%s4642_s23 + $0x70] sm:$0xff]  }
  0x1a   : > { %3634 = vmatprep.subr.bf16.mxu0 %v3927_v5  ;;  %3895 = vmatprep.subr.bf16.mxu1 %v3927_v5  ;;  %v3957_v33 = vld [vmem:[%s4642_s23 + $0x270] sm:$0xff]   ;;  %v3958_v34 = vld [vmem:[%s4642_s23 + $0x78] sm:$0xff]   ;;  %v3960_v36 = vld [vmem:[%s4642_s23 + $0x80] sm:$0xff]  }
  0x1b   : > { %v3959_v35 = vld [vmem:[%s4642_s23 + $0x278] sm:$0xff]   ;;  %v3961_v37 = vld [vmem:[%s4642_s23 + $0x280] sm:$0xff]   ;;  %v3962_v38 = vld [vmem:[%s4642_s23 + $0x88] sm:$0xff]  }
  0x1c   : > { %v3963_v39 = vld [vmem:[%s4642_s23 + $0x288] sm:$0xff]   ;;  %v3964_v40 = vld [vmem:[%s4642_s23 + $0x90] sm:$0xff]   ;;  %v3966_v42 = vld [vmem:[%s4642_s23 + $0x98] sm:$0xff]  }
  0x1d   : > { %3635 = vmatpush3.bf16.msra.mxu0 %v3927_v5  ;;  %3899 = vmatpush3.bf16.msra.mxu1 %v3927_v5  ;;  %v3965_v41 = vld [vmem:[%s4642_s23 + $0x290] sm:$0xff]   ;;  %v3967_v43 = vld [vmem:[%s4642_s23 + $0x298] sm:$0xff]   ;;  %v3968_v44 = vld [vmem:[%s4642_s23 + $0xa0] sm:$0xff]  }
  0x1e   : > { %v3969_v45 = vld [vmem:[%s4642_s23 + $0x2a0] sm:$0xff]   ;;  %v3970_v46 = vld [vmem:[%s4642_s23 + $0xa8] sm:$0xff]   ;;  %v3972_v48 = vld [vmem:[%s4642_s23 + $0xb0] sm:$0xff]  }
  0x1f   : > { %v3971_v47 = vld [vmem:[%s4642_s23 + $0x2a8] sm:$0xff]   ;;  %v3973_v49 = vld [vmem:[%s4642_s23 + $0x2b0] sm:$0xff]   ;;  %v3974_v50 = vld [vmem:[%s4642_s23 + $0xb8] sm:$0xff]  }
  0x20   : > { %3637 = vmatmul.mubr.msk.bf16.vlgmr.msra.gmra.mxu0 %vm1166_vm0, %v3930_v6  ;;  %3765 = vmatmul.mubr.msk.bf16.vlgmr.msra.gmra.mxu1 %vm1166_vm0, %v3931_v7  ;;  %v3975_v51 = vld [vmem:[%s4642_s23 + $0x2b8] sm:$0xff]   ;;  %v3976_v52 = vld [vmem:[%s4642_s23 + $0xc0] sm:$0xff]   ;;  %v3978_v54 = vld [vmem:[%s4642_s23 + $0xc8] sm:$0xff]  }
  0x21   : > { %3640 = vmatprep.mubr.msk.bf16.mxu0 %vm1166_vm0, %v3932_v8  ;;  %3768 = vmatprep.mubr.msk.bf16.mxu1 %vm1166_vm0, %v3933_v9  ;;  %v3977_v53 = vld [vmem:[%s4642_s23 + $0x2c0] sm:$0xff]   ;;  %v3979_v55 = vld [vmem:[%s4642_s23 + $0x2c8] sm:$0xff]   ;;  %v3980_v56 = vld [vmem:[%s4642_s23 + $0xd0] sm:$0xff]  }
  0x22   : > { %v3981_v57 = vld [vmem:[%s4642_s23 + $0x2d0] sm:$0xff]   ;;  %v3982_v58 = vld [vmem:[%s4642_s23 + $0xd8] sm:$0xff]   ;;  %v3984_v60 = vld [vmem:[%s4642_s23 + $0xe0] sm:$0xff]  }
  0x23   : > { %v3983_v59 = vld [vmem:[%s4642_s23 + $0x2d8] sm:$0xff]   ;;  %v3985_v61 = vld [vmem:[%s4642_s23 + $0x2e0] sm:$0xff]   ;;  %v3986_v62 = vld [vmem:[%s4642_s23 + $0xe8] sm:$0xff]  }
  0x24   : > { %v3987_v63 = vld [vmem:[%s4642_s23 + $0x2e8] sm:$0xff]   ;;  %v3988_v0 = vld [vmem:[%s4642_s23 + $0xf0] sm:$0xff]   ;;  %v3990_v2 = vld [vmem:[%s4642_s23 + $0xf8] sm:$0xff]  }
  0x25   : > { %v3989_v1 = vld [vmem:[%s4642_s23 + $0x2f0] sm:$0xff]   ;;  %v3991_v3 = vld [vmem:[%s4642_s23 + $0x2f8] sm:$0xff]   ;;  %v3992_v4 = vld [vmem:[%s4642_s23 + $0x100] sm:$0xff]  }
  0x26   : > { %v3993_v5 = vld [vmem:[%s4642_s23 + $0x300] sm:$0xff]   ;;  %v3994_v6 = vld [vmem:[%s4642_s23 + $0x108] sm:$0xff]   ;;  %v3996_v8 = vld [vmem:[%s4642_s23 + $0x110] sm:$0xff]  }
  0x27   : > { %v3995_v7 = vld [vmem:[%s4642_s23 + $0x308] sm:$0xff]   ;;  %v3997_v9 = vld [vmem:[%s4642_s23 + $0x310] sm:$0xff]  }
  0x28   : > { %3641 = vmatmul.mubr.msk.bf16.gmra.mxu0 %vm1166_vm0, %v3934_v10  ;;  %3769 = vmatmul.mubr.msk.bf16.gmra.mxu1 %vm1166_vm0, %v3935_v11  ;;  %v3998_v10 = vld [vmem:[%s4642_s23 + $0x118] sm:$0xff]  }
  0x29   : > { %3644 = vmatprep.mubr.msk.bf16.mxu0 %vm1166_vm0, %v3936_v12  ;;  %3772 = vmatprep.mubr.msk.bf16.mxu1 %vm1166_vm0, %v3937_v13  ;;  %v3999_v11 = vld [vmem:[%s4642_s23 + $0x318] sm:$0xff]   ;;  %v4000_v12 = vld [vmem:[%s4642_s23 + $0x120] sm:$0xff]  }
  0x2a   : > { %v4001_v13 = vld [vmem:[%s4642_s23 + $0x320] sm:$0xff]  }
  0x30   : > { %3645 = vmatmul.mubr.msk.bf16.gmra.mxu0 %vm1166_vm0, %v3938_v14  ;;  %3773 = vmatmul.mubr.msk.bf16.gmra.mxu1 %vm1166_vm0, %v3939_v15  ;;  %v4002_v14 = vld [vmem:[%s4642_s23 + $0x128] sm:$0xff]  }
  0x31   : > { %3648 = vmatprep.mubr.msk.bf16.mxu0 %vm1166_vm0, %v3940_v16  ;;  %3776 = vmatprep.mubr.msk.bf16.mxu1 %vm1166_vm0, %v3941_v17  ;;  %v4003_v15 = vld [vmem:[%s4642_s23 + $0x328] sm:$0xff]   ;;  %v4004_v16 = vld [vmem:[%s4642_s23 + $0x130] sm:$0xff]  }
  0x32   : > { %v4005_v17 = vld [vmem:[%s4642_s23 + $0x330] sm:$0xff]  }
  0x38   : > { %3649 = vmatmul.mubr.msk.bf16.gmra.mxu0 %vm1166_vm0, %v3942_v18  ;;  %3777 = vmatmul.mubr.msk.bf16.gmra.mxu1 %vm1166_vm0, %v3943_v19  ;;  %v4006_v18 = vld [vmem:[%s4642_s23 + $0x138] sm:$0xff]  }
  0x39   : > { %3652 = vmatprep.mubr.msk.bf16.mxu0 %vm1166_vm0, %v3944_v20  ;;  %3780 = vmatprep.mubr.msk.bf16.mxu1 %vm1166_vm0, %v3945_v21  ;;  %v4007_v19 = vld [vmem:[%s4642_s23 + $0x338] sm:$0xff]   ;;  %v4008_v20 = vld [vmem:[%s4642_s23 + $0x140] sm:$0xff]  }
  0x3a   : > { %v4009_v21 = vld [vmem:[%s4642_s23 + $0x340] sm:$0xff]  }
  0x40   : > { %3653 = vmatmul.mubr.msk.bf16.gmra.mxu0 %vm1166_vm0, %v3946_v22  ;;  %3781 = vmatmul.mubr.msk.bf16.gmra.mxu1 %vm1166_vm0, %v3947_v23  ;;  %v4010_v22 = vld [vmem:[%s4642_s23 + $0x148] sm:$0xff]  }
  0x41   : > { %3656 = vmatprep.mubr.msk.bf16.mxu0 %vm1166_vm0, %v3948_v24  ;;  %3784 = vmatprep.mubr.msk.bf16.mxu1 %vm1166_vm0, %v3949_v25  ;;  %v4011_v23 = vld [vmem:[%s4642_s23 + $0x348] sm:$0xff]   ;;  %v4012_v24 = vld [vmem:[%s4642_s23 + $0x150] sm:$0xff]  }
  0x42   : > { %v4013_v25 = vld [vmem:[%s4642_s23 + $0x350] sm:$0xff]  }
  0x48   : > { %3657 = vmatmul.mubr.msk.bf16.gmra.mxu0 %vm1166_vm0, %v3950_v26  ;;  %3785 = vmatmul.mubr.msk.bf16.gmra.mxu1 %vm1166_vm0, %v3951_v27  ;;  %v4014_v26 = vld [vmem:[%s4642_s23 + $0x158] sm:$0xff]  }
  0x49   : > { %3660 = vmatprep.mubr.msk.bf16.mxu0 %vm1166_vm0, %v3952_v28  ;;  %3788 = vmatprep.mubr.msk.bf16.mxu1 %vm1166_vm0, %v3953_v29  ;;  %v4015_v27 = vld [vmem:[%s4642_s23 + $0x358] sm:$0xff]   ;;  %v4016_v28 = vld [vmem:[%s4642_s23 + $0x160] sm:$0xff]  }
  0x4a   : > { %v4017_v29 = vld [vmem:[%s4642_s23 + $0x360] sm:$0xff]  }
  0x50   : > { %3661 = vmatmul.mubr.msk.bf16.gmra.mxu0 %vm1166_vm0, %v3954_v30  ;;  %3789 = vmatmul.mubr.msk.bf16.gmra.mxu1 %vm1166_vm0, %v3955_v31  ;;  %v4018_v30 = vld [vmem:[%s4642_s23 + $0x168] sm:$0xff]  }
  0x51   : > { %3664 = vmatprep.mubr.msk.bf16.mxu0 %vm1166_vm0, %v3956_v32  ;;  %3792 = vmatprep.mubr.msk.bf16.mxu1 %vm1166_vm0, %v3957_v33  ;;  %v4019_v31 = vld [vmem:[%s4642_s23 + $0x368] sm:$0xff]   ;;  %v4020_v32 = vld [vmem:[%s4642_s23 + $0x170] sm:$0xff]  }
  0x52   : > { %v4021_v33 = vld [vmem:[%s4642_s23 + $0x370] sm:$0xff]  }
  0x58   : > { %3665 = vmatmul.mubr.msk.bf16.gmra.mxu0 %vm1166_vm0, %v3958_v34  ;;  %3793 = vmatmul.mubr.msk.bf16.gmra.mxu1 %vm1166_vm0, %v3959_v35  ;;  %v4022_v34 = vld [vmem:[%s4642_s23 + $0x178] sm:$0xff]  }
  0x59   : > { %3668 = vmatprep.mubr.msk.bf16.mxu0 %vm1166_vm0, %v3960_v36  ;;  %3796 = vmatprep.mubr.msk.bf16.mxu1 %vm1166_vm0, %v3961_v37  ;;  %v4023_v35 = vld [vmem:[%s4642_s23 + $0x378] sm:$0xff]   ;;  %v4024_v36 = vld [vmem:[%s4642_s23 + $0x180] sm:$0xff]  }
  0x5a   : > { %v4025_v37 = vld [vmem:[%s4642_s23 + $0x380] sm:$0xff]  }
  0x60   : > { %3669 = vmatmul.mubr.msk.bf16.gmra.mxu0 %vm1166_vm0, %v3962_v38  ;;  %3797 = vmatmul.mubr.msk.bf16.gmra.mxu1 %vm1166_vm0, %v3963_v39  ;;  %v4026_v38 = vld [vmem:[%s4642_s23 + $0x188] sm:$0xff]  }
  0x61   : > { %3672 = vmatprep.mubr.msk.bf16.mxu0 %vm1166_vm0, %v3964_v40  ;;  %3800 = vmatprep.mubr.msk.bf16.mxu1 %vm1166_vm0, %v3965_v41  ;;  %v4027_v39 = vld [vmem:[%s4642_s23 + $0x388] sm:$0xff]   ;;  %v4028_v40 = vld [vmem:[%s4642_s23 + $0x190] sm:$0xff]  }
  0x62   : > { %v4029_v41 = vld [vmem:[%s4642_s23 + $0x390] sm:$0xff]  }
  0x68   : > { %3673 = vmatmul.mubr.msk.bf16.gmra.mxu0 %vm1166_vm0, %v3966_v42  ;;  %3801 = vmatmul.mubr.msk.bf16.gmra.mxu1 %vm1166_vm0, %v3967_v43  ;;  %v4847_v42 = vld [vmem:[%s5444_s2] ss:$0 sm:$0xff] }
  0x69   : > { %3676 = vmatprep.mubr.msk.bf16.mxu0 %vm1166_vm0, %v3968_v44  ;;  %3804 = vmatprep.mubr.msk.bf16.mxu1 %vm1166_vm0, %v3969_v45 }
  0x70   : > { %3677 = vmatmul.mubr.msk.bf16.gmra.mxu0 %vm1166_vm0, %v3970_v46  ;;  %3805 = vmatmul.mubr.msk.bf16.gmra.mxu1 %vm1166_vm0, %v3971_v47 }
  0x71   : > { %3680 = vmatprep.mubr.msk.bf16.mxu0 %vm1166_vm0, %v3972_v48  ;;  %3808 = vmatprep.mubr.msk.bf16.mxu1 %vm1166_vm0, %v3973_v49 }
  0x78   : > { %3681 = vmatmul.mubr.msk.bf16.gmra.mxu0 %vm1166_vm0, %v3974_v50  ;;  %3809 = vmatmul.mubr.msk.bf16.gmra.mxu1 %vm1166_vm0, %v3975_v51 }
  0x79   : > { %3684 = vmatprep.mubr.msk.bf16.mxu0 %vm1166_vm0, %v3976_v52  ;;  %3812 = vmatprep.mubr.msk.bf16.mxu1 %vm1166_vm0, %v3977_v53  ;;  %v4030_v53 = vld [vmem:[%s4642_s23 + $0x198] sm:$0xff]  }
  0x80   : > { %3685 = vmatmul.mubr.msk.bf16.gmra.mxu0 %vm1166_vm0, %v3978_v54  ;;  %3813 = vmatmul.mubr.msk.bf16.gmra.mxu1 %vm1166_vm0, %v3979_v55  ;;  %v4031_v54 = vld [vmem:[%s4642_s23 + $0x398] sm:$0xff]  }
  0x81   : > { %3688 = vmatprep.mubr.msk.bf16.mxu0 %vm1166_vm0, %v3980_v56  ;;  %3816 = vmatprep.mubr.msk.bf16.mxu1 %vm1166_vm0, %v3981_v57  ;;  %v4032_v57 = vld [vmem:[%s4642_s23 + $0x1a0] sm:$0xff]  }
  0x88   : > { %3689 = vmatmul.mubr.msk.bf16.gmra.mxu0 %vm1166_vm0, %v3982_v58  ;;  %3817 = vmatmul.mubr.msk.bf16.gmra.mxu1 %vm1166_vm0, %v3983_v59  ;;  %v4033_v58 = vld [vmem:[%s4642_s23 + $0x3a0] sm:$0xff]  }
  0x89   : > { %3692 = vmatprep.mubr.msk.bf16.mxu0 %vm1166_vm0, %v3984_v60  ;;  %3820 = vmatprep.mubr.msk.bf16.mxu1 %vm1166_vm0, %v3985_v61 }
  0x90   : > { %3693 = vmatmul.mubr.msk.bf16.gmra.mxu0 %vm1166_vm0, %v3986_v62  ;;  %3821 = vmatmul.mubr.msk.bf16.gmra.mxu1 %vm1166_vm0, %v3987_v63 }
  0x91   : > { %3696 = vmatprep.mubr.msk.bf16.mxu0 %vm1166_vm0, %v3988_v0  ;;  %3824 = vmatprep.mubr.msk.bf16.mxu1 %vm1166_vm0, %v3989_v1 }
  0x98   : > { %3697 = vmatmul.mubr.msk.bf16.gmra.mxu0 %vm1166_vm0, %v3990_v2  ;;  %3825 = vmatmul.mubr.msk.bf16.gmra.mxu1 %vm1166_vm0, %v3991_v3 }
  0x99   : > { %3700 = vmatprep.mubr.msk.bf16.mxu0 %vm1166_vm0, %v3992_v4  ;;  %3828 = vmatprep.mubr.msk.bf16.mxu1 %vm1166_vm0, %v3993_v5 }
  0xa0   : > { %3701 = vmatmul.mubr.msk.bf16.gmra.mxu0 %vm1166_vm0, %v3994_v6  ;;  %3829 = vmatmul.mubr.msk.bf16.gmra.mxu1 %vm1166_vm0, %v3995_v7 }
  0xa1   : > { %3704 = vmatprep.mubr.msk.bf16.mxu0 %vm1166_vm0, %v3996_v8  ;;  %3832 = vmatprep.mubr.msk.bf16.mxu1 %vm1166_vm0, %v3997_v9  ;;  %v4034_v9 = vld [vmem:[%s4642_s23 + $0x1a8] sm:$0xff]  }
  0xa8   : > { %3705 = vmatmul.mubr.msk.bf16.gmra.mxu0 %vm1166_vm0, %v3998_v10  ;;  %3833 = vmatmul.mubr.msk.bf16.gmra.mxu1 %vm1166_vm0, %v3999_v11  ;;  %v4035_v10 = vld [vmem:[%s4642_s23 + $0x3a8] sm:$0xff]  }
  0xa9   : > { %3708 = vmatprep.mubr.msk.bf16.mxu0 %vm1166_vm0, %v4000_v12  ;;  %3836 = vmatprep.mubr.msk.bf16.mxu1 %vm1166_vm0, %v4001_v13  ;;  %v4036_v13 = vld [vmem:[%s4642_s23 + $0x1b0] sm:$0xff]  }
  0xb0   : > { %3709 = vmatmul.mubr.msk.bf16.gmra.mxu0 %vm1166_vm0, %v4002_v14  ;;  %3837 = vmatmul.mubr.msk.bf16.gmra.mxu1 %vm1166_vm0, %v4003_v15  ;;  %v4037_v14 = vld [vmem:[%s4642_s23 + $0x3b0] sm:$0xff]  }
  0xb1   : > { %3712 = vmatprep.mubr.msk.bf16.mxu0 %vm1166_vm0, %v4004_v16  ;;  %3840 = vmatprep.mubr.msk.bf16.mxu1 %vm1166_vm0, %v4005_v17 }
  0xb8   : > { %3713 = vmatmul.mubr.msk.bf16.gmra.mxu0 %vm1166_vm0, %v4006_v18  ;;  %3841 = vmatmul.mubr.msk.bf16.gmra.mxu1 %vm1166_vm0, %v4007_v19 }
  0xb9   : > { %3716 = vmatprep.mubr.msk.bf16.mxu0 %vm1166_vm0, %v4008_v20  ;;  %3844 = vmatprep.mubr.msk.bf16.mxu1 %vm1166_vm0, %v4009_v21 }
  0xc0   : > { %3717 = vmatmul.mubr.msk.bf16.gmra.mxu0 %vm1166_vm0, %v4010_v22  ;;  %3845 = vmatmul.mubr.msk.bf16.gmra.mxu1 %vm1166_vm0, %v4011_v23 }
  0xc1   : > { %3720 = vmatprep.mubr.msk.bf16.mxu0 %vm1166_vm0, %v4012_v24  ;;  %3848 = vmatprep.mubr.msk.bf16.mxu1 %vm1166_vm0, %v4013_v25 }
  0xc8   : > { %3721 = vmatmul.mubr.msk.bf16.gmra.mxu0 %vm1166_vm0, %v4014_v26  ;;  %3849 = vmatmul.mubr.msk.bf16.gmra.mxu1 %vm1166_vm0, %v4015_v27 }
  0xc9   : > { %3724 = vmatprep.mubr.msk.bf16.mxu0 %vm1166_vm0, %v4016_v28  ;;  %3852 = vmatprep.mubr.msk.bf16.mxu1 %vm1166_vm0, %v4017_v29 }
  0xd0   : > { %3725 = vmatmul.mubr.msk.bf16.gmra.mxu0 %vm1166_vm0, %v4018_v30  ;;  %3853 = vmatmul.mubr.msk.bf16.gmra.mxu1 %vm1166_vm0, %v4019_v31 }
  0xd1   : > { %3728 = vmatprep.mubr.msk.bf16.mxu0 %vm1166_vm0, %v4020_v32  ;;  %3856 = vmatprep.mubr.msk.bf16.mxu1 %vm1166_vm0, %v4021_v33 }
  0xd8   : > { %3729 = vmatmul.mubr.msk.bf16.gmra.mxu0 %vm1166_vm0, %v4022_v34  ;;  %3857 = vmatmul.mubr.msk.bf16.gmra.mxu1 %vm1166_vm0, %v4023_v35  ;;  %v4038_v34 = vld [vmem:[%s4642_s23 + $0x1b8] sm:$0xff]  }
  0xd9   : > { %3732 = vmatprep.mubr.msk.bf16.mxu0 %vm1166_vm0, %v4024_v36  ;;  %3860 = vmatprep.mubr.msk.bf16.mxu1 %vm1166_vm0, %v4025_v37  ;;  %v4039_v35 = vld [vmem:[%s4642_s23 + $0x3b8] sm:$0xff]  }
  0xe0   : > { %v3638_v43 = vpop.f32.mrf.mxu0  ;;  %3733 = vmatmul.mubr.msk.bf16.gmra.mxu0 %vm1166_vm0, %v4026_v38  ;;  %v3766_v44 = vpop.f32.mrf.mxu1  ;;  %3861 = vmatmul.mubr.msk.bf16.gmra.mxu1 %vm1166_vm0, %v4027_v39  ;;  %v4040_v39 = vld [vmem:[%s4642_s23 + $0x1c0] sm:$0xff]  }
  0xe1   : > { %v1594_v45 = vadd.f32 %v3638_v43, %v4847_v42  ;;  %v2106_v46 = vadd.f32 %v3766_v44, %v4847_v42  ;;  %3736 = vmatprep.mubr.msk.bf16.mxu0 %vm1166_vm0, %v4028_v40  ;;  %3864 = vmatprep.mubr.msk.bf16.mxu1 %vm1166_vm0, %v4029_v41  ;;  %v4041_v40 = vld [vmem:[%s4642_s23 + $0x3c0] sm:$0xff]  }
  0xe2   : > { %v1585_v47 = vpop.f32.mrf.mxu0  ;;  %v2097_v48 = vpop.f32.mrf.mxu1 }
  0xe3   : > { %4056 = vtanh.f32 %v1594_v45  ;;  %v1586_v49 = vadd.f32 %v4847_v42, %v1585_v47  ;;  %v2098_v50 = vadd.f32 %v4847_v42, %v2097_v48 }
  0xe4   : > { %4058 = vtanh.f32 %v2106_v46  ;;  %v3639_v51 = vpop.f32.mrf.mxu0  ;;  %v3767_v52 = vpop.f32.mrf.mxu1 }
  0xe5   : > { %4060 = vtanh.f32 %v1586_v49  ;;  %v1597_v55 = vadd.f32 %v3639_v51, %v4847_v42  ;;  %v2109_v56 = vadd.f32 %v3767_v52, %v4847_v42 }
  0xe6   : > { %4062 = vtanh.f32 %v2098_v50  ;;  %v1588_v59 = vpop.f32.mrf.mxu0  ;;  %v2100_v60 = vpop.f32.mrf.mxu1 }
  0xe7   : > { %4064 = vtanh.f32 %v1597_v55  ;;  %v1589_v61 = vadd.f32 %v4847_v42, %v1588_v59  ;;  %v2101_v62 = vadd.f32 %v4847_v42, %v2100_v60 }
  0xe8   : > { %4066 = vtanh.f32 %v2109_v56  ;;  %v3642_v63 = vpop.f32.mrf.mxu0  ;;  %3737 = vmatmul.mubr.msk.bf16.gmra.mxu0 %vm1166_vm0, %v4030_v53  ;;  %v3770_v0 = vpop.f32.mrf.mxu1  ;;  %3865 = vmatmul.mubr.msk.bf16.gmra.mxu1 %vm1166_vm0, %v4031_v54 }
  0xe9   : > { %4068 = vtanh.f32 %v1589_v61  ;;  %v1610_v1 = vadd.f32 %v3642_v63, %v4847_v42  ;;  %v2122_v2 = vadd.f32 %v3770_v0, %v4847_v42  ;;  %3740 = vmatprep.mubr.msk.bf16.mxu0 %vm1166_vm0, %v4032_v57  ;;  %3868 = vmatprep.mubr.msk.bf16.mxu1 %vm1166_vm0, %v4033_v58  ;;  %v4042_v63 = vld [vmem:[%s4642_s23 + $0x1c8] sm:$0xff]  }
  0xea   : > { %4070 = vtanh.f32 %v2101_v62  ;;  %v1601_v3 = vpop.f32.mrf.mxu0  ;;  %v2113_v4 = vpop.f32.mrf.mxu1  ;;  %v4043_v0 = vld [vmem:[%s4642_s23 + $0x3c8] sm:$0xff]  }
  0xeb   : > { %4072 = vtanh.f32 %v1610_v1  ;;  %v1602_v5 = vadd.f32 %v4847_v42, %v1601_v3  ;;  %v2114_v6 = vadd.f32 %v4847_v42, %v2113_v4  ;;  %v4044_v4 = vld [vmem:[%s4642_s23 + $0x1d0] sm:$0xff]  }
  0xec   : > { %4074 = vtanh.f32 %v2122_v2  ;;  %v3643_v7 = vpop.f32.mrf.mxu0  ;;  %v3771_v8 = vpop.f32.mrf.mxu1 }
  0xed   : > { %4076 = vtanh.f32 %v1602_v5  ;;  %v1613_v11 = vadd.f32 %v3643_v7, %v4847_v42  ;;  %v2125_v12 = vadd.f32 %v3771_v8, %v4847_v42  ;;  %v4045_v5 = vld [vmem:[%s4642_s23 + $0x3d0] sm:$0xff]  }
  0xee   : > { %4078 = vtanh.f32 %v2114_v6  ;;  %v1604_v15 = vpop.f32.mrf.mxu0  ;;  %v2116_v16 = vpop.f32.mrf.mxu1 }
  0xef   : > { %4080 = vtanh.f32 %v1613_v11  ;;  %v1605_v17 = vadd.f32 %v4847_v42, %v1604_v15  ;;  %v2117_v18 = vadd.f32 %v4847_v42, %v2116_v16 }
  0xf0   : > { %v4057_v19 = vpop.eup %4056  ;;  %4082 = vtanh.f32 %v2125_v12  ;;  %v3646_v20 = vpop.f32.mrf.mxu0  ;;  %3741 = vmatmul.mubr.msk.bf16.gmra.mxu0 %vm1166_vm0, %v4034_v9  ;;  %3869 = vmatmul.mubr.msk.bf16.gmra.mxu1 %vm1166_vm0, %v4035_v10 }
  0xf1   : > { %v3774_v21 = vpop.f32.mrf.mxu1  ;;  %v4059_v22 = vpop.eup %4058  ;;  %2866 = vst [vmem:[%s4883_s29 + $0x10] sm:$0xff] %v4057_v19  ;;  %4084 = vtanh.f32 %v1605_v17  ;;  %v1626_v23 = vadd.f32 %v3646_v20, %v4847_v42  ;;  %3744 = vmatprep.mubr.msk.bf16.mxu0 %vm1166_vm0, %v4036_v13  ;;  %3872 = vmatprep.mubr.msk.bf16.mxu1 %vm1166_vm0, %v4037_v14 }
  0xf2   : > { %v2138_v24 = vadd.f32 %v3774_v21, %v4847_v42  ;;  %v4061_v25 = vpop.eup %4060  ;;  %2994 = vst [vmem:[%s4883_s29 + $0x410] sm:$0xff] %v4059_v22  ;;  %4086 = vtanh.f32 %v2117_v18  ;;  %v1617_v26 = vpop.f32.mrf.mxu0 }
  0xf3   : > { %v2129_v27 = vpop.f32.mrf.mxu1  ;;  %v4063_v28 = vpop.eup %4062  ;;  %2864 = vst [vmem:[%s4883_s29] sm:$0xff] %v4061_v25  ;;  %4088 = vtanh.f32 %v1626_v23  ;;  %v1618_v29 = vadd.f32 %v4847_v42, %v1617_v26 }
  0xf4   : > { %v2130_v30 = vadd.f32 %v4847_v42, %v2129_v27  ;;  %v4065_v31 = vpop.eup %4064  ;;  %2992 = vst [vmem:[%s4883_s29 + $0x400] sm:$0xff] %v4063_v28  ;;  %4090 = vtanh.f32 %v2138_v24  ;;  %v3647_v32 = vpop.f32.mrf.mxu0  ;;  %v4046_v27 = vld [vmem:[%s4642_s23 + $0x1d8] sm:$0xff]  }
  0xf5   : > { %v3775_v33 = vpop.f32.mrf.mxu1  ;;  %v4067_v36 = vpop.eup %4066  ;;  %2867 = vst [vmem:[%s4883_s29 + $0x18] sm:$0xff] %v4065_v31  ;;  %4092 = vtanh.f32 %v1618_v29  ;;  %v1629_v37 = vadd.f32 %v3647_v32, %v4847_v42  ;;  %v4047_v28 = vld [vmem:[%s4642_s23 + $0x3d8] sm:$0xff]   ;;  %v4048_v32 = vld [vmem:[%s4642_s23 + $0x1e0] sm:$0xff]  }
  0xf6   : > { %v2141_v38 = vadd.f32 %v3775_v33, %v4847_v42  ;;  %v4069_v41 = vpop.eup %4068  ;;  %2995 = vst [vmem:[%s4883_s29 + $0x418] sm:$0xff] %v4067_v36  ;;  %4094 = vtanh.f32 %v2130_v30  ;;  %v1620_v43 = vpop.f32.mrf.mxu0  ;;  %v4049_v33 = vld [vmem:[%s4642_s23 + $0x3e0] sm:$0xff]  }
  0xf7   : > { %v2132_v44 = vpop.f32.mrf.mxu1  ;;  %v4071_v45 = vpop.eup %4070  ;;  %2865 = vst [vmem:[%s4883_s29 + $0x8] sm:$0xff] %v4069_v41  ;;  %4096 = vtanh.f32 %v1629_v37  ;;  %v1621_v46 = vadd.f32 %v4847_v42, %v1620_v43 }
  0xf8   : > { %v2133_v47 = vadd.f32 %v4847_v42, %v2132_v44  ;;  %v4073_v48 = vpop.eup %4072  ;;  %2993 = vst [vmem:[%s4883_s29 + $0x408] sm:$0xff] %v4071_v45  ;;  %4098 = vtanh.f32 %v2141_v38  ;;  %v3650_v49 = vpop.f32.mrf.mxu0  ;;  %3745 = vmatmul.mubr.msk.bf16.gmra.mxu0 %vm1166_vm0, %v4038_v34  ;;  %3873 = vmatmul.mubr.msk.bf16.gmra.mxu1 %vm1166_vm0, %v4039_v35 }
  0xf9   : > { %v3778_v50 = vpop.f32.mrf.mxu1  ;;  %v4075_v51 = vpop.eup %4074  ;;  %2870 = vst [vmem:[%s4883_s29 + $0x30] sm:$0xff] %v4073_v48  ;;  %4100 = vtanh.f32 %v1621_v46  ;;  %v1642_v52 = vadd.f32 %v3650_v49, %v4847_v42  ;;  %3748 = vmatprep.mubr.msk.bf16.mxu0 %vm1166_vm0, %v4040_v39  ;;  %3876 = vmatprep.mubr.msk.bf16.mxu1 %vm1166_vm0, %v4041_v40 }
  0xfa   : > { %v2154_v53 = vadd.f32 %v3778_v50, %v4847_v42  ;;  %v4077_v54 = vpop.eup %4076  ;;  %2998 = vst [vmem:[%s4883_s29 + $0x430] sm:$0xff] %v4075_v51  ;;  %4102 = vtanh.f32 %v2133_v47  ;;  %v1633_v55 = vpop.f32.mrf.mxu0 }
  0xfb   : > { %v2145_v56 = vpop.f32.mrf.mxu1  ;;  %v4079_v57 = vpop.eup %4078  ;;  %2868 = vst [vmem:[%s4883_s29 + $0x20] sm:$0xff] %v4077_v54  ;;  %4104 = vtanh.f32 %v1642_v52  ;;  %v1634_v58 = vadd.f32 %v4847_v42, %v1633_v55 }
  0xfc   : > { %v2146_v59 = vadd.f32 %v4847_v42, %v2145_v56  ;;  %v4081_v60 = vpop.eup %4080  ;;  %2996 = vst [vmem:[%s4883_s29 + $0x420] sm:$0xff] %v4079_v57  ;;  %4106 = vtanh.f32 %v2154_v53  ;;  %v3651_v61 = vpop.f32.mrf.mxu0  ;;  %v4050_v56 = vld [vmem:[%s4642_s23 + $0x1e8] sm:$0xff]  }
  0xfd   : > { %v3779_v62 = vpop.f32.mrf.mxu1  ;;  %v4083_v1 = vpop.eup %4082  ;;  %2871 = vst [vmem:[%s4883_s29 + $0x38] sm:$0xff] %v4081_v60  ;;  %4108 = vtanh.f32 %v1634_v58  ;;  %v1645_v2 = vadd.f32 %v3651_v61, %v4847_v42  ;;  %v4051_v57 = vld [vmem:[%s4642_s23 + $0x3e8] sm:$0xff]   ;;  %v4052_v61 = vld [vmem:[%s4642_s23 + $0x1f0] sm:$0xff]  }
  0xfe   : > { %v2157_v3 = vadd.f32 %v3779_v62, %v4847_v42  ;;  %v4085_v6 = vpop.eup %4084  ;;  %2999 = vst [vmem:[%s4883_s29 + $0x438] sm:$0xff] %v4083_v1  ;;  %4110 = vtanh.f32 %v2146_v59  ;;  %v1636_v7 = vpop.f32.mrf.mxu0  ;;  %v4053_v62 = vld [vmem:[%s4642_s23 + $0x3f0] sm:$0xff]  }
  0xff   : > { %v2148_v8 = vpop.f32.mrf.mxu1  ;;  %v4087_v9 = vpop.eup %4086  ;;  %2869 = vst [vmem:[%s4883_s29 + $0x28] sm:$0xff] %v4085_v6  ;;  %4112 = vtanh.f32 %v1645_v2  ;;  %v1637_v10 = vadd.f32 %v4847_v42, %v1636_v7 }
 0x100   : > { %v2149_v11 = vadd.f32 %v4847_v42, %v2148_v8  ;;  %v4089_v12 = vpop.eup %4088  ;;  %2997 = vst [vmem:[%s4883_s29 + $0x428] sm:$0xff] %v4087_v9  ;;  %4114 = vtanh.f32 %v2157_v3  ;;  %v3654_v13 = vpop.f32.mrf.mxu0  ;;  %3749 = vmatmul.mubr.msk.bf16.gmra.mxu0 %vm1166_vm0, %v4042_v63  ;;  %3877 = vmatmul.mubr.msk.bf16.gmra.mxu1 %vm1166_vm0, %v4043_v0 }
 0x101   : > { %v3782_v14 = vpop.f32.mrf.mxu1  ;;  %v4091_v15 = vpop.eup %4090  ;;  %2874 = vst [vmem:[%s4883_s29 + $0x50] sm:$0xff] %v4089_v12  ;;  %4116 = vtanh.f32 %v1637_v10  ;;  %v1658_v16 = vadd.f32 %v3654_v13, %v4847_v42  ;;  %3752 = vmatprep.mubr.msk.bf16.mxu0 %vm1166_vm0, %v4044_v4  ;;  %3880 = vmatprep.mubr.msk.bf16.mxu1 %vm1166_vm0, %v4045_v5 }
 0x102   : > { %v2170_v17 = vadd.f32 %v3782_v14, %v4847_v42  ;;  %v4093_v18 = vpop.eup %4092  ;;  %3002 = vst [vmem:[%s4883_s29 + $0x450] sm:$0xff] %v4091_v15  ;;  %4118 = vtanh.f32 %v2149_v11  ;;  %v1649_v19 = vpop.f32.mrf.mxu0 }
 0x103   : > { %v2161_v20 = vpop.f32.mrf.mxu1  ;;  %v4095_v21 = vpop.eup %4094  ;;  %2872 = vst [vmem:[%s4883_s29 + $0x40] sm:$0xff] %v4093_v18  ;;  %4120 = vtanh.f32 %v1658_v16  ;;  %v1650_v22 = vadd.f32 %v4847_v42, %v1649_v19 }
 0x104   : > { %v2162_v23 = vadd.f32 %v4847_v42, %v2161_v20  ;;  %v4097_v24 = vpop.eup %4096  ;;  %3000 = vst [vmem:[%s4883_s29 + $0x440] sm:$0xff] %v4095_v21  ;;  %4122 = vtanh.f32 %v2170_v17  ;;  %v3655_v25 = vpop.f32.mrf.mxu0  ;;  %v4054_v20 = vld [vmem:[%s4642_s23 + $0x1f8] sm:$0xff]  }
 0x105   : > { %v3783_v26 = vpop.f32.mrf.mxu1  ;;  %v4099_v29 = vpop.eup %4098  ;;  %2875 = vst [vmem:[%s4883_s29 + $0x58] sm:$0xff] %v4097_v24  ;;  %4124 = vtanh.f32 %v1650_v22  ;;  %v1661_v30 = vadd.f32 %v3655_v25, %v4847_v42  ;;  %v4055_v21 = vld [vmem:[%s4642_s23 + $0x3f8] sm:$0xff]  }
 0x106   : > { %v2173_v31 = vadd.f32 %v3783_v26, %v4847_v42  ;;  %v4101_v34 = vpop.eup %4100  ;;  %3003 = vst [vmem:[%s4883_s29 + $0x458] sm:$0xff] %v4099_v29  ;;  %4126 = vtanh.f32 %v2162_v23  ;;  %v1652_v35 = vpop.f32.mrf.mxu0 }
 0x107   : > { %v2164_v36 = vpop.f32.mrf.mxu1  ;;  %v4103_v37 = vpop.eup %4102  ;;  %2873 = vst [vmem:[%s4883_s29 + $0x48] sm:$0xff] %v4101_v34  ;;  %4128 = vtanh.f32 %v1661_v30  ;;  %v1653_v38 = vadd.f32 %v4847_v42, %v1652_v35 }
 0x108   : > { %v2165_v39 = vadd.f32 %v4847_v42, %v2164_v36  ;;  %v4105_v40 = vpop.eup %4104  ;;  %3001 = vst [vmem:[%s4883_s29 + $0x448] sm:$0xff] %v4103_v37  ;;  %4130 = vtanh.f32 %v2173_v31  ;;  %v3658_v41 = vpop.f32.mrf.mxu0  ;;  %3753 = vmatmul.mubr.msk.bf16.gmra.mxu0 %vm1166_vm0, %v4046_v27  ;;  %3881 = vmatmul.mubr.msk.bf16.gmra.mxu1 %vm1166_vm0, %v4047_v28 }
 0x109   : > { %v3786_v43 = vpop.f32.mrf.mxu1  ;;  %v4107_v44 = vpop.eup %4106  ;;  %2878 = vst [vmem:[%s4883_s29 + $0x70] sm:$0xff] %v4105_v40  ;;  %4132 = vtanh.f32 %v1653_v38  ;;  %v1674_v45 = vadd.f32 %v3658_v41, %v4847_v42  ;;  %3756 = vmatprep.mubr.msk.bf16.mxu0 %vm1166_vm0, %v4048_v32  ;;  %3884 = vmatprep.mubr.msk.bf16.mxu1 %vm1166_vm0, %v4049_v33 }
 0x10a   : > { %v2186_v46 = vadd.f32 %v3786_v43, %v4847_v42  ;;  %v4109_v47 = vpop.eup %4108  ;;  %3006 = vst [vmem:[%s4883_s29 + $0x470] sm:$0xff] %v4107_v44  ;;  %4134 = vtanh.f32 %v2165_v39  ;;  %v1665_v48 = vpop.f32.mrf.mxu0 }
 0x10b   : > { %v2177_v49 = vpop.f32.mrf.mxu1  ;;  %v4111_v50 = vpop.eup %4110  ;;  %2876 = vst [vmem:[%s4883_s29 + $0x60] sm:$0xff] %v4109_v47  ;;  %4136 = vtanh.f32 %v1674_v45  ;;  %v1666_v51 = vadd.f32 %v4847_v42, %v1665_v48 }
 0x10c   : > { %v2178_v52 = vadd.f32 %v4847_v42, %v2177_v49  ;;  %v4113_v53 = vpop.eup %4112  ;;  %3004 = vst [vmem:[%s4883_s29 + $0x460] sm:$0xff] %v4111_v50  ;;  %4138 = vtanh.f32 %v2186_v46  ;;  %v3659_v54 = vpop.f32.mrf.mxu0 }
 0x10d   : > { %v3787_v55 = vpop.f32.mrf.mxu1  ;;  %v4115_v58 = vpop.eup %4114  ;;  %2879 = vst [vmem:[%s4883_s29 + $0x78] sm:$0xff] %v4113_v53  ;;  %4140 = vtanh.f32 %v1666_v51  ;;  %v1677_v59 = vadd.f32 %v3659_v54, %v4847_v42 }
 0x10e   : > { %v2189_v60 = vadd.f32 %v3787_v55, %v4847_v42  ;;  %v4117_v63 = vpop.eup %4116  ;;  %3007 = vst [vmem:[%s4883_s29 + $0x478] sm:$0xff] %v4115_v58  ;;  %4142 = vtanh.f32 %v2178_v52  ;;  %v1668_v0 = vpop.f32.mrf.mxu0 }
 0x10f   : > { %v2180_v1 = vpop.f32.mrf.mxu1  ;;  %v4119_v2 = vpop.eup %4118  ;;  %2877 = vst [vmem:[%s4883_s29 + $0x68] sm:$0xff] %v4117_v63  ;;  %4144 = vtanh.f32 %v1677_v59  ;;  %v1669_v3 = vadd.f32 %v4847_v42, %v1668_v0 }
 0x110   : > { %v2181_v4 = vadd.f32 %v4847_v42, %v2180_v1  ;;  %v4121_v5 = vpop.eup %4120  ;;  %3005 = vst [vmem:[%s4883_s29 + $0x468] sm:$0xff] %v4119_v2  ;;  %4146 = vtanh.f32 %v2189_v60  ;;  %v3662_v6 = vpop.f32.mrf.mxu0  ;;  %3757 = vmatmul.mubr.msk.bf16.gmra.mxu0 %vm1166_vm0, %v4050_v56  ;;  %3885 = vmatmul.mubr.msk.bf16.gmra.mxu1 %vm1166_vm0, %v4051_v57 }
 0x111   : > { %v3790_v7 = vpop.f32.mrf.mxu1  ;;  %v4123_v8 = vpop.eup %4122  ;;  %2882 = vst [vmem:[%s4883_s29 + $0x90] sm:$0xff] %v4121_v5  ;;  %4148 = vtanh.f32 %v1669_v3  ;;  %v1690_v9 = vadd.f32 %v3662_v6, %v4847_v42  ;;  %3760 = vmatprep.mubr.msk.bf16.mxu0 %vm1166_vm0, %v4052_v61  ;;  %3888 = vmatprep.mubr.msk.bf16.mxu1 %vm1166_vm0, %v4053_v62 }
 0x112   : > { %v2202_v10 = vadd.f32 %v3790_v7, %v4847_v42  ;;  %v4125_v11 = vpop.eup %4124  ;;  %3010 = vst [vmem:[%s4883_s29 + $0x490] sm:$0xff] %v4123_v8  ;;  %4150 = vtanh.f32 %v2181_v4  ;;  %v1681_v12 = vpop.f32.mrf.mxu0 }
 0x113   : > { %v2193_v13 = vpop.f32.mrf.mxu1  ;;  %v4127_v14 = vpop.eup %4126  ;;  %2880 = vst [vmem:[%s4883_s29 + $0x80] sm:$0xff] %v4125_v11  ;;  %4152 = vtanh.f32 %v1690_v9  ;;  %v1682_v15 = vadd.f32 %v4847_v42, %v1681_v12 }
 0x114   : > { %v2194_v16 = vadd.f32 %v4847_v42, %v2193_v13  ;;  %v4129_v17 = vpop.eup %4128  ;;  %3008 = vst [vmem:[%s4883_s29 + $0x480] sm:$0xff] %v4127_v14  ;;  %4154 = vtanh.f32 %v2202_v10  ;;  %v3663_v18 = vpop.f32.mrf.mxu0 }
 0x115   : > { %v3791_v19 = vpop.f32.mrf.mxu1  ;;  %v4131_v22 = vpop.eup %4130  ;;  %2883 = vst [vmem:[%s4883_s29 + $0x98] sm:$0xff] %v4129_v17  ;;  %4156 = vtanh.f32 %v1682_v15  ;;  %v1693_v23 = vadd.f32 %v3663_v18, %v4847_v42 }
 0x116   : > { %v2205_v24 = vadd.f32 %v3791_v19, %v4847_v42  ;;  %v4133_v25 = vpop.eup %4132  ;;  %3011 = vst [vmem:[%s4883_s29 + $0x498] sm:$0xff] %v4131_v22  ;;  %4158 = vtanh.f32 %v2194_v16  ;;  %v1684_v26 = vpop.f32.mrf.mxu0 }
 0x117   : > { %v2196_v27 = vpop.f32.mrf.mxu1  ;;  %v4135_v28 = vpop.eup %4134  ;;  %2881 = vst [vmem:[%s4883_s29 + $0x88] sm:$0xff] %v4133_v25  ;;  %4160 = vtanh.f32 %v1693_v23  ;;  %v1685_v29 = vadd.f32 %v4847_v42, %v1684_v26 }
 0x118   : > { %v2197_v30 = vadd.f32 %v4847_v42, %v2196_v27  ;;  %v4137_v31 = vpop.eup %4136  ;;  %3009 = vst [vmem:[%s4883_s29 + $0x488] sm:$0xff] %v4135_v28  ;;  %4162 = vtanh.f32 %v2205_v24  ;;  %v3666_v32 = vpop.f32.mrf.mxu0  ;;  %3761 = vmatmul.mubr.msk.bf16.gmra.mxu0 %vm1166_vm0, %v4054_v20  ;;  %3889 = vmatmul.mubr.msk.bf16.gmra.mxu1 %vm1166_vm0, %v4055_v21 }
 0x119   : > { %v3794_v33 = vpop.f32.mrf.mxu1  ;;  %v4139_v34 = vpop.eup %4138  ;;  %2886 = vst [vmem:[%s4883_s29 + $0xb0] sm:$0xff] %v4137_v31  ;;  %4164 = vtanh.f32 %v1685_v29  ;;  %v1706_v35 = vadd.f32 %v3666_v32, %v4847_v42 }
 0x11a   : > { %v2218_v36 = vadd.f32 %v3794_v33, %v4847_v42  ;;  %v4141_v37 = vpop.eup %4140  ;;  %3014 = vst [vmem:[%s4883_s29 + $0x4b0] sm:$0xff] %v4139_v34  ;;  %4166 = vtanh.f32 %v2197_v30  ;;  %v1697_v38 = vpop.f32.mrf.mxu0 }
 0x11b   : > { %v2209_v39 = vpop.f32.mrf.mxu1  ;;  %v4143_v40 = vpop.eup %4142  ;;  %2884 = vst [vmem:[%s4883_s29 + $0xa0] sm:$0xff] %v4141_v37  ;;  %4168 = vtanh.f32 %v1706_v35  ;;  %v1698_v41 = vadd.f32 %v4847_v42, %v1697_v38 }
 0x11c   : > { %v2210_v43 = vadd.f32 %v4847_v42, %v2209_v39  ;;  %v4145_v44 = vpop.eup %4144  ;;  %3012 = vst [vmem:[%s4883_s29 + $0x4a0] sm:$0xff] %v4143_v40  ;;  %4170 = vtanh.f32 %v2218_v36  ;;  %v3667_v45 = vpop.f32.mrf.mxu0 }
 0x11d   : > { %v3795_v46 = vpop.f32.mrf.mxu1  ;;  %v4147_v47 = vpop.eup %4146  ;;  %2887 = vst [vmem:[%s4883_s29 + $0xb8] sm:$0xff] %v4145_v44  ;;  %4172 = vtanh.f32 %v1698_v41  ;;  %v1709_v48 = vadd.f32 %v3667_v45, %v4847_v42 }
 0x11e   : > { %v2221_v49 = vadd.f32 %v3795_v46, %v4847_v42  ;;  %v4149_v50 = vpop.eup %4148  ;;  %3015 = vst [vmem:[%s4883_s29 + $0x4b8] sm:$0xff] %v4147_v47  ;;  %4174 = vtanh.f32 %v2210_v43  ;;  %v1700_v51 = vpop.f32.mrf.mxu0 }
 0x11f   : > { %v2212_v52 = vpop.f32.mrf.mxu1  ;;  %v4151_v53 = vpop.eup %4150  ;;  %2885 = vst [vmem:[%s4883_s29 + $0xa8] sm:$0xff] %v4149_v50  ;;  %4176 = vtanh.f32 %v1709_v48  ;;  %v1701_v54 = vadd.f32 %v4847_v42, %v1700_v51 }
 0x120   : > { %v2213_v55 = vadd.f32 %v4847_v42, %v2212_v52  ;;  %v4153_v56 = vpop.eup %4152  ;;  %3013 = vst [vmem:[%s4883_s29 + $0x4a8] sm:$0xff] %v4151_v53  ;;  %4178 = vtanh.f32 %v2221_v49  ;;  %v3670_v57 = vpop.f32.mrf.mxu0 }
 0x121   : > { %v3798_v58 = vpop.f32.mrf.mxu1  ;;  %v4155_v59 = vpop.eup %4154  ;;  %2890 = vst [vmem:[%s4883_s29 + $0xd0] sm:$0xff] %v4153_v56  ;;  %4180 = vtanh.f32 %v1701_v54  ;;  %v1722_v60 = vadd.f32 %v3670_v57, %v4847_v42 }
 0x122   : > { %v2234_v61 = vadd.f32 %v3798_v58, %v4847_v42  ;;  %v4157_v62 = vpop.eup %4156  ;;  %3018 = vst [vmem:[%s4883_s29 + $0x4d0] sm:$0xff] %v4155_v59  ;;  %4182 = vtanh.f32 %v2213_v55  ;;  %v1713_v63 = vpop.f32.mrf.mxu0 }
 0x123   : > { %v2225_v0 = vpop.f32.mrf.mxu1  ;;  %v4159_v1 = vpop.eup %4158  ;;  %2888 = vst [vmem:[%s4883_s29 + $0xc0] sm:$0xff] %v4157_v62  ;;  %4184 = vtanh.f32 %v1722_v60  ;;  %v1714_v2 = vadd.f32 %v4847_v42, %v1713_v63 }
 0x124   : > { %v2226_v3 = vadd.f32 %v4847_v42, %v2225_v0  ;;  %v4161_v4 = vpop.eup %4160  ;;  %3016 = vst [vmem:[%s4883_s29 + $0x4c0] sm:$0xff] %v4159_v1  ;;  %4186 = vtanh.f32 %v2234_v61  ;;  %v3671_v5 = vpop.f32.mrf.mxu0 }
 0x125   : > { %v3799_v6 = vpop.f32.mrf.mxu1  ;;  %v4163_v7 = vpop.eup %4162  ;;  %2891 = vst [vmem:[%s4883_s29 + $0xd8] sm:$0xff] %v4161_v4  ;;  %4188 = vtanh.f32 %v1714_v2  ;;  %v1725_v8 = vadd.f32 %v3671_v5, %v4847_v42 }
 0x126   : > { %v2237_v9 = vadd.f32 %v3799_v6, %v4847_v42  ;;  %v4165_v10 = vpop.eup %4164  ;;  %3019 = vst [vmem:[%s4883_s29 + $0x4d8] sm:$0xff] %v4163_v7  ;;  %4190 = vtanh.f32 %v2226_v3  ;;  %v1716_v11 = vpop.f32.mrf.mxu0 }
 0x127   : > { %v2228_v12 = vpop.f32.mrf.mxu1  ;;  %v4167_v13 = vpop.eup %4166  ;;  %2889 = vst [vmem:[%s4883_s29 + $0xc8] sm:$0xff] %v4165_v10  ;;  %4192 = vtanh.f32 %v1725_v8  ;;  %v1717_v14 = vadd.f32 %v4847_v42, %v1716_v11 }
 0x128   : > { %v2229_v15 = vadd.f32 %v4847_v42, %v2228_v12  ;;  %v4169_v16 = vpop.eup %4168  ;;  %3017 = vst [vmem:[%s4883_s29 + $0x4c8] sm:$0xff] %v4167_v13  ;;  %4194 = vtanh.f32 %v2237_v9  ;;  %v3674_v17 = vpop.f32.mrf.mxu0 }
 0x129   : > { %v3802_v18 = vpop.f32.mrf.mxu1  ;;  %v4171_v19 = vpop.eup %4170  ;;  %2894 = vst [vmem:[%s4883_s29 + $0xf0] sm:$0xff] %v4169_v16  ;;  %4196 = vtanh.f32 %v1717_v14  ;;  %v1738_v20 = vadd.f32 %v3674_v17, %v4847_v42 }
 0x12a   : > { %v2250_v21 = vadd.f32 %v3802_v18, %v4847_v42  ;;  %v4173_v22 = vpop.eup %4172  ;;  %3022 = vst [vmem:[%s4883_s29 + $0x4f0] sm:$0xff] %v4171_v19  ;;  %4198 = vtanh.f32 %v2229_v15  ;;  %v1729_v23 = vpop.f32.mrf.mxu0 }
 0x12b   : > { %v2241_v24 = vpop.f32.mrf.mxu1  ;;  %v4175_v25 = vpop.eup %4174  ;;  %2892 = vst [vmem:[%s4883_s29 + $0xe0] sm:$0xff] %v4173_v22  ;;  %4200 = vtanh.f32 %v1738_v20  ;;  %v1730_v26 = vadd.f32 %v4847_v42, %v1729_v23 }
 0x12c   : > { %v2242_v27 = vadd.f32 %v4847_v42, %v2241_v24  ;;  %v4177_v28 = vpop.eup %4176  ;;  %3020 = vst [vmem:[%s4883_s29 + $0x4e0] sm:$0xff] %v4175_v25  ;;  %4202 = vtanh.f32 %v2250_v21  ;;  %v3675_v29 = vpop.f32.mrf.mxu0 }
 0x12d   : > { %v3803_v30 = vpop.f32.mrf.mxu1  ;;  %v4179_v31 = vpop.eup %4178  ;;  %2895 = vst [vmem:[%s4883_s29 + $0xf8] sm:$0xff] %v4177_v28  ;;  %4204 = vtanh.f32 %v1730_v26  ;;  %v1741_v32 = vadd.f32 %v3675_v29, %v4847_v42 }
 0x12e   : > { %v2253_v33 = vadd.f32 %v3803_v30, %v4847_v42  ;;  %v4181_v34 = vpop.eup %4180  ;;  %3023 = vst [vmem:[%s4883_s29 + $0x4f8] sm:$0xff] %v4179_v31  ;;  %4206 = vtanh.f32 %v2242_v27  ;;  %v1732_v35 = vpop.f32.mrf.mxu0  ;;  %v5092_v30 = vld [vmem:[%s5444_s2] ss:$0 sm:$0xff] }
 0x12f   : > { %v2244_v36 = vpop.f32.mrf.mxu1  ;;  %v4183_v37 = vpop.eup %4182  ;;  %2893 = vst [vmem:[%s4883_s29 + $0xe8] sm:$0xff] %v4181_v34  ;;  %4208 = vtanh.f32 %v1741_v32  ;;  %v1733_v38 = vadd.f32 %v4847_v42, %v1732_v35 }
 0x130   : > { %v2245_v39 = vadd.f32 %v4847_v42, %v2244_v36  ;;  %v4185_v40 = vpop.eup %4184  ;;  %3021 = vst [vmem:[%s4883_s29 + $0x4e8] sm:$0xff] %v4183_v37  ;;  %4210 = vtanh.f32 %v2253_v33  ;;  %v3678_v41 = vpop.f32.mrf.mxu0 }
 0x131   : > { %v3806_v43 = vpop.f32.mrf.mxu1  ;;  %v4187_v44 = vpop.eup %4186  ;;  %2898 = vst [vmem:[%s4883_s29 + $0x110] sm:$0xff] %v4185_v40  ;;  %4212 = vtanh.f32 %v1733_v38  ;;  %v1754_v45 = vadd.f32 %v3678_v41, %v4847_v42 }
 0x132   : > { %v2266_v46 = vadd.f32 %v3806_v43, %v4847_v42  ;;  %v4189_v47 = vpop.eup %4188  ;;  %3026 = vst [vmem:[%s4883_s29 + $0x510] sm:$0xff] %v4187_v44  ;;  %4214 = vtanh.f32 %v2245_v39  ;;  %v1745_v48 = vpop.f32.mrf.mxu0 }
 0x133   : > { %v2257_v49 = vpop.f32.mrf.mxu1  ;;  %v4191_v50 = vpop.eup %4190  ;;  %2896 = vst [vmem:[%s4883_s29 + $0x100] sm:$0xff] %v4189_v47  ;;  %4216 = vtanh.f32 %v1754_v45  ;;  %v1746_v51 = vadd.f32 %v4847_v42, %v1745_v48 }
 0x134   : > { %v2258_v52 = vadd.f32 %v4847_v42, %v2257_v49  ;;  %v4193_v53 = vpop.eup %4192  ;;  %3024 = vst [vmem:[%s4883_s29 + $0x500] sm:$0xff] %v4191_v50  ;;  %4218 = vtanh.f32 %v2266_v46  ;;  %v3679_v54 = vpop.f32.mrf.mxu0 }
 0x135   : > { %v3807_v55 = vpop.f32.mrf.mxu1  ;;  %v4195_v56 = vpop.eup %4194  ;;  %2899 = vst [vmem:[%s4883_s29 + $0x118] sm:$0xff] %v4193_v53  ;;  %4220 = vtanh.f32 %v1746_v51  ;;  %v1757_v57 = vadd.f32 %v3679_v54, %v4847_v42 }
 0x136   : > { %v2269_v58 = vadd.f32 %v3807_v55, %v4847_v42  ;;  %v4197_v59 = vpop.eup %4196  ;;  %3027 = vst [vmem:[%s4883_s29 + $0x518] sm:$0xff] %v4195_v56  ;;  %4222 = vtanh.f32 %v2258_v52  ;;  %v1748_v60 = vpop.f32.mrf.mxu0 }
 0x137   : > { %v2260_v61 = vpop.f32.mrf.mxu1  ;;  %v4199_v62 = vpop.eup %4198  ;;  %2897 = vst [vmem:[%s4883_s29 + $0x108] sm:$0xff] %v4197_v59  ;;  %4224 = vtanh.f32 %v1757_v57  ;;  %v1749_v63 = vadd.f32 %v4847_v42, %v1748_v60 }
 0x138   : > { %v2261_v0 = vadd.f32 %v4847_v42, %v2260_v61  ;;  %v4201_v1 = vpop.eup %4200  ;;  %3025 = vst [vmem:[%s4883_s29 + $0x508] sm:$0xff] %v4199_v62  ;;  %4226 = vtanh.f32 %v2269_v58  ;;  %v3682_v2 = vpop.f32.mrf.mxu0 }
 0x139   : > { %v3810_v3 = vpop.f32.mrf.mxu1  ;;  %v4203_v4 = vpop.eup %4202  ;;  %2902 = vst [vmem:[%s4883_s29 + $0x130] sm:$0xff] %v4201_v1  ;;  %4228 = vtanh.f32 %v1749_v63  ;;  %v1770_v5 = vadd.f32 %v3682_v2, %v4847_v42 }
 0x13a   : > { %v2282_v6 = vadd.f32 %v3810_v3, %v4847_v42  ;;  %v4205_v7 = vpop.eup %4204  ;;  %3030 = vst [vmem:[%s4883_s29 + $0x530] sm:$0xff] %v4203_v4  ;;  %4230 = vtanh.f32 %v2261_v0  ;;  %v1761_v8 = vpop.f32.mrf.mxu0 }
 0x13b   : > { %v2273_v9 = vpop.f32.mrf.mxu1  ;;  %v4207_v10 = vpop.eup %4206  ;;  %2900 = vst [vmem:[%s4883_s29 + $0x120] sm:$0xff] %v4205_v7  ;;  %4232 = vtanh.f32 %v1770_v5  ;;  %v1762_v11 = vadd.f32 %v4847_v42, %v1761_v8 }
 0x13c   : > { %v2274_v12 = vadd.f32 %v4847_v42, %v2273_v9  ;;  %v4209_v13 = vpop.eup %4208  ;;  %3028 = vst [vmem:[%s4883_s29 + $0x520] sm:$0xff] %v4207_v10  ;;  %4234 = vtanh.f32 %v2282_v6  ;;  %v3683_v14 = vpop.f32.mrf.mxu0 }
 0x13d   : > { %v3811_v15 = vpop.f32.mrf.mxu1  ;;  %v4211_v16 = vpop.eup %4210  ;;  %2903 = vst [vmem:[%s4883_s29 + $0x138] sm:$0xff] %v4209_v13  ;;  %4236 = vtanh.f32 %v1762_v11  ;;  %v1773_v17 = vadd.f32 %v3683_v14, %v4847_v42 }
 0x13e   : > { %v2285_v18 = vadd.f32 %v3811_v15, %v4847_v42  ;;  %v4213_v19 = vpop.eup %4212  ;;  %3031 = vst [vmem:[%s4883_s29 + $0x538] sm:$0xff] %v4211_v16  ;;  %4238 = vtanh.f32 %v2274_v12  ;;  %v1764_v20 = vpop.f32.mrf.mxu0 }
 0x13f   : > { %v2276_v21 = vpop.f32.mrf.mxu1  ;;  %v4215_v22 = vpop.eup %4214  ;;  %2901 = vst [vmem:[%s4883_s29 + $0x128] sm:$0xff] %v4213_v19  ;;  %4240 = vtanh.f32 %v1773_v17  ;;  %v1765_v23 = vadd.f32 %v4847_v42, %v1764_v20 }
 0x140   : > { %v2277_v24 = vadd.f32 %v4847_v42, %v2276_v21  ;;  %v4217_v25 = vpop.eup %4216  ;;  %3029 = vst [vmem:[%s4883_s29 + $0x528] sm:$0xff] %v4215_v22  ;;  %4242 = vtanh.f32 %v2285_v18  ;;  %v3686_v26 = vpop.f32.mrf.mxu0 }
 0x141   : > { %v3814_v27 = vpop.f32.mrf.mxu1  ;;  %v4219_v28 = vpop.eup %4218  ;;  %2906 = vst [vmem:[%s4883_s29 + $0x150] sm:$0xff] %v4217_v25  ;;  %4244 = vtanh.f32 %v1765_v23  ;;  %v1786_v29 = vadd.f32 %v3686_v26, %v4847_v42 }
 0x142   : > { %v2298_v31 = vadd.f32 %v5092_v30, %v3814_v27  ;;  %v4221_v32 = vpop.eup %4220  ;;  %3034 = vst [vmem:[%s4883_s29 + $0x550] sm:$0xff] %v4219_v28  ;;  %4246 = vtanh.f32 %v2277_v24  ;;  %v1777_v33 = vpop.f32.mrf.mxu0 }
 0x143   : > { %v2289_v34 = vpop.f32.mrf.mxu1  ;;  %v4223_v35 = vpop.eup %4222  ;;  %2904 = vst [vmem:[%s4883_s29 + $0x140] sm:$0xff] %v4221_v32  ;;  %4248 = vtanh.f32 %v1786_v29  ;;  %v1778_v36 = vadd.f32 %v5092_v30, %v1777_v33 }
 0x144   : > { %v2290_v42 = vadd.f32 %v5092_v30, %v2289_v34  ;;  %v4225_v37 = vpop.eup %4224  ;;  %3032 = vst [vmem:[%s4883_s29 + $0x540] sm:$0xff] %v4223_v35  ;;  %4250 = vtanh.f32 %v2298_v31  ;;  %v3687_v38 = vpop.f32.mrf.mxu0 }
 0x145   : > { %v3815_v39 = vpop.f32.mrf.mxu1  ;;  %v4227_v40 = vpop.eup %4226  ;;  %2907 = vst [vmem:[%s4883_s29 + $0x158] sm:$0xff] %v4225_v37  ;;  %4252 = vtanh.f32 %v1778_v36  ;;  %v1789_v41 = vadd.f32 %v5092_v30, %v3687_v38 }
 0x146   : > { %v2301_v43 = vadd.f32 %v5092_v30, %v3815_v39  ;;  %v4229_v44 = vpop.eup %4228  ;;  %3035 = vst [vmem:[%s4883_s29 + $0x558] sm:$0xff] %v4227_v40  ;;  %4254 = vtanh.f32 %v2290_v42  ;;  %v1780_v45 = vpop.f32.mrf.mxu0 }
 0x147   : > { %v2292_v46 = vpop.f32.mrf.mxu1  ;;  %v4231_v47 = vpop.eup %4230  ;;  %2905 = vst [vmem:[%s4883_s29 + $0x148] sm:$0xff] %v4229_v44  ;;  %4256 = vtanh.f32 %v1789_v41  ;;  %v1781_v48 = vadd.f32 %v5092_v30, %v1780_v45 }
 0x148   : > { %v2293_v49 = vadd.f32 %v5092_v30, %v2292_v46  ;;  %v4233_v50 = vpop.eup %4232  ;;  %3033 = vst [vmem:[%s4883_s29 + $0x548] sm:$0xff] %v4231_v47  ;;  %4258 = vtanh.f32 %v2301_v43  ;;  %v3690_v51 = vpop.f32.mrf.mxu0 }
 0x149   : > { %v3818_v52 = vpop.f32.mrf.mxu1  ;;  %v4235_v53 = vpop.eup %4234  ;;  %2910 = vst [vmem:[%s4883_s29 + $0x170] sm:$0xff] %v4233_v50  ;;  %4260 = vtanh.f32 %v1781_v48  ;;  %v1802_v54 = vadd.f32 %v5092_v30, %v3690_v51 }
 0x14a   : > { %v2314_v55 = vadd.f32 %v5092_v30, %v3818_v52  ;;  %v4237_v56 = vpop.eup %4236  ;;  %3038 = vst [vmem:[%s4883_s29 + $0x570] sm:$0xff] %v4235_v53  ;;  %4262 = vtanh.f32 %v2293_v49  ;;  %v1793_v57 = vpop.f32.mrf.mxu0 }
 0x14b   : > { %v2305_v58 = vpop.f32.mrf.mxu1  ;;  %v4239_v59 = vpop.eup %4238  ;;  %2908 = vst [vmem:[%s4883_s29 + $0x160] sm:$0xff] %v4237_v56  ;;  %4264 = vtanh.f32 %v1802_v54  ;;  %v1794_v60 = vadd.f32 %v5092_v30, %v1793_v57 }
 0x14c   : > { %v2306_v61 = vadd.f32 %v5092_v30, %v2305_v58  ;;  %v4241_v62 = vpop.eup %4240  ;;  %3036 = vst [vmem:[%s4883_s29 + $0x560] sm:$0xff] %v4239_v59  ;;  %4266 = vtanh.f32 %v2314_v55  ;;  %v3691_v63 = vpop.f32.mrf.mxu0 }
 0x14d   : > { %v3819_v0 = vpop.f32.mrf.mxu1  ;;  %v4243_v1 = vpop.eup %4242  ;;  %2911 = vst [vmem:[%s4883_s29 + $0x178] sm:$0xff] %v4241_v62  ;;  %4268 = vtanh.f32 %v1794_v60  ;;  %v1805_v2 = vadd.f32 %v5092_v30, %v3691_v63 }
 0x14e   : > { %v2317_v3 = vadd.f32 %v5092_v30, %v3819_v0  ;;  %v4245_v4 = vpop.eup %4244  ;;  %3039 = vst [vmem:[%s4883_s29 + $0x578] sm:$0xff] %v4243_v1  ;;  %4270 = vtanh.f32 %v2306_v61  ;;  %v1796_v5 = vpop.f32.mrf.mxu0 }
 0x14f   : > { %v2308_v6 = vpop.f32.mrf.mxu1  ;;  %v4247_v7 = vpop.eup %4246  ;;  %2909 = vst [vmem:[%s4883_s29 + $0x168] sm:$0xff] %v4245_v4  ;;  %4272 = vtanh.f32 %v1805_v2  ;;  %v1797_v8 = vadd.f32 %v5092_v30, %v1796_v5 }
 0x150   : > { %v2309_v9 = vadd.f32 %v5092_v30, %v2308_v6  ;;  %v4249_v10 = vpop.eup %4248  ;;  %3037 = vst [vmem:[%s4883_s29 + $0x568] sm:$0xff] %v4247_v7  ;;  %4274 = vtanh.f32 %v2317_v3  ;;  %v3694_v11 = vpop.f32.mrf.mxu0 }
 0x151   : > { %v3822_v12 = vpop.f32.mrf.mxu1  ;;  %v4251_v13 = vpop.eup %4250  ;;  %2914 = vst [vmem:[%s4883_s29 + $0x190] sm:$0xff] %v4249_v10  ;;  %4276 = vtanh.f32 %v1797_v8  ;;  %v1818_v14 = vadd.f32 %v5092_v30, %v3694_v11 }
 0x152   : > { %v2330_v15 = vadd.f32 %v5092_v30, %v3822_v12  ;;  %v4253_v16 = vpop.eup %4252  ;;  %3042 = vst [vmem:[%s4883_s29 + $0x590] sm:$0xff] %v4251_v13  ;;  %4278 = vtanh.f32 %v2309_v9  ;;  %v1809_v17 = vpop.f32.mrf.mxu0 }
 0x153   : > { %v2321_v18 = vpop.f32.mrf.mxu1  ;;  %v4255_v19 = vpop.eup %4254  ;;  %2912 = vst [vmem:[%s4883_s29 + $0x180] sm:$0xff] %v4253_v16  ;;  %4280 = vtanh.f32 %v1818_v14  ;;  %v1810_v20 = vadd.f32 %v5092_v30, %v1809_v17 }
 0x154   : > { %v2322_v21 = vadd.f32 %v5092_v30, %v2321_v18  ;;  %v4257_v22 = vpop.eup %4256  ;;  %3040 = vst [vmem:[%s4883_s29 + $0x580] sm:$0xff] %v4255_v19  ;;  %4282 = vtanh.f32 %v2330_v15  ;;  %v3695_v23 = vpop.f32.mrf.mxu0 }
 0x155   : > { %v3823_v24 = vpop.f32.mrf.mxu1  ;;  %v4259_v25 = vpop.eup %4258  ;;  %2915 = vst [vmem:[%s4883_s29 + $0x198] sm:$0xff] %v4257_v22  ;;  %4284 = vtanh.f32 %v1810_v20  ;;  %v1821_v26 = vadd.f32 %v5092_v30, %v3695_v23 }
 0x156   : > { %v2333_v27 = vadd.f32 %v5092_v30, %v3823_v24  ;;  %v4261_v28 = vpop.eup %4260  ;;  %3043 = vst [vmem:[%s4883_s29 + $0x598] sm:$0xff] %v4259_v25  ;;  %4286 = vtanh.f32 %v2322_v21  ;;  %v1812_v29 = vpop.f32.mrf.mxu0 }
 0x157   : > { %v2324_v31 = vpop.f32.mrf.mxu1  ;;  %v4263_v32 = vpop.eup %4262  ;;  %2913 = vst [vmem:[%s4883_s29 + $0x188] sm:$0xff] %v4261_v28  ;;  %4288 = vtanh.f32 %v1821_v26  ;;  %v1813_v33 = vadd.f32 %v5092_v30, %v1812_v29 }
 0x158   : > { %v2325_v34 = vadd.f32 %v5092_v30, %v2324_v31  ;;  %v4265_v35 = vpop.eup %4264  ;;  %3041 = vst [vmem:[%s4883_s29 + $0x588] sm:$0xff] %v4263_v32  ;;  %4290 = vtanh.f32 %v2333_v27  ;;  %v3698_v36 = vpop.f32.mrf.mxu0 }
 0x159   : > { %v3826_v42 = vpop.f32.mrf.mxu1  ;;  %v4267_v37 = vpop.eup %4266  ;;  %2918 = vst [vmem:[%s4883_s29 + $0x1b0] sm:$0xff] %v4265_v35  ;;  %4292 = vtanh.f32 %v1813_v33  ;;  %v1834_v38 = vadd.f32 %v5092_v30, %v3698_v36 }
 0x15a   : > { %v2346_v39 = vadd.f32 %v5092_v30, %v3826_v42  ;;  %v4269_v40 = vpop.eup %4268  ;;  %3046 = vst [vmem:[%s4883_s29 + $0x5b0] sm:$0xff] %v4267_v37  ;;  %4294 = vtanh.f32 %v2325_v34  ;;  %v1825_v41 = vpop.f32.mrf.mxu0 }
 0x15b   : > { %v2337_v43 = vpop.f32.mrf.mxu1  ;;  %v4271_v44 = vpop.eup %4270  ;;  %2916 = vst [vmem:[%s4883_s29 + $0x1a0] sm:$0xff] %v4269_v40  ;;  %4296 = vtanh.f32 %v1834_v38  ;;  %v1826_v45 = vadd.f32 %v5092_v30, %v1825_v41 }
 0x15c   : > { %v2338_v46 = vadd.f32 %v5092_v30, %v2337_v43  ;;  %v4273_v47 = vpop.eup %4272  ;;  %3044 = vst [vmem:[%s4883_s29 + $0x5a0] sm:$0xff] %v4271_v44  ;;  %4298 = vtanh.f32 %v2346_v39  ;;  %v3699_v48 = vpop.f32.mrf.mxu0 }
 0x15d   : > { %v3827_v49 = vpop.f32.mrf.mxu1  ;;  %v4275_v50 = vpop.eup %4274  ;;  %2919 = vst [vmem:[%s4883_s29 + $0x1b8] sm:$0xff] %v4273_v47  ;;  %4300 = vtanh.f32 %v1826_v45  ;;  %v1837_v51 = vadd.f32 %v5092_v30, %v3699_v48 }
 0x15e   : > { %v2349_v52 = vadd.f32 %v5092_v30, %v3827_v49  ;;  %v4277_v53 = vpop.eup %4276  ;;  %3047 = vst [vmem:[%s4883_s29 + $0x5b8] sm:$0xff] %v4275_v50  ;;  %4302 = vtanh.f32 %v2338_v46  ;;  %v1828_v54 = vpop.f32.mrf.mxu0 }
 0x15f   : > { %v2340_v55 = vpop.f32.mrf.mxu1  ;;  %v4279_v56 = vpop.eup %4278  ;;  %2917 = vst [vmem:[%s4883_s29 + $0x1a8] sm:$0xff] %v4277_v53  ;;  %4304 = vtanh.f32 %v1837_v51  ;;  %v1829_v57 = vadd.f32 %v5092_v30, %v1828_v54 }
 0x160   : > { %v2341_v58 = vadd.f32 %v5092_v30, %v2340_v55  ;;  %v4281_v59 = vpop.eup %4280  ;;  %3045 = vst [vmem:[%s4883_s29 + $0x5a8] sm:$0xff] %v4279_v56  ;;  %4306 = vtanh.f32 %v2349_v52  ;;  %v3702_v60 = vpop.f32.mrf.mxu0 }
 0x161   : > { %v3830_v61 = vpop.f32.mrf.mxu1  ;;  %v4283_v62 = vpop.eup %4282  ;;  %2922 = vst [vmem:[%s4883_s29 + $0x1d0] sm:$0xff] %v4281_v59  ;;  %4308 = vtanh.f32 %v1829_v57  ;;  %v1850_v63 = vadd.f32 %v5092_v30, %v3702_v60 }
 0x162   : > { %v2362_v0 = vadd.f32 %v5092_v30, %v3830_v61  ;;  %v4285_v1 = vpop.eup %4284  ;;  %3050 = vst [vmem:[%s4883_s29 + $0x5d0] sm:$0xff] %v4283_v62  ;;  %4310 = vtanh.f32 %v2341_v58  ;;  %v1841_v2 = vpop.f32.mrf.mxu0 }
 0x163   : > { %v2353_v3 = vpop.f32.mrf.mxu1  ;;  %v4287_v4 = vpop.eup %4286  ;;  %2920 = vst [vmem:[%s4883_s29 + $0x1c0] sm:$0xff] %v4285_v1  ;;  %4312 = vtanh.f32 %v1850_v63  ;;  %v1842_v5 = vadd.f32 %v5092_v30, %v1841_v2 }
 0x164   : > { %v2354_v6 = vadd.f32 %v5092_v30, %v2353_v3  ;;  %v4289_v7 = vpop.eup %4288  ;;  %3048 = vst [vmem:[%s4883_s29 + $0x5c0] sm:$0xff] %v4287_v4  ;;  %4314 = vtanh.f32 %v2362_v0  ;;  %v3703_v8 = vpop.f32.mrf.mxu0 }
 0x165   : > { %v3831_v9 = vpop.f32.mrf.mxu1  ;;  %v4291_v10 = vpop.eup %4290  ;;  %2923 = vst [vmem:[%s4883_s29 + $0x1d8] sm:$0xff] %v4289_v7  ;;  %4316 = vtanh.f32 %v1842_v5  ;;  %v1853_v11 = vadd.f32 %v5092_v30, %v3703_v8 }
 0x166   : > { %v2365_v12 = vadd.f32 %v5092_v30, %v3831_v9  ;;  %v4293_v13 = vpop.eup %4292  ;;  %3051 = vst [vmem:[%s4883_s29 + $0x5d8] sm:$0xff] %v4291_v10  ;;  %4318 = vtanh.f32 %v2354_v6  ;;  %v1844_v14 = vpop.f32.mrf.mxu0 }
 0x167   : > { %v2356_v15 = vpop.f32.mrf.mxu1  ;;  %v4295_v16 = vpop.eup %4294  ;;  %2921 = vst [vmem:[%s4883_s29 + $0x1c8] sm:$0xff] %v4293_v13  ;;  %4320 = vtanh.f32 %v1853_v11  ;;  %v1845_v17 = vadd.f32 %v5092_v30, %v1844_v14 }
 0x168   : > { %v2357_v18 = vadd.f32 %v5092_v30, %v2356_v15  ;;  %v4297_v19 = vpop.eup %4296  ;;  %3049 = vst [vmem:[%s4883_s29 + $0x5c8] sm:$0xff] %v4295_v16  ;;  %4322 = vtanh.f32 %v2365_v12  ;;  %v3706_v20 = vpop.f32.mrf.mxu0 }
 0x169   : > { %v3834_v21 = vpop.f32.mrf.mxu1  ;;  %v4299_v22 = vpop.eup %4298  ;;  %2926 = vst [vmem:[%s4883_s29 + $0x1f0] sm:$0xff] %v4297_v19  ;;  %4324 = vtanh.f32 %v1845_v17  ;;  %v1866_v23 = vadd.f32 %v5092_v30, %v3706_v20 }
 0x16a   : > { %v2378_v24 = vadd.f32 %v5092_v30, %v3834_v21  ;;  %v4301_v25 = vpop.eup %4300  ;;  %3054 = vst [vmem:[%s4883_s29 + $0x5f0] sm:$0xff] %v4299_v22  ;;  %4326 = vtanh.f32 %v2357_v18  ;;  %v1857_v26 = vpop.f32.mrf.mxu0 }
 0x16b   : > { %v2369_v27 = vpop.f32.mrf.mxu1  ;;  %v4303_v28 = vpop.eup %4302  ;;  %2924 = vst [vmem:[%s4883_s29 + $0x1e0] sm:$0xff] %v4301_v25  ;;  %4328 = vtanh.f32 %v1866_v23  ;;  %v1858_v29 = vadd.f32 %v5092_v30, %v1857_v26 }
 0x16c   : > { %v2370_v31 = vadd.f32 %v5092_v30, %v2369_v27  ;;  %v4305_v32 = vpop.eup %4304  ;;  %3052 = vst [vmem:[%s4883_s29 + $0x5e0] sm:$0xff] %v4303_v28  ;;  %4330 = vtanh.f32 %v2378_v24  ;;  %v3707_v33 = vpop.f32.mrf.mxu0 }
 0x16d   : > { %v3835_v34 = vpop.f32.mrf.mxu1  ;;  %v4307_v35 = vpop.eup %4306  ;;  %2927 = vst [vmem:[%s4883_s29 + $0x1f8] sm:$0xff] %v4305_v32  ;;  %4332 = vtanh.f32 %v1858_v29  ;;  %v1869_v36 = vadd.f32 %v5092_v30, %v3707_v33 }
 0x16e   : > { %v2381_v42 = vadd.f32 %v5092_v30, %v3835_v34  ;;  %v4309_v37 = vpop.eup %4308  ;;  %3055 = vst [vmem:[%s4883_s29 + $0x5f8] sm:$0xff] %v4307_v35  ;;  %4334 = vtanh.f32 %v2370_v31  ;;  %v1860_v38 = vpop.f32.mrf.mxu0 }
 0x16f   : > { %v2372_v39 = vpop.f32.mrf.mxu1  ;;  %v4311_v40 = vpop.eup %4310  ;;  %2925 = vst [vmem:[%s4883_s29 + $0x1e8] sm:$0xff] %v4309_v37  ;;  %4336 = vtanh.f32 %v1869_v36  ;;  %v1861_v41 = vadd.f32 %v5092_v30, %v1860_v38 }
 0x170   : > { %v2373_v43 = vadd.f32 %v5092_v30, %v2372_v39  ;;  %v4313_v44 = vpop.eup %4312  ;;  %3053 = vst [vmem:[%s4883_s29 + $0x5e8] sm:$0xff] %v4311_v40  ;;  %4338 = vtanh.f32 %v2381_v42  ;;  %v3710_v45 = vpop.f32.mrf.mxu0 }
 0x171   : > { %v3838_v46 = vpop.f32.mrf.mxu1  ;;  %v4315_v47 = vpop.eup %4314  ;;  %2930 = vst [vmem:[%s4883_s29 + $0x210] sm:$0xff] %v4313_v44  ;;  %4340 = vtanh.f32 %v1861_v41  ;;  %v1882_v48 = vadd.f32 %v5092_v30, %v3710_v45 }
 0x172   : > { %v2394_v49 = vadd.f32 %v5092_v30, %v3838_v46  ;;  %v4317_v50 = vpop.eup %4316  ;;  %3058 = vst [vmem:[%s4883_s29 + $0x610] sm:$0xff] %v4315_v47  ;;  %4342 = vtanh.f32 %v2373_v43  ;;  %v1873_v51 = vpop.f32.mrf.mxu0 }
 0x173   : > { %v2385_v52 = vpop.f32.mrf.mxu1  ;;  %v4319_v53 = vpop.eup %4318  ;;  %2928 = vst [vmem:[%s4883_s29 + $0x200] sm:$0xff] %v4317_v50  ;;  %4344 = vtanh.f32 %v1882_v48  ;;  %v1874_v54 = vadd.f32 %v5092_v30, %v1873_v51 }
 0x174   : > { %v2386_v55 = vadd.f32 %v5092_v30, %v2385_v52  ;;  %v4321_v56 = vpop.eup %4320  ;;  %3056 = vst [vmem:[%s4883_s29 + $0x600] sm:$0xff] %v4319_v53  ;;  %4346 = vtanh.f32 %v2394_v49  ;;  %v3711_v57 = vpop.f32.mrf.mxu0 }
 0x175   : > { %v3839_v58 = vpop.f32.mrf.mxu1  ;;  %v4323_v59 = vpop.eup %4322  ;;  %2931 = vst [vmem:[%s4883_s29 + $0x218] sm:$0xff] %v4321_v56  ;;  %4348 = vtanh.f32 %v1874_v54  ;;  %v1885_v60 = vadd.f32 %v5092_v30, %v3711_v57 }
 0x176   : > { %v2397_v61 = vadd.f32 %v5092_v30, %v3839_v58  ;;  %v4325_v62 = vpop.eup %4324  ;;  %3059 = vst [vmem:[%s4883_s29 + $0x618] sm:$0xff] %v4323_v59  ;;  %4350 = vtanh.f32 %v2386_v55  ;;  %v1876_v63 = vpop.f32.mrf.mxu0 }
 0x177   : > { %v2388_v0 = vpop.f32.mrf.mxu1  ;;  %v4327_v1 = vpop.eup %4326  ;;  %2929 = vst [vmem:[%s4883_s29 + $0x208] sm:$0xff] %v4325_v62  ;;  %4352 = vtanh.f32 %v1885_v60  ;;  %v1877_v2 = vadd.f32 %v5092_v30, %v1876_v63 }
 0x178   : > { %v2389_v3 = vadd.f32 %v5092_v30, %v2388_v0  ;;  %v4329_v4 = vpop.eup %4328  ;;  %3057 = vst [vmem:[%s4883_s29 + $0x608] sm:$0xff] %v4327_v1  ;;  %4354 = vtanh.f32 %v2397_v61  ;;  %v3714_v5 = vpop.f32.mrf.mxu0 }
 0x179   : > { %v3842_v6 = vpop.f32.mrf.mxu1  ;;  %v4331_v7 = vpop.eup %4330  ;;  %2934 = vst [vmem:[%s4883_s29 + $0x230] sm:$0xff] %v4329_v4  ;;  %4356 = vtanh.f32 %v1877_v2  ;;  %v1898_v8 = vadd.f32 %v5092_v30, %v3714_v5 }
 0x17a   : > { %v2410_v9 = vadd.f32 %v5092_v30, %v3842_v6  ;;  %v4333_v10 = vpop.eup %4332  ;;  %3062 = vst [vmem:[%s4883_s29 + $0x630] sm:$0xff] %v4331_v7  ;;  %4358 = vtanh.f32 %v2389_v3  ;;  %v1889_v11 = vpop.f32.mrf.mxu0 }
 0x17b   : > { %v2401_v12 = vpop.f32.mrf.mxu1  ;;  %v4335_v13 = vpop.eup %4334  ;;  %2932 = vst [vmem:[%s4883_s29 + $0x220] sm:$0xff] %v4333_v10  ;;  %4360 = vtanh.f32 %v1898_v8  ;;  %v1890_v14 = vadd.f32 %v5092_v30, %v1889_v11 }
 0x17c   : > { %v2402_v15 = vadd.f32 %v5092_v30, %v2401_v12  ;;  %v4337_v16 = vpop.eup %4336  ;;  %3060 = vst [vmem:[%s4883_s29 + $0x620] sm:$0xff] %v4335_v13  ;;  %4362 = vtanh.f32 %v2410_v9  ;;  %v3715_v17 = vpop.f32.mrf.mxu0 }
 0x17d   : > { %v3843_v18 = vpop.f32.mrf.mxu1  ;;  %v4339_v19 = vpop.eup %4338  ;;  %2935 = vst [vmem:[%s4883_s29 + $0x238] sm:$0xff] %v4337_v16  ;;  %4364 = vtanh.f32 %v1890_v14  ;;  %v1901_v20 = vadd.f32 %v5092_v30, %v3715_v17 }
 0x17e   : > { %v2413_v21 = vadd.f32 %v5092_v30, %v3843_v18  ;;  %v4341_v22 = vpop.eup %4340  ;;  %3063 = vst [vmem:[%s4883_s29 + $0x638] sm:$0xff] %v4339_v19  ;;  %4366 = vtanh.f32 %v2402_v15  ;;  %v1892_v23 = vpop.f32.mrf.mxu0 }
 0x17f   : > { %v2404_v24 = vpop.f32.mrf.mxu1  ;;  %v4343_v25 = vpop.eup %4342  ;;  %2933 = vst [vmem:[%s4883_s29 + $0x228] sm:$0xff] %v4341_v22  ;;  %4368 = vtanh.f32 %v1901_v20  ;;  %v1893_v26 = vadd.f32 %v5092_v30, %v1892_v23 }
 0x180   : > { %v2405_v27 = vadd.f32 %v5092_v30, %v2404_v24  ;;  %v4345_v28 = vpop.eup %4344  ;;  %3061 = vst [vmem:[%s4883_s29 + $0x628] sm:$0xff] %v4343_v25  ;;  %4370 = vtanh.f32 %v2413_v21  ;;  %v3718_v29 = vpop.f32.mrf.mxu0 }
 0x181   : > { %v3846_v31 = vpop.f32.mrf.mxu1  ;;  %v4347_v32 = vpop.eup %4346  ;;  %2938 = vst [vmem:[%s4883_s29 + $0x250] sm:$0xff] %v4345_v28  ;;  %4372 = vtanh.f32 %v1893_v26  ;;  %v1914_v33 = vadd.f32 %v5092_v30, %v3718_v29 }
 0x182   : > { %v2426_v34 = vadd.f32 %v5092_v30, %v3846_v31  ;;  %v4349_v35 = vpop.eup %4348  ;;  %3066 = vst [vmem:[%s4883_s29 + $0x650] sm:$0xff] %v4347_v32  ;;  %4374 = vtanh.f32 %v2405_v27  ;;  %v1905_v36 = vpop.f32.mrf.mxu0 }
 0x183   : > { %v2417_v42 = vpop.f32.mrf.mxu1  ;;  %v4351_v37 = vpop.eup %4350  ;;  %2936 = vst [vmem:[%s4883_s29 + $0x240] sm:$0xff] %v4349_v35  ;;  %4376 = vtanh.f32 %v1914_v33  ;;  %v1906_v38 = vadd.f32 %v5092_v30, %v1905_v36 }
 0x184   : > { %v2418_v39 = vadd.f32 %v5092_v30, %v2417_v42  ;;  %v4353_v40 = vpop.eup %4352  ;;  %3064 = vst [vmem:[%s4883_s29 + $0x640] sm:$0xff] %v4351_v37  ;;  %4378 = vtanh.f32 %v2426_v34  ;;  %v3719_v41 = vpop.f32.mrf.mxu0 }
 0x185   : > { %v3847_v43 = vpop.f32.mrf.mxu1  ;;  %v4355_v44 = vpop.eup %4354  ;;  %2939 = vst [vmem:[%s4883_s29 + $0x258] sm:$0xff] %v4353_v40  ;;  %4380 = vtanh.f32 %v1906_v38  ;;  %v1917_v45 = vadd.f32 %v5092_v30, %v3719_v41 }
 0x186   : > { %v2429_v46 = vadd.f32 %v5092_v30, %v3847_v43  ;;  %v4357_v47 = vpop.eup %4356  ;;  %3067 = vst [vmem:[%s4883_s29 + $0x658] sm:$0xff] %v4355_v44  ;;  %4382 = vtanh.f32 %v2418_v39  ;;  %v1908_v48 = vpop.f32.mrf.mxu0 }
 0x187   : > { %v2420_v49 = vpop.f32.mrf.mxu1  ;;  %v4359_v50 = vpop.eup %4358  ;;  %2937 = vst [vmem:[%s4883_s29 + $0x248] sm:$0xff] %v4357_v47  ;;  %4384 = vtanh.f32 %v1917_v45  ;;  %v1909_v51 = vadd.f32 %v5092_v30, %v1908_v48 }
 0x188   : > { %v2421_v52 = vadd.f32 %v5092_v30, %v2420_v49  ;;  %v4361_v53 = vpop.eup %4360  ;;  %3065 = vst [vmem:[%s4883_s29 + $0x648] sm:$0xff] %v4359_v50  ;;  %4386 = vtanh.f32 %v2429_v46  ;;  %v3722_v54 = vpop.f32.mrf.mxu0 }
 0x189   : > { %v3850_v55 = vpop.f32.mrf.mxu1  ;;  %v4363_v56 = vpop.eup %4362  ;;  %2942 = vst [vmem:[%s4883_s29 + $0x270] sm:$0xff] %v4361_v53  ;;  %4388 = vtanh.f32 %v1909_v51  ;;  %v1930_v57 = vadd.f32 %v5092_v30, %v3722_v54 }
 0x18a   : > { %v2442_v58 = vadd.f32 %v5092_v30, %v3850_v55  ;;  %v4365_v59 = vpop.eup %4364  ;;  %3070 = vst [vmem:[%s4883_s29 + $0x670] sm:$0xff] %v4363_v56  ;;  %4390 = vtanh.f32 %v2421_v52  ;;  %v1921_v60 = vpop.f32.mrf.mxu0 }
 0x18b   : > { %v2433_v61 = vpop.f32.mrf.mxu1  ;;  %v4367_v62 = vpop.eup %4366  ;;  %2940 = vst [vmem:[%s4883_s29 + $0x260] sm:$0xff] %v4365_v59  ;;  %4392 = vtanh.f32 %v1930_v57  ;;  %v1922_v63 = vadd.f32 %v5092_v30, %v1921_v60 }
 0x18c   : > { %v2434_v0 = vadd.f32 %v5092_v30, %v2433_v61  ;;  %v4369_v1 = vpop.eup %4368  ;;  %3068 = vst [vmem:[%s4883_s29 + $0x660] sm:$0xff] %v4367_v62  ;;  %4394 = vtanh.f32 %v2442_v58  ;;  %v3723_v2 = vpop.f32.mrf.mxu0 }
 0x18d   : > { %v3851_v3 = vpop.f32.mrf.mxu1  ;;  %v4371_v4 = vpop.eup %4370  ;;  %2943 = vst [vmem:[%s4883_s29 + $0x278] sm:$0xff] %v4369_v1  ;;  %4396 = vtanh.f32 %v1922_v63  ;;  %v1933_v5 = vadd.f32 %v5092_v30, %v3723_v2 }
 0x18e   : > { %v2445_v6 = vadd.f32 %v5092_v30, %v3851_v3  ;;  %v4373_v7 = vpop.eup %4372  ;;  %3071 = vst [vmem:[%s4883_s29 + $0x678] sm:$0xff] %v4371_v4  ;;  %4398 = vtanh.f32 %v2434_v0  ;;  %v1924_v8 = vpop.f32.mrf.mxu0 }
 0x18f   : > { %v2436_v9 = vpop.f32.mrf.mxu1  ;;  %v4375_v10 = vpop.eup %4374  ;;  %2941 = vst [vmem:[%s4883_s29 + $0x268] sm:$0xff] %v4373_v7  ;;  %4400 = vtanh.f32 %v1933_v5  ;;  %v1925_v11 = vadd.f32 %v5092_v30, %v1924_v8 }
 0x190   : > { %v2437_v12 = vadd.f32 %v5092_v30, %v2436_v9  ;;  %v4377_v13 = vpop.eup %4376  ;;  %3069 = vst [vmem:[%s4883_s29 + $0x668] sm:$0xff] %v4375_v10  ;;  %4402 = vtanh.f32 %v2445_v6  ;;  %v3726_v14 = vpop.f32.mrf.mxu0 }
 0x191   : > { %v3854_v15 = vpop.f32.mrf.mxu1  ;;  %v4379_v16 = vpop.eup %4378  ;;  %2946 = vst [vmem:[%s4883_s29 + $0x290] sm:$0xff] %v4377_v13  ;;  %4404 = vtanh.f32 %v1925_v11  ;;  %v1946_v17 = vadd.f32 %v5092_v30, %v3726_v14 }
 0x192   : > { %v2458_v18 = vadd.f32 %v5092_v30, %v3854_v15  ;;  %v4381_v19 = vpop.eup %4380  ;;  %3074 = vst [vmem:[%s4883_s29 + $0x690] sm:$0xff] %v4379_v16  ;;  %4406 = vtanh.f32 %v2437_v12  ;;  %v1937_v20 = vpop.f32.mrf.mxu0 }
 0x193   : > { %v2449_v21 = vpop.f32.mrf.mxu1  ;;  %v4383_v22 = vpop.eup %4382  ;;  %2944 = vst [vmem:[%s4883_s29 + $0x280] sm:$0xff] %v4381_v19  ;;  %4408 = vtanh.f32 %v1946_v17  ;;  %v1938_v23 = vadd.f32 %v5092_v30, %v1937_v20 }
 0x194   : > { %v2450_v24 = vadd.f32 %v5092_v30, %v2449_v21  ;;  %v4385_v25 = vpop.eup %4384  ;;  %3072 = vst [vmem:[%s4883_s29 + $0x680] sm:$0xff] %v4383_v22  ;;  %4410 = vtanh.f32 %v2458_v18  ;;  %v3727_v26 = vpop.f32.mrf.mxu0 }
 0x195   : > { %v3855_v27 = vpop.f32.mrf.mxu1  ;;  %v4387_v28 = vpop.eup %4386  ;;  %2947 = vst [vmem:[%s4883_s29 + $0x298] sm:$0xff] %v4385_v25  ;;  %4412 = vtanh.f32 %v1938_v23  ;;  %v1949_v29 = vadd.f32 %v5092_v30, %v3727_v26  ;;  %v5304_v26 = vld [vmem:[%s5444_s2] ss:$0 sm:$0xff] }
 0x196   : > { %v2461_v31 = vadd.f32 %v5092_v30, %v3855_v27  ;;  %v4389_v32 = vpop.eup %4388  ;;  %3075 = vst [vmem:[%s4883_s29 + $0x698] sm:$0xff] %v4387_v28  ;;  %4414 = vtanh.f32 %v2450_v24  ;;  %v1940_v33 = vpop.f32.mrf.mxu0 }
 0x197   : > { %v2452_v34 = vpop.f32.mrf.mxu1  ;;  %v4391_v35 = vpop.eup %4390  ;;  %2945 = vst [vmem:[%s4883_s29 + $0x288] sm:$0xff] %v4389_v32  ;;  %4416 = vtanh.f32 %v1949_v29  ;;  %v1941_v36 = vadd.f32 %v5092_v30, %v1940_v33 }
 0x198   : > { %v2453_v42 = vadd.f32 %v5092_v30, %v2452_v34  ;;  %v4393_v37 = vpop.eup %4392  ;;  %3073 = vst [vmem:[%s4883_s29 + $0x688] sm:$0xff] %v4391_v35  ;;  %4418 = vtanh.f32 %v2461_v31  ;;  %v3730_v38 = vpop.f32.mrf.mxu0 }
 0x199   : > { %v3858_v39 = vpop.f32.mrf.mxu1  ;;  %v4395_v40 = vpop.eup %4394  ;;  %2950 = vst [vmem:[%s4883_s29 + $0x2b0] sm:$0xff] %v4393_v37  ;;  %4420 = vtanh.f32 %v1941_v36  ;;  %v1962_v41 = vadd.f32 %v5092_v30, %v3730_v38 }
 0x19a   : > { %v2474_v43 = vadd.f32 %v5092_v30, %v3858_v39  ;;  %v4397_v44 = vpop.eup %4396  ;;  %3078 = vst [vmem:[%s4883_s29 + $0x6b0] sm:$0xff] %v4395_v40  ;;  %4422 = vtanh.f32 %v2453_v42  ;;  %v1953_v45 = vpop.f32.mrf.mxu0 }
 0x19b   : > { %v2465_v46 = vpop.f32.mrf.mxu1  ;;  %v4399_v47 = vpop.eup %4398  ;;  %2948 = vst [vmem:[%s4883_s29 + $0x2a0] sm:$0xff] %v4397_v44  ;;  %4424 = vtanh.f32 %v1962_v41  ;;  %v1954_v48 = vadd.f32 %v5092_v30, %v1953_v45 }
 0x19c   : > { %v2466_v49 = vadd.f32 %v5092_v30, %v2465_v46  ;;  %v4401_v50 = vpop.eup %4400  ;;  %3076 = vst [vmem:[%s4883_s29 + $0x6a0] sm:$0xff] %v4399_v47  ;;  %4426 = vtanh.f32 %v2474_v43  ;;  %v3731_v51 = vpop.f32.mrf.mxu0 }
 0x19d   : > { %v3859_v52 = vpop.f32.mrf.mxu1  ;;  %v4403_v53 = vpop.eup %4402  ;;  %2951 = vst [vmem:[%s4883_s29 + $0x2b8] sm:$0xff] %v4401_v50  ;;  %4428 = vtanh.f32 %v1954_v48  ;;  %v1965_v54 = vadd.f32 %v5092_v30, %v3731_v51 }
 0x19e   : > { %v2477_v55 = vadd.f32 %v5092_v30, %v3859_v52  ;;  %v4405_v56 = vpop.eup %4404  ;;  %3079 = vst [vmem:[%s4883_s29 + $0x6b8] sm:$0xff] %v4403_v53  ;;  %4430 = vtanh.f32 %v2466_v49  ;;  %v1956_v57 = vpop.f32.mrf.mxu0 }
 0x19f   : > { %v2468_v58 = vpop.f32.mrf.mxu1  ;;  %v4407_v59 = vpop.eup %4406  ;;  %2949 = vst [vmem:[%s4883_s29 + $0x2a8] sm:$0xff] %v4405_v56  ;;  %4432 = vtanh.f32 %v1965_v54  ;;  %v1957_v60 = vadd.f32 %v5092_v30, %v1956_v57 }
 0x1a0   : > { %v2469_v61 = vadd.f32 %v5092_v30, %v2468_v58  ;;  %v4409_v62 = vpop.eup %4408  ;;  %3077 = vst [vmem:[%s4883_s29 + $0x6a8] sm:$0xff] %v4407_v59  ;;  %4434 = vtanh.f32 %v2477_v55  ;;  %v3734_v63 = vpop.f32.mrf.mxu0 }
 0x1a1   : > { %v3862_v0 = vpop.f32.mrf.mxu1  ;;  %v4411_v1 = vpop.eup %4410  ;;  %2954 = vst [vmem:[%s4883_s29 + $0x2d0] sm:$0xff] %v4409_v62  ;;  %4436 = vtanh.f32 %v1957_v60  ;;  %v1978_v2 = vadd.f32 %v5092_v30, %v3734_v63 }
 0x1a2   : > { %v2490_v3 = vadd.f32 %v5092_v30, %v3862_v0  ;;  %v4413_v4 = vpop.eup %4412  ;;  %3082 = vst [vmem:[%s4883_s29 + $0x6d0] sm:$0xff] %v4411_v1  ;;  %4438 = vtanh.f32 %v2469_v61  ;;  %v1969_v5 = vpop.f32.mrf.mxu0 }
 0x1a3   : > { %v2481_v6 = vpop.f32.mrf.mxu1  ;;  %v4415_v7 = vpop.eup %4414  ;;  %2952 = vst [vmem:[%s4883_s29 + $0x2c0] sm:$0xff] %v4413_v4  ;;  %4440 = vtanh.f32 %v1978_v2  ;;  %v1970_v8 = vadd.f32 %v5092_v30, %v1969_v5 }
 0x1a4   : > { %v2482_v9 = vadd.f32 %v5092_v30, %v2481_v6  ;;  %v4417_v10 = vpop.eup %4416  ;;  %3080 = vst [vmem:[%s4883_s29 + $0x6c0] sm:$0xff] %v4415_v7  ;;  %4442 = vtanh.f32 %v2490_v3  ;;  %v3735_v11 = vpop.f32.mrf.mxu0 }
 0x1a5   : > { %v3863_v12 = vpop.f32.mrf.mxu1  ;;  %v4419_v13 = vpop.eup %4418  ;;  %2955 = vst [vmem:[%s4883_s29 + $0x2d8] sm:$0xff] %v4417_v10  ;;  %4444 = vtanh.f32 %v1970_v8  ;;  %v1981_v14 = vadd.f32 %v5092_v30, %v3735_v11 }
 0x1a6   : > { %v2493_v15 = vadd.f32 %v5092_v30, %v3863_v12  ;;  %v4421_v16 = vpop.eup %4420  ;;  %3083 = vst [vmem:[%s4883_s29 + $0x6d8] sm:$0xff] %v4419_v13  ;;  %4446 = vtanh.f32 %v2482_v9  ;;  %v1972_v17 = vpop.f32.mrf.mxu0 }
 0x1a7   : > { %v2484_v18 = vpop.f32.mrf.mxu1  ;;  %v4423_v19 = vpop.eup %4422  ;;  %2953 = vst [vmem:[%s4883_s29 + $0x2c8] sm:$0xff] %v4421_v16  ;;  %4448 = vtanh.f32 %v1981_v14  ;;  %v1973_v20 = vadd.f32 %v5092_v30, %v1972_v17 }
 0x1a8   : > { %v2485_v21 = vadd.f32 %v5092_v30, %v2484_v18  ;;  %v4425_v22 = vpop.eup %4424  ;;  %3081 = vst [vmem:[%s4883_s29 + $0x6c8] sm:$0xff] %v4423_v19  ;;  %4450 = vtanh.f32 %v2493_v15  ;;  %v3738_v23 = vpop.f32.mrf.mxu0 }
 0x1a9   : > { %v3866_v24 = vpop.f32.mrf.mxu1  ;;  %v4427_v25 = vpop.eup %4426  ;;  %2958 = vst [vmem:[%s4883_s29 + $0x2f0] sm:$0xff] %v4425_v22  ;;  %4452 = vtanh.f32 %v1973_v20  ;;  %v1994_v27 = vadd.f32 %v5304_v26, %v3738_v23 }
 0x1aa   : > { %v2506_v28 = vadd.f32 %v5304_v26, %v3866_v24  ;;  %v4429_v30 = vpop.eup %4428  ;;  %3086 = vst [vmem:[%s4883_s29 + $0x6f0] sm:$0xff] %v4427_v25  ;;  %4454 = vtanh.f32 %v2485_v21  ;;  %v1985_v29 = vpop.f32.mrf.mxu0 }
 0x1ab   : > { %v2497_v31 = vpop.f32.mrf.mxu1  ;;  %v4431_v32 = vpop.eup %4430  ;;  %2956 = vst [vmem:[%s4883_s29 + $0x2e0] sm:$0xff] %v4429_v30  ;;  %4456 = vtanh.f32 %v1994_v27  ;;  %v1986_v33 = vadd.f32 %v5304_v26, %v1985_v29 }
 0x1ac   : > { %v2498_v34 = vadd.f32 %v5304_v26, %v2497_v31  ;;  %v4433_v35 = vpop.eup %4432  ;;  %3084 = vst [vmem:[%s4883_s29 + $0x6e0] sm:$0xff] %v4431_v32  ;;  %4458 = vtanh.f32 %v2506_v28  ;;  %v3739_v36 = vpop.f32.mrf.mxu0 }
 0x1ad   : > { %v3867_v42 = vpop.f32.mrf.mxu1  ;;  %v4435_v37 = vpop.eup %4434  ;;  %2959 = vst [vmem:[%s4883_s29 + $0x2f8] sm:$0xff] %v4433_v35  ;;  %4460 = vtanh.f32 %v1986_v33  ;;  %v1997_v38 = vadd.f32 %v5304_v26, %v3739_v36 }
 0x1ae   : > { %v2509_v39 = vadd.f32 %v5304_v26, %v3867_v42  ;;  %v4437_v40 = vpop.eup %4436  ;;  %3087 = vst [vmem:[%s4883_s29 + $0x6f8] sm:$0xff] %v4435_v37  ;;  %4462 = vtanh.f32 %v2498_v34  ;;  %v1988_v41 = vpop.f32.mrf.mxu0 }
 0x1af   : > { %v2500_v43 = vpop.f32.mrf.mxu1  ;;  %v4439_v44 = vpop.eup %4438  ;;  %2957 = vst [vmem:[%s4883_s29 + $0x2e8] sm:$0xff] %v4437_v40  ;;  %4464 = vtanh.f32 %v1997_v38  ;;  %v1989_v45 = vadd.f32 %v5304_v26, %v1988_v41 }
 0x1b0   : > { %v2501_v46 = vadd.f32 %v5304_v26, %v2500_v43  ;;  %v4441_v47 = vpop.eup %4440  ;;  %3085 = vst [vmem:[%s4883_s29 + $0x6e8] sm:$0xff] %v4439_v44  ;;  %4466 = vtanh.f32 %v2509_v39  ;;  %v3742_v48 = vpop.f32.mrf.mxu0 }
 0x1b1   : > { %v3870_v49 = vpop.f32.mrf.mxu1  ;;  %v4443_v50 = vpop.eup %4442  ;;  %2962 = vst [vmem:[%s4883_s29 + $0x310] sm:$0xff] %v4441_v47  ;;  %4468 = vtanh.f32 %v1989_v45  ;;  %v2010_v51 = vadd.f32 %v5304_v26, %v3742_v48 }
 0x1b2   : > { %v2522_v52 = vadd.f32 %v5304_v26, %v3870_v49  ;;  %v4445_v53 = vpop.eup %4444  ;;  %3090 = vst [vmem:[%s4883_s29 + $0x710] sm:$0xff] %v4443_v50  ;;  %4470 = vtanh.f32 %v2501_v46  ;;  %v2001_v54 = vpop.f32.mrf.mxu0 }
 0x1b3   : > { %v2513_v55 = vpop.f32.mrf.mxu1  ;;  %v4447_v56 = vpop.eup %4446  ;;  %2960 = vst [vmem:[%s4883_s29 + $0x300] sm:$0xff] %v4445_v53  ;;  %4472 = vtanh.f32 %v2010_v51  ;;  %v2002_v57 = vadd.f32 %v5304_v26, %v2001_v54 }
 0x1b4   : > { %v2514_v58 = vadd.f32 %v5304_v26, %v2513_v55  ;;  %v4449_v59 = vpop.eup %4448  ;;  %3088 = vst [vmem:[%s4883_s29 + $0x700] sm:$0xff] %v4447_v56  ;;  %4474 = vtanh.f32 %v2522_v52  ;;  %v3743_v60 = vpop.f32.mrf.mxu0 }
 0x1b5   : > { %v3871_v61 = vpop.f32.mrf.mxu1  ;;  %v4451_v62 = vpop.eup %4450  ;;  %2963 = vst [vmem:[%s4883_s29 + $0x318] sm:$0xff] %v4449_v59  ;;  %4476 = vtanh.f32 %v2002_v57  ;;  %v2013_v63 = vadd.f32 %v5304_v26, %v3743_v60 }
 0x1b6   : > { %v2525_v0 = vadd.f32 %v5304_v26, %v3871_v61  ;;  %v4453_v1 = vpop.eup %4452  ;;  %3091 = vst [vmem:[%s4883_s29 + $0x718] sm:$0xff] %v4451_v62  ;;  %4478 = vtanh.f32 %v2514_v58  ;;  %v2004_v2 = vpop.f32.mrf.mxu0 }
 0x1b7   : > { %v2516_v3 = vpop.f32.mrf.mxu1  ;;  %v4455_v4 = vpop.eup %4454  ;;  %2961 = vst [vmem:[%s4883_s29 + $0x308] sm:$0xff] %v4453_v1  ;;  %4480 = vtanh.f32 %v2013_v63  ;;  %v2005_v5 = vadd.f32 %v5304_v26, %v2004_v2 }
 0x1b8   : > { %v2517_v6 = vadd.f32 %v5304_v26, %v2516_v3  ;;  %v4457_v7 = vpop.eup %4456  ;;  %3089 = vst [vmem:[%s4883_s29 + $0x708] sm:$0xff] %v4455_v4  ;;  %4482 = vtanh.f32 %v2525_v0  ;;  %v3746_v8 = vpop.f32.mrf.mxu0 }
 0x1b9   : > { %v3874_v9 = vpop.f32.mrf.mxu1  ;;  %v4459_v10 = vpop.eup %4458  ;;  %2966 = vst [vmem:[%s4883_s29 + $0x330] sm:$0xff] %v4457_v7  ;;  %4484 = vtanh.f32 %v2005_v5  ;;  %v2026_v11 = vadd.f32 %v5304_v26, %v3746_v8 }
 0x1ba   : > { %v2538_v12 = vadd.f32 %v5304_v26, %v3874_v9  ;;  %v4461_v13 = vpop.eup %4460  ;;  %3094 = vst [vmem:[%s4883_s29 + $0x730] sm:$0xff] %v4459_v10  ;;  %4486 = vtanh.f32 %v2517_v6  ;;  %v2017_v14 = vpop.f32.mrf.mxu0 }
 0x1bb   : > { %v2529_v15 = vpop.f32.mrf.mxu1  ;;  %v4463_v16 = vpop.eup %4462  ;;  %2964 = vst [vmem:[%s4883_s29 + $0x320] sm:$0xff] %v4461_v13  ;;  %4488 = vtanh.f32 %v2026_v11  ;;  %v2018_v17 = vadd.f32 %v5304_v26, %v2017_v14 }
 0x1bc   : > { %v2530_v18 = vadd.f32 %v5304_v26, %v2529_v15  ;;  %v4465_v19 = vpop.eup %4464  ;;  %3092 = vst [vmem:[%s4883_s29 + $0x720] sm:$0xff] %v4463_v16  ;;  %4490 = vtanh.f32 %v2538_v12  ;;  %v3747_v20 = vpop.f32.mrf.mxu0 }
 0x1bd   : > { %v3875_v21 = vpop.f32.mrf.mxu1  ;;  %v4467_v22 = vpop.eup %4466  ;;  %2967 = vst [vmem:[%s4883_s29 + $0x338] sm:$0xff] %v4465_v19  ;;  %4492 = vtanh.f32 %v2018_v17  ;;  %v2029_v23 = vadd.f32 %v5304_v26, %v3747_v20 }
 0x1be   : > { %v2541_v24 = vadd.f32 %v5304_v26, %v3875_v21  ;;  %v4469_v25 = vpop.eup %4468  ;;  %3095 = vst [vmem:[%s4883_s29 + $0x738] sm:$0xff] %v4467_v22  ;;  %4494 = vtanh.f32 %v2530_v18  ;;  %v2020_v27 = vpop.f32.mrf.mxu0 }
 0x1bf   : > { %v2532_v28 = vpop.f32.mrf.mxu1  ;;  %v4471_v30 = vpop.eup %4470  ;;  %2965 = vst [vmem:[%s4883_s29 + $0x328] sm:$0xff] %v4469_v25  ;;  %4496 = vtanh.f32 %v2029_v23  ;;  %v2021_v29 = vadd.f32 %v5304_v26, %v2020_v27 }
 0x1c0   : > { %v2533_v31 = vadd.f32 %v5304_v26, %v2532_v28  ;;  %v4473_v32 = vpop.eup %4472  ;;  %3093 = vst [vmem:[%s4883_s29 + $0x728] sm:$0xff] %v4471_v30  ;;  %4498 = vtanh.f32 %v2541_v24  ;;  %v3750_v33 = vpop.f32.mrf.mxu0 }
 0x1c1   : > { %v3878_v34 = vpop.f32.mrf.mxu1  ;;  %v4475_v35 = vpop.eup %4474  ;;  %2970 = vst [vmem:[%s4883_s29 + $0x350] sm:$0xff] %v4473_v32  ;;  %4500 = vtanh.f32 %v2021_v29  ;;  %v2042_v36 = vadd.f32 %v5304_v26, %v3750_v33 }
 0x1c2   : > { %v2554_v42 = vadd.f32 %v5304_v26, %v3878_v34  ;;  %v4477_v37 = vpop.eup %4476  ;;  %3098 = vst [vmem:[%s4883_s29 + $0x750] sm:$0xff] %v4475_v35  ;;  %4502 = vtanh.f32 %v2533_v31  ;;  %v2033_v38 = vpop.f32.mrf.mxu0 }
 0x1c3   : > { %v2545_v39 = vpop.f32.mrf.mxu1  ;;  %v4479_v40 = vpop.eup %4478  ;;  %2968 = vst [vmem:[%s4883_s29 + $0x340] sm:$0xff] %v4477_v37  ;;  %4504 = vtanh.f32 %v2042_v36  ;;  %v2034_v41 = vadd.f32 %v5304_v26, %v2033_v38 }
 0x1c4   : > { %v2546_v43 = vadd.f32 %v5304_v26, %v2545_v39  ;;  %v4481_v44 = vpop.eup %4480  ;;  %3096 = vst [vmem:[%s4883_s29 + $0x740] sm:$0xff] %v4479_v40  ;;  %4506 = vtanh.f32 %v2554_v42  ;;  %v3751_v45 = vpop.f32.mrf.mxu0 }
 0x1c5   : > { %v3879_v46 = vpop.f32.mrf.mxu1  ;;  %v4483_v47 = vpop.eup %4482  ;;  %2971 = vst [vmem:[%s4883_s29 + $0x358] sm:$0xff] %v4481_v44  ;;  %4508 = vtanh.f32 %v2034_v41  ;;  %v2045_v48 = vadd.f32 %v5304_v26, %v3751_v45 }
 0x1c6   : > { %v2557_v49 = vadd.f32 %v5304_v26, %v3879_v46  ;;  %v4485_v50 = vpop.eup %4484  ;;  %3099 = vst [vmem:[%s4883_s29 + $0x758] sm:$0xff] %v4483_v47  ;;  %4510 = vtanh.f32 %v2546_v43  ;;  %v2036_v51 = vpop.f32.mrf.mxu0 }
 0x1c7   : > { %v2548_v52 = vpop.f32.mrf.mxu1  ;;  %v4487_v53 = vpop.eup %4486  ;;  %2969 = vst [vmem:[%s4883_s29 + $0x348] sm:$0xff] %v4485_v50  ;;  %4512 = vtanh.f32 %v2045_v48  ;;  %v2037_v54 = vadd.f32 %v5304_v26, %v2036_v51 }
 0x1c8   : > { %v2549_v55 = vadd.f32 %v5304_v26, %v2548_v52  ;;  %v4489_v56 = vpop.eup %4488  ;;  %3097 = vst [vmem:[%s4883_s29 + $0x748] sm:$0xff] %v4487_v53  ;;  %4514 = vtanh.f32 %v2557_v49  ;;  %v3754_v57 = vpop.f32.mrf.mxu0 }
 0x1c9   : > { %v3882_v58 = vpop.f32.mrf.mxu1  ;;  %v4491_v59 = vpop.eup %4490  ;;  %2974 = vst [vmem:[%s4883_s29 + $0x370] sm:$0xff] %v4489_v56  ;;  %4516 = vtanh.f32 %v2037_v54  ;;  %v2058_v60 = vadd.f32 %v5304_v26, %v3754_v57 }
 0x1ca   : > { %v2570_v61 = vadd.f32 %v5304_v26, %v3882_v58  ;;  %v4493_v62 = vpop.eup %4492  ;;  %3102 = vst [vmem:[%s4883_s29 + $0x770] sm:$0xff] %v4491_v59  ;;  %4518 = vtanh.f32 %v2549_v55  ;;  %v2049_v63 = vpop.f32.mrf.mxu0 }
 0x1cb   : > { %v2561_v0 = vpop.f32.mrf.mxu1  ;;  %v4495_v1 = vpop.eup %4494  ;;  %2972 = vst [vmem:[%s4883_s29 + $0x360] sm:$0xff] %v4493_v62  ;;  %4520 = vtanh.f32 %v2058_v60  ;;  %v2050_v2 = vadd.f32 %v5304_v26, %v2049_v63 }
 0x1cc   : > { %v2562_v3 = vadd.f32 %v5304_v26, %v2561_v0  ;;  %v4497_v4 = vpop.eup %4496  ;;  %3100 = vst [vmem:[%s4883_s29 + $0x760] sm:$0xff] %v4495_v1  ;;  %4522 = vtanh.f32 %v2570_v61  ;;  %v3755_v5 = vpop.f32.mrf.mxu0 }
 0x1cd   : > { %v3883_v6 = vpop.f32.mrf.mxu1  ;;  %v4499_v7 = vpop.eup %4498  ;;  %2975 = vst [vmem:[%s4883_s29 + $0x378] sm:$0xff] %v4497_v4  ;;  %4524 = vtanh.f32 %v2050_v2  ;;  %v2061_v8 = vadd.f32 %v5304_v26, %v3755_v5 }
 0x1ce   : > { %v2573_v9 = vadd.f32 %v5304_v26, %v3883_v6  ;;  %v4501_v10 = vpop.eup %4500  ;;  %3103 = vst [vmem:[%s4883_s29 + $0x778] sm:$0xff] %v4499_v7  ;;  %4526 = vtanh.f32 %v2562_v3  ;;  %v2052_v11 = vpop.f32.mrf.mxu0 }
 0x1cf   : > { %v2564_v12 = vpop.f32.mrf.mxu1  ;;  %v4503_v13 = vpop.eup %4502  ;;  %2973 = vst [vmem:[%s4883_s29 + $0x368] sm:$0xff] %v4501_v10  ;;  %4528 = vtanh.f32 %v2061_v8  ;;  %v2053_v14 = vadd.f32 %v5304_v26, %v2052_v11 }
 0x1d0   : > { %v2565_v15 = vadd.f32 %v5304_v26, %v2564_v12  ;;  %v4505_v16 = vpop.eup %4504  ;;  %3101 = vst [vmem:[%s4883_s29 + $0x768] sm:$0xff] %v4503_v13  ;;  %4530 = vtanh.f32 %v2573_v9  ;;  %v3758_v17 = vpop.f32.mrf.mxu0 }
 0x1d1   : > { %v3886_v18 = vpop.f32.mrf.mxu1  ;;  %v4507_v19 = vpop.eup %4506  ;;  %2978 = vst [vmem:[%s4883_s29 + $0x390] sm:$0xff] %v4505_v16  ;;  %4532 = vtanh.f32 %v2053_v14  ;;  %v2074_v20 = vadd.f32 %v5304_v26, %v3758_v17 }
 0x1d2   : > { %v2586_v21 = vadd.f32 %v5304_v26, %v3886_v18  ;;  %v4509_v22 = vpop.eup %4508  ;;  %3106 = vst [vmem:[%s4883_s29 + $0x790] sm:$0xff] %v4507_v19  ;;  %4534 = vtanh.f32 %v2565_v15  ;;  %v2065_v23 = vpop.f32.mrf.mxu0 }
 0x1d3   : > { %v2577_v24 = vpop.f32.mrf.mxu1  ;;  %v4511_v25 = vpop.eup %4510  ;;  %2976 = vst [vmem:[%s4883_s29 + $0x380] sm:$0xff] %v4509_v22  ;;  %4536 = vtanh.f32 %v2074_v20  ;;  %v2066_v27 = vadd.f32 %v5304_v26, %v2065_v23 }
 0x1d4   : > { %v2578_v28 = vadd.f32 %v5304_v26, %v2577_v24  ;;  %v4513_v30 = vpop.eup %4512  ;;  %3104 = vst [vmem:[%s4883_s29 + $0x780] sm:$0xff] %v4511_v25  ;;  %4538 = vtanh.f32 %v2586_v21  ;;  %v3759_v29 = vpop.f32.mrf.mxu0 }
 0x1d5   : > { %v3887_v31 = vpop.f32.mrf.mxu1  ;;  %v4515_v32 = vpop.eup %4514  ;;  %2979 = vst [vmem:[%s4883_s29 + $0x398] sm:$0xff] %v4513_v30  ;;  %4540 = vtanh.f32 %v2066_v27  ;;  %v2077_v33 = vadd.f32 %v5304_v26, %v3759_v29 }
 0x1d6   : > { %v2589_v34 = vadd.f32 %v5304_v26, %v3887_v31  ;;  %v4517_v35 = vpop.eup %4516  ;;  %3107 = vst [vmem:[%s4883_s29 + $0x798] sm:$0xff] %v4515_v32  ;;  %4542 = vtanh.f32 %v2578_v28  ;;  %v2068_v36 = vpop.f32.mrf.mxu0 }
 0x1d7   : > { %v2580_v42 = vpop.f32.mrf.mxu1  ;;  %v4519_v37 = vpop.eup %4518  ;;  %2977 = vst [vmem:[%s4883_s29 + $0x388] sm:$0xff] %v4517_v35  ;;  %4544 = vtanh.f32 %v2077_v33  ;;  %v2069_v38 = vadd.f32 %v5304_v26, %v2068_v36 }
 0x1d8   : > { %v2581_v39 = vadd.f32 %v5304_v26, %v2580_v42  ;;  %v4521_v40 = vpop.eup %4520  ;;  %3105 = vst [vmem:[%s4883_s29 + $0x788] sm:$0xff] %v4519_v37  ;;  %4546 = vtanh.f32 %v2589_v34  ;;  %v3762_v41 = vpop.f32.mrf.mxu0 }
 0x1d9   : > { %v3890_v43 = vpop.f32.mrf.mxu1  ;;  %v4523_v44 = vpop.eup %4522  ;;  %2982 = vst [vmem:[%s4883_s29 + $0x3b0] sm:$0xff] %v4521_v40  ;;  %4548 = vtanh.f32 %v2069_v38  ;;  %v2090_v45 = vadd.f32 %v5304_v26, %v3762_v41 }
 0x1da   : > { %v2602_v46 = vadd.f32 %v5304_v26, %v3890_v43  ;;  %v4525_v47 = vpop.eup %4524  ;;  %3110 = vst [vmem:[%s4883_s29 + $0x7b0] sm:$0xff] %v4523_v44  ;;  %4550 = vtanh.f32 %v2581_v39  ;;  %v2081_v48 = vpop.f32.mrf.mxu0 }
 0x1db   : > { %v2593_v49 = vpop.f32.mrf.mxu1  ;;  %v4527_v50 = vpop.eup %4526  ;;  %2980 = vst [vmem:[%s4883_s29 + $0x3a0] sm:$0xff] %v4525_v47  ;;  %4552 = vtanh.f32 %v2090_v45  ;;  %v2082_v51 = vadd.f32 %v5304_v26, %v2081_v48 }
 0x1dc   : > { %v2594_v52 = vadd.f32 %v5304_v26, %v2593_v49  ;;  %v4529_v53 = vpop.eup %4528  ;;  %3108 = vst [vmem:[%s4883_s29 + $0x7a0] sm:$0xff] %v4527_v50  ;;  %4554 = vtanh.f32 %v2602_v46  ;;  %v3763_v54 = vpop.f32.mrf.mxu0 }
 0x1dd   : > { %v3891_v55 = vpop.f32.mrf.mxu1  ;;  %v4531_v56 = vpop.eup %4530  ;;  %2983 = vst [vmem:[%s4883_s29 + $0x3b8] sm:$0xff] %v4529_v53  ;;  %4556 = vtanh.f32 %v2082_v51  ;;  %v2093_v57 = vadd.f32 %v5304_v26, %v3763_v54 }
 0x1de   : > { %v2605_v58 = vadd.f32 %v5304_v26, %v3891_v55  ;;  %v4533_v59 = vpop.eup %4532  ;;  %3111 = vst [vmem:[%s4883_s29 + $0x7b8] sm:$0xff] %v4531_v56  ;;  %4558 = vtanh.f32 %v2594_v52  ;;  %v2084_v60 = vpop.f32.mrf.mxu0 }
 0x1df   : > { %v2596_v61 = vpop.f32.mrf.mxu1  ;;  %v4535_v62 = vpop.eup %4534  ;;  %2981 = vst [vmem:[%s4883_s29 + $0x3a8] sm:$0xff] %v4533_v59  ;;  %4560 = vtanh.f32 %v2093_v57  ;;  %v2085_v63 = vadd.f32 %v5304_v26, %v2084_v60 }
 0x1e0   : > { %v2597_v0 = vadd.f32 %v5304_v26, %v2596_v61  ;;  %v4537_v1 = vpop.eup %4536  ;;  %3109 = vst [vmem:[%s4883_s29 + $0x7a8] sm:$0xff] %v4535_v62  ;;  %4562 = vtanh.f32 %v2605_v58 }
 0x1e1   : > { %v4539_v2 = vpop.eup %4538  ;;  %2986 = vst [vmem:[%s4883_s29 + $0x3d0] sm:$0xff] %v4537_v1  ;;  %4564 = vtanh.f32 %v2085_v63 }
 0x1e2   : > { %v4541_v3 = vpop.eup %4540  ;;  %3114 = vst [vmem:[%s4883_s29 + $0x7d0] sm:$0xff] %v4539_v2  ;;  %4566 = vtanh.f32 %v2597_v0 }
 0x1e3   : > { %v4543_v4 = vpop.eup %4542  ;;  %2984 = vst [vmem:[%s4883_s29 + $0x3c0] sm:$0xff] %v4541_v3 }
 0x1e4   : > { %v4545_v5 = vpop.eup %4544  ;;  %3112 = vst [vmem:[%s4883_s29 + $0x7c0] sm:$0xff] %v4543_v4 }
 0x1e5   : > { %v4547_v26 = vpop.eup %4546  ;;  %2987 = vst [vmem:[%s4883_s29 + $0x3d8] sm:$0xff] %v4545_v5 }
 0x1e6   : > { %v4549_v6 = vpop.eup %4548  ;;  %3115 = vst [vmem:[%s4883_s29 + $0x7d8] sm:$0xff] %v4547_v26 }
 0x1e7   : > { %v4551_v7 = vpop.eup %4550  ;;  %2985 = vst [vmem:[%s4883_s29 + $0x3c8] sm:$0xff] %v4549_v6 }
 0x1e8   : > { %v4553_v8 = vpop.eup %4552  ;;  %3113 = vst [vmem:[%s4883_s29 + $0x7c8] sm:$0xff] %v4551_v7 }
 0x1e9   : > { %v4555_v9 = vpop.eup %4554  ;;  %2990 = vst [vmem:[%s4883_s29 + $0x3f0] sm:$0xff] %v4553_v8 }
 0x1ea   : > { %v4557_v10 = vpop.eup %4556  ;;  %3118 = vst [vmem:[%s4883_s29 + $0x7f0] sm:$0xff] %v4555_v9 }
 0x1eb   : > { %v4559_v11 = vpop.eup %4558  ;;  %2988 = vst [vmem:[%s4883_s29 + $0x3e0] sm:$0xff] %v4557_v10 }
 0x1ec   : > { %v4561_v12 = vpop.eup %4560  ;;  %3116 = vst [vmem:[%s4883_s29 + $0x7e0] sm:$0xff] %v4559_v11 }
 0x1ed   : > { %v4563_v13 = vpop.eup %4562  ;;  %2991 = vst [vmem:[%s4883_s29 + $0x3f8] sm:$0xff] %v4561_v12 }
 0x1ee   : > { %v4565_v14 = vpop.eup %4564  ;;  %3119 = vst [vmem:[%s4883_s29 + $0x7f8] sm:$0xff] %v4563_v13 }
 0x1ef   : > { %v4567_v15 = vpop.eup %4566  ;;  %2989 = vst [vmem:[%s4883_s29 + $0x3e8] sm:$0xff] %v4565_v14 }
 0x1f0   : > { %3117 = vst [vmem:[%s4883_s29 + $0x7e8] sm:$0xff] %v4567_v15 }
 0x1f1 PF: > { %s13_s14 = sadd.s32 1, %s4592_s14   ;;  %s5446_s12 = smov %s4588_s13 }
 0x1f2   : > { %p10_p5 = scmp.ge.s32.totalorder %s13_s14, 6   ;;  %s5447_s13 = smov %s5449_s15 }
 0x1f4   :  { %12 = sbr.rel (!%p10_p5) target bundleno = 2 (0x2), region = 65 }

</bundles_post_ra>
